<compile_context>
chip_gen: v5e
topology: v5e:2x2
jax: 0.10.0
libtpu: 0.0.40
codegen_flags: <defaults>
</compile_context>

<pallas_src>
import functools

import jax
import jax.numpy as jnp
import numpy as np
from jax import lax
from jax.experimental import pallas as pl
from jax.experimental.pallas import tpu as pltpu


def _fused_branch_kernel(x_ref, mask_ref, w_ref, b_ref, o_ref, *, L, Wp):
    """One branch (one grid step): L x [3x3 SAME conv + bias + ReLU], fused.

    x_ref:    (M, C)      flat zero-padded NHWC input, M = B*Hp*Wp,
                          row index = b*(Hp*Wp) + yp*Wp + xp, lanes = channels.
    mask_ref: (M, 1)      f32 interior mask (1 inside the HxW region, 0 border).
    w_ref:    (L*9, C, C) per-layer HWIO weights flattened over (ky, kx).
    b_ref:    (L, 1, C)   per-layer biases.
    o_ref:    (M, C)      last-layer output, padded layout: the value for pixel
                          (y, x) of image b lives at row b*(Hp*Wp)+(y+1)*Wp+(x+1).
    """
    M, C = o_ref.shape

    mask = mask_ref[...]                          # (M, 1) f32 interior mask
    cur = x_ref[...].astype(jnp.float32)          # padded activations, (M, C)

    for l in range(L):
        # Column-shifted copies (dx = -1, 0, +1): 2 XLU rolls, shared by all
        # three kernel rows.  Rows that pick up wrapped data are never valid
        # output rows (the Hp x Wp padding gives exactly enough slack), so no
        # per-tap masking is needed.
        c = (pltpu.roll(cur, 1, 0),               # c[0][r] = cur[r - 1]  (dx=-1)
             cur,                                 # c[1][r] = cur[r]      (dx= 0)
             pltpu.roll(cur, M - 1, 0))           # c[2][r] = cur[r + 1]  (dx=+1)

        # Per-kernel-row partial sums t[ky] = sum_kx c[kx] @ W[ky, kx].
        # Bias initializes the center-row accumulator (added exactly once).
        t = []
        for ky in range(3):
            acc = (jnp.broadcast_to(b_ref[l].astype(jnp.float32), (M, C))
                   if ky == 1 else None)
            for kx in range(3):
                d = jnp.dot(c[kx], w_ref[l * 9 + ky * 3 + kx],
                            preferred_element_type=jnp.float32)
                acc = d if acc is None else acc + d
            t.append(acc)

        # Combine the three row partials with 2 more sublane rolls (dy = -1,+1).
        out = pltpu.roll(t[0], Wp, 0) + t[1] + pltpu.roll(t[2], M - Wp, 0)
        out = jnp.maximum(out, 0.0)               # ReLU

        if l < L - 1:
            # Rebuild the zero border of the padded grid in place (VPU mul),
            # no re-embed roll / HBM round trip.
            cur = out * mask
        else:
            o_ref[...] = out.astype(o_ref.dtype)


@jax.jit
def decoupled_head_forward(x_nchw, cls_ws, cls_bs, reg_ws, reg_bs):
    """Matches DecoupledHead.forward: x (B,C,H,W) -> (cls_feats, reg_feats)."""
    B, C, H, W = x_nchw.shape
    Hp, Wp = H + 2, W + 2
    M = B * Hp * Wp
    L = len(cls_ws)
    # The kernel stacks both branches; the module defaults use equal depths.
    assert len(reg_ws) == L, "cls/reg head depths must match for the fused kernel"

    # One NCHW -> NHWC transpose and ONE zero pad, shared by both branches.
    x_nhwc = jnp.transpose(x_nchw, (0, 2, 3, 1))
    x_pad = jnp.pad(x_nhwc, ((0, 0), (1, 1), (1, 1), (0, 0))).reshape(M, C)

    # Static interior mask (trace-time constant) used to rebuild the zero
    # border between layers inside the kernel.
    mask_np = np.zeros((B, Hp, Wp, 1), np.float32)
    mask_np[:, 1:H + 1, 1:W + 1, :] = 1.0
    mask = jnp.asarray(mask_np.reshape(M, 1))

    def stack_w(ws):   # list of (3,3,C,C) HWIO -> (L*9, C, C), index = l*9+ky*3+kx
        return jnp.stack([w.reshape(9, C, C) for w in ws]).reshape(L * 9, C, C)

    def stack_b(bs):   # list of (C,) -> (L, 1, C)
        return jnp.stack([b.reshape(1, C) for b in bs])

    w_all = jnp.stack([stack_w(cls_ws), stack_w(reg_ws)])   # (2, L*9, C, C)
    b_all = jnp.stack([stack_b(cls_bs), stack_b(reg_bs)])   # (2, L, 1, C)

    kernel = functools.partial(_fused_branch_kernel, L=L, Wp=Wp)

    out_flat = pl.pallas_call(
        kernel,
        out_shape=jax.ShapeDtypeStruct((2, M, C), x_nchw.dtype),
        grid=(2,),  # branch axis: 0 = cls, 1 = reg
        in_specs=[
            pl.BlockSpec((M, C), lambda br: (0, 0)),                # shared input
            pl.BlockSpec((M, 1), lambda br: (0, 0)),                # interior mask
            pl.BlockSpec((pl.Squeezed(), L * 9, C, C), lambda br: (br, 0, 0, 0)),
            pl.BlockSpec((pl.Squeezed(), L, 1, C), lambda br: (br, 0, 0, 0)),
        ],
        out_specs=pl.BlockSpec((pl.Squeezed(), M, C), lambda br: (br, 0, 0)),
        compiler_params=pltpu.CompilerParams(
            dimension_semantics=("parallel",)),   # cls/reg split across TCs on v7x
    )(x_pad, mask, w_all, b_all)

    # Output is on the padded grid (interior rows valid): crop and emit NCHW
    # with a single transpose covering both branches.
    out = out_flat.reshape(2, B, Hp, Wp, C)[:, :, 1:H + 1, 1:W + 1, :]
    out = jnp.transpose(out, (0, 1, 4, 2, 3))                  # (2, B, C, H, W)
    return out[0], out[1]


def _init_branch_params(key, num_layers, c):
    ws, bs = [], []
    for _ in range(num_layers):
        key, kw, kb = jax.random.split(key, 3)
        ws.append(jax.random.normal(kw, (3, 3, c, c), jnp.float32) * 0.02)
        bs.append(jax.random.normal(kb, (c,), jnp.float32) * 0.01)
    return ws, bs, key


def _reference_branch(x_nhwc, weights, biases):
    """Pure-JAX reference (lax conv) for correctness check."""
    h = x_nhwc
    for w, b in zip(weights, biases):
        h = lax.conv_general_dilated(
            h, w, window_strides=(1, 1), padding="SAME",
            dimension_numbers=("NHWC", "HWIO", "NHWC"))
        h = jnp.maximum(h + b[None, None, None, :], 0.0)
    return h


if __name__ == "__main__":
    # Small shapes consistent with the module: B=2, head_dim=128, H=W=8.
    B, C, H, W = 2, 128, 8, 8
    NUM_CLS_HEAD = 4
    NUM_REG_HEAD = 4

    key = jax.random.PRNGKey(0)
    key, kx = jax.random.split(key)
    x = jax.random.normal(kx, (B, C, H, W), jnp.float32)  # NCHW, like PyTorch

    cls_ws, cls_bs, key = _init_branch_params(key, NUM_CLS_HEAD, C)
    reg_ws, reg_bs, key = _init_branch_params(key, NUM_REG_HEAD, C)

    cls_out, reg_out = decoupled_head_forward(x, cls_ws, cls_bs, reg_ws, reg_bs)
    jax.block_until_ready((cls_out, reg_out))

    # Verify against a pure-JAX reference.
    x_nhwc = jnp.transpose(x, (0, 2, 3, 1))
    cls_ref = jnp.transpose(_reference_branch(x_nhwc, cls_ws, cls_bs), (0, 3, 1, 2))
    reg_ref = jnp.transpose(_reference_branch(x_nhwc, reg_ws, reg_bs), (0, 3, 1, 2))
    np.testing.assert_allclose(np.asarray(cls_out), np.asarray(cls_ref),
                               atol=1e-4, rtol=1e-4)
    np.testing.assert_allclose(np.asarray(reg_out), np.asarray(reg_ref),
                               atol=1e-4, rtol=1e-4)
    assert cls_out.shape == (B, C, H, W) and reg_out.shape == (B, C, H, W)

    print("KERNEL_OK")
</pallas_src>

<mosaic_0001>
module attributes {stable_mosaic.version = 11 : i64} {
  func.func @_fused_branch_kernel(%arg0: i32, %arg1: memref<200x128xf32, #tpu.memory_space<vmem>>, %arg2: memref<200x1xf32, #tpu.memory_space<vmem>>, %arg3: memref<1x36x128x128xf32, #tpu.memory_space<vmem>>, %arg4: memref<1x4x1x128xf32, #tpu.memory_space<vmem>>, %arg5: memref<1x200x128xf32, #tpu.memory_space<vmem>>) attributes {dimension_semantics = [#tpu.dimension_semantics<parallel>], iteration_bounds = array<i64: 2>, scalar_prefetch = 0 : i64, scratch_operands = 0 : i64, tpu.core_type = #tpu.core_type<tc>, window_params = [{pipeline_mode = #tpu.pipeline_mode<synchronous>, transform_indices = @transform_0, window_bounds = array<i64: 200, 128>}, {pipeline_mode = #tpu.pipeline_mode<synchronous>, transform_indices = @transform_1, window_bounds = array<i64: 200, 1>}, {transform_indices = @transform_2, window_bounds = array<i64: 1, 36, 128, 128>}, {transform_indices = @transform_3, window_bounds = array<i64: 1, 4, 1, 128>}, {transform_indices = @transform_4, window_bounds = array<i64: 1, 200, 128>}]} {
    %c0 = arith.constant 0 : index
    %c0_0 = arith.constant 0 : index
    %0 = vector.load %arg2[%c0, %c0_0] : memref<200x1xf32, #tpu.memory_space<vmem>>, vector<200x1xf32>
    %c0_1 = arith.constant 0 : index
    %c0_2 = arith.constant 0 : index
    %1 = vector.load %arg1[%c0_1, %c0_2] : memref<200x128xf32, #tpu.memory_space<vmem>>, vector<200x128xf32>
    %c1_i32 = arith.constant 1 : i32
    %2 = tpu.dynamic_rotate %1 by %c1_i32 dim 0 : vector<200x128xf32>, i32 -> vector<200x128xf32>
    %c199_i32 = arith.constant 199 : i32
    %3 = tpu.dynamic_rotate %1 by %c199_i32 dim 0 : vector<200x128xf32>, i32 -> vector<200x128xf32>
    %c0_3 = arith.constant 0 : index
    %c0_4 = arith.constant 0 : index
    %c0_5 = arith.constant 0 : index
    %c0_6 = arith.constant 0 : index
    %4 = vector.load %arg3[%c0_3, %c0_4, %c0_5, %c0_6] : memref<1x36x128x128xf32, #tpu.memory_space<vmem>>, vector<1x1x128x128xf32>
    %5 = vector.shape_cast %4 : vector<1x1x128x128xf32> to vector<128x128xf32>
    %cst = arith.constant dense<0.000000e+00> : vector<200x128xf32>
    %6 = tpu.matmul %2, %5, %cst {dimension_numbers = #tpu.dot_dimension_numbers<[1], [0], [0], [1], [0, 0, 1, 1], [], []>} : vector<200x128xf32>, vector<128x128xf32>, vector<200x128xf32> -> vector<200x128xf32>
    %c0_7 = arith.constant 0 : index
    %c1 = arith.constant 1 : index
    %c0_8 = arith.constant 0 : index
    %c0_9 = arith.constant 0 : index
    %7 = vector.load %arg3[%c0_7, %c1, %c0_8, %c0_9] : memref<1x36x128x128xf32, #tpu.memory_space<vmem>>, vector<1x1x128x128xf32>
    %8 = vector.shape_cast %7 : vector<1x1x128x128xf32> to vector<128x128xf32>
    %cst_10 = arith.constant dense<0.000000e+00> : vector<200x128xf32>
    %9 = tpu.matmul %1, %8, %cst_10 {dimension_numbers = #tpu.dot_dimension_numbers<[1], [0], [0], [1], [0, 0, 1, 1], [], []>} : vector<200x128xf32>, vector<128x128xf32>, vector<200x128xf32> -> vector<200x128xf32>
    %10 = arith.addf %6, %9 : vector<200x128xf32>
    %c0_11 = arith.constant 0 : index
    %c2 = arith.constant 2 : index
    %c0_12 = arith.constant 0 : index
    %c0_13 = arith.constant 0 : index
    %11 = vector.load %arg3[%c0_11, %c2, %c0_12, %c0_13] : memref<1x36x128x128xf32, #tpu.memory_space<vmem>>, vector<1x1x128x128xf32>
    %12 = vector.shape_cast %11 : vector<1x1x128x128xf32> to vector<128x128xf32>
    %cst_14 = arith.constant dense<0.000000e+00> : vector<200x128xf32>
    %13 = tpu.matmul %3, %12, %cst_14 {dimension_numbers = #tpu.dot_dimension_numbers<[1], [0], [0], [1], [0, 0, 1, 1], [], []>} : vector<200x128xf32>, vector<128x128xf32>, vector<200x128xf32> -> vector<200x128xf32>
    %14 = arith.addf %10, %13 : vector<200x128xf32>
    %c0_15 = arith.constant 0 : index
    %c0_16 = arith.constant 0 : index
    %c0_17 = arith.constant 0 : index
    %c0_18 = arith.constant 0 : index
    %15 = vector.load %arg4[%c0_15, %c0_16, %c0_17, %c0_18] : memref<1x4x1x128xf32, #tpu.memory_space<vmem>>, vector<1x1x1x128xf32>
    %16 = vector.shape_cast %15 : vector<1x1x1x128xf32> to vector<1x128xf32>
    %17 = vector.shape_cast %16 : vector<1x128xf32> to vector<1x128xf32>
    %18 = vector.broadcast %17 : vector<1x128xf32> to vector<200x128xf32>
    %c0_19 = arith.constant 0 : index
    %c3 = arith.constant 3 : index
    %c0_20 = arith.constant 0 : index
    %c0_21 = arith.constant 0 : index
    %19 = vector.load %arg3[%c0_19, %c3, %c0_20, %c0_21] : memref<1x36x128x128xf32, #tpu.memory_space<vmem>>, vector<1x1x128x128xf32>
    %20 = vector.shape_cast %19 : vector<1x1x128x128xf32> to vector<128x128xf32>
    %cst_22 = arith.constant dense<0.000000e+00> : vector<200x128xf32>
    %21 = tpu.matmul %2, %20, %cst_22 {dimension_numbers = #tpu.dot_dimension_numbers<[1], [0], [0], [1], [0, 0, 1, 1], [], []>} : vector<200x128xf32>, vector<128x128xf32>, vector<200x128xf32> -> vector<200x128xf32>
    %22 = arith.addf %18, %21 : vector<200x128xf32>
    %c0_23 = arith.constant 0 : index
    %c4 = arith.constant 4 : index
    %c0_24 = arith.constant 0 : index
    %c0_25 = arith.constant 0 : index
    %23 = vector.load %arg3[%c0_23, %c4, %c0_24, %c0_25] : memref<1x36x128x128xf32, #tpu.memory_space<vmem>>, vector<1x1x128x128xf32>
    %24 = vector.shape_cast %23 : vector<1x1x128x128xf32> to vector<128x128xf32>
    %cst_26 = arith.constant dense<0.000000e+00> : vector<200x128xf32>
    %25 = tpu.matmul %1, %24, %cst_26 {dimension_numbers = #tpu.dot_dimension_numbers<[1], [0], [0], [1], [0, 0, 1, 1], [], []>} : vector<200x128xf32>, vector<128x128xf32>, vector<200x128xf32> -> vector<200x128xf32>
    %26 = arith.addf %22, %25 : vector<200x128xf32>
    %c0_27 = arith.constant 0 : index
    %c5 = arith.constant 5 : index
    %c0_28 = arith.constant 0 : index
    %c0_29 = arith.constant 0 : index
    %27 = vector.load %arg3[%c0_27, %c5, %c0_28, %c0_29] : memref<1x36x128x128xf32, #tpu.memory_space<vmem>>, vector<1x1x128x128xf32>
    %28 = vector.shape_cast %27 : vector<1x1x128x128xf32> to vector<128x128xf32>
    %cst_30 = arith.constant dense<0.000000e+00> : vector<200x128xf32>
    %29 = tpu.matmul %3, %28, %cst_30 {dimension_numbers = #tpu.dot_dimension_numbers<[1], [0], [0], [1], [0, 0, 1, 1], [], []>} : vector<200x128xf32>, vector<128x128xf32>, vector<200x128xf32> -> vector<200x128xf32>
    %30 = arith.addf %26, %29 : vector<200x128xf32>
    %c0_31 = arith.constant 0 : index
    %c6 = arith.constant 6 : index
    %c0_32 = arith.constant 0 : index
    %c0_33 = arith.constant 0 : index
    %31 = vector.load %arg3[%c0_31, %c6, %c0_32, %c0_33] : memref<1x36x128x128xf32, #tpu.memory_space<vmem>>, vector<1x1x128x128xf32>
    %32 = vector.shape_cast %31 : vector<1x1x128x128xf32> to vector<128x128xf32>
    %cst_34 = arith.constant dense<0.000000e+00> : vector<200x128xf32>
    %33 = tpu.matmul %2, %32, %cst_34 {dimension_numbers = #tpu.dot_dimension_numbers<[1], [0], [0], [1], [0, 0, 1, 1], [], []>} : vector<200x128xf32>, vector<128x128xf32>, vector<200x128xf32> -> vector<200x128xf32>
    %c0_35 = arith.constant 0 : index
    %c7 = arith.constant 7 : index
    %c0_36 = arith.constant 0 : index
    %c0_37 = arith.constant 0 : index
    %34 = vector.load %arg3[%c0_35, %c7, %c0_36, %c0_37] : memref<1x36x128x128xf32, #tpu.memory_space<vmem>>, vector<1x1x128x128xf32>
    %35 = vector.shape_cast %34 : vector<1x1x128x128xf32> to vector<128x128xf32>
    %cst_38 = arith.constant dense<0.000000e+00> : vector<200x128xf32>
    %36 = tpu.matmul %1, %35, %cst_38 {dimension_numbers = #tpu.dot_dimension_numbers<[1], [0], [0], [1], [0, 0, 1, 1], [], []>} : vector<200x128xf32>, vector<128x128xf32>, vector<200x128xf32> -> vector<200x128xf32>
    %37 = arith.addf %33, %36 : vector<200x128xf32>
    %c0_39 = arith.constant 0 : index
    %c8 = arith.constant 8 : index
    %c0_40 = arith.constant 0 : index
    %c0_41 = arith.constant 0 : index
    %38 = vector.load %arg3[%c0_39, %c8, %c0_40, %c0_41] : memref<1x36x128x128xf32, #tpu.memory_space<vmem>>, vector<1x1x128x128xf32>
    %39 = vector.shape_cast %38 : vector<1x1x128x128xf32> to vector<128x128xf32>
    %cst_42 = arith.constant dense<0.000000e+00> : vector<200x128xf32>
    %40 = tpu.matmul %3, %39, %cst_42 {dimension_numbers = #tpu.dot_dimension_numbers<[1], [0], [0], [1], [0, 0, 1, 1], [], []>} : vector<200x128xf32>, vector<128x128xf32>, vector<200x128xf32> -> vector<200x128xf32>
    %41 = arith.addf %37, %40 : vector<200x128xf32>
    %c10_i32 = arith.constant 10 : i32
    %42 = tpu.dynamic_rotate %14 by %c10_i32 dim 0 : vector<200x128xf32>, i32 -> vector<200x128xf32>
    %43 = arith.addf %42, %30 : vector<200x128xf32>
    %c190_i32 = arith.constant 190 : i32
    %44 = tpu.dynamic_rotate %41 by %c190_i32 dim 0 : vector<200x128xf32>, i32 -> vector<200x128xf32>
    %45 = arith.addf %43, %44 : vector<200x128xf32>
    %cst_43 = arith.constant 0.000000e+00 : f32
    %46 = vector.broadcast %cst_43 : f32 to vector<200x128xf32>
    %47 = arith.maximumf %45, %46 : vector<200x128xf32>
    %48 = vector.broadcast %0 : vector<200x1xf32> to vector<200x128xf32>
    %49 = arith.mulf %47, %48 : vector<200x128xf32>
    %c1_i32_44 = arith.constant 1 : i32
    %50 = tpu.dynamic_rotate %49 by %c1_i32_44 dim 0 : vector<200x128xf32>, i32 -> vector<200x128xf32>
    %c199_i32_45 = arith.constant 199 : i32
    %51 = tpu.dynamic_rotate %49 by %c199_i32_45 dim 0 : vector<200x128xf32>, i32 -> vector<200x128xf32>
    %c0_46 = arith.constant 0 : index
    %c9 = arith.constant 9 : index
    %c0_47 = arith.constant 0 : index
    %c0_48 = arith.constant 0 : index
    %52 = vector.load %arg3[%c0_46, %c9, %c0_47, %c0_48] : memref<1x36x128x128xf32, #tpu.memory_space<vmem>>, vector<1x1x128x128xf32>
    %53 = vector.shape_cast %52 : vector<1x1x128x128xf32> to vector<128x128xf32>
    %cst_49 = arith.constant dense<0.000000e+00> : vector<200x128xf32>
    %54 = tpu.matmul %50, %53, %cst_49 {dimension_numbers = #tpu.dot_dimension_numbers<[1], [0], [0], [1], [0, 0, 1, 1], [], []>} : vector<200x128xf32>, vector<128x128xf32>, vector<200x128xf32> -> vector<200x128xf32>
    %c0_50 = arith.constant 0 : index
    %c10 = arith.constant 10 : index
    %c0_51 = arith.constant 0 : index
    %c0_52 = arith.constant 0 : index
    %55 = vector.load %arg3[%c0_50, %c10, %c0_51, %c0_52] : memref<1x36x128x128xf32, #tpu.memory_space<vmem>>, vector<1x1x128x128xf32>
    %56 = vector.shape_cast %55 : vector<1x1x128x128xf32> to vector<128x128xf32>
    %cst_53 = arith.constant dense<0.000000e+00> : vector<200x128xf32>
    %57 = tpu.matmul %49, %56, %cst_53 {dimension_numbers = #tpu.dot_dimension_numbers<[1], [0], [0], [1], [0, 0, 1, 1], [], []>} : vector<200x128xf32>, vector<128x128xf32>, vector<200x128xf32> -> vector<200x128xf32>
    %58 = arith.addf %54, %57 : vector<200x128xf32>
    %c0_54 = arith.constant 0 : index
    %c11 = arith.constant 11 : index
    %c0_55 = arith.constant 0 : index
    %c0_56 = arith.constant 0 : index
    %59 = vector.load %arg3[%c0_54, %c11, %c0_55, %c0_56] : memref<1x36x128x128xf32, #tpu.memory_space<vmem>>, vector<1x1x128x128xf32>
    %60 = vector.shape_cast %59 : vector<1x1x128x128xf32> to vector<128x128xf32>
    %cst_57 = arith.constant dense<0.000000e+00> : vector<200x128xf32>
    %61 = tpu.matmul %51, %60, %cst_57 {dimension_numbers = #tpu.dot_dimension_numbers<[1], [0], [0], [1], [0, 0, 1, 1], [], []>} : vector<200x128xf32>, vector<128x128xf32>, vector<200x128xf32> -> vector<200x128xf32>
    %62 = arith.addf %58, %61 : vector<200x128xf32>
    %c0_58 = arith.constant 0 : index
    %c1_59 = arith.constant 1 : index
    %c0_60 = arith.constant 0 : index
    %c0_61 = arith.constant 0 : index
    %63 = vector.load %arg4[%c0_58, %c1_59, %c0_60, %c0_61] : memref<1x4x1x128xf32, #tpu.memory_space<vmem>>, vector<1x1x1x128xf32>
    %64 = vector.shape_cast %63 : vector<1x1x1x128xf32> to vector<1x128xf32>
    %65 = vector.shape_cast %64 : vector<1x128xf32> to vector<1x128xf32>
    %66 = vector.broadcast %65 : vector<1x128xf32> to vector<200x128xf32>
    %c0_62 = arith.constant 0 : index
    %c12 = arith.constant 12 : index
    %c0_63 = arith.constant 0 : index
    %c0_64 = arith.constant 0 : index
    %67 = vector.load %arg3[%c0_62, %c12, %c0_63, %c0_64] : memref<1x36x128x128xf32, #tpu.memory_space<vmem>>, vector<1x1x128x128xf32>
    %68 = vector.shape_cast %67 : vector<1x1x128x128xf32> to vector<128x128xf32>
    %cst_65 = arith.constant dense<0.000000e+00> : vector<200x128xf32>
    %69 = tpu.matmul %50, %68, %cst_65 {dimension_numbers = #tpu.dot_dimension_numbers<[1], [0], [0], [1], [0, 0, 1, 1], [], []>} : vector<200x128xf32>, vector<128x128xf32>, vector<200x128xf32> -> vector<200x128xf32>
    %70 = arith.addf %66, %69 : vector<200x128xf32>
    %c0_66 = arith.constant 0 : index
    %c13 = arith.constant 13 : index
    %c0_67 = arith.constant 0 : index
    %c0_68 = arith.constant 0 : index
    %71 = vector.load %arg3[%c0_66, %c13, %c0_67, %c0_68] : memref<1x36x128x128xf32, #tpu.memory_space<vmem>>, vector<1x1x128x128xf32>
    %72 = vector.shape_cast %71 : vector<1x1x128x128xf32> to vector<128x128xf32>
    %cst_69 = arith.constant dense<0.000000e+00> : vector<200x128xf32>
    %73 = tpu.matmul %49, %72, %cst_69 {dimension_numbers = #tpu.dot_dimension_numbers<[1], [0], [0], [1], [0, 0, 1, 1], [], []>} : vector<200x128xf32>, vector<128x128xf32>, vector<200x128xf32> -> vector<200x128xf32>
    %74 = arith.addf %70, %73 : vector<200x128xf32>
    %c0_70 = arith.constant 0 : index
    %c14 = arith.constant 14 : index
    %c0_71 = arith.constant 0 : index
    %c0_72 = arith.constant 0 : index
    %75 = vector.load %arg3[%c0_70, %c14, %c0_71, %c0_72] : memref<1x36x128x128xf32, #tpu.memory_space<vmem>>, vector<1x1x128x128xf32>
    %76 = vector.shape_cast %75 : vector<1x1x128x128xf32> to vector<128x128xf32>
    %cst_73 = arith.constant dense<0.000000e+00> : vector<200x128xf32>
    %77 = tpu.matmul %51, %76, %cst_73 {dimension_numbers = #tpu.dot_dimension_numbers<[1], [0], [0], [1], [0, 0, 1, 1], [], []>} : vector<200x128xf32>, vector<128x128xf32>, vector<200x128xf32> -> vector<200x128xf32>
    %78 = arith.addf %74, %77 : vector<200x128xf32>
    %c0_74 = arith.constant 0 : index
    %c15 = arith.constant 15 : index
    %c0_75 = arith.constant 0 : index
    %c0_76 = arith.constant 0 : index
    %79 = vector.load %arg3[%c0_74, %c15, %c0_75, %c0_76] : memref<1x36x128x128xf32, #tpu.memory_space<vmem>>, vector<1x1x128x128xf32>
    %80 = vector.shape_cast %79 : vector<1x1x128x128xf32> to vector<128x128xf32>
    %cst_77 = arith.constant dense<0.000000e+00> : vector<200x128xf32>
    %81 = tpu.matmul %50, %80, %cst_77 {dimension_numbers = #tpu.dot_dimension_numbers<[1], [0], [0], [1], [0, 0, 1, 1], [], []>} : vector<200x128xf32>, vector<128x128xf32>, vector<200x128xf32> -> vector<200x128xf32>
    %c0_78 = arith.constant 0 : index
    %c16 = arith.constant 16 : index
    %c0_79 = arith.constant 0 : index
    %c0_80 = arith.constant 0 : index
    %82 = vector.load %arg3[%c0_78, %c16, %c0_79, %c0_80] : memref<1x36x128x128xf32, #tpu.memory_space<vmem>>, vector<1x1x128x128xf32>
    %83 = vector.shape_cast %82 : vector<1x1x128x128xf32> to vector<128x128xf32>
    %cst_81 = arith.constant dense<0.000000e+00> : vector<200x128xf32>
    %84 = tpu.matmul %49, %83, %cst_81 {dimension_numbers = #tpu.dot_dimension_numbers<[1], [0], [0], [1], [0, 0, 1, 1], [], []>} : vector<200x128xf32>, vector<128x128xf32>, vector<200x128xf32> -> vector<200x128xf32>
    %85 = arith.addf %81, %84 : vector<200x128xf32>
    %c0_82 = arith.constant 0 : index
    %c17 = arith.constant 17 : index
    %c0_83 = arith.constant 0 : index
    %c0_84 = arith.constant 0 : index
    %86 = vector.load %arg3[%c0_82, %c17, %c0_83, %c0_84] : memref<1x36x128x128xf32, #tpu.memory_space<vmem>>, vector<1x1x128x128xf32>
    %87 = vector.shape_cast %86 : vector<1x1x128x128xf32> to vector<128x128xf32>
    %cst_85 = arith.constant dense<0.000000e+00> : vector<200x128xf32>
    %88 = tpu.matmul %51, %87, %cst_85 {dimension_numbers = #tpu.dot_dimension_numbers<[1], [0], [0], [1], [0, 0, 1, 1], [], []>} : vector<200x128xf32>, vector<128x128xf32>, vector<200x128xf32> -> vector<200x128xf32>
    %89 = arith.addf %85, %88 : vector<200x128xf32>
    %c10_i32_86 = arith.constant 10 : i32
    %90 = tpu.dynamic_rotate %62 by %c10_i32_86 dim 0 : vector<200x128xf32>, i32 -> vector<200x128xf32>
    %91 = arith.addf %90, %78 : vector<200x128xf32>
    %c190_i32_87 = arith.constant 190 : i32
    %92 = tpu.dynamic_rotate %89 by %c190_i32_87 dim 0 : vector<200x128xf32>, i32 -> vector<200x128xf32>
    %93 = arith.addf %91, %92 : vector<200x128xf32>
    %cst_88 = arith.constant 0.000000e+00 : f32
    %94 = vector.broadcast %cst_88 : f32 to vector<200x128xf32>
    %95 = arith.maximumf %93, %94 : vector<200x128xf32>
    %96 = vector.broadcast %0 : vector<200x1xf32> to vector<200x128xf32>
    %97 = arith.mulf %95, %96 : vector<200x128xf32>
    %c1_i32_89 = arith.constant 1 : i32
    %98 = tpu.dynamic_rotate %97 by %c1_i32_89 dim 0 : vector<200x128xf32>, i32 -> vector<200x128xf32>
    %c199_i32_90 = arith.constant 199 : i32
    %99 = tpu.dynamic_rotate %97 by %c199_i32_90 dim 0 : vector<200x128xf32>, i32 -> vector<200x128xf32>
    %c0_91 = arith.constant 0 : index
    %c18 = arith.constant 18 : index
    %c0_92 = arith.constant 0 : index
    %c0_93 = arith.constant 0 : index
    %100 = vector.load %arg3[%c0_91, %c18, %c0_92, %c0_93] : memref<1x36x128x128xf32, #tpu.memory_space<vmem>>, vector<1x1x128x128xf32>
    %101 = vector.shape_cast %100 : vector<1x1x128x128xf32> to vector<128x128xf32>
    %cst_94 = arith.constant dense<0.000000e+00> : vector<200x128xf32>
    %102 = tpu.matmul %98, %101, %cst_94 {dimension_numbers = #tpu.dot_dimension_numbers<[1], [0], [0], [1], [0, 0, 1, 1], [], []>} : vector<200x128xf32>, vector<128x128xf32>, vector<200x128xf32> -> vector<200x128xf32>
    %c0_95 = arith.constant 0 : index
    %c19 = arith.constant 19 : index
    %c0_96 = arith.constant 0 : index
    %c0_97 = arith.constant 0 : index
    %103 = vector.load %arg3[%c0_95, %c19, %c0_96, %c0_97] : memref<1x36x128x128xf32, #tpu.memory_space<vmem>>, vector<1x1x128x128xf32>
    %104 = vector.shape_cast %103 : vector<1x1x128x128xf32> to vector<128x128xf32>
    %cst_98 = arith.constant dense<0.000000e+00> : vector<200x128xf32>
    %105 = tpu.matmul %97, %104, %cst_98 {dimension_numbers = #tpu.dot_dimension_numbers<[1], [0], [0], [1], [0, 0, 1, 1], [], []>} : vector<200x128xf32>, vector<128x128xf32>, vector<200x128xf32> -> vector<200x128xf32>
    %106 = arith.addf %102, %105 : vector<200x128xf32>
    %c0_99 = arith.constant 0 : index
    %c20 = arith.constant 20 : index
    %c0_100 = arith.constant 0 : index
    %c0_101 = arith.constant 0 : index
    %107 = vector.load %arg3[%c0_99, %c20, %c0_100, %c0_101] : memref<1x36x128x128xf32, #tpu.memory_space<vmem>>, vector<1x1x128x128xf32>
    %108 = vector.shape_cast %107 : vector<1x1x128x128xf32> to vector<128x128xf32>
    %cst_102 = arith.constant dense<0.000000e+00> : vector<200x128xf32>
    %109 = tpu.matmul %99, %108, %cst_102 {dimension_numbers = #tpu.dot_dimension_numbers<[1], [0], [0], [1], [0, 0, 1, 1], [], []>} : vector<200x128xf32>, vector<128x128xf32>, vector<200x128xf32> -> vector<200x128xf32>
    %110 = arith.addf %106, %109 : vector<200x128xf32>
    %c0_103 = arith.constant 0 : index
    %c2_104 = arith.constant 2 : index
    %c0_105 = arith.constant 0 : index
    %c0_106 = arith.constant 0 : index
    %111 = vector.load %arg4[%c0_103, %c2_104, %c0_105, %c0_106] : memref<1x4x1x128xf32, #tpu.memory_space<vmem>>, vector<1x1x1x128xf32>
    %112 = vector.shape_cast %111 : vector<1x1x1x128xf32> to vector<1x128xf32>
    %113 = vector.shape_cast %112 : vector<1x128xf32> to vector<1x128xf32>
    %114 = vector.broadcast %113 : vector<1x128xf32> to vector<200x128xf32>
    %c0_107 = arith.constant 0 : index
    %c21 = arith.constant 21 : index
    %c0_108 = arith.constant 0 : index
    %c0_109 = arith.constant 0 : index
    %115 = vector.load %arg3[%c0_107, %c21, %c0_108, %c0_109] : memref<1x36x128x128xf32, #tpu.memory_space<vmem>>, vector<1x1x128x128xf32>
    %116 = vector.shape_cast %115 : vector<1x1x128x128xf32> to vector<128x128xf32>
    %cst_110 = arith.constant dense<0.000000e+00> : vector<200x128xf32>
    %117 = tpu.matmul %98, %116, %cst_110 {dimension_numbers = #tpu.dot_dimension_numbers<[1], [0], [0], [1], [0, 0, 1, 1], [], []>} : vector<200x128xf32>, vector<128x128xf32>, vector<200x128xf32> -> vector<200x128xf32>
    %118 = arith.addf %114, %117 : vector<200x128xf32>
    %c0_111 = arith.constant 0 : index
    %c22 = arith.constant 22 : index
    %c0_112 = arith.constant 0 : index
    %c0_113 = arith.constant 0 : index
    %119 = vector.load %arg3[%c0_111, %c22, %c0_112, %c0_113] : memref<1x36x128x128xf32, #tpu.memory_space<vmem>>, vector<1x1x128x128xf32>
    %120 = vector.shape_cast %119 : vector<1x1x128x128xf32> to vector<128x128xf32>
    %cst_114 = arith.constant dense<0.000000e+00> : vector<200x128xf32>
    %121 = tpu.matmul %97, %120, %cst_114 {dimension_numbers = #tpu.dot_dimension_numbers<[1], [0], [0], [1], [0, 0, 1, 1], [], []>} : vector<200x128xf32>, vector<128x128xf32>, vector<200x128xf32> -> vector<200x128xf32>
    %122 = arith.addf %118, %121 : vector<200x128xf32>
    %c0_115 = arith.constant 0 : index
    %c23 = arith.constant 23 : index
    %c0_116 = arith.constant 0 : index
    %c0_117 = arith.constant 0 : index
    %123 = vector.load %arg3[%c0_115, %c23, %c0_116, %c0_117] : memref<1x36x128x128xf32, #tpu.memory_space<vmem>>, vector<1x1x128x128xf32>
    %124 = vector.shape_cast %123 : vector<1x1x128x128xf32> to vector<128x128xf32>
    %cst_118 = arith.constant dense<0.000000e+00> : vector<200x128xf32>
    %125 = tpu.matmul %99, %124, %cst_118 {dimension_numbers = #tpu.dot_dimension_numbers<[1], [0], [0], [1], [0, 0, 1, 1], [], []>} : vector<200x128xf32>, vector<128x128xf32>, vector<200x128xf32> -> vector<200x128xf32>
    %126 = arith.addf %122, %125 : vector<200x128xf32>
    %c0_119 = arith.constant 0 : index
    %c24 = arith.constant 24 : index
    %c0_120 = arith.constant 0 : index
    %c0_121 = arith.constant 0 : index
    %127 = vector.load %arg3[%c0_119, %c24, %c0_120, %c0_121] : memref<1x36x128x128xf32, #tpu.memory_space<vmem>>, vector<1x1x128x128xf32>
    %128 = vector.shape_cast %127 : vector<1x1x128x128xf32> to vector<128x128xf32>
    %cst_122 = arith.constant dense<0.000000e+00> : vector<200x128xf32>
    %129 = tpu.matmul %98, %128, %cst_122 {dimension_numbers = #tpu.dot_dimension_numbers<[1], [0], [0], [1], [0, 0, 1, 1], [], []>} : vector<200x128xf32>, vector<128x128xf32>, vector<200x128xf32> -> vector<200x128xf32>
    %c0_123 = arith.constant 0 : index
    %c25 = arith.constant 25 : index
    %c0_124 = arith.constant 0 : index
    %c0_125 = arith.constant 0 : index
    %130 = vector.load %arg3[%c0_123, %c25, %c0_124, %c0_125] : memref<1x36x128x128xf32, #tpu.memory_space<vmem>>, vector<1x1x128x128xf32>
    %131 = vector.shape_cast %130 : vector<1x1x128x128xf32> to vector<128x128xf32>
    %cst_126 = arith.constant dense<0.000000e+00> : vector<200x128xf32>
    %132 = tpu.matmul %97, %131, %cst_126 {dimension_numbers = #tpu.dot_dimension_numbers<[1], [0], [0], [1], [0, 0, 1, 1], [], []>} : vector<200x128xf32>, vector<128x128xf32>, vector<200x128xf32> -> vector<200x128xf32>
    %133 = arith.addf %129, %132 : vector<200x128xf32>
    %c0_127 = arith.constant 0 : index
    %c26 = arith.constant 26 : index
    %c0_128 = arith.constant 0 : index
    %c0_129 = arith.constant 0 : index
    %134 = vector.load %arg3[%c0_127, %c26, %c0_128, %c0_129] : memref<1x36x128x128xf32, #tpu.memory_space<vmem>>, vector<1x1x128x128xf32>
    %135 = vector.shape_cast %134 : vector<1x1x128x128xf32> to vector<128x128xf32>
    %cst_130 = arith.constant dense<0.000000e+00> : vector<200x128xf32>
    %136 = tpu.matmul %99, %135, %cst_130 {dimension_numbers = #tpu.dot_dimension_numbers<[1], [0], [0], [1], [0, 0, 1, 1], [], []>} : vector<200x128xf32>, vector<128x128xf32>, vector<200x128xf32> -> vector<200x128xf32>
    %137 = arith.addf %133, %136 : vector<200x128xf32>
    %c10_i32_131 = arith.constant 10 : i32
    %138 = tpu.dynamic_rotate %110 by %c10_i32_131 dim 0 : vector<200x128xf32>, i32 -> vector<200x128xf32>
    %139 = arith.addf %138, %126 : vector<200x128xf32>
    %c190_i32_132 = arith.constant 190 : i32
    %140 = tpu.dynamic_rotate %137 by %c190_i32_132 dim 0 : vector<200x128xf32>, i32 -> vector<200x128xf32>
    %141 = arith.addf %139, %140 : vector<200x128xf32>
    %cst_133 = arith.constant 0.000000e+00 : f32
    %142 = vector.broadcast %cst_133 : f32 to vector<200x128xf32>
    %143 = arith.maximumf %141, %142 : vector<200x128xf32>
    %144 = vector.broadcast %0 : vector<200x1xf32> to vector<200x128xf32>
    %145 = arith.mulf %143, %144 : vector<200x128xf32>
    %c1_i32_134 = arith.constant 1 : i32
    %146 = tpu.dynamic_rotate %145 by %c1_i32_134 dim 0 : vector<200x128xf32>, i32 -> vector<200x128xf32>
    %c199_i32_135 = arith.constant 199 : i32
    %147 = tpu.dynamic_rotate %145 by %c199_i32_135 dim 0 : vector<200x128xf32>, i32 -> vector<200x128xf32>
    %c0_136 = arith.constant 0 : index
    %c27 = arith.constant 27 : index
    %c0_137 = arith.constant 0 : index
    %c0_138 = arith.constant 0 : index
    %148 = vector.load %arg3[%c0_136, %c27, %c0_137, %c0_138] : memref<1x36x128x128xf32, #tpu.memory_space<vmem>>, vector<1x1x128x128xf32>
    %149 = vector.shape_cast %148 : vector<1x1x128x128xf32> to vector<128x128xf32>
    %cst_139 = arith.constant dense<0.000000e+00> : vector<200x128xf32>
    %150 = tpu.matmul %146, %149, %cst_139 {dimension_numbers = #tpu.dot_dimension_numbers<[1], [0], [0], [1], [0, 0, 1, 1], [], []>} : vector<200x128xf32>, vector<128x128xf32>, vector<200x128xf32> -> vector<200x128xf32>
    %c0_140 = arith.constant 0 : index
    %c28 = arith.constant 28 : index
    %c0_141 = arith.constant 0 : index
    %c0_142 = arith.constant 0 : index
    %151 = vector.load %arg3[%c0_140, %c28, %c0_141, %c0_142] : memref<1x36x128x128xf32, #tpu.memory_space<vmem>>, vector<1x1x128x128xf32>
    %152 = vector.shape_cast %151 : vector<1x1x128x128xf32> to vector<128x128xf32>
    %cst_143 = arith.constant dense<0.000000e+00> : vector<200x128xf32>
    %153 = tpu.matmul %145, %152, %cst_143 {dimension_numbers = #tpu.dot_dimension_numbers<[1], [0], [0], [1], [0, 0, 1, 1], [], []>} : vector<200x128xf32>, vector<128x128xf32>, vector<200x128xf32> -> vector<200x128xf32>
    %154 = arith.addf %150, %153 : vector<200x128xf32>
    %c0_144 = arith.constant 0 : index
    %c29 = arith.constant 29 : index
    %c0_145 = arith.constant 0 : index
    %c0_146 = arith.constant 0 : index
    %155 = vector.load %arg3[%c0_144, %c29, %c0_145, %c0_146] : memref<1x36x128x128xf32, #tpu.memory_space<vmem>>, vector<1x1x128x128xf32>
    %156 = vector.shape_cast %155 : vector<1x1x128x128xf32> to vector<128x128xf32>
    %cst_147 = arith.constant dense<0.000000e+00> : vector<200x128xf32>
    %157 = tpu.matmul %147, %156, %cst_147 {dimension_numbers = #tpu.dot_dimension_numbers<[1], [0], [0], [1], [0, 0, 1, 1], [], []>} : vector<200x128xf32>, vector<128x128xf32>, vector<200x128xf32> -> vector<200x128xf32>
    %158 = arith.addf %154, %157 : vector<200x128xf32>
    %c0_148 = arith.constant 0 : index
    %c3_149 = arith.constant 3 : index
    %c0_150 = arith.constant 0 : index
    %c0_151 = arith.constant 0 : index
    %159 = vector.load %arg4[%c0_148, %c3_149, %c0_150, %c0_151] : memref<1x4x1x128xf32, #tpu.memory_space<vmem>>, vector<1x1x1x128xf32>
    %160 = vector.shape_cast %159 : vector<1x1x1x128xf32> to vector<1x128xf32>
    %161 = vector.shape_cast %160 : vector<1x128xf32> to vector<1x128xf32>
    %162 = vector.broadcast %161 : vector<1x128xf32> to vector<200x128xf32>
    %c0_152 = arith.constant 0 : index
    %c30 = arith.constant 30 : index
    %c0_153 = arith.constant 0 : index
    %c0_154 = arith.constant 0 : index
    %163 = vector.load %arg3[%c0_152, %c30, %c0_153, %c0_154] : memref<1x36x128x128xf32, #tpu.memory_space<vmem>>, vector<1x1x128x128xf32>
    %164 = vector.shape_cast %163 : vector<1x1x128x128xf32> to vector<128x128xf32>
    %cst_155 = arith.constant dense<0.000000e+00> : vector<200x128xf32>
    %165 = tpu.matmul %146, %164, %cst_155 {dimension_numbers = #tpu.dot_dimension_numbers<[1], [0], [0], [1], [0, 0, 1, 1], [], []>} : vector<200x128xf32>, vector<128x128xf32>, vector<200x128xf32> -> vector<200x128xf32>
    %166 = arith.addf %162, %165 : vector<200x128xf32>
    %c0_156 = arith.constant 0 : index
    %c31 = arith.constant 31 : index
    %c0_157 = arith.constant 0 : index
    %c0_158 = arith.constant 0 : index
    %167 = vector.load %arg3[%c0_156, %c31, %c0_157, %c0_158] : memref<1x36x128x128xf32, #tpu.memory_space<vmem>>, vector<1x1x128x128xf32>
    %168 = vector.shape_cast %167 : vector<1x1x128x128xf32> to vector<128x128xf32>
    %cst_159 = arith.constant dense<0.000000e+00> : vector<200x128xf32>
    %169 = tpu.matmul %145, %168, %cst_159 {dimension_numbers = #tpu.dot_dimension_numbers<[1], [0], [0], [1], [0, 0, 1, 1], [], []>} : vector<200x128xf32>, vector<128x128xf32>, vector<200x128xf32> -> vector<200x128xf32>
    %170 = arith.addf %166, %169 : vector<200x128xf32>
    %c0_160 = arith.constant 0 : index
    %c32 = arith.constant 32 : index
    %c0_161 = arith.constant 0 : index
    %c0_162 = arith.constant 0 : index
    %171 = vector.load %arg3[%c0_160, %c32, %c0_161, %c0_162] : memref<1x36x128x128xf32, #tpu.memory_space<vmem>>, vector<1x1x128x128xf32>
    %172 = vector.shape_cast %171 : vector<1x1x128x128xf32> to vector<128x128xf32>
    %cst_163 = arith.constant dense<0.000000e+00> : vector<200x128xf32>
    %173 = tpu.matmul %147, %172, %cst_163 {dimension_numbers = #tpu.dot_dimension_numbers<[1], [0], [0], [1], [0, 0, 1, 1], [], []>} : vector<200x128xf32>, vector<128x128xf32>, vector<200x128xf32> -> vector<200x128xf32>
    %174 = arith.addf %170, %173 : vector<200x128xf32>
    %c0_164 = arith.constant 0 : index
    %c33 = arith.constant 33 : index
    %c0_165 = arith.constant 0 : index
    %c0_166 = arith.constant 0 : index
    %175 = vector.load %arg3[%c0_164, %c33, %c0_165, %c0_166] : memref<1x36x128x128xf32, #tpu.memory_space<vmem>>, vector<1x1x128x128xf32>
    %176 = vector.shape_cast %175 : vector<1x1x128x128xf32> to vector<128x128xf32>
    %cst_167 = arith.constant dense<0.000000e+00> : vector<200x128xf32>
    %177 = tpu.matmul %146, %176, %cst_167 {dimension_numbers = #tpu.dot_dimension_numbers<[1], [0], [0], [1], [0, 0, 1, 1], [], []>} : vector<200x128xf32>, vector<128x128xf32>, vector<200x128xf32> -> vector<200x128xf32>
    %c0_168 = arith.constant 0 : index
    %c34 = arith.constant 34 : index
    %c0_169 = arith.constant 0 : index
    %c0_170 = arith.constant 0 : index
    %178 = vector.load %arg3[%c0_168, %c34, %c0_169, %c0_170] : memref<1x36x128x128xf32, #tpu.memory_space<vmem>>, vector<1x1x128x128xf32>
    %179 = vector.shape_cast %178 : vector<1x1x128x128xf32> to vector<128x128xf32>
    %cst_171 = arith.constant dense<0.000000e+00> : vector<200x128xf32>
    %180 = tpu.matmul %145, %179, %cst_171 {dimension_numbers = #tpu.dot_dimension_numbers<[1], [0], [0], [1], [0, 0, 1, 1], [], []>} : vector<200x128xf32>, vector<128x128xf32>, vector<200x128xf32> -> vector<200x128xf32>
    %181 = arith.addf %177, %180 : vector<200x128xf32>
    %c0_172 = arith.constant 0 : index
    %c35 = arith.constant 35 : index
    %c0_173 = arith.constant 0 : index
    %c0_174 = arith.constant 0 : index
    %182 = vector.load %arg3[%c0_172, %c35, %c0_173, %c0_174] : memref<1x36x128x128xf32, #tpu.memory_space<vmem>>, vector<1x1x128x128xf32>
    %183 = vector.shape_cast %182 : vector<1x1x128x128xf32> to vector<128x128xf32>
    %cst_175 = arith.constant dense<0.000000e+00> : vector<200x128xf32>
    %184 = tpu.matmul %147, %183, %cst_175 {dimension_numbers = #tpu.dot_dimension_numbers<[1], [0], [0], [1], [0, 0, 1, 1], [], []>} : vector<200x128xf32>, vector<128x128xf32>, vector<200x128xf32> -> vector<200x128xf32>
    %185 = arith.addf %181, %184 : vector<200x128xf32>
    %c10_i32_176 = arith.constant 10 : i32
    %186 = tpu.dynamic_rotate %158 by %c10_i32_176 dim 0 : vector<200x128xf32>, i32 -> vector<200x128xf32>
    %187 = arith.addf %186, %174 : vector<200x128xf32>
    %c190_i32_177 = arith.constant 190 : i32
    %188 = tpu.dynamic_rotate %185 by %c190_i32_177 dim 0 : vector<200x128xf32>, i32 -> vector<200x128xf32>
    %189 = arith.addf %187, %188 : vector<200x128xf32>
    %cst_178 = arith.constant 0.000000e+00 : f32
    %190 = vector.broadcast %cst_178 : f32 to vector<200x128xf32>
    %191 = arith.maximumf %189, %190 : vector<200x128xf32>
    %c0_179 = arith.constant 0 : index
    %c0_180 = arith.constant 0 : index
    %c0_181 = arith.constant 0 : index
    %192 = vector.load %arg5[%c0_179, %c0_180, %c0_181] : memref<1x200x128xf32, #tpu.memory_space<vmem>>, vector<1x200x128xf32>
    %193 = vector.shape_cast %192 : vector<1x200x128xf32> to vector<200x128xf32>
    %194 = vector.shape_cast %191 : vector<200x128xf32> to vector<1x200x128xf32>
    tpu.vector_store %arg5[%c0_179, %c0_180, %c0_181], %194 {strides = array<i32>} : memref<1x200x128xf32, #tpu.memory_space<vmem>>, vector<1x200x128xf32>,
    return
  }
  func.func @transform_0(%arg0: i32) -> (i32, i32) {
    %c0_i32 = arith.constant 0 : i32
    %c0_i32_0 = arith.constant 0 : i32
    %c0_i32_1 = arith.constant 0 : i32
    return %c0_i32, %c0_i32_0 : i32, i32
  }
  func.func @transform_1(%arg0: i32) -> (i32, i32) {
    %c0_i32 = arith.constant 0 : i32
    %c0_i32_0 = arith.constant 0 : i32
    %c0_i32_1 = arith.constant 0 : i32
    return %c0_i32, %c0_i32_0 : i32, i32
  }
  func.func @transform_2(%arg0: i32) -> (i32, i32, i32, i32) {
    %c0_i32 = arith.constant 0 : i32
    %c0_i32_0 = arith.constant 0 : i32
    %c0_i32_1 = arith.constant 0 : i32
    %c0_i32_2 = arith.constant 0 : i32
    return %arg0, %c0_i32, %c0_i32_0, %c0_i32_1 : i32, i32, i32, i32
  }
  func.func @transform_3(%arg0: i32) -> (i32, i32, i32, i32) {
    %c0_i32 = arith.constant 0 : i32
    %c0_i32_0 = arith.constant 0 : i32
    %c0_i32_1 = arith.constant 0 : i32
    %c0_i32_2 = arith.constant 0 : i32
    return %arg0, %c0_i32, %c0_i32_0, %c0_i32_1 : i32, i32, i32, i32
  }
  func.func @transform_4(%arg0: i32) -> (i32, i32, i32) {
    %c0_i32 = arith.constant 0 : i32
    %c0_i32_0 = arith.constant 0 : i32
    %c0_i32_1 = arith.constant 0 : i32
    return %arg0, %c0_i32, %c0_i32_0 : i32, i32, i32
  }
}

</mosaic_0001>

<bundles_post_ra>
// kernel: decoupled_head_forward.1
= control target key start
LH: loop header
LB: loop body
LE: loop exit
PB: predicated region body
PF: predicated region fallthrough
CT: control target
= control target key end

     0   :  { %s6757_s15 = smov 0   ;;  %s12114_s0 = inlined_call_operand.vmem [shape: f32[200,128], index: 0, kind: input, shape index: {}]   ;;  %s12115_s1 = inlined_call_operand.vmem [shape: f32[200,1], index: 1, kind: input, shape index: {}]   ;;  %s12116_s2 = inlined_call_operand.vmem [shape: f32[2,36,128,128], index: 2, kind: input, shape index: {}]   ;;  %s12117_s3 = inlined_call_operand.vmem [shape: f32[2,4,1,128], index: 3, kind: input, shape index: {}]   ;;  %s12118_s4 = inlined_call_operand.vmem [shape: f32[2,200,128], index: 4, kind: output, shape index: {}]  }
   0x1 LB: > { %s6105_s16 = sadd.s32 4294967295, %s6729_s15   ;;  %p6109_p0 = scmp.ge.s32.totalorder %s6729_s15, 1  ;;  %s6729_s15 = sphi %s6757_s15, %s14_s15  }
   0x2   : > { %p171_p1 = scmp.lt.s32.totalorder %s6729_s15, 3 }
   0x4   : > { %p172_p2 = pnand %p6109_p0, %p171_p1 }
   0x6   : > { %175 = sbr.rel (%p172_p2) target bundleno = 2449 (0x991), region = 36 }
   0xb   : > { %p201_p3 = scmp.lt.s32.totalorder %s6105_s16, 1  ;;  %v290_v33 = vlaneseq  ;;  %v6814_v39 = vld [vmem:[%s12114_s0] sm:$0xff]  ;;  %v6827_v43 = vld [vmem:[%s12114_s0 + $0x8] sm:$0xff]  ;;  %v6860_v60 = vld [vmem:[%s12114_s0 + $0x10] sm:$0xff] }
   0xc   : > { %v6820_v41 = vld [vmem:[%s12114_s0 + $0xc0] sm:$0xff]  ;;  %v265_v49 = vrot.slane %v6814_v39, 7  ;;  %v12119_v51 = vrot.slane %v6814_v39, 1  ;;  %v319_v52 = vrot.slane %v6827_v43, 1  ;;  %v266_v62 = vrot.slane %v6827_v43, 7 }
   0xd   : > { %s13215_s16 = smov (!%p201_p3, %s6105_s16), 1  ;;  %v6822_v42 = vshrl.u32 %v290_v33, 7  ;;  %v12120_v50 = vrot.slane %v6820_v41, 7  ;;  %v320_v63 = vrot.slane %v6860_v60, 1 }
   0xe   : > { %s6678_s17 = smul.u32 4608, %s13215_s16  ;;  %s6111_s25 = sshll.u32 %s13215_s16, 2 }
   0xf   : > { %vm292_vm0 = vcmp.lt.s32.totalorder %v6822_v42, 1  ;;  %vm343_vm1 = vcmp.lt.s32.totalorder %v6822_v42, 7  ;;  %s7334_s28 = scalar_lea.vmem %s12117_s3, %s6111_s25  ;;  %vm1503_vm2 = vcmp.lt.s32.totalorder %v6822_v42, 2  ;;  %vm1579_vm3 = vcmp.lt.s32.totalorder %v6822_v42, 6 }
  0x10   : > { %s6771_s20 = scalar_lea.vmem %s12116_s2, %s6678_s17  ;;  %v6848_v57 = vsel %vm292_vm0, %v12120_v50, %v265_v49  ;;  %v6854_v58 = vsel %vm343_vm1, %v12119_v51, %v319_v52 }
  0x11   : > { %v6128_v0 = vld [vmem:[%s6771_s20 + $0xf8] sm:$0xff]  ;;  %v6127_v3 = vld [vmem:[%s6771_s20 + $0xf0] sm:$0xff]  ;;  %v6126_v6 = vld [vmem:[%s6771_s20 + $0xe8] sm:$0xff]  ;;  %12378 = vst [vmem:[#allocation2_spill] sm:$0xff] %v6848_v57 }
  0x12   : > { %v384_v1 = vld [vmem:[%s6771_s20 + $0x78] sm:$0xff]  ;;  %402 = vmatpush.msra.mxu0 %v6128_v0  ;;  %v383_v4 = vld [vmem:[%s6771_s20 + $0x70] sm:$0xff]  ;;  %v382_v7 = vld [vmem:[%s6771_s20 + $0x68] sm:$0xff] }
  0x13   : > { %v6144_v2 = vld [vmem:[%s6771_s20 + $0x178] sm:$0xff]  ;;  %494 = vmatpush.msra.mxu1 %v384_v1  ;;  %v6143_v5 = vld [vmem:[%s6771_s20 + $0x170] sm:$0xff]  ;;  %v6142_v8 = vld [vmem:[%s6771_s20 + $0x168] sm:$0xff]  ;;  %v6871_v1 = vsel %vm292_vm0, %v265_v49, %v266_v62 }
  0x14   : > { %603 = vmatpush.msra.mxu2 %v6144_v2  ;;  %403 = vmatpush.msra.mxu0 %v6127_v3  ;;  %v6125_v9 = vld [vmem:[%s6771_s20 + $0xe0] sm:$0xff]  ;;  %v6124_v12 = vld [vmem:[%s6771_s20 + $0xd8] sm:$0xff]  ;;  %v6123_v15 = vld [vmem:[%s6771_s20 + $0xd0] sm:$0xff]  ;;  %12379 = vst [vmem:[#allocation3_spill] sm:$0xff] %v6871_v1  ;;  %v6875_v2 = vsel %vm343_vm1, %v319_v52, %v320_v63 }
  0x15   : > { %495 = vmatpush.msra.mxu1 %v383_v4  ;;  %v381_v10 = vld [vmem:[%s6771_s20 + $0x60] sm:$0xff]  ;;  %v380_v13 = vld [vmem:[%s6771_s20 + $0x58] sm:$0xff]  ;;  %v379_v16 = vld [vmem:[%s6771_s20 + $0x50] sm:$0xff] }
  0x16   : > { %604 = vmatpush.msra.mxu2 %v6143_v5  ;;  %404 = vmatpush.msra.mxu0 %v6126_v6  ;;  %v6141_v11 = vld [vmem:[%s6771_s20 + $0x160] sm:$0xff]  ;;  %v6140_v14 = vld [vmem:[%s6771_s20 + $0x158] sm:$0xff]  ;;  %v6139_v17 = vld [vmem:[%s6771_s20 + $0x150] sm:$0xff]  ;;  %v267_v5 = vrot.slane %v6860_v60, 7 }
  0x17   : > { %496 = vmatpush.msra.mxu1 %v382_v7  ;;  %v6122_v18 = vld [vmem:[%s6771_s20 + $0xc8] sm:$0xff]  ;;  %v6121_v21 = vld [vmem:[%s6771_s20 + $0xc0] sm:$0xff]  ;;  %v6120_v24 = vld [vmem:[%s6771_s20 + $0xb8] sm:$0xff] }
  0x18   : > { %605 = vmatpush.msra.mxu2 %v6142_v8  ;;  %405 = vmatpush.msra.mxu0 %v6125_v9  ;;  %v378_v19 = vld [vmem:[%s6771_s20 + $0x48] sm:$0xff]  ;;  %v377_v22 = vld [vmem:[%s6771_s20 + $0x40] sm:$0xff]  ;;  %v376_v25 = vld [vmem:[%s6771_s20 + $0x38] sm:$0xff]  ;;  %v6890_v7 = vsel %vm292_vm0, %v266_v62, %v267_v5 }
  0x19   : > { %497 = vmatpush.msra.mxu1 %v381_v10  ;;  %v6138_v20 = vld [vmem:[%s6771_s20 + $0x148] sm:$0xff]  ;;  %v6137_v23 = vld [vmem:[%s6771_s20 + $0x140] sm:$0xff]  ;;  %v6136_v26 = vld [vmem:[%s6771_s20 + $0x138] sm:$0xff]  ;;  %12380 = vst [vmem:[#allocation4_spill] sm:$0xff] %v6890_v7 }
  0x1a   : > { %606 = vmatpush.msra.mxu2 %v6141_v11  ;;  %406 = vmatpush.msra.mxu0 %v6124_v12  ;;  %v6119_v27 = vld [vmem:[%s6771_s20 + $0xb0] sm:$0xff]  ;;  %v6118_v30 = vld [vmem:[%s6771_s20 + $0xa8] sm:$0xff]  ;;  %v6117_v34 = vld [vmem:[%s6771_s20 + $0xa0] sm:$0xff] }
  0x1b   : > { %498 = vmatpush.msra.mxu1 %v380_v13  ;;  %v375_v28 = vld [vmem:[%s6771_s20 + $0x30] sm:$0xff]  ;;  %v374_v31 = vld [vmem:[%s6771_s20 + $0x28] sm:$0xff]  ;;  %v373_v35 = vld [vmem:[%s6771_s20 + $0x20] sm:$0xff] }
  0x1c   : > { %607 = vmatpush.msra.mxu2 %v6140_v14  ;;  %407 = vmatpush.msra.mxu0 %v6123_v15  ;;  %v6135_v29 = vld [vmem:[%s6771_s20 + $0x130] sm:$0xff]  ;;  %v6134_v32 = vld [vmem:[%s6771_s20 + $0x128] sm:$0xff]  ;;  %v6133_v36 = vld [vmem:[%s6771_s20 + $0x120] sm:$0xff] }
  0x1d   : > { %499 = vmatpush.msra.mxu1 %v379_v16  ;;  %v6116_v37 = vld [vmem:[%s6771_s20 + $0x98] sm:$0xff]  ;;  %v6115_v44 = vld [vmem:[%s6771_s20 + $0x90] sm:$0xff]  ;;  %v6114_v47 = vld [vmem:[%s6771_s20 + $0x88] sm:$0xff] }
  0x1e   : > { %608 = vmatpush.msra.mxu2 %v6139_v17  ;;  %408 = vmatpush.msra.mxu0 %v6122_v18  ;;  %v372_v38 = vld [vmem:[%s6771_s20 + $0x18] sm:$0xff]  ;;  %v371_v45 = vld [vmem:[%s6771_s20 + $0x10] sm:$0xff]  ;;  %v370_v48 = vld [vmem:[%s6771_s20 + $0x8] sm:$0xff] }
  0x1f   : > { %500 = vmatpush.msra.mxu1 %v378_v19  ;;  %v6132_v40 = vld [vmem:[%s6771_s20 + $0x118] sm:$0xff]  ;;  %v6131_v46 = vld [vmem:[%s6771_s20 + $0x110] sm:$0xff]  ;;  %v6130_v53 = vld [vmem:[%s6771_s20 + $0x108] sm:$0xff] }
  0x20   : > { %609 = vmatpush.msra.mxu2 %v6138_v20  ;;  %409 = vmatpush.msra.mxu0 %v6121_v21  ;;  %v6113_v54 = vld [vmem:[%s6771_s20 + $0x80] sm:$0xff]  ;;  %v6176_v59 = vld [vmem:[%s6771_s20 + $0x278] sm:$0xff]  ;;  %v6175_v61 = vld [vmem:[%s6771_s20 + $0x270] sm:$0xff] }
  0x21   : > { %501 = vmatpush.msra.mxu1 %v377_v22  ;;  %v369_v55 = vld [vmem:[%s6771_s20] sm:$0xff]  ;;  %v6174_v0 = vld [vmem:[%s6771_s20 + $0x268] sm:$0xff]  ;;  %v6880_v3 = vld [vmem:[%s12114_s0 + $0x18] sm:$0xff] }
  0x22   : > { %610 = vmatpush.msra.mxu2 %v6137_v23  ;;  %410 = vmatpush.msra.mxu0 %v6120_v24  ;;  %v6129_v56 = vld [vmem:[%s6771_s20 + $0x100] sm:$0xff]  ;;  %v321_v6 = vrot.slane %v6880_v3, 1  ;;  %v6172_v10 = vld [vmem:[%s6771_s20 + $0x258] sm:$0xff]  ;;  %v268_v11 = vrot.slane %v6880_v3, 7  ;;  %v6918_v15 = vld [vmem:[%s12114_s0 + $0x28] sm:$0xff] }
  0x23   : > { %502 = vmatpush.msra.mxu1 %v376_v25  ;;  %v6173_v4 = vld [vmem:[%s6771_s20 + $0x260] sm:$0xff]  ;;  %v6171_v16 = vld [vmem:[%s6771_s20 + $0x250] sm:$0xff]  ;;  %v323_v18 = vrot.slane %v6918_v15, 1  ;;  %v270_v22 = vrot.slane %v6918_v15, 7 }
  0x24   : > { %611 = vmatpush.msra.mxu2 %v6136_v26  ;;  %411 = vmatpush.msra.mxu0 %v6119_v27  ;;  %v6894_v8 = vsel %vm343_vm1, %v320_v63, %v321_v6  ;;  %v6899_v9 = vld [vmem:[%s12114_s0 + $0x20] sm:$0xff]  ;;  %v6909_v13 = vsel %vm292_vm0, %v267_v5, %v268_v11  ;;  %v6937_v21 = vld [vmem:[%s12114_s0 + $0x30] sm:$0xff]  ;;  %v6955_v26 = vld [vmem:[%s12114_s0 + $0x38] sm:$0xff] }
  0x25   : > { %503 = vmatpush.msra.mxu1 %v375_v28  ;;  %v322_v12 = vrot.slane %v6899_v9, 1  ;;  %12381 = vst [vmem:[#allocation5_spill] sm:$0xff] %v6909_v13  ;;  %v269_v17 = vrot.slane %v6899_v9, 7  ;;  %v324_v23 = vrot.slane %v6937_v21, 1  ;;  %v6170_v27 = vld [vmem:[%s6771_s20 + $0x248] sm:$0xff]  ;;  %v271_v28 = vrot.slane %v6937_v21, 7 }
  0x26   : > { %612 = vmatpush.msra.mxu2 %v6135_v29  ;;  %412 = vmatpush.msra.mxu0 %v6118_v30  ;;  %v325_v29 = vrot.slane %v6955_v26, 1  ;;  %v272_v33 = vrot.slane %v6955_v26, 7  ;;  %v7048_v63 = vld [vmem:[%s12114_s0 + $0x60] sm:$0xff] }
  0x27   : > { %504 = vmatpush.msra.mxu1 %v374_v31  ;;  %v6913_v14 = vsel %vm343_vm1, %v321_v6, %v322_v12  ;;  %v6928_v19 = vsel %vm292_vm0, %v268_v11, %v269_v17  ;;  %v6932_v20 = vsel %vm343_vm1, %v322_v12, %v323_v18  ;;  %v6946_v24 = vsel %vm292_vm0, %v269_v17, %v270_v22  ;;  %v7067_v11 = vld [vmem:[%s12114_s0 + $0x68] sm:$0xff] }
  0x28   : > { %613 = vmatpush.msra.mxu2 %v6134_v32  ;;  %413 = vmatpush.msra.mxu0 %v6117_v34  ;;  %v6950_v25 = vsel %vm343_vm1, %v323_v18, %v324_v23  ;;  %v6965_v30 = vsel %vm292_vm0, %v270_v22, %v271_v28  ;;  %v6969_v31 = vsel %vm343_vm1, %v324_v23, %v325_v29  ;;  %v6974_v32 = vld [vmem:[%s12114_s0 + $0x40] sm:$0xff]  ;;  %v330_v5 = vrot.slane %v7048_v63, 1  ;;  %v7085_v22 = vld [vmem:[%s12114_s0 + $0x70] sm:$0xff]  ;;  %v6166_v23 = vld [vmem:[%s6771_s20 + $0x228] sm:$0xff] }
  0x29   : > { %505 = vmatpush.msra.mxu1 %v373_v35  ;;  %v326_v34 = vrot.slane %v6974_v32, 1  ;;  %v6983_v35 = vsel %vm292_vm0, %v271_v28, %v272_v33  ;;  %v277_v12 = vrot.slane %v7048_v63, 7  ;;  %v332_v28 = vrot.slane %v7085_v22, 1 }
  0x2a   : > { %614 = vmatpush.msra.mxu2 %v6133_v36  ;;  %414 = vmatpush.msra.mxu0 %v6116_v37  ;;  %v6992_v37 = vld [vmem:[%s12114_s0 + $0x48] sm:$0xff] }
  0x2b   : > { %506 = vmatpush.msra.mxu1 %v372_v38  ;;  %v6987_v36 = vsel %vm343_vm1, %v325_v29, %v326_v34  ;;  %v6169_v38 = vld [vmem:[%s6771_s20 + $0x240] sm:$0xff]  ;;  %v274_v49 = vrot.slane %v6992_v37, 7  ;;  %v6160_v29 = vld [vmem:[%s6771_s20 + $0x1f8] sm:$0xff] }
  0x2c   : > { %615 = vmatpush.msra.mxu2 %v6132_v40  ;;  %415 = vmatpush.msra.mxu0 %v6115_v44  ;;  %v273_v40 = vrot.slane %v6974_v32, 7  ;;  %v327_v44 = vrot.slane %v6992_v37, 1 }
  0x2d   : > { %507 = vmatpush.msra.mxu1 %v371_v45  ;;  %741 = vmatpush.msra.mxu3 %v6160_v29  ;;  %v6152_v29 = vld [vmem:[%s6771_s20 + $0x1b8] sm:$0xff] }
  0x2e   : > { %616 = vmatpush.msra.mxu2 %v6131_v46  ;;  %416 = vmatpush.msra.mxu0 %v6114_v47  ;;  %v7002_v45 = vsel %vm292_vm0, %v272_v33, %v273_v40  ;;  %v7006_v46 = vsel %vm343_vm1, %v326_v34, %v327_v44  ;;  %v7011_v47 = vld [vmem:[%s12114_s0 + $0x50] sm:$0xff] }
  0x2f   : > { %508 = vmatpush.msra.mxu1 %v370_v48  ;;  %v6168_v48 = vld [vmem:[%s6771_s20 + $0x238] sm:$0xff]  ;;  %v328_v52 = vrot.slane %v7011_v47, 1 }
  0x30   : > { %617 = vmatpush.msra.mxu2 %v6130_v53  ;;  %417 = vmatpush.msra.mxu0 %v6113_v54  ;;  %v7021_v53 = vsel %vm292_vm0, %v273_v40, %v274_v49  ;;  %v6159_v40 = vld [vmem:[%s6771_s20 + $0x1f0] sm:$0xff] }
  0x31   : > { %509 = vmatpush.msra.mxu1 %v369_v55  ;;  %418 = vmatmul.f32.vlgmr.msra.gmra.mxu0 %v6814_v39  ;;  %v7025_v54 = vsel %vm343_vm1, %v327_v44, %v328_v52  ;;  %v7030_v55 = vld [vmem:[%s12114_s0 + $0x58] sm:$0xff]  ;;  %v6158_v44 = vld [vmem:[%s6771_s20 + $0x1e8] sm:$0xff] }
  0x32   : > { %618 = vmatpush.msra.mxu2 %v6129_v56  ;;  %510 = vmatmul.f32.vlgmr.msra.gmra.mxu1 %v6848_v57  ;;  %v275_v56 = vrot.slane %v7011_v47, 7 }
  0x33   : > { %619 = vmatmul.f32.vlgmr.msra.gmra.mxu2 %v6854_v58  ;;  %875 = vmatpush.msrb.mxu0 %v6176_v59  ;;  %v329_v59 = vrot.slane %v7030_v55, 1 }
  0x34   : > { %742 = vmatpush.msra.mxu3 %v6159_v40 }
  0x35   : > { %876 = vmatpush.msrb.mxu0 %v6175_v61  ;;  %v7039_v61 = vsel %vm292_vm0, %v274_v49, %v275_v56  ;;  %v7043_v62 = vsel %vm343_vm1, %v328_v52, %v329_v59  ;;  %v279_v49 = vrot.slane %v7085_v22, 7 }
  0x36   : > { %743 = vmatpush.msra.mxu3 %v6158_v44 }
  0x37   : > { %877 = vmatpush.msrb.mxu0 %v6174_v0  ;;  %v6167_v0 = vld [vmem:[%s6771_s20 + $0x230] sm:$0xff] }
  0x39   : > { %421 = vmatmul.f32.gmra.mxu0 %v6827_v43 }
  0x3a   : > { %513 = vmatmul.f32.gmra.mxu1 %v6871_v1  ;;  %878 = vmatpush.msrb.mxu0 %v6173_v4  ;;  %v276_v4 = vrot.slane %v7030_v55, 7 }
  0x3b   : > { %622 = vmatmul.f32.gmra.mxu2 %v6875_v2 }
  0x3c   : > { %879 = vmatpush.msrb.mxu0 %v6172_v10  ;;  %v7058_v6 = vsel %vm292_vm0, %v275_v56, %v276_v4  ;;  %v7062_v10 = vsel %vm343_vm1, %v329_v59, %v330_v5  ;;  %v7076_v17 = vsel %vm292_vm0, %v276_v4, %v277_v12  ;;  %v6157_v56 = vld [vmem:[%s6771_s20 + $0x1e0] sm:$0xff]  ;;  %v6156_v59 = vld [vmem:[%s6771_s20 + $0x1d8] sm:$0xff] }
  0x3d   : > { %744 = vmatpush.msra.mxu3 %v6157_v56  ;;  %v6164_v56 = vld [vmem:[%s6771_s20 + $0x218] sm:$0xff] }
  0x3e   : > { %880 = vmatpush.msrb.mxu0 %v6171_v16  ;;  %v331_v16 = vrot.slane %v7067_v11, 1 }
  0x3f   : > { %745 = vmatpush.msra.mxu3 %v6156_v59  ;;  %v6151_v59 = vld [vmem:[%s6771_s20 + $0x1b0] sm:$0xff] }
  0x40   : > { %881 = vmatpush.msrb.mxu0 %v6170_v27  ;;  %v7080_v18 = vsel %vm343_vm1, %v330_v5, %v331_v16  ;;  %v278_v27 = vrot.slane %v7067_v11, 7  ;;  %v7100_v34 = vsel %vm343_vm1, %v331_v16, %v332_v28  ;;  %v7128_v5 = vld [vmem:[%s12114_s0 + $0x80] sm:$0xff]  ;;  %v6154_v16 = vld [vmem:[%s6771_s20 + $0x1c8] sm:$0xff] }
  0x41   : > { %424 = vmatmul.f32.gmra.mxu0 %v6860_v60  ;;  %12383 = vst [vmem:[#allocation7_spill] sm:$0xff] %v7128_v5 }
  0x42   : > { %516 = vmatmul.f32.gmra.mxu1 %v6890_v7  ;;  %882 = vmatpush.msrb.mxu0 %v6169_v38  ;;  %v7096_v33 = vsel %vm292_vm0, %v277_v12, %v278_v27  ;;  %v7105_v38 = vld [vmem:[%s12114_s0 + $0x78] sm:$0xff]  ;;  %v6155_v12 = vld [vmem:[%s6771_s20 + $0x1d0] sm:$0xff] }
  0x43   : > { %625 = vmatmul.f32.gmra.mxu2 %v6894_v8  ;;  %12382 = vst [vmem:[#allocation6_spill] sm:$0xff] %v7105_v38  ;;  %v333_v52 = vrot.slane %v7105_v38, 1  ;;  %746 = vmatpush.msra.mxu3 %v6155_v12  ;;  %v281_v12 = vrot.slane %v7128_v5, 7 }
  0x44   : > { %883 = vmatpush.msrb.mxu0 %v6168_v48  ;;  %v6165_v48 = vld [vmem:[%s6771_s20 + $0x220] sm:$0xff] }
  0x45   : > { %v7123_v4 = vsel %vm343_vm1, %v332_v28, %v333_v52  ;;  %747 = vmatpush.msra.mxu3 %v6154_v16  ;;  %v6153_v28 = vld [vmem:[%s6771_s20 + $0x1c0] sm:$0xff] }
  0x46   : > { %884 = vmatpush.msrb.mxu0 %v6167_v0  ;;  %v7119_v0 = vsel %vm292_vm0, %v278_v27, %v279_v49  ;;  %v334_v27 = vrot.slane %v7128_v5, 1 }
  0x47   : > { %748 = vmatpush.msra.mxu3 %v6153_v28  ;;  %v6149_v28 = vld [vmem:[%s6771_s20 + $0x1a0] sm:$0xff] }
  0x48   : > { %885 = vmatpush.msrb.mxu0 %v6166_v23  ;;  %v280_v23 = vrot.slane %v7105_v38, 7  ;;  %v7145_v44 = vsel %vm343_vm1, %v333_v52, %v334_v27  ;;  %v6192_v52 = vld [vmem:[%s6771_s20 + $0x2f8] sm:$0xff] }
  0x49   : > { %427 = vmatmul.f32.gmra.mxu0 %v6880_v3  ;;  %12384 = vst [vmem:[#allocation8_spill] sm:$0xff] %v7145_v44  ;;  %749 = vmatpush.msra.mxu3 %v6152_v29 }
  0x4a   : > { %519 = vmatmul.f32.gmra.mxu1 %v6909_v13  ;;  %886 = vmatpush.msrb.mxu0 %v6165_v48  ;;  %v7141_v40 = vsel %vm292_vm0, %v279_v49, %v280_v23  ;;  %v7150_v48 = vld [vmem:[%s12114_s0 + $0x88] sm:$0xff]  ;;  %v7169_v50 = vsel %vm292_vm0, %v280_v23, %v281_v12 }
  0x4b   : > { %628 = vmatmul.f32.gmra.mxu2 %v6913_v14  ;;  %12385 = vst [vmem:[#allocation9_spill] sm:$0xff] %v7150_v48  ;;  %750 = vmatpush.msra.mxu3 %v6151_v59  ;;  %v6150_v49 = vld [vmem:[%s6771_s20 + $0x1a8] sm:$0xff]  ;;  %v335_v16 = vrot.slane %v7150_v48, 1  ;;  %v6148_v59 = vld [vmem:[%s6771_s20 + $0x198] sm:$0xff] }
  0x4c   : > { %887 = vmatpush.msrb.mxu0 %v6164_v56  ;;  %1009 = vmatpush.msrb.mxu1 %v6192_v52  ;;  %v7178_v56 = vld [vmem:[%s12114_s0 + $0x90] sm:$0xff]  ;;  %v6146_v23 = vld [vmem:[%s6771_s20 + $0x188] sm:$0xff] }
  0x4d   : > { %751 = vmatpush.msra.mxu3 %v6150_v49  ;;  %12389 = vst [vmem:[#allocation13_spill] sm:$0xff] %v7178_v56  ;;  %v6147_v49 = vld [vmem:[%s6771_s20 + $0x190] sm:$0xff]  ;;  %v336_v52 = vrot.slane %v7178_v56, 1 }
  0x4f   : > { %752 = vmatpush.msra.mxu3 %v6149_v28  ;;  %v6145_v28 = vld [vmem:[%s6771_s20 + $0x180] sm:$0xff] }
  0x51   : > { %430 = vmatmul.f32.gmra.mxu0 %v6899_v9  ;;  %753 = vmatpush.msra.mxu3 %v6148_v59 }
  0x52   : > { %522 = vmatmul.f32.gmra.mxu1 %v6928_v19 }
  0x53   : > { %631 = vmatmul.f32.gmra.mxu2 %v6932_v20  ;;  %754 = vmatpush.msra.mxu3 %v6147_v49 }
  0x55   : > { %755 = vmatpush.msra.mxu3 %v6146_v23  ;;  %v7206_v23 = vld [vmem:[%s12114_s0 + $0x98] sm:$0xff] }
  0x56   : > { %12394 = vst [vmem:[#allocation18_spill] sm:$0xff] %v7206_v23 }
  0x57   : > { %756 = vmatpush.msra.mxu3 %v6145_v28  ;;  %v6163_v28 = vld [vmem:[%s6771_s20 + $0x210] sm:$0xff] }
  0x58   : > { %757 = vmatmul.f32.vlgmr.msra.gmra.mxu3 %v6848_v57  ;;  %888 = vmatpush.msrb.mxu0 %v6163_v28  ;;  %v7233_v28 = vld [vmem:[%s12114_s0 + $0xa0] sm:$0xff] }
  0x59   : > { %433 = vmatmul.f32.gmra.mxu0 %v6918_v15  ;;  %12399 = vst [vmem:[#allocation23_spill] sm:$0xff] %v7233_v28 }
  0x5a   : > { %525 = vmatmul.f32.gmra.mxu1 %v6946_v24 }
  0x5b   : > { %634 = vmatmul.f32.gmra.mxu2 %v6950_v25 }
  0x60   : > { %760 = vmatmul.f32.gmra.mxu3 %v6871_v1  ;;  %v6188_v1 = vld [vmem:[%s6771_s20 + $0x2d8] sm:$0xff] }
  0x61   : > { %436 = vmatmul.f32.gmra.mxu0 %v6937_v21 }
  0x62   : > { %528 = vmatmul.f32.gmra.mxu1 %v6965_v30 }
  0x63   : > { %637 = vmatmul.f32.gmra.mxu2 %v6969_v31 }
  0x68   : > { %763 = vmatmul.f32.gmra.mxu3 %v6890_v7 }
  0x69   : > { %439 = vmatmul.f32.gmra.mxu0 %v6955_v26 }
  0x6a   : > { %531 = vmatmul.f32.gmra.mxu1 %v6983_v35 }
  0x6b   : > { %640 = vmatmul.f32.gmra.mxu2 %v6987_v36 }
  0x70   : > { %766 = vmatmul.f32.gmra.mxu3 %v6909_v13 }
  0x71   : > { %442 = vmatmul.f32.gmra.mxu0 %v6974_v32 }
  0x72   : > { %534 = vmatmul.f32.gmra.mxu1 %v7002_v45 }
  0x73   : > { %643 = vmatmul.f32.gmra.mxu2 %v7006_v46 }
  0x78   : > { %769 = vmatmul.f32.gmra.mxu3 %v6928_v19 }
  0x79   : > { %445 = vmatmul.f32.gmra.mxu0 %v6992_v37 }
  0x7a   : > { %537 = vmatmul.f32.gmra.mxu1 %v7021_v53 }
  0x7b   : > { %646 = vmatmul.f32.gmra.mxu2 %v7025_v54 }
  0x80   : > { %772 = vmatmul.f32.gmra.mxu3 %v6946_v24 }
  0x81   : > { %448 = vmatmul.f32.gmra.mxu0 %v7011_v47 }
  0x82   : > { %540 = vmatmul.f32.gmra.mxu1 %v7039_v61 }
  0x83   : > { %649 = vmatmul.f32.gmra.mxu2 %v7043_v62 }
  0x88   : > { %775 = vmatmul.f32.gmra.mxu3 %v6965_v30 }
  0x89   : > { %451 = vmatmul.f32.gmra.mxu0 %v7030_v55 }
  0x8a   : > { %543 = vmatmul.f32.gmra.mxu1 %v7058_v6 }
  0x8b   : > { %652 = vmatmul.f32.gmra.mxu2 %v7062_v10 }
  0x90   : > { %778 = vmatmul.f32.gmra.mxu3 %v6983_v35 }
  0x91   : > { %454 = vmatmul.f32.gmra.mxu0 %v7048_v63 }
  0x92   : > { %546 = vmatmul.f32.gmra.mxu1 %v7076_v17 }
  0x93   : > { %655 = vmatmul.f32.gmra.mxu2 %v7080_v18 }
  0x98   : > { %781 = vmatmul.f32.gmra.mxu3 %v7002_v45 }
  0x99   : > { %457 = vmatmul.f32.gmra.mxu0 %v7067_v11 }
  0x9a   : > { %549 = vmatmul.f32.gmra.mxu1 %v7096_v33 }
  0x9b   : > { %658 = vmatmul.f32.gmra.mxu2 %v7100_v34 }
  0xa0   : > { %784 = vmatmul.f32.gmra.mxu3 %v7021_v53 }
  0xa1   : > { %460 = vmatmul.f32.gmra.mxu0 %v7085_v22 }
  0xa2   : > { %552 = vmatmul.f32.gmra.mxu1 %v7119_v0 }
  0xa3   : > { %661 = vmatmul.f32.gmra.mxu2 %v7123_v4 }
  0xa8   : > { %787 = vmatmul.f32.gmra.mxu3 %v7039_v61 }
  0xa9   : > { %463 = vmatmul.f32.gmra.mxu0 %v7105_v38 }
  0xaa   : > { %555 = vmatmul.f32.gmra.mxu1 %v7141_v40 }
  0xab   : > { %664 = vmatmul.f32.gmra.mxu2 %v7145_v44  ;;  %v7173_v44 = vsel %vm343_vm1, %v334_v27, %v335_v16  ;;  %v282_v27 = vrot.slane %v7150_v48, 7 }
  0xac   : > { %12388 = vst [vmem:[#allocation12_spill] sm:$0xff] %v7173_v44 }
  0xae   : > { %v7162_v29 = vpop.f32.mrf.mxu0 }
  0xaf   : > { %12386 = vst [vmem:[#allocation10_spill] sm:$0xff] %v7162_v29  ;;  %v7165_v51 = vpop.f32.mrf.mxu1  ;;  %v7197_v29 = vsel %vm292_vm0, %v281_v12, %v282_v27  ;;  %v283_v12 = vrot.slane %v7178_v56, 7 }
  0xb0   : > { %12387 = vst [vmem:[#allocation11_spill] sm:$0xff] %v7165_v51  ;;  %790 = vmatmul.f32.gmra.mxu3 %v7058_v6 }
  0xb1   : > { %466 = vmatmul.f32.gmra.mxu0 %v7128_v5 }
  0xb2   : > { %558 = vmatmul.f32.gmra.mxu1 %v7169_v50 }
  0xb3   : > { %667 = vmatmul.f32.gmra.mxu2 %v7173_v44  ;;  %v7201_v44 = vsel %vm343_vm1, %v335_v16, %v336_v52  ;;  %v337_v16 = vrot.slane %v7206_v23, 1 }
  0xb4   : > { %12393 = vst [vmem:[#allocation17_spill] sm:$0xff] %v7201_v44 }
  0xb6   : > { %v7188_v59 = vpop.f32.mrf.mxu2  ;;  %v7190_v51 = vpop.f32.mrf.mxu0 }
  0xb7   : > { %12390 = vst [vmem:[#allocation14_spill] sm:$0xff] %v7188_v59  ;;  %v7193_v49 = vpop.f32.mrf.mxu1 }
  0xb8   : > { %12391 = vst [vmem:[#allocation15_spill] sm:$0xff] %v7190_v51  ;;  %v6191_v51 = vld [vmem:[%s6771_s20 + $0x2f0] sm:$0xff]  ;;  %793 = vmatmul.f32.gmra.mxu3 %v7076_v17 }
  0xb9   : > { %12392 = vst [vmem:[#allocation16_spill] sm:$0xff] %v7193_v49  ;;  %469 = vmatmul.f32.gmra.mxu0 %v7150_v48  ;;  %1010 = vmatpush.msrb.mxu1 %v6191_v51  ;;  %v7224_v51 = vsel %vm292_vm0, %v282_v27, %v283_v12  ;;  %v6189_v27 = vld [vmem:[%s6771_s20 + $0x2e0] sm:$0xff] }
  0xba   : > { %561 = vmatmul.f32.gmra.mxu1 %v7197_v29 }
  0xbb   : > { %670 = vmatmul.f32.gmra.mxu2 %v7201_v44  ;;  %v7228_v44 = vsel %vm343_vm1, %v336_v52, %v337_v16  ;;  %v284_v52 = vrot.slane %v7206_v23, 7 }
  0xbc   : > { %12398 = vst [vmem:[#allocation22_spill] sm:$0xff] %v7228_v44 }
  0xbe   : > { %v7215_v49 = vpop.f32.mrf.mxu2  ;;  %v7217_v57 = vpop.f32.mrf.mxu0 }
  0xbf   : > { %12395 = vst [vmem:[#allocation19_spill] sm:$0xff] %v7215_v49  ;;  %v7220_v59 = vpop.f32.mrf.mxu1  ;;  %v6162_v49 = vld [vmem:[%s6771_s20 + $0x208] sm:$0xff] }
  0xc0   : > { %12396 = vst [vmem:[#allocation20_spill] sm:$0xff] %v7217_v57  ;;  %v6190_v57 = vld [vmem:[%s6771_s20 + $0x2e8] sm:$0xff]  ;;  %889 = vmatpush.msrb.mxu0 %v6162_v49  ;;  %796 = vmatmul.f32.gmra.mxu3 %v7096_v33 }
  0xc1   : > { %12397 = vst [vmem:[#allocation21_spill] sm:$0xff] %v7220_v59  ;;  %472 = vmatmul.f32.gmra.mxu0 %v7178_v56  ;;  %1011 = vmatpush.msrb.mxu1 %v6190_v57  ;;  %v338_v59 = vrot.slane %v7233_v28, 1  ;;  %v6187_v57 = vld [vmem:[%s6771_s20 + $0x2d0] sm:$0xff]  ;;  %v7254_v56 = vsel %vm292_vm0, %v283_v12, %v284_v52  ;;  %v6185_v12 = vld [vmem:[%s6771_s20 + $0x2c0] sm:$0xff] }
  0xc2   : > { %564 = vmatmul.f32.gmra.mxu1 %v7224_v51 }
  0xc3   : > { %673 = vmatmul.f32.gmra.mxu2 %v7228_v44  ;;  %1012 = vmatpush.msrb.mxu1 %v6189_v27  ;;  %v7258_v49 = vsel %vm343_vm1, %v337_v16, %v338_v59  ;;  %v6186_v27 = vld [vmem:[%s6771_s20 + $0x2c8] sm:$0xff]  ;;  %v285_v16 = vrot.slane %v7233_v28, 7 }
  0xc4   : > { %12403 = vst [vmem:[#allocation27_spill] sm:$0xff] %v7258_v49 }
  0xc5   : > { %1013 = vmatpush.msrb.mxu1 %v6188_v1  ;;  %v7263_v1 = vld [vmem:[%s12114_s0 + $0xa8] sm:$0xff] }
  0xc6   : > { %v7244_v48 = vpop.f32.mrf.mxu2  ;;  %v7246_v5 = vpop.f32.mrf.mxu0  ;;  %12404 = vst [vmem:[#allocation28_spill] sm:$0xff] %v7263_v1 }
  0xc7   : > { %12400 = vst [vmem:[#allocation24_spill] sm:$0xff] %v7244_v48  ;;  %v7250_v44 = vpop.f32.mrf.mxu1  ;;  %1014 = vmatpush.msrb.mxu1 %v6187_v57  ;;  %v339_v57 = vrot.slane %v7263_v1, 1 }
  0xc8   : > { %12401 = vst [vmem:[#allocation25_spill] sm:$0xff] %v7246_v5  ;;  %799 = vmatmul.f32.gmra.mxu3 %v7119_v0 }
  0xc9   : > { %12402 = vst [vmem:[#allocation26_spill] sm:$0xff] %v7250_v44  ;;  %475 = vmatmul.f32.gmra.mxu0 %v7206_v23  ;;  %1015 = vmatpush.msrb.mxu1 %v6186_v27  ;;  %v6184_v44 = vld [vmem:[%s6771_s20 + $0x2b8] sm:$0xff]  ;;  %v6183_v27 = vld [vmem:[%s6771_s20 + $0x2b0] sm:$0xff]  ;;  %v7283_v23 = vsel %vm292_vm0, %v284_v52, %v285_v16 }
  0xca   : > { %567 = vmatmul.f32.gmra.mxu1 %v7254_v56  ;;  %v6224_v52 = vld [vmem:[%s6771_s20 + $0x3f8] sm:$0xff] }
  0xcb   : > { %676 = vmatmul.f32.gmra.mxu2 %v7258_v49  ;;  %1016 = vmatpush.msrb.mxu1 %v6185_v12  ;;  %v7287_v12 = vsel %vm343_vm1, %v338_v59, %v339_v57  ;;  %v6208_v59 = vld [vmem:[%s6771_s20 + $0x378] sm:$0xff] }
  0xcc   : > { %12408 = vst [vmem:[#allocation32_spill] sm:$0xff] %v7287_v12  ;;  %1160 = vmatpush.msrb.mxu2 %v6224_v52  ;;  %1252 = vmatpush.msrb.mxu3 %v6208_v59  ;;  %v6178_v59 = vld [vmem:[%s6771_s20 + $0x288] sm:$0xff] }
  0xcd   : > { %1017 = vmatpush.msrb.mxu1 %v6184_v44  ;;  %v7292_v44 = vld [vmem:[%s12114_s0 + $0xb0] sm:$0xff] }
  0xce   : > { %v7273_v5 = vpop.f32.mrf.mxu2  ;;  %v7275_v48 = vpop.f32.mrf.mxu0  ;;  %v340_v13 = vrot.slane %v7292_v44, 1 }
  0xcf   : > { %12405 = vst [vmem:[#allocation29_spill] sm:$0xff] %v7273_v5  ;;  %v7279_v49 = vpop.f32.mrf.mxu1  ;;  %1018 = vmatpush.msrb.mxu1 %v6183_v27  ;;  %v6182_v5 = vld [vmem:[%s6771_s20 + $0x2a8] sm:$0xff]  ;;  %v286_v27 = vrot.slane %v7263_v1, 7 }
  0xd0   : > { %12406 = vst [vmem:[#allocation30_spill] sm:$0xff] %v7275_v48  ;;  %v6161_v48 = vld [vmem:[%s6771_s20 + $0x200] sm:$0xff]  ;;  %v7319_v52 = vsel %vm343_vm1, %v339_v57, %v340_v13  ;;  %802 = vmatmul.f32.gmra.mxu3 %v7141_v40 }
  0xd1   : > { %12407 = vst [vmem:[#allocation31_spill] sm:$0xff] %v7279_v49  ;;  %478 = vmatmul.f32.gmra.mxu0 %v7233_v28  ;;  %1019 = vmatpush.msrb.mxu1 %v6182_v5  ;;  %v6181_v49 = vld [vmem:[%s6771_s20 + $0x2a0] sm:$0xff]  ;;  %v6180_v5 = vld [vmem:[%s6771_s20 + $0x298] sm:$0xff] }
  0xd2   : > { %570 = vmatmul.f32.gmra.mxu1 %v7283_v23  ;;  %890 = vmatpush.msrb.mxu0 %v6161_v48  ;;  %v7315_v48 = vsel %vm292_vm0, %v285_v16, %v286_v27  ;;  %12412 = vst [vmem:[#allocation36_spill] sm:$0xff] %v7319_v52  ;;  %v287_v16 = vrot.slane %v7292_v44, 7 }
  0xd3   : > { %679 = vmatmul.f32.gmra.mxu2 %v7287_v12  ;;  %1020 = vmatpush.msrb.mxu1 %v6181_v49  ;;  %v6179_v12 = vld [vmem:[%s6771_s20 + $0x290] sm:$0xff]  ;;  %v7324_v49 = vld [vmem:[%s12114_s0 + $0xb8] sm:$0xff] }
  0xd4   : > { %12413 = vst [vmem:[#allocation37_spill] sm:$0xff] %v7324_v49  ;;  %v341_v57 = vrot.slane %v7324_v49, 1 }
  0xd5   : > { %1021 = vmatpush.msrb.mxu1 %v6180_v5  ;;  %v6240_v5 = vld [vmem:[%s6771_s20 + $0x478] sm:$0xff] }
  0xd6   : > { %v7305_v28 = vpop.f32.mrf.mxu2  ;;  %v7307_v7 = vpop.f32.mrf.mxu0  ;;  %1361 = vmatpush.msra.mxu0 %v6240_v5  ;;  %v6207_v5 = vld [vmem:[%s6771_s20 + $0x370] sm:$0xff] }
  0xd7   : > { %12409 = vst [vmem:[#allocation33_spill] sm:$0xff] %v7305_v28  ;;  %v7311_v38 = vpop.f32.mrf.mxu1  ;;  %1022 = vmatpush.msrb.mxu1 %v6179_v12  ;;  %1253 = vmatpush.msrb.mxu3 %v6207_v5  ;;  %v6222_v5 = vld [vmem:[%s6771_s20 + $0x3e8] sm:$0xff] }
  0xd8   : > { %12410 = vst [vmem:[#allocation34_spill] sm:$0xff] %v7307_v7  ;;  %805 = vmatmul.f32.gmra.mxu3 %v7169_v50 }
  0xd9   : > { %12411 = vst [vmem:[#allocation35_spill] sm:$0xff] %v7311_v38  ;;  %481 = vmatmul.f32.gmra.mxu0 %v7263_v1  ;;  %v6177_v38 = vld [vmem:[%s6771_s20 + $0x280] sm:$0xff]  ;;  %1023 = vmatpush.msrb.mxu1 %v6178_v59  ;;  %v7349_v1 = vsel %vm292_vm0, %v286_v27, %v287_v16  ;;  %v6223_v59 = vld [vmem:[%s6771_s20 + $0x3f0] sm:$0xff]  ;;  %v342_v27 = vrot.slane %v6820_v41, 1 }
  0xda   : > { %573 = vmatmul.f32.gmra.mxu1 %v7315_v48  ;;  %1161 = vmatpush.msrb.mxu2 %v6223_v59 }
  0xdb   : > { %682 = vmatmul.f32.gmra.mxu2 %v7319_v52  ;;  %1024 = vmatpush.msrb.mxu1 %v6177_v38  ;;  %v7353_v52 = vsel %vm343_vm1, %v340_v13, %v341_v57  ;;  %v288_v38 = vrot.slane %v7324_v49, 7 }
  0xdc   : > { %12417 = vst [vmem:[#allocation41_spill] sm:$0xff] %v7353_v52  ;;  %1162 = vmatpush.msrb.mxu2 %v6222_v5  ;;  %v6238_v5 = vld [vmem:[%s6771_s20 + $0x468] sm:$0xff] }
  0xdd   : > { %v7371_v59 = vsel %vm292_vm0, %v287_v16, %v288_v38 }
  0xde   : > { %v7340_v12 = vpop.f32.mrf.mxu2  ;;  %v7342_v7 = vpop.f32.mrf.mxu0  ;;  %12421 = vst [vmem:[#allocation45_spill] sm:$0xff] %v7371_v59 }
  0xdf   : > { %12414 = vst [vmem:[#allocation38_spill] sm:$0xff] %v7340_v12  ;;  %v7345_v28 = vpop.f32.mrf.mxu1  ;;  %v7375_v12 = vsel %vm343_vm1, %v341_v57, %v342_v27 }
  0xe0   : > { %12415 = vst [vmem:[#allocation39_spill] sm:$0xff] %v7342_v7  ;;  %808 = vmatmul.f32.gmra.mxu3 %v7197_v29 }
  0xe1   : > { %12416 = vst [vmem:[#allocation40_spill] sm:$0xff] %v7345_v28  ;;  %484 = vmatmul.f32.gmra.mxu0 %v7292_v44 }
  0xe2   : > { %576 = vmatmul.f32.gmra.mxu1 %v7349_v1 }
  0xe3   : > { %685 = vmatmul.f32.gmra.mxu2 %v7353_v52  ;;  %v6239_v52 = vld [vmem:[%s6771_s20 + $0x470] sm:$0xff] }
  0xe4   : > { %1362 = vmatpush.msra.mxu0 %v6239_v52  ;;  %v12427_v52 = vrot.slane %v6814_v39, 1 }
  0xe6   : > { %v7362_v28 = vpop.f32.mrf.mxu2  ;;  %v7364_v13 = vpop.f32.mrf.mxu0  ;;  %1363 = vmatpush.msra.mxu0 %v6238_v5 }
  0xe7   : > { %12418 = vst [vmem:[#allocation42_spill] sm:$0xff] %v7362_v28  ;;  %v7367_v7 = vpop.f32.mrf.mxu1  ;;  %v6206_v28 = vld [vmem:[%s6771_s20 + $0x368] sm:$0xff] }
  0xe8   : > { %12419 = vst [vmem:[#allocation43_spill] sm:$0xff] %v7364_v13  ;;  %1254 = vmatpush.msrb.mxu3 %v6206_v28  ;;  %v12425_v13 = vrot.slane %v6820_v41, 7  ;;  %v7400_v28 = vsel %vm343_vm1, %v342_v27, %v12427_v52  ;;  %v6221_v27 = vld [vmem:[%s6771_s20 + $0x3e0] sm:$0xff] }
  0xe9   : > { %12420 = vst [vmem:[#allocation44_spill] sm:$0xff] %v7367_v7  ;;  %487 = vmatmul.f32.gmra.mxu0 %v7324_v49  ;;  %1163 = vmatpush.msrb.mxu2 %v6221_v27  ;;  %v6204_v27 = vld [vmem:[%s6771_s20 + $0x358] sm:$0xff] }
  0xea   : > { %579 = vmatmul.f32.gmra.mxu1 %v7371_v59  ;;  %v7394_v49 = vsel %vm292_vm0, %v288_v38, %v12425_v13  ;;  %v6205_v13 = vld [vmem:[%s6771_s20 + $0x360] sm:$0xff]  ;;  %811 = vmatmul.f32.gmra.mxu3 %v7224_v51 }
  0xeb   : > { %688 = vmatmul.f32.gmra.mxu2 %v7375_v12  ;;  %12426 = vst [vmem:[#allocation49_spill] sm:$0xff] %v7394_v49  ;;  %1255 = vmatpush.msrb.mxu3 %v6205_v13 }
  0xed   : > { %1256 = vmatpush.msrb.mxu3 %v6204_v27  ;;  %v6219_v27 = vld [vmem:[%s6771_s20 + $0x3d0] sm:$0xff] }
  0xee   : > { %v7383_v16 = vpop.f32.mrf.mxu2  ;;  %v7385_v7 = vpop.f32.mrf.mxu0 }
  0xef   : > { %12422 = vst [vmem:[#allocation46_spill] sm:$0xff] %v7383_v16  ;;  %v7388_v57 = vpop.f32.mrf.mxu1  ;;  %v6210_v16 = vld [vmem:[%s6771_s20 + $0x388] sm:$0xff] }
  0xf0   : > { %12423 = vst [vmem:[#allocation47_spill] sm:$0xff] %v7385_v7 }
  0xf1   : > { %12424 = vst [vmem:[#allocation48_spill] sm:$0xff] %v7388_v57  ;;  %490 = vmatmul.f32.gmra.mxu0 %v6820_v41 }
  0xf2   : > { %582 = vmatmul.f32.gmra.mxu1 %v7394_v49  ;;  %814 = vmatmul.f32.gmra.mxu3 %v7254_v56 }
  0xf3   : > { %691 = vmatmul.f32.gmra.mxu2 %v7400_v28 }
  0xf6   : > { %v7406_v57 = vpop.f32.mrf.mxu2  ;;  %v7408_v7 = vpop.f32.mrf.mxu0 }
  0xf7   : > { %12428 = vst [vmem:[#allocation50_spill] sm:$0xff] %v7406_v57  ;;  %v7411_v38 = vpop.f32.mrf.mxu1  ;;  %v12473_v57 = vld [vmem:[#allocation6_spill] sm:$0xff] }
  0xf8   : > { %12429 = vst [vmem:[#allocation51_spill] sm:$0xff] %v7408_v7  ;;  %v6237_v7 = vld [vmem:[%s6771_s20 + $0x460] sm:$0xff] }
  0xf9   : > { %12430 = vst [vmem:[#allocation52_spill] sm:$0xff] %v7411_v38  ;;  %891 = vmatmul.f32.vlgmr.msrb.gmra.mxu0 %v6814_v39  ;;  %v6220_v39 = vld [vmem:[%s6771_s20 + $0x3d8] sm:$0xff] }
  0xfa   : > { %1025 = vmatmul.f32.vlgmr.msrb.gmra.mxu1 %v6854_v58  ;;  %1364 = vmatpush.msra.mxu0 %v6237_v7  ;;  %v6228_v38 = vld [vmem:[%s6771_s20 + $0x418] sm:$0xff] }
  0xfb   : > { %1164 = vmatpush.msrb.mxu2 %v6220_v39  ;;  %817 = vmatmul.f32.gmra.mxu3 %v7283_v23 }
  0xfd   : > { %1165 = vmatpush.msrb.mxu2 %v6219_v27 }
  0xfe   : > { %v7417_v41 = vpop.f32.mrf.mxu2  ;;  %v7419_v52 = vpop.f32.mrf.mxu0 }
  0xff   : > { %12431 = vst [vmem:[#allocation53_spill] sm:$0xff] %v7417_v41  ;;  %v7422_v5 = vpop.f32.mrf.mxu1 }
 0x100   : > { %12432 = vst [vmem:[#allocation54_spill] sm:$0xff] %v7419_v52 }
 0x101   : > { %12433 = vst [vmem:[#allocation55_spill] sm:$0xff] %v7422_v5  ;;  %894 = vmatmul.f32.gmra.mxu0 %v6827_v43  ;;  %v6236_v43 = vld [vmem:[%s6771_s20 + $0x458] sm:$0xff] }
 0x102   : > { %1028 = vmatmul.f32.gmra.mxu1 %v6875_v2  ;;  %1365 = vmatpush.msra.mxu0 %v6236_v43 }
 0x103   : > { %820 = vmatmul.f32.gmra.mxu3 %v7315_v48 }
 0x106   : > { %v7429_v13 = vpop.f32.mrf.mxu2  ;;  %v7431_v52 = vpop.f32.mrf.mxu0 }
 0x107   : > { %12434 = vst [vmem:[#allocation56_spill] sm:$0xff] %v7429_v13  ;;  %v7434_v41 = vpop.f32.mrf.mxu1 }
 0x108   : > { %12435 = vst [vmem:[#allocation57_spill] sm:$0xff] %v7431_v52  ;;  %v6203_v52 = vld [vmem:[%s6771_s20 + $0x350] sm:$0xff] }
 0x109   : > { %12436 = vst [vmem:[#allocation58_spill] sm:$0xff] %v7434_v41  ;;  %897 = vmatmul.f32.gmra.mxu0 %v6860_v60  ;;  %1257 = vmatpush.msrb.mxu3 %v6203_v52 }
 0x10a   : > { %1031 = vmatmul.f32.gmra.mxu1 %v6894_v8 }
 0x10b   : > { %823 = vmatmul.f32.gmra.mxu3 %v7349_v1 }
 0x10e   : > { %v7439_v7 = vpop.f32.mrf.mxu2  ;;  %v7441_v5 = vpop.f32.mrf.mxu0 }
 0x10f   : > { %12437 = vst [vmem:[#allocation59_spill] sm:$0xff] %v7439_v7  ;;  %v7444_v39 = vpop.f32.mrf.mxu1  ;;  %v6235_v7 = vld [vmem:[%s6771_s20 + $0x450] sm:$0xff] }
 0x110   : > { %12438 = vst [vmem:[#allocation60_spill] sm:$0xff] %v7441_v5  ;;  %1366 = vmatpush.msra.mxu0 %v6235_v7 }
 0x111   : > { %12439 = vst [vmem:[#allocation61_spill] sm:$0xff] %v7444_v39  ;;  %900 = vmatmul.f32.gmra.mxu0 %v6880_v3  ;;  %v6196_v39 = vld [vmem:[%s6771_s20 + $0x318] sm:$0xff] }
 0x112   : > { %1034 = vmatmul.f32.gmra.mxu1 %v6913_v14 }
 0x113   : > { %826 = vmatmul.f32.gmra.mxu3 %v7371_v59 }
 0x116   : > { %v7450_v60 = vpop.f32.mrf.mxu2  ;;  %v7452_v43 = vpop.f32.mrf.mxu0 }
 0x117   : > { %12440 = vst [vmem:[#allocation62_spill] sm:$0xff] %v7450_v60  ;;  %v7455_v5 = vpop.f32.mrf.mxu1  ;;  %v6202_v60 = vld [vmem:[%s6771_s20 + $0x348] sm:$0xff] }
 0x118   : > { %12441 = vst [vmem:[#allocation63_spill] sm:$0xff] %v7452_v43  ;;  %v6218_v43 = vld [vmem:[%s6771_s20 + $0x3c8] sm:$0xff]  ;;  %1258 = vmatpush.msrb.mxu3 %v6202_v60 }
 0x119   : > { %12442 = vst [vmem:[#allocation64_spill] sm:$0xff] %v7455_v5  ;;  %903 = vmatmul.f32.gmra.mxu0 %v6899_v9  ;;  %1166 = vmatpush.msrb.mxu2 %v6218_v43  ;;  %v6201_v5 = vld [vmem:[%s6771_s20 + $0x340] sm:$0xff] }
 0x11a   : > { %1037 = vmatmul.f32.gmra.mxu1 %v6932_v20  ;;  %1259 = vmatpush.msrb.mxu3 %v6201_v5 }
 0x11e   : > { %v7460_v3 = vpop.f32.mrf.mxu2  ;;  %v7462_v27 = vpop.f32.mrf.mxu0 }
 0x11f   : > { %12443 = vst [vmem:[#allocation65_spill] sm:$0xff] %v7460_v3  ;;  %v7465_v52 = vpop.f32.mrf.mxu1  ;;  %v6234_v3 = vld [vmem:[%s6771_s20 + $0x448] sm:$0xff] }
 0x120   : > { %12444 = vst [vmem:[#allocation66_spill] sm:$0xff] %v7462_v27  ;;  %1367 = vmatpush.msra.mxu0 %v6234_v3 }
 0x121   : > { %12445 = vst [vmem:[#allocation67_spill] sm:$0xff] %v7465_v52  ;;  %906 = vmatmul.f32.gmra.mxu0 %v6918_v15  ;;  %v6217_v52 = vld [vmem:[%s6771_s20 + $0x3c0] sm:$0xff] }
 0x122   : > { %1040 = vmatmul.f32.gmra.mxu1 %v6950_v25  ;;  %1167 = vmatpush.msrb.mxu2 %v6217_v52  ;;  %v6216_v52 = vld [vmem:[%s6771_s20 + $0x3b8] sm:$0xff] }
 0x124   : > { %1168 = vmatpush.msrb.mxu2 %v6216_v52  ;;  %v6199_v52 = vld [vmem:[%s6771_s20 + $0x330] sm:$0xff] }
 0x126   : > { %v7471_v9 = vpop.f32.mrf.mxu2  ;;  %v7473_v7 = vpop.f32.mrf.mxu0 }
 0x127   : > { %12446 = vst [vmem:[#allocation68_spill] sm:$0xff] %v7471_v9  ;;  %v7476_v27 = vpop.f32.mrf.mxu1  ;;  %v6212_v9 = vld [vmem:[%s6771_s20 + $0x398] sm:$0xff] }
 0x128   : > { %12447 = vst [vmem:[#allocation69_spill] sm:$0xff] %v7473_v7 }
 0x129   : > { %12448 = vst [vmem:[#allocation70_spill] sm:$0xff] %v7476_v27  ;;  %909 = vmatmul.f32.gmra.mxu0 %v6937_v21  ;;  %v6233_v21 = vld [vmem:[%s6771_s20 + $0x440] sm:$0xff] }
 0x12a   : > { %1043 = vmatmul.f32.gmra.mxu1 %v6969_v31  ;;  %1368 = vmatpush.msra.mxu0 %v6233_v21 }
 0x12e   : > { %v7483_v15 = vpop.f32.mrf.mxu2  ;;  %v7485_v60 = vpop.f32.mrf.mxu0 }
 0x12f   : > { %12449 = vst [vmem:[#allocation71_spill] sm:$0xff] %v7483_v15  ;;  %v7488_v43 = vpop.f32.mrf.mxu1 }
 0x130   : > { %12450 = vst [vmem:[#allocation72_spill] sm:$0xff] %v7485_v60  ;;  %v6200_v60 = vld [vmem:[%s6771_s20 + $0x338] sm:$0xff] }
 0x131   : > { %12451 = vst [vmem:[#allocation73_spill] sm:$0xff] %v7488_v43  ;;  %912 = vmatmul.f32.gmra.mxu0 %v6955_v26  ;;  %v7503_v26 = vpop.f32.mrf.mxu3  ;;  %1260 = vmatpush.msrb.mxu3 %v6200_v60 }
 0x132   : > { %1046 = vmatmul.f32.gmra.mxu1 %v6987_v36  ;;  %12455 = vst [vmem:[#allocation77_spill] sm:$0xff] %v7503_v26  ;;  %829 = vmatmul.f32.gmra.mxu3 %v7394_v49 }
 0x133   : > { %1261 = vmatpush.msrb.mxu3 %v6199_v52 }
 0x136   : > { %v7493_v27 = vpop.f32.mrf.mxu2  ;;  %v7495_v3 = vpop.f32.mrf.mxu0 }
 0x137   : > { %12452 = vst [vmem:[#allocation74_spill] sm:$0xff] %v7493_v27  ;;  %v7498_v5 = vpop.f32.mrf.mxu1 }
 0x138   : > { %12453 = vst [vmem:[#allocation75_spill] sm:$0xff] %v7495_v3 }
 0x139   : > { %12454 = vst [vmem:[#allocation76_spill] sm:$0xff] %v7498_v5  ;;  %915 = vmatmul.f32.gmra.mxu0 %v6974_v32  ;;  %v6232_v5 = vld [vmem:[%s6771_s20 + $0x438] sm:$0xff]  ;;  %v7515_v43 = vpop.f32.mrf.mxu3  ;;  %v6215_v32 = vld [vmem:[%s6771_s20 + $0x3b0] sm:$0xff] }
 0x13a   : > { %1049 = vmatmul.f32.gmra.mxu1 %v7006_v46  ;;  %1369 = vmatpush.msra.mxu0 %v6232_v5 }
 0x13b   : > { %1169 = vmatpush.msrb.mxu2 %v6215_v32 }
 0x13e   : > { %v7506_v21 = vpop.f32.mrf.mxu2  ;;  %v7508_v27 = vpop.f32.mrf.mxu0 }
 0x13f   : > { %12456 = vst [vmem:[#allocation78_spill] sm:$0xff] %v7506_v21  ;;  %v7511_v3 = vpop.f32.mrf.mxu1  ;;  %v6231_v21 = vld [vmem:[%s6771_s20 + $0x430] sm:$0xff] }
 0x140   : > { %12457 = vst [vmem:[#allocation79_spill] sm:$0xff] %v7508_v27  ;;  %1370 = vmatpush.msra.mxu0 %v6231_v21 }
 0x141   : > { %12458 = vst [vmem:[#allocation80_spill] sm:$0xff] %v7511_v3  ;;  %918 = vmatmul.f32.gmra.mxu0 %v6992_v37  ;;  %v7528_v37 = vpop.f32.mrf.mxu3 }
 0x142   : > { %1052 = vmatmul.f32.gmra.mxu1 %v7025_v54 }
 0x146   : > { %v7520_v60 = vpop.f32.mrf.mxu2  ;;  %v7522_v27 = vpop.f32.mrf.mxu0 }
 0x147   : > { %12459 = vst [vmem:[#allocation81_spill] sm:$0xff] %v7520_v60  ;;  %v7525_v3 = vpop.f32.mrf.mxu1 }
 0x148   : > { %12460 = vst [vmem:[#allocation82_spill] sm:$0xff] %v7522_v27  ;;  %v6214_v27 = vld [vmem:[%s6771_s20 + $0x3a8] sm:$0xff] }
 0x149   : > { %12461 = vst [vmem:[#allocation83_spill] sm:$0xff] %v7525_v3  ;;  %921 = vmatmul.f32.gmra.mxu0 %v7011_v47  ;;  %v6198_v3 = vld [vmem:[%s6771_s20 + $0x328] sm:$0xff]  ;;  %1170 = vmatpush.msrb.mxu2 %v6214_v27  ;;  %v7542_v47 = vpop.f32.mrf.mxu3  ;;  %v6197_v27 = vld [vmem:[%s6771_s20 + $0x320] sm:$0xff] }
 0x14a   : > { %1055 = vmatmul.f32.gmra.mxu1 %v7043_v62  ;;  %12465 = vst [vmem:[#allocation87_spill] sm:$0xff] %v7542_v47  ;;  %1262 = vmatpush.msrb.mxu3 %v6198_v3 }
 0x14c   : > { %1263 = vmatpush.msrb.mxu3 %v6197_v27 }
 0x14e   : > { %v7532_v5 = vpop.f32.mrf.mxu2  ;;  %v7534_v32 = vpop.f32.mrf.mxu0  ;;  %1264 = vmatpush.msrb.mxu3 %v6196_v39 }
 0x14f   : > { %12462 = vst [vmem:[#allocation84_spill] sm:$0xff] %v7532_v5  ;;  %v7537_v52 = vpop.f32.mrf.mxu1 }
 0x150   : > { %12463 = vst [vmem:[#allocation85_spill] sm:$0xff] %v7534_v32 }
 0x151   : > { %12464 = vst [vmem:[#allocation86_spill] sm:$0xff] %v7537_v52  ;;  %924 = vmatmul.f32.gmra.mxu0 %v7030_v55  ;;  %v6230_v52 = vld [vmem:[%s6771_s20 + $0x428] sm:$0xff]  ;;  %v7554_v60 = vpop.f32.mrf.mxu3  ;;  %v6213_v55 = vld [vmem:[%s6771_s20 + $0x3a0] sm:$0xff] }
 0x152   : > { %1058 = vmatmul.f32.gmra.mxu1 %v7062_v10  ;;  %12467 = vst [vmem:[#allocation89_spill] sm:$0xff] %v7554_v60  ;;  %1371 = vmatpush.msra.mxu0 %v6230_v52  ;;  %v6229_v52 = vld [vmem:[%s6771_s20 + $0x420] sm:$0xff]  ;;  %v6195_v60 = vld [vmem:[%s6771_s20 + $0x310] sm:$0xff] }
 0x153   : > { %1171 = vmatpush.msrb.mxu2 %v6213_v55  ;;  %1265 = vmatpush.msrb.mxu3 %v6195_v60 }
 0x154   : > { %1372 = vmatpush.msra.mxu0 %v6229_v52 }
 0x155   : > { %1172 = vmatpush.msrb.mxu2 %v6212_v9  ;;  %v6211_v9 = vld [vmem:[%s6771_s20 + $0x390] sm:$0xff] }
 0x156   : > { %v7545_v21 = vpop.f32.mrf.mxu2  ;;  %v7547_v5 = vpop.f32.mrf.mxu0  ;;  %1373 = vmatpush.msra.mxu0 %v6228_v38 }
 0x157   : > { %12466 = vst [vmem:[#allocation88_spill] sm:$0xff] %v7545_v21  ;;  %v7550_v32 = vpop.f32.mrf.mxu1  ;;  %1173 = vmatpush.msrb.mxu2 %v6211_v9 }
 0x159   : > { %927 = vmatmul.f32.gmra.mxu0 %v7048_v63  ;;  %v7567_v63 = vpop.f32.mrf.mxu3  ;;  %1174 = vmatpush.msrb.mxu2 %v6210_v16 }
 0x15a   : > { %1061 = vmatmul.f32.gmra.mxu1 %v7080_v18  ;;  %12468 = vst [vmem:[#allocation90_spill] sm:$0xff] %v7567_v63  ;;  %v6209_v63 = vld [vmem:[%s6771_s20 + $0x380] sm:$0xff] }
 0x15b   : > { %1175 = vmatpush.msrb.mxu2 %v6209_v63  ;;  %v12480_v63 = vld [vmem:[#allocation10_spill] sm:$0xff] }
 0x15e   : > { %v7559_v3 = vpop.f32.mrf.mxu2  ;;  %v7561_v21 = vpop.f32.mrf.mxu0 }
 0x15f   : > { %v7564_v15 = vpop.f32.mrf.mxu1 }
 0x161   : > { %930 = vmatmul.f32.gmra.mxu0 %v7067_v11  ;;  %v7581_v11 = vpop.f32.mrf.mxu3 }
 0x162   : > { %1064 = vmatmul.f32.gmra.mxu1 %v7100_v34  ;;  %12471 = vst [vmem:[#allocation93_spill] sm:$0xff] %v7581_v11  ;;  %v6272_v11 = vld [vmem:[%s6771_s20 + $0x578] sm:$0xff] }
 0x163   : > { %1939 = vmatpush.msra.mxu1 %v6272_v11  ;;  %v12478_v11 = vld [vmem:[#allocation7_spill] sm:$0xff] }
 0x166   : > { %v7571_v55 = vpop.f32.mrf.mxu2  ;;  %v7573_v27 = vpop.f32.mrf.mxu0 }
 0x167   : > { %12469 = vst [vmem:[#allocation91_spill] sm:$0xff] %v7573_v27  ;;  %v7576_v7 = vpop.f32.mrf.mxu1  ;;  %v6194_v27 = vld [vmem:[%s6771_s20 + $0x308] sm:$0xff] }
 0x168   : > { %12470 = vst [vmem:[#allocation92_spill] sm:$0xff] %v7576_v7  ;;  %v12482_v7 = vld [vmem:[#allocation12_spill] sm:$0xff]  ;;  %1266 = vmatpush.msrb.mxu3 %v6194_v27 }
 0x169   : > { %933 = vmatmul.f32.gmra.mxu0 %v7085_v22  ;;  %v7590_v39 = vpop.f32.mrf.mxu3  ;;  %v12475_v22 = vld [vmem:[#allocation8_spill] sm:$0xff] }
 0x16a   : > { %1067 = vmatmul.f32.gmra.mxu1 %v7123_v4  ;;  %12474 = vst [vmem:[#allocation6_spill] sm:$0xff] %v7590_v39  ;;  %v7606_v39 = vld [vmem:[%s7334_s28] ss:$0 sm:$0xff] }
 0x16e   : > { %v7584_v52 = vpop.f32.mrf.mxu2  ;;  %v491_v41 = vpop.f32.mrf.mxu0 }
 0x16f   : > { %12472 = vst [vmem:[#allocation94_spill] sm:$0xff] %v7584_v52  ;;  %v583_v13 = vpop.f32.mrf.mxu1 }
 0x170   : > { %v584_v9 = vadd.f32 %v583_v13, %v491_v41  ;;  %v6193_v41 = vld [vmem:[%s6771_s20 + $0x300] sm:$0xff]  ;;  %v6227_v13 = vld [vmem:[%s6771_s20 + $0x410] sm:$0xff] }
 0x171   : > { %936 = vmatmul.f32.gmra.mxu0 %v12473_v57  ;;  %v6696_v57 = vld [vmem:[%s12114_s0] sm:$0xff]  ;;  %v7609_v60 = vpop.f32.mrf.mxu3  ;;  %1267 = vmatpush.msrb.mxu3 %v6193_v41 }
 0x172   : > { %1070 = vmatmul.f32.gmra.mxu1 %v12475_v22  ;;  %1176 = vmatmul.f32.vlgmr.msrb.gmra.mxu2 %v6696_v57  ;;  %12479 = vst [vmem:[#allocation7_spill] sm:$0xff] %v7609_v60  ;;  %v834_v57 = vadd.f32 %v7606_v39, %v7515_v43  ;;  %v6271_v43 = vld [vmem:[%s6771_s20 + $0x570] sm:$0xff] }
 0x173   : > { %1374 = vmatpush.msra.mxu0 %v6227_v13  ;;  %v12486_v22 = vld [vmem:[#allocation16_spill] sm:$0xff]  ;;  %1940 = vmatpush.msra.mxu1 %v6271_v43  ;;  %v12489_v13 = vld [vmem:[#allocation19_spill] sm:$0xff] }
 0x176   : > { %v7597_v47 = vpop.f32.mrf.mxu0  ;;  %v692_v38 = vpop.f32.mrf.mxu2 }
 0x177   : > { %12476 = vst [vmem:[#allocation95_spill] sm:$0xff] %v7597_v47  ;;  %v7603_v16 = vpop.f32.mrf.mxu1  ;;  %v12481_v47 = vld [vmem:[#allocation11_spill] sm:$0xff]  ;;  %v7613_v52 = vadd.f32 %v692_v38, %v584_v9  ;;  %v12484_v38 = vld [vmem:[#allocation2_spill] sm:$0xff] }
 0x178   : > { %12477 = vst [vmem:[#allocation96_spill] sm:$0xff] %v7603_v16  ;;  %v512_v26 = vadd.f32 %v12481_v47, %v12480_v63  ;;  %v12483_v16 = vld [vmem:[#allocation14_spill] sm:$0xff]  ;;  %v6697_v47 = vld [vmem:[%s12114_s0 + $0x8] sm:$0xff]  ;;  %1268 = vmatmul.f32.vlgmr.msrb.gmra.mxu3 %v12484_v38  ;;  %v6731_v38 = vmov 0  }
 0x179   : > { %939 = vmatmul.f32.gmra.mxu0 %v12478_v11  ;;  %v7632_v41 = vpop.f32.mrf.mxu3  ;;  %6689 = vset.pattern.permute.xlu0 %v6731_v38 }
 0x17a   : > { %1073 = vmatmul.f32.gmra.mxu1 %v12482_v7  ;;  %v695_v49 = vadd.f32 %v12483_v16, %v512_v26  ;;  %1179 = vmatmul.f32.gmra.mxu2 %v6697_v47  ;;  %v12485_v7 = vld [vmem:[#allocation15_spill] sm:$0xff]  ;;  %v12487_v16 = vld [vmem:[#allocation9_spill] sm:$0xff]  ;;  %12488 = vst [vmem:[#allocation10_spill] sm:$0xff] %v7632_v41  ;;  %v12490_v47 = vrot.slane %v7613_v52, 6 }
 0x17b   : > { %v515_v59 = vadd.f32 %v12486_v22, %v12485_v7  ;;  %v835_v7 = vadd.f32 %v7606_v39, %v7528_v37  ;;  %6690 = vset.pattern.permute.xlu1 %v6731_v38  ;;  %6691 = vset.pattern.permute.xlu2 %v6731_v38  ;;  %v6698_v37 = vld [vmem:[%s12114_s0 + $0x10] sm:$0xff]  ;;  %v6226_v41 = vld [vmem:[%s6771_s20 + $0x408] sm:$0xff] }
 0x17c   : > { %v1478_v27 = vrot.slane %v695_v49, 6  ;;  %v12491_v49 = vld [vmem:[#allocation17_spill] sm:$0xff]  ;;  %1375 = vmatpush.msra.mxu0 %v6226_v41 }
 0x17d   : > { %v7635_v11 = vadd.f32 %v12489_v13, %v515_v59  ;;  %v12493_v13 = vld [vmem:[#allocation13_spill] sm:$0xff] }
 0x17e   : > { %v895_v60 = vpop.f32.mrf.mxu0 }
 0x17f   : > { %v968_v9 = vadd.f32 %v895_v60, %v834_v57  ;;  %v1029_v63 = vpop.f32.mrf.mxu1  ;;  %v1528_v60 = vsel %vm1503_vm2, %v12490_v47, %v1478_v27  ;;  %v215_v57 = vld [vmem:[%s12115_s1] sm:$0xff]  ;;  %v12151_v59 = vrot.slane %v7635_v11, 6 }
 0x180   : > { %1657 = vperm.xlu0 %6689, %v215_v57   ;;  %v12495_v57 = vld [vmem:[#allocation22_spill] sm:$0xff] }
 0x181   : > { %v1102_v26 = vadd.f32 %v1029_v63, %v968_v9  ;;  %942 = vmatmul.f32.gmra.mxu0 %v12487_v16  ;;  %v12492_v63 = vld [vmem:[#allocation3_spill] sm:$0xff]  ;;  %v7655_v47 = vpop.f32.mrf.mxu3 }
 0x182   : > { %1076 = vmatmul.f32.gmra.mxu1 %v12491_v49  ;;  %1182 = vmatmul.f32.gmra.mxu2 %v6698_v37  ;;  %12494 = vst [vmem:[#allocation11_spill] sm:$0xff] %v7655_v47  ;;  %v6270_v37 = vld [vmem:[%s6771_s20 + $0x568] sm:$0xff]  ;;  %v12505_v47 = vld [vmem:[#allocation32_spill] sm:$0xff] }
 0x183   : > { %v7644_v22 = vadd.f32 %v1528_v60, %v1102_v26  ;;  %1271 = vmatmul.f32.gmra.mxu3 %v12492_v63  ;;  %v1527_v60 = vsel %vm1503_vm2, %v1478_v27, %v12151_v59  ;;  %1941 = vmatpush.msra.mxu1 %v6270_v37  ;;  %v6699_v63 = vld [vmem:[%s12114_s0 + $0x18] sm:$0xff]  ;;  %v221_v37 = vld [vmem:[%s12115_s1 + $0x30] sm:$0xff]  ;;  %v12503_v59 = vld [vmem:[#allocation23_spill] sm:$0xff] }
 0x186   : > { %v898_v9 = vpop.f32.mrf.mxu0 }
 0x187   : > { %v969_v43 = vadd.f32 %v898_v9, %v835_v7  ;;  %v1032_v26 = vpop.f32.mrf.mxu1  ;;  %v217_v7 = vld [vmem:[%s12115_s1 + $0x10] sm:$0xff]  ;;  %v216_v9 = vld [vmem:[%s12115_s1 + $0x8] sm:$0xff] }
 0x188   : > { %1667 = vperm.xlu1 %6690, %v217_v7   ;;  %1662 = vperm.xlu0 %6689, %v216_v9   ;;  %v6225_v7 = vld [vmem:[%s6771_s20 + $0x400] sm:$0xff] }
 0x189   : > { %v1103_v16 = vadd.f32 %v1032_v26, %v969_v43  ;;  %945 = vmatmul.f32.gmra.mxu0 %v12493_v13  ;;  %v12496_v43 = vld [vmem:[#allocation4_spill] sm:$0xff]  ;;  %v7681_v41 = vpop.f32.mrf.mxu3  ;;  %v12499_v13 = vld [vmem:[#allocation27_spill] sm:$0xff] }
 0x18a   : > { %1079 = vmatmul.f32.gmra.mxu1 %v12495_v57  ;;  %1185 = vmatmul.f32.gmra.mxu2 %v6699_v63  ;;  %12498 = vst [vmem:[#allocation14_spill] sm:$0xff] %v7681_v41  ;;  %v6700_v63 = vld [vmem:[%s12114_s0 + $0x20] sm:$0xff] }
 0x18b   : > { %v7662_v38 = vadd.f32 %v1527_v60, %v1103_v16  ;;  %1274 = vmatmul.f32.gmra.mxu3 %v12496_v43  ;;  %v12497_v16 = vld [vmem:[#allocation18_spill] sm:$0xff]  ;;  %v218_v60 = vld [vmem:[%s12115_s1 + $0x18] sm:$0xff]  ;;  %1376 = vmatpush.msra.mxu0 %v6225_v7  ;;  %v224_v7 = vld [vmem:[%s12115_s1 + $0x48] sm:$0xff] }
 0x18c   : > { %v12501_v43 = vld [vmem:[#allocation5_spill] sm:$0xff] }
 0x18e   : > { %v7672_v27 = vpop.f32.mrf.mxu0 }
 0x18f   : > { %v7678_v26 = vpop.f32.mrf.mxu1 }
 0x190   : > { %1672 = vperm.xlu1 %6690, %v218_v60   ;;  %1687 = vperm.xlu0 %6689, %v221_v37   ;;  %v6269_v60 = vld [vmem:[%s6771_s20 + $0x560] sm:$0xff]  ;;  %v222_v37 = vld [vmem:[%s12115_s1 + $0x38] sm:$0xff] }
 0x191   : > { %948 = vmatmul.f32.gmra.mxu0 %v12497_v16  ;;  %v7700_v41 = vpop.f32.mrf.mxu3  ;;  %1942 = vmatpush.msra.mxu1 %v6269_v60  ;;  %v6268_v60 = vld [vmem:[%s6771_s20 + $0x558] sm:$0xff] }
 0x192   : > { %1082 = vmatmul.f32.gmra.mxu1 %v12499_v13  ;;  %1188 = vmatmul.f32.gmra.mxu2 %v6700_v63  ;;  %12504 = vst [vmem:[#allocation16_spill] sm:$0xff] %v7700_v41  ;;  %v12507_v41 = vld [vmem:[#allocation28_spill] sm:$0xff] }
 0x193   : > { %1277 = vmatmul.f32.gmra.mxu3 %v12501_v43  ;;  %1943 = vmatpush.msra.mxu1 %v6268_v60  ;;  %v228_v60 = vld [vmem:[%s12115_s1 + $0x68] sm:$0xff] }
 0x196   : > { %v7691_v9 = vpop.f32.mrf.mxu0 }
 0x197   : > { %12500 = vst [vmem:[#allocation2_spill] sm:$0xff] %v7691_v9  ;;  %v7697_v16 = vpop.f32.mrf.mxu1  ;;  %v12509_v9 = vld [vmem:[#allocation36_spill] sm:$0xff] }
 0x198   : > { %12502 = vst [vmem:[#allocation15_spill] sm:$0xff] %v7697_v16  ;;  %1692 = vperm.xlu1 %6690, %v222_v37   ;;  %1702 = vperm.xlu0 %6689, %v224_v7   ;;  %v225_v37 = vld [vmem:[%s12115_s1 + $0x50] sm:$0xff]  ;;  %v227_v7 = vld [vmem:[%s12115_s1 + $0x60] sm:$0xff] }
 0x199   : > { %951 = vmatmul.f32.gmra.mxu0 %v12503_v59  ;;  %v6701_v59 = vld [vmem:[%s12114_s0 + $0x28] sm:$0xff]  ;;  %v7719_v16 = vpop.f32.mrf.mxu3 }
 0x19a   : > { %1085 = vmatmul.f32.gmra.mxu1 %v12505_v47  ;;  %1191 = vmatmul.f32.gmra.mxu2 %v6701_v59  ;;  %12508 = vst [vmem:[#allocation19_spill] sm:$0xff] %v7719_v16 }
 0x19b   : > { %1280 = vmatmul.f32.gmra.mxu3 %v6928_v19 }
 0x19e   : > { %v7710_v63 = vpop.f32.mrf.mxu0 }
 0x19f   : > { %v7716_v43 = vpop.f32.mrf.mxu1 }
 0x1a0   : > { %12506 = vst [vmem:[#allocation9_spill] sm:$0xff] %v7716_v43  ;;  %1707 = vperm.xlu1 %6690, %v225_v37   ;;  %1717 = vperm.xlu0 %6689, %v227_v7   ;;  %v12512_v43 = vld [vmem:[#allocation41_spill] sm:$0xff] }
 0x1a1   : > { %954 = vmatmul.f32.gmra.mxu0 %v12507_v41  ;;  %v6702_v41 = vld [vmem:[%s12114_s0 + $0x30] sm:$0xff]  ;;  %v7738_v16 = vpop.f32.mrf.mxu3  ;;  %v230_v37 = vld [vmem:[%s12115_s1 + $0x78] sm:$0xff] }
 0x1a2   : > { %1088 = vmatmul.f32.gmra.mxu1 %v12509_v9  ;;  %1194 = vmatmul.f32.gmra.mxu2 %v6702_v41  ;;  %12511 = vst [vmem:[#allocation3_spill] sm:$0xff] %v7738_v16  ;;  %v12513_v41 = vld [vmem:[#allocation37_spill] sm:$0xff] }
 0x1a3   : > { %1283 = vmatmul.f32.gmra.mxu3 %v6946_v24 }
 0x1a6   : > { %v7729_v19 = vpop.f32.mrf.mxu0 }
 0x1a7   : > { %v7735_v59 = vpop.f32.mrf.mxu1 }
 0x1a8   : > { %12510 = vst [vmem:[#allocation17_spill] sm:$0xff] %v7735_v59  ;;  %1722 = vperm.xlu1 %6690, %v228_v60   ;;  %1732 = vperm.xlu0 %6689, %v230_v37   ;;  %v6267_v59 = vld [vmem:[%s6771_s20 + $0x550] sm:$0xff]  ;;  %v231_v60 = vld [vmem:[%s12115_s1 + $0x80] sm:$0xff] }
 0x1a9   : > { %957 = vmatmul.f32.gmra.mxu0 %v7292_v44  ;;  %v6703_v44 = vld [vmem:[%s12114_s0 + $0x38] sm:$0xff]  ;;  %v7756_v16 = vpop.f32.mrf.mxu3  ;;  %v233_v37 = vld [vmem:[%s12115_s1 + $0x90] sm:$0xff]  ;;  %1944 = vmatpush.msra.mxu1 %v6267_v59 }
 0x1aa   : > { %1091 = vmatmul.f32.gmra.mxu1 %v12512_v43  ;;  %1197 = vmatmul.f32.gmra.mxu2 %v6703_v44  ;;  %12514 = vst [vmem:[#allocation13_spill] sm:$0xff] %v7756_v16  ;;  %v6704_v44 = vld [vmem:[%s12114_s0 + $0x40] sm:$0xff] }
 0x1ab   : > { %1286 = vmatmul.f32.gmra.mxu3 %v6965_v30  ;;  %v7777_v16 = vld [vmem:[%s12114_s0 + $0xc0] sm:$0xff] }
 0x1ae   : > { %v7747_v24 = vpop.f32.mrf.mxu0 }
 0x1af   : > { %v7753_v7 = vpop.f32.mrf.mxu1 }
 0x1b0   : > { %1737 = vperm.xlu1 %6690, %v231_v60   ;;  %1747 = vperm.xlu0 %6689, %v233_v37   ;;  %v239_v60 = vld [vmem:[%s12115_s1 + $0xc0] sm:$0xff]  ;;  %v6266_v37 = vld [vmem:[%s6771_s20 + $0x548] sm:$0xff] }
 0x1b1   : > { %960 = vmatmul.f32.gmra.mxu0 %v12513_v41  ;;  %v7780_v59 = vpop.f32.mrf.mxu3  ;;  %1945 = vmatpush.msra.mxu1 %v6266_v37 }
 0x1b2   : > { %1094 = vmatmul.f32.gmra.mxu1 %v7375_v12  ;;  %1200 = vmatmul.f32.gmra.mxu2 %v6704_v44  ;;  %12517 = vst [vmem:[#allocation18_spill] sm:$0xff] %v7780_v59  ;;  %v6706_v59 = vld [vmem:[%s12114_s0 + $0x48] sm:$0xff] }
 0x1b3   : > { %1289 = vmatmul.f32.gmra.mxu3 %v6983_v35  ;;  %v235_v35 = vld [vmem:[%s12115_s1 + $0xa0] sm:$0xff] }
 0x1b6   : > { %v7766_v30 = vpop.f32.mrf.mxu0 }
 0x1b7   : > { %12515 = vst [vmem:[#allocation22_spill] sm:$0xff] %v7766_v30  ;;  %v7772_v41 = vpop.f32.mrf.mxu1 }
 0x1b8   : > { %12516 = vst [vmem:[#allocation4_spill] sm:$0xff] %v7772_v41  ;;  %1777 = vperm.xlu1 %6690, %v239_v60   ;;  %1757 = vperm.xlu0 %6689, %v235_v35   ;;  %v219_v60 = vld [vmem:[%s12115_s1 + $0x20] sm:$0xff]  ;;  %v238_v35 = vld [vmem:[%s12115_s1 + $0xb8] sm:$0xff] }
 0x1b9   : > { %963 = vmatmul.f32.gmra.mxu0 %v7777_v16  ;;  %v7799_v30 = vpop.f32.mrf.mxu3  ;;  %1677 = vperm.xlu2 %6691, %v219_v60   ;;  %v220_v60 = vld [vmem:[%s12115_s1 + $0x28] sm:$0xff] }
 0x1ba   : > { %1097 = vmatmul.f32.gmra.mxu1 %v7400_v28  ;;  %1203 = vmatmul.f32.gmra.mxu2 %v6706_v59  ;;  %12518 = vst [vmem:[#allocation27_spill] sm:$0xff] %v7799_v30  ;;  %v6265_v30 = vld [vmem:[%s6771_s20 + $0x540] sm:$0xff] }
 0x1bb   : > { %1292 = vmatmul.f32.gmra.mxu3 %v7002_v45  ;;  %v6707_v45 = vld [vmem:[%s12114_s0 + $0x50] sm:$0xff]  ;;  %1946 = vmatpush.msra.mxu1 %v6265_v30  ;;  %v223_v30 = vld [vmem:[%s12115_s1 + $0x40] sm:$0xff] }
 0x1be   : > { %v7790_v44 = vpop.f32.mrf.mxu0 }
 0x1bf   : > { %v7796_v41 = vpop.f32.mrf.mxu1 }
 0x1c0   : > { %1772 = vperm.xlu0 %6689, %v238_v35  }
 0x1c1   : > { %1377 = vmatmul.f32.vlgmr.msra.gmra.mxu0 %v6854_v58  ;;  %v7816_v37 = vpop.f32.mrf.mxu3  ;;  %1682 = vperm.xlu2 %6691, %v220_v60   ;;  %v236_v60 = vld [vmem:[%s12115_s1 + $0xa8] sm:$0xff] }
 0x1c2   : > { %1206 = vmatmul.f32.gmra.mxu2 %v6707_v45  ;;  %12519 = vst [vmem:[#allocation5_spill] sm:$0xff] %v7816_v37  ;;  %1762 = vperm.xlu1 %6690, %v236_v60  }
 0x1c3   : > { %1295 = vmatmul.f32.gmra.mxu3 %v7021_v53  ;;  %v6708_v53 = vld [vmem:[%s12114_s0 + $0x58] sm:$0xff] }
 0x1c6   : > { %v7807_v59 = vpop.f32.mrf.mxu0 }
 0x1c7   : > { %v7813_v58 = vpop.f32.mrf.mxu1 }
 0x1c9   : > { %1380 = vmatmul.f32.gmra.mxu0 %v6875_v2  ;;  %v7831_v45 = vpop.f32.mrf.mxu3  ;;  %1697 = vperm.xlu2 %6691, %v223_v30   ;;  %v226_v30 = vld [vmem:[%s12115_s1 + $0x58] sm:$0xff] }
 0x1ca   : > { %1209 = vmatmul.f32.gmra.mxu2 %v6708_v53  ;;  %12522 = vst [vmem:[#allocation28_spill] sm:$0xff] %v7831_v45  ;;  %v6264_v53 = vld [vmem:[%s6771_s20 + $0x538] sm:$0xff] }
 0x1cb   : > { %1298 = vmatmul.f32.gmra.mxu3 %v7039_v61  ;;  %v6709_v61 = vld [vmem:[%s12114_s0 + $0x60] sm:$0xff]  ;;  %1947 = vmatpush.msra.mxu1 %v6264_v53  ;;  %v6263_v53 = vld [vmem:[%s6771_s20 + $0x530] sm:$0xff] }
 0x1cd   : > { %1948 = vmatpush.msra.mxu1 %v6263_v53  ;;  %v232_v53 = vld [vmem:[%s12115_s1 + $0x88] sm:$0xff] }
 0x1ce   : > { %v7822_v35 = vpop.f32.mrf.mxu0 }
 0x1cf   : > { %12520 = vst [vmem:[#allocation23_spill] sm:$0xff] %v7822_v35  ;;  %v7828_v2 = vpop.f32.mrf.mxu1 }
 0x1d0   : > { %12521 = vst [vmem:[#allocation32_spill] sm:$0xff] %v7828_v2 }
 0x1d1   : > { %1383 = vmatmul.f32.gmra.mxu0 %v6894_v8  ;;  %v7849_v45 = vpop.f32.mrf.mxu3  ;;  %1712 = vperm.xlu2 %6691, %v226_v30   ;;  %v229_v30 = vld [vmem:[%s12115_s1 + $0x70] sm:$0xff] }
 0x1d2   : > { %1212 = vmatmul.f32.gmra.mxu2 %v6709_v61  ;;  %12525 = vst [vmem:[#allocation37_spill] sm:$0xff] %v7849_v45  ;;  %v6710_v61 = vld [vmem:[%s12114_s0 + $0x68] sm:$0xff] }
 0x1d3   : > { %1301 = vmatmul.f32.gmra.mxu3 %v7058_v6 }
 0x1d6   : > { %v7839_v37 = vpop.f32.mrf.mxu0 }
 0x1d7   : > { %12523 = vst [vmem:[#allocation36_spill] sm:$0xff] %v7839_v37  ;;  %v7845_v8 = vpop.f32.mrf.mxu1  ;;  %v12561_v37 = vld [vmem:[#allocation94_spill] sm:$0xff] }
 0x1d8   : > { %12524 = vst [vmem:[#allocation41_spill] sm:$0xff] %v7845_v8 }
 0x1d9   : > { %1386 = vmatmul.f32.gmra.mxu0 %v6913_v14  ;;  %v7863_v14 = vpop.f32.mrf.mxu3  ;;  %1727 = vperm.xlu2 %6691, %v229_v30  }
 0x1da   : > { %1215 = vmatmul.f32.gmra.mxu2 %v6710_v61  ;;  %12528 = vst [vmem:[#allocation99_spill] sm:$0xff] %v7863_v14  ;;  %v6712_v14 = vld [vmem:[%s12114_s0 + $0x78] sm:$0xff] }
 0x1db   : > { %1304 = vmatmul.f32.gmra.mxu3 %v7076_v17  ;;  %v6711_v17 = vld [vmem:[%s12114_s0 + $0x70] sm:$0xff] }
 0x1de   : > { %v7854_v60 = vpop.f32.mrf.mxu0 }
 0x1df   : > { %12526 = vst [vmem:[#allocation97_spill] sm:$0xff] %v7854_v60  ;;  %v7860_v6 = vpop.f32.mrf.mxu1  ;;  %v12559_v60 = vld [vmem:[#allocation92_spill] sm:$0xff] }
 0x1e0   : > { %12527 = vst [vmem:[#allocation98_spill] sm:$0xff] %v7860_v6  ;;  %v6321_v6 = vld [vmem:[%s6771_s20 + $0x6f8] sm:$0xff] }
 0x1e1   : > { %1389 = vmatmul.f32.gmra.mxu0 %v6932_v20  ;;  %v7878_v61 = vpop.f32.mrf.mxu3  ;;  %1742 = vperm.xlu2 %6691, %v232_v53   ;;  %v234_v53 = vld [vmem:[%s12115_s1 + $0x98] sm:$0xff] }
 0x1e2   : > { %1218 = vmatmul.f32.gmra.mxu2 %v6711_v17  ;;  %12531 = vst [vmem:[#allocation102_spill] sm:$0xff] %v7878_v61 }
 0x1e3   : > { %1307 = vmatmul.f32.gmra.mxu3 %v7096_v33 }
 0x1e6   : > { %v7869_v45 = vpop.f32.mrf.mxu0 }
 0x1e7   : > { %12529 = vst [vmem:[#allocation100_spill] sm:$0xff] %v7869_v45  ;;  %v7875_v20 = vpop.f32.mrf.mxu1 }
 0x1e8   : > { %12530 = vst [vmem:[#allocation101_spill] sm:$0xff] %v7875_v20 }
 0x1e9   : > { %1392 = vmatmul.f32.gmra.mxu0 %v6950_v25  ;;  %v6262_v25 = vld [vmem:[%s6771_s20 + $0x528] sm:$0xff]  ;;  %v7893_v17 = vpop.f32.mrf.mxu3  ;;  %1752 = vperm.xlu2 %6691, %v234_v53   ;;  %v237_v53 = vld [vmem:[%s12115_s1 + $0xb0] sm:$0xff] }
 0x1ea   : > { %1221 = vmatmul.f32.gmra.mxu2 %v6712_v14  ;;  %1949 = vmatpush.msra.mxu1 %v6262_v25 }
 0x1eb   : > { %1310 = vmatmul.f32.gmra.mxu3 %v7119_v0  ;;  %v6713_v0 = vld [vmem:[%s12114_s0 + $0x80] sm:$0xff] }
 0x1ee   : > { %v7883_v30 = vpop.f32.mrf.mxu0 }
 0x1ef   : > { %12532 = vst [vmem:[#allocation103_spill] sm:$0xff] %v7883_v30  ;;  %v7889_v33 = vpop.f32.mrf.mxu1  ;;  %v6254_v30 = vld [vmem:[%s6771_s20 + $0x4e8] sm:$0xff] }
 0x1f0   : > { %12533 = vst [vmem:[#allocation104_spill] sm:$0xff] %v7889_v33  ;;  %v6261_v33 = vld [vmem:[%s6771_s20 + $0x520] sm:$0xff] }
 0x1f1   : > { %1395 = vmatmul.f32.gmra.mxu0 %v6969_v31  ;;  %v7907_v31 = vpop.f32.mrf.mxu3  ;;  %1950 = vmatpush.msra.mxu1 %v6261_v33 }
 0x1f2   : > { %1224 = vmatmul.f32.gmra.mxu2 %v6713_v0  ;;  %1767 = vperm.xlu2 %6691, %v237_v53   ;;  %v6715_v53 = vld [vmem:[%s12114_s0 + $0x90] sm:$0xff] }
 0x1f3   : > { %1313 = vmatmul.f32.gmra.mxu3 %v7141_v40  ;;  %v6714_v40 = vld [vmem:[%s12114_s0 + $0x88] sm:$0xff] }
 0x1f5   : > { %v7909_v25 = vpop.f32.mrf.mxu2 }
 0x1f6   : > { %v7898_v61 = vpop.f32.mrf.mxu0 }
 0x1f7   : > { %12534 = vst [vmem:[#allocation105_spill] sm:$0xff] %v7898_v61  ;;  %v7904_v14 = vpop.f32.mrf.mxu1 }
 0x1f8   : > { %12535 = vst [vmem:[#allocation106_spill] sm:$0xff] %v7904_v14 }
 0x1f9   : > { %1398 = vmatmul.f32.gmra.mxu0 %v6987_v36 }
 0x1fa   : > { %1227 = vmatmul.f32.gmra.mxu2 %v6714_v40 }
 0x1fb   : > { %1316 = vmatmul.f32.gmra.mxu3 %v7169_v50  ;;  %v7926_v14 = vpop.f32.mrf.mxu3 }
 0x1fd   : > { %v7924_v0 = vpop.f32.mrf.mxu2 }
 0x1fe   : > { %v7915_v61 = vpop.f32.mrf.mxu0 }
 0x1ff   : > { %12536 = vst [vmem:[#allocation107_spill] sm:$0xff] %v7915_v61  ;;  %v7921_v36 = vpop.f32.mrf.mxu1  ;;  %v6256_v61 = vld [vmem:[%s6771_s20 + $0x4f8] sm:$0xff] }
 0x200   : > { %12537 = vst [vmem:[#allocation108_spill] sm:$0xff] %v7921_v36  ;;  %v6260_v36 = vld [vmem:[%s6771_s20 + $0x518] sm:$0xff]  ;;  %2031 = vmatpush.msra.mxu2 %v6256_v61 }
 0x201   : > { %1401 = vmatmul.f32.gmra.mxu0 %v7006_v46  ;;  %1951 = vmatpush.msra.mxu1 %v6260_v36  ;;  %v6259_v36 = vld [vmem:[%s6771_s20 + $0x510] sm:$0xff] }
 0x202   : > { %1230 = vmatmul.f32.gmra.mxu2 %v6715_v53  ;;  %v6716_v53 = vld [vmem:[%s12114_s0 + $0x98] sm:$0xff] }
 0x203   : > { %1319 = vmatmul.f32.gmra.mxu3 %v7197_v29  ;;  %1952 = vmatpush.msra.mxu1 %v6259_v36 }
 0x205   : > { %v7937_v50 = vpop.f32.mrf.mxu2 }
 0x206   : > { %v7928_v33 = vpop.f32.mrf.mxu0  ;;  %v7939_v46 = vpop.f32.mrf.mxu3 }
 0x207   : > { %12538 = vst [vmem:[#allocation109_spill] sm:$0xff] %v7928_v33  ;;  %v7934_v40 = vpop.f32.mrf.mxu1 }
 0x208   : > { %12539 = vst [vmem:[#allocation110_spill] sm:$0xff] %v7934_v40 }
 0x209   : > { %1404 = vmatmul.f32.gmra.mxu0 %v7025_v54 }
 0x20a   : > { %1233 = vmatmul.f32.gmra.mxu2 %v6716_v53 }
 0x20b   : > { %1322 = vmatmul.f32.gmra.mxu3 %v7224_v51 }
 0x20d   : > { %v7952_v54 = vpop.f32.mrf.mxu2 }
 0x20e   : > { %v7943_v33 = vpop.f32.mrf.mxu0  ;;  %v7954_v40 = vpop.f32.mrf.mxu3 }
 0x20f   : > { %12540 = vst [vmem:[#allocation111_spill] sm:$0xff] %v7943_v33  ;;  %v7949_v29 = vpop.f32.mrf.mxu1  ;;  %v6717_v33 = vld [vmem:[%s12114_s0 + $0xa0] sm:$0xff] }
 0x210   : > { %12541 = vst [vmem:[#allocation112_spill] sm:$0xff] %v7949_v29 }
 0x211   : > { %1407 = vmatmul.f32.gmra.mxu0 %v7043_v62  ;;  %v7965_v62 = vpop.permute.xlu1 %1667 }
 0x212   : > { %1236 = vmatmul.f32.gmra.mxu2 %v6717_v33  ;;  %12544 = vst [vmem:[#allocation115_spill] sm:$0xff] %v7965_v62 }
 0x213   : > { %1325 = vmatmul.f32.gmra.mxu3 %v7254_v56  ;;  %v6718_v56 = vld [vmem:[%s12114_s0 + $0xa8] sm:$0xff] }
 0x215   : > { %v7968_v53 = vpop.f32.mrf.mxu2 }
 0x216   : > { %v7957_v61 = vpop.f32.mrf.mxu0  ;;  %v7970_v36 = vpop.f32.mrf.mxu3 }
 0x217   : > { %12542 = vst [vmem:[#allocation113_spill] sm:$0xff] %v7957_v61  ;;  %v7963_v51 = vpop.f32.mrf.mxu1  ;;  %v6255_v61 = vld [vmem:[%s6771_s20 + $0x4f0] sm:$0xff] }
 0x218   : > { %12543 = vst [vmem:[#allocation114_spill] sm:$0xff] %v7963_v51  ;;  %2032 = vmatpush.msra.mxu2 %v6255_v61  ;;  %v6258_v61 = vld [vmem:[%s6771_s20 + $0x508] sm:$0xff] }
 0x219   : > { %1410 = vmatmul.f32.gmra.mxu0 %v7062_v10  ;;  %v7982_v10 = vpop.permute.xlu1 %1672  ;;  %1953 = vmatpush.msra.mxu1 %v6258_v61  ;;  %v6287_v61 = vld [vmem:[%s6771_s20 + $0x5f0] sm:$0xff] }
 0x21a   : > { %1239 = vmatmul.f32.gmra.mxu2 %v6718_v56  ;;  %12547 = vst [vmem:[#allocation118_spill] sm:$0xff] %v7982_v10  ;;  %v6252_v56 = vld [vmem:[%s6771_s20 + $0x4d8] sm:$0xff] }
 0x21b   : > { %1328 = vmatmul.f32.gmra.mxu3 %v7283_v23  ;;  %2033 = vmatpush.msra.mxu2 %v6254_v30  ;;  %v578_v30 = vadd.f32 %v7564_v15, %v7561_v21  ;;  %v6286_v15 = vld [vmem:[%s6771_s20 + $0x5e8] sm:$0xff]  ;;  %v856_v21 = vadd.f32 %v7606_v39, %v7893_v17  ;;  %v6720_v17 = vld [vmem:[%s12114_s0 + $0xb8] sm:$0xff] }
 0x21d   : > { %v7984_v51 = vpop.f32.mrf.mxu2 }
 0x21e   : > { %v7973_v29 = vpop.f32.mrf.mxu0  ;;  %v7989_v20 = vpop.f32.mrf.mxu3 }
 0x21f   : > { %12545 = vst [vmem:[#allocation116_spill] sm:$0xff] %v7973_v29  ;;  %v7979_v33 = vpop.f32.mrf.mxu1  ;;  %v6253_v29 = vld [vmem:[%s6771_s20 + $0x4e0] sm:$0xff] }
 0x220   : > { %12546 = vst [vmem:[#allocation117_spill] sm:$0xff] %v7979_v33  ;;  %2034 = vmatpush.msra.mxu2 %v6253_v29  ;;  %v6288_v33 = vld [vmem:[%s6771_s20 + $0x5f8] sm:$0xff]  ;;  %v6251_v29 = vld [vmem:[%s6771_s20 + $0x4d0] sm:$0xff] }
 0x221   : > { %1413 = vmatmul.f32.gmra.mxu0 %v7080_v18  ;;  %v6719_v18 = vld [vmem:[%s12114_s0 + $0xb0] sm:$0xff]  ;;  %2140 = vmatpush.msra.mxu3 %v6288_v33  ;;  %v6250_v33 = vld [vmem:[%s6771_s20 + $0x4c8] sm:$0xff] }
 0x222   : > { %1242 = vmatmul.f32.gmra.mxu2 %v6719_v18 }
 0x223   : > { %1331 = vmatmul.f32.gmra.mxu3 %v7315_v48  ;;  %2035 = vmatpush.msra.mxu2 %v6252_v56  ;;  %v575_v48 = vadd.f32 %v7550_v32, %v7547_v5 }
 0x224   : > { %2141 = vmatpush.msra.mxu3 %v6287_v61  ;;  %v6284_v61 = vld [vmem:[%s6771_s20 + $0x5d8] sm:$0xff] }
 0x225   : > { %v8006_v18 = vpop.f32.mrf.mxu2  ;;  %2036 = vmatpush.msra.mxu2 %v6251_v29  ;;  %v6249_v29 = vld [vmem:[%s6771_s20 + $0x4c0] sm:$0xff]  ;;  %v8024_v5 = vadd.f32 %v7559_v3, %v575_v48 }
 0x226   : > { %v7991_v23 = vpop.f32.mrf.mxu0  ;;  %v8013_v56 = vpop.f32.mrf.mxu3  ;;  %2142 = vmatpush.msra.mxu3 %v6286_v15  ;;  %v6283_v15 = vld [vmem:[%s6771_s20 + $0x5d0] sm:$0xff] }
 0x227   : > { %12548 = vst [vmem:[#allocation119_spill] sm:$0xff] %v7991_v23  ;;  %v7999_v45 = vpop.f32.mrf.mxu1  ;;  %v8011_v23 = vadd.f32 %v7571_v55, %v578_v30  ;;  %2037 = vmatpush.msra.mxu2 %v6250_v33  ;;  %v6248_v30 = vld [vmem:[%s6771_s20 + $0x4b8] sm:$0xff]  ;;  %v12152_v48 = vrot.slane %v8024_v5, 6 }
 0x228   : > { %12549 = vst [vmem:[#allocation120_spill] sm:$0xff] %v7999_v45  ;;  %v6285_v45 = vld [vmem:[%s6771_s20 + $0x5e0] sm:$0xff] }
 0x229   : > { %1416 = vmatmul.f32.gmra.mxu0 %v7100_v34  ;;  %v8019_v34 = vpop.permute.xlu1 %1692  ;;  %12551 = vst [vmem:[#allocation122_spill] sm:$0xff] %v8024_v5  ;;  %2038 = vmatpush.msra.mxu2 %v6249_v29  ;;  %v12153_v32 = vrot.slane %v8011_v23, 6  ;;  %v12557_v5 = vld [vmem:[#allocation49_spill] sm:$0xff] }
 0x22a   : > { %12550 = vst [vmem:[#allocation121_spill] sm:$0xff] %v8019_v34  ;;  %2143 = vmatpush.msra.mxu3 %v6285_v45  ;;  %1245 = vmatmul.f32.gmra.mxu2 %v6720_v17  ;;  %v6247_v45 = vld [vmem:[%s6771_s20 + $0x4b0] sm:$0xff] }
 0x22b   : > { %1334 = vmatmul.f32.gmra.mxu3 %v7349_v1  ;;  %2039 = vmatpush.msra.mxu2 %v6248_v30  ;;  %v1506_v1 = vsel %vm1503_vm2, %v12152_v48, %v12153_v32  ;;  %v6282_v30 = vld [vmem:[%s6771_s20 + $0x5c8] sm:$0xff]  ;;  %v6280_v48 = vld [vmem:[%s6771_s20 + $0x5b8] sm:$0xff] }
 0x22c   : > { %2144 = vmatpush.msra.mxu3 %v6284_v61  ;;  %v12554_v32 = vld [vmem:[#allocation45_spill] sm:$0xff] }
 0x22d   : > { %v8037_v17 = vpop.f32.mrf.mxu2  ;;  %2040 = vmatpush.msra.mxu2 %v6247_v45 }
 0x22e   : > { %v961_v55 = vpop.f32.mrf.mxu0  ;;  %2145 = vmatpush.msra.mxu3 %v6283_v15  ;;  %v6244_v15 = vld [vmem:[%s6771_s20 + $0x498] sm:$0xff] }
 0x22f   : > { %v990_v33 = vadd.f32 %v961_v55, %v856_v21  ;;  %v1095_v3 = vpop.f32.mrf.mxu1  ;;  %v8045_v21 = vpop.f32.mrf.mxu3  ;;  %v6246_v55 = vld [vmem:[%s6771_s20 + $0x4a8] sm:$0xff] }
 0x230   : > { %2041 = vmatpush.msra.mxu2 %v6246_v55  ;;  %2146 = vmatpush.msra.mxu3 %v6282_v30  ;;  %v6279_v55 = vld [vmem:[%s6771_s20 + $0x5b0] sm:$0xff] }
 0x231   : > { %v1124_v29 = vadd.f32 %v1095_v3, %v990_v33  ;;  %1419 = vmatmul.f32.gmra.mxu0 %v7123_v4  ;;  %v6245_v4 = vld [vmem:[%s6771_s20 + $0x4a0] sm:$0xff]  ;;  %v8053_v3 = vpop.permute.xlu1 %1707  ;;  %v12555_v30 = vld [vmem:[#allocation8_spill] sm:$0xff] }
 0x232   : > { %v6281_v33 = vld [vmem:[%s6771_s20 + $0x5c0] sm:$0xff]  ;;  %12553 = vst [vmem:[#allocation124_spill] sm:$0xff] %v8053_v3  ;;  %2042 = vmatpush.msra.mxu2 %v6245_v4  ;;  %v1273_v3 = vadd.f32 %v7939_v46, %v7924_v0 }
 0x233   : > { %v8049_v61 = vadd.f32 %v1506_v1, %v1124_v29  ;;  %2147 = vmatpush.msra.mxu3 %v6281_v33  ;;  %1248 = vmatmul.f32.gmra.mxu2 %v7777_v16  ;;  %v6257_v29 = vld [vmem:[%s6771_s20 + $0x500] sm:$0xff]  ;;  %v6243_v1 = vld [vmem:[%s6771_s20 + $0x490] sm:$0xff]  ;;  %v6242_v16 = vld [vmem:[%s6771_s20 + $0x488] sm:$0xff] }
 0x234   : > { %1337 = vmatmul.f32.gmra.mxu3 %v12554_v32  ;;  %2043 = vmatpush.msra.mxu2 %v6244_v15  ;;  %v6278_v32 = vld [vmem:[%s6771_s20 + $0x5a8] sm:$0xff]  ;;  %v6277_v15 = vld [vmem:[%s6771_s20 + $0x5a0] sm:$0xff] }
 0x235   : > { %12552 = vst [vmem:[#allocation123_spill] sm:$0xff] %v8049_v61  ;;  %2148 = vmatpush.msra.mxu3 %v6280_v48  ;;  %1954 = vmatpush.msra.mxu1 %v6257_v29  ;;  %v8063_v4 = vpop.f32.mrf.mxu2  ;;  %v6241_v48 = vld [vmem:[%s6771_s20 + $0x480] sm:$0xff] }
 0x236   : > { %v964_v45 = vpop.f32.mrf.mxu0  ;;  %2044 = vmatpush.msra.mxu2 %v6243_v1  ;;  %v857_v1 = vadd.f32 %v7606_v39, %v7907_v31  ;;  %v6274_v31 = vld [vmem:[%s6771_s20 + $0x588] sm:$0xff] }
 0x237   : > { %v8065_v33 = vpop.f32.mrf.mxu3  ;;  %2149 = vmatpush.msra.mxu3 %v6279_v55  ;;  %v6305_v55 = vld [vmem:[%s6771_s20 + $0x678] sm:$0xff]  ;;  %2413 = vmatpush.msrb.mxu1 %v6321_v6 }
 0x238   : > { %2045 = vmatpush.msra.mxu2 %v6242_v16  ;;  %v6275_v16 = vld [vmem:[%s6771_s20 + $0x590] sm:$0xff]  ;;  %2279 = vmatpush.msrb.mxu0 %v6305_v55  ;;  %v12562_v6 = vld [vmem:[#allocation77_spill] sm:$0xff] }
 0x239   : > { %1422 = vmatmul.f32.gmra.mxu0 %v12555_v30  ;;  %2150 = vmatpush.msra.mxu3 %v6278_v32  ;;  %v6276_v30 = vld [vmem:[%s6771_s20 + $0x598] sm:$0xff]  ;;  %v8072_v29 = vpop.permute.xlu1 %1722  ;;  %v12558_v32 = vld [vmem:[#allocation91_spill] sm:$0xff] }
 0x23a   : > { %2046 = vmatpush.msra.mxu2 %v6241_v48  ;;  %12556 = vst [vmem:[#allocation45_spill] sm:$0xff] %v8072_v29  ;;  %v581_v8 = vadd.f32 %v12559_v60, %v12558_v32  ;;  %v1270_v48 = vadd.f32 %v7926_v14, %v7909_v25  ;;  %v991_v60 = vadd.f32 %v964_v45, %v857_v1  ;;  %v6273_v32 = vld [vmem:[%s6771_s20 + $0x580] sm:$0xff]  ;;  %v1098_v14 = vpop.f32.mrf.mxu1 }
 0x23b   : > { %2151 = vmatpush.msra.mxu3 %v6277_v15  ;;  %v12560_v15 = vld [vmem:[#allocation12_spill] sm:$0xff] }
 0x23c   : > { %1340 = vmatmul.f32.gmra.mxu3 %v12557_v5  ;;  %v1125_v35 = vadd.f32 %v1098_v14, %v991_v60 }
 0x23d   : > { %2152 = vmatpush.msra.mxu3 %v6276_v30  ;;  %v8085_v29 = vpop.f32.mrf.mxu2  ;;  %v718_v30 = vadd.f32 %v12561_v37, %v581_v8  ;;  %v6304_v37 = vld [vmem:[%s6771_s20 + $0x670] sm:$0xff] }
 0x23e   : > { %v1378_v61 = vpop.f32.mrf.mxu0  ;;  %2280 = vmatpush.msrb.mxu0 %v6304_v37  ;;  %v6302_v37 = vld [vmem:[%s6771_s20 + $0x660] sm:$0xff] }
 0x23f   : > { %v8087_v5 = vpop.f32.mrf.mxu3  ;;  %2153 = vmatpush.msra.mxu3 %v6275_v16  ;;  %v8094_v25 = vadd.f32 %v1378_v61, %v1270_v48  ;;  %v1501_v2 = vrot.slane %v718_v30, 6  ;;  %v12564_v61 = vld [vmem:[#allocation95_spill] sm:$0xff]  ;;  %v1276_v48 = vadd.f32 %v7954_v40, %v7937_v50 }
 0x241   : > { %1425 = vmatmul.f32.gmra.mxu0 %v12560_v15  ;;  %2154 = vmatpush.msra.mxu3 %v6274_v31  ;;  %v833_v15 = vadd.f32 %v7606_v39, %v12562_v6  ;;  %v12159_v8 = vrot.slane %v8094_v25, 2  ;;  %v8101_v46 = vpop.permute.xlu1 %1737  ;;  %v12565_v31 = vrot.slane %v8011_v23, 6  ;;  %v6320_v23 = vld [vmem:[%s6771_s20 + $0x6f0] sm:$0xff] }
 0x242   : > { %12563 = vst [vmem:[#allocation8_spill] sm:$0xff] %v8101_v46  ;;  %2414 = vmatpush.msrb.mxu1 %v6320_v23 }
 0x243   : > { %2155 = vmatpush.msra.mxu3 %v6273_v32  ;;  %v967_v45 = vadd.f32 %v12564_v61, %v833_v15  ;;  %v1505_v30 = vsel %vm1503_vm2, %v12565_v31, %v1501_v2  ;;  %v12566_v32 = vld [vmem:[#allocation96_spill] sm:$0xff] }
 0x244   : > { %v1553_v60 = vadd.f32 %v1505_v30, %v1125_v35  ;;  %v6301_v30 = vld [vmem:[%s6771_s20 + $0x658] sm:$0xff] }
 0x245   : > { %v8105_v1 = vpop.f32.mrf.mxu2  ;;  %v1101_v14 = vadd.f32 %v12566_v32, %v967_v45  ;;  %v8140_v32 = vpop.permute.xlu0 %1657 }
 0x246   : > { %v1381_v55 = vpop.f32.mrf.mxu0  ;;  %12569 = vst [vmem:[#allocation91_spill] sm:$0xff] %v8140_v32 }
 0x247   : > { %v1454_v16 = vadd.f32 %v1381_v55, %v1273_v3  ;;  %v8107_v3 = vpop.f32.mrf.mxu3  ;;  %v6303_v55 = vld [vmem:[%s6771_s20 + $0x668] sm:$0xff] }
 0x248   : > { %2281 = vmatpush.msrb.mxu0 %v6303_v55  ;;  %v6319_v55 = vld [vmem:[%s6771_s20 + $0x6e8] sm:$0xff] }
 0x249   : > { %v1555_v0 = vrot.slane %v1454_v16, 2  ;;  %1428 = vmatmul.f32.gmra.mxu0 %v12491_v49  ;;  %v12567_v16 = vrot.slane %v7613_v52, 6  ;;  %v1279_v52 = vadd.f32 %v7970_v36, %v7952_v54  ;;  %v6299_v54 = vld [vmem:[%s6771_s20 + $0x648] sm:$0xff]  ;;  %2415 = vmatpush.msrb.mxu1 %v6319_v55 }
 0x24a   : > { %2282 = vmatpush.msrb.mxu0 %v6302_v37  ;;  %v6297_v37 = vld [vmem:[%s6771_s20 + $0x638] sm:$0xff] }
 0x24b   : > { %v1603_v49 = vsel %vm1579_vm3, %v12159_v8, %v1555_v0  ;;  %v1504_v40 = vsel %vm1503_vm2, %v1501_v2, %v12567_v16  ;;  %v6298_v16 = vld [vmem:[%s6771_s20 + $0x640] sm:$0xff] }
 0x24c   : > { %v1629_v15 = vadd.f32 %v1603_v49, %v1553_v60  ;;  %v1529_v35 = vadd.f32 %v1504_v40, %v1101_v14  ;;  %2283 = vmatpush.msrb.mxu0 %v6301_v30  ;;  %v6300_v60 = vld [vmem:[%s6771_s20 + $0x650] sm:$0xff] }
 0x24e   : > { %v1384_v6 = vpop.f32.mrf.mxu0  ;;  %v1654_v45 = vmax.f32 %v1629_v15, 0.0  ;;  %2284 = vmatpush.msrb.mxu0 %v6300_v60 }
 0x24f   : > { %v1455_v50 = vadd.f32 %v1384_v6, %v1276_v48  ;;  %v8128_v31 = vpop.f32.mrf.mxu3  ;;  %v8135_v48 = vpop.permute.xlu1 %1777 }
 0x250   : > { %12568 = vst [vmem:[#allocation49_spill] sm:$0xff] %v8135_v48  ;;  %v8143_v6 = vmul.f32 %v8135_v48, %v1654_v45  ;;  %2285 = vmatpush.msrb.mxu0 %v6299_v54 }
 0x251   : > { %v1556_v61 = vrot.slane %v1455_v50, 2  ;;  %1431 = vmatmul.f32.gmra.mxu0 %v12495_v57  ;;  %v8137_v57 = vpop.f32.mrf.mxu2 }
 0x252   : > { %v12158_v23 = vrot.slane %v8143_v6, 7  ;;  %2286 = vmatpush.msrb.mxu0 %v6298_v16 }
 0x253   : > { %v1602_v2 = vsel %vm1579_vm3, %v1555_v0, %v1556_v61 }
 0x254   : > { %v1605_v49 = vadd.f32 %v1602_v2, %v1529_v35  ;;  %v1282_v35 = vadd.f32 %v7989_v20, %v7968_v53  ;;  %2287 = vmatpush.msrb.mxu0 %v6297_v37  ;;  %v6296_v2 = vld [vmem:[%s6771_s20 + $0x630] sm:$0xff]  ;;  %v6294_v37 = vld [vmem:[%s6771_s20 + $0x620] sm:$0xff] }
 0x256   : > { %v1630_v14 = vmax.f32 %v1605_v49, 0.0  ;;  %v1387_v15 = vpop.f32.mrf.mxu0  ;;  %v12570_v49 = vld [vmem:[#allocation87_spill] sm:$0xff]  ;;  %2288 = vmatpush.msrb.mxu0 %v6296_v2 }
 0x257   : > { %v1456_v36 = vadd.f32 %v1387_v15, %v1279_v52  ;;  %v8167_v52 = vpop.f32.mrf.mxu3  ;;  %v836_v20 = vadd.f32 %v7606_v39, %v12570_v49  ;;  %v12572_v15 = vld [vmem:[#allocation21_spill] sm:$0xff] }
 0x258   : > { %v8147_v0 = vmul.f32 %v8140_v32, %v1630_v14  ;;  %v12571_v14 = vld [vmem:[#allocation20_spill] sm:$0xff]  ;;  %v12578_v32 = vld [vmem:[#allocation29_spill] sm:$0xff] }
 0x259   : > { %v1557_v40 = vrot.slane %v1456_v36, 2  ;;  %1434 = vmatmul.f32.gmra.mxu0 %v12499_v13  ;;  %v8173_v60 = vpop.f32.mrf.mxu2  ;;  %v518_v54 = vadd.f32 %v12572_v15, %v12571_v14  ;;  %v8178_v36 = vpop.permute.xlu0 %1662  ;;  %v970_v2 = vadd.f32 %v7672_v27, %v836_v20 }
 0x25a   : > { %1955 = vmatmul.f32.vlgmr.msra.gmra.mxu1 %v8147_v0  ;;  %v1805_v50 = vrot.slane %v8147_v0, 7  ;;  %12573 = vst [vmem:[#allocation92_spill] sm:$0xff] %v8178_v36 }
 0x25b   : > { %v1601_v45 = vsel %vm1579_vm3, %v1556_v61, %v1557_v40 }
 0x25c   : > { %v1606_v30 = vadd.f32 %v1601_v45, %v7644_v22  ;;  %v8165_v13 = vsel %vm292_vm0, %v12158_v23, %v1805_v50  ;;  %v6295_v22 = vld [vmem:[%s6771_s20 + $0x628] sm:$0xff]  ;;  %v12574_v45 = vld [vmem:[#allocation24_spill] sm:$0xff] }
 0x25d   : > { %2047 = vmatmul.f32.vlgmr.msra.gmra.mxu2 %v8165_v13  ;;  %2289 = vmatpush.msrb.mxu0 %v6295_v22  ;;  %v8185_v49 = vadd.f32 %v12574_v45, %v518_v54  ;;  %v1285_v22 = vadd.f32 %v8013_v56, %v7984_v51  ;;  %v6292_v54 = vld [vmem:[%s6771_s20 + $0x610] sm:$0xff]  ;;  %v6291_v45 = vld [vmem:[%s6771_s20 + $0x608] sm:$0xff] }
 0x25e   : > { %v1631_v53 = vmax.f32 %v1606_v30, 0.0  ;;  %v1390_v61 = vpop.f32.mrf.mxu0 }
 0x25f   : > { %v1457_v55 = vadd.f32 %v1390_v61, %v1282_v35  ;;  %v12157_v35 = vrot.slane %v8147_v0, 1  ;;  %2290 = vmatpush.msrb.mxu0 %v6294_v37  ;;  %v6293_v61 = vld [vmem:[%s6771_s20 + $0x618] sm:$0xff]  ;;  %v1480_v51 = vrot.slane %v8185_v49, 6  ;;  %v8216_v37 = vpop.f32.mrf.mxu3 }
 0x260   : > { %v8181_v16 = vmul.f32 %v8178_v36, %v1631_v53  ;;  %v6318_v36 = vld [vmem:[%s6771_s20 + $0x6e0] sm:$0xff] }
 0x261   : > { %v1558_v30 = vrot.slane %v1457_v55, 2  ;;  %1437 = vmatmul.f32.gmra.mxu0 %v12505_v47  ;;  %v8224_v8 = vpop.f32.mrf.mxu2  ;;  %2416 = vmatpush.msrb.mxu1 %v6318_v36 }
 0x262   : > { %1958 = vmatmul.f32.gmra.mxu1 %v8181_v16  ;;  %v1806_v14 = vrot.slane %v8181_v16, 7  ;;  %v1856_v53 = vrot.slane %v8181_v16, 1  ;;  %2291 = vmatpush.msrb.mxu0 %v6293_v61  ;;  %v12576_v61 = vld [vmem:[#allocation25_spill] sm:$0xff] }
 0x263   : > { %v1600_v15 = vsel %vm1579_vm3, %v1557_v40, %v1558_v30  ;;  %v1104_v40 = vadd.f32 %v7678_v26, %v970_v2  ;;  %v12579_v2 = vrot.slane %v7635_v11, 6  ;;  %v1288_v11 = vadd.f32 %v8045_v21, %v8006_v18  ;;  %v12583_v21 = vld [vmem:[#allocation15_spill] sm:$0xff] }
 0x264   : > { %v1607_v47 = vadd.f32 %v1600_v15, %v7662_v38  ;;  %v8201_v27 = vsel %vm292_vm0, %v1805_v50, %v1806_v14  ;;  %v8207_v20 = vsel %vm343_vm1, %v12157_v35, %v1856_v53  ;;  %v12575_v38 = vld [vmem:[#allocation89_spill] sm:$0xff]  ;;  %2292 = vmatpush.msrb.mxu0 %v6292_v54  ;;  %v12577_v15 = vld [vmem:[#allocation26_spill] sm:$0xff] }
 0x265   : > { %2050 = vmatmul.f32.gmra.mxu2 %v8201_v27  ;;  %2156 = vmatmul.f32.vlgmr.msra.gmra.mxu3 %v8207_v20  ;;  %v837_v56 = vadd.f32 %v7606_v39, %v12575_v38  ;;  %v521_v35 = vadd.f32 %v12577_v15, %v12576_v61  ;;  %v6290_v38 = vld [vmem:[%s6771_s20 + $0x600] sm:$0xff] }
 0x266   : > { %v1632_v50 = vmax.f32 %v1607_v47, 0.0  ;;  %v1393_v55 = vpop.f32.mrf.mxu0  ;;  %2293 = vmatpush.msrb.mxu0 %v6291_v45  ;;  %v1526_v47 = vsel %vm1503_vm2, %v12579_v2, %v1480_v51  ;;  %v12585_v2 = vld [vmem:[#allocation31_spill] sm:$0xff] }
 0x267   : > { %v1458_v49 = vadd.f32 %v1393_v55, %v1285_v22  ;;  %v698_v26 = vadd.f32 %v12578_v32, %v521_v35  ;;  %v1532_v22 = vadd.f32 %v1526_v47, %v1104_v40  ;;  %v12580_v55 = vld [vmem:[#allocation2_spill] sm:$0xff] }
 0x268   : > { %v8222_v23 = vmul.f32 %v7965_v62, %v1632_v50  ;;  %v971_v50 = vadd.f32 %v12580_v55, %v837_v56  ;;  %2294 = vmatpush.msrb.mxu0 %v6290_v38  ;;  %v12582_v40 = vld [vmem:[#allocation90_spill] sm:$0xff]  ;;  %v12586_v55 = vld [vmem:[#allocation33_spill] sm:$0xff] }
 0x269   : > { %v1559_v54 = vrot.slane %v1458_v49, 2  ;;  %1440 = vmatmul.f32.gmra.mxu0 %v12509_v9  ;;  %v1481_v56 = vrot.slane %v698_v26, 6  ;;  %v838_v18 = vadd.f32 %v7606_v39, %v12582_v40  ;;  %v12584_v38 = vld [vmem:[#allocation30_spill] sm:$0xff]  ;;  %v6317_v26 = vld [vmem:[%s6771_s20 + $0x6d8] sm:$0xff] }
 0x26a   : > { %1961 = vmatmul.f32.gmra.mxu1 %v8222_v23  ;;  %v1807_v61 = vrot.slane %v8222_v23, 7  ;;  %v1857_v45 = vrot.slane %v8222_v23, 1  ;;  %v1105_v15 = vadd.f32 %v12583_v21, %v971_v50  ;;  %v8271_v21 = vpop.f32.mrf.mxu2 }
 0x26b   : > { %v1599_v32 = vsel %vm1579_vm3, %v1558_v30, %v1559_v54  ;;  %v1525_v62 = vsel %vm1503_vm2, %v1480_v51, %v1481_v56  ;;  %2417 = vmatpush.msrb.mxu1 %v6317_v26 }
 0x26c   : > { %v1608_v35 = vadd.f32 %v1599_v32, %v1532_v22  ;;  %v8244_v9 = vsel %vm292_vm0, %v1806_v14, %v1807_v61  ;;  %v8248_v36 = vsel %vm343_vm1, %v1856_v53, %v1857_v45  ;;  %v524_v14 = vadd.f32 %v12585_v2, %v12584_v38  ;;  %v8260_v53 = vpop.f32.mrf.mxu3 }
 0x26d   : > { %12581 = vst [vmem:[#allocation12_spill] sm:$0xff] %v8244_v9  ;;  %2053 = vmatmul.f32.gmra.mxu2 %v8244_v9  ;;  %2159 = vmatmul.f32.gmra.mxu3 %v8248_v36  ;;  %v1533_v50 = vadd.f32 %v1525_v62, %v1105_v15  ;;  %v8285_v15 = vpop.permute.xlu2 %1677 }
 0x26e   : > { %v1633_v30 = vmax.f32 %v1608_v35, 0.0  ;;  %v1396_v49 = vpop.f32.mrf.mxu0  ;;  %v699_v32 = vadd.f32 %v12586_v55, %v524_v14  ;;  %v972_v35 = vadd.f32 %v7710_v63, %v838_v18  ;;  %12588 = vst [vmem:[#allocation77_spill] sm:$0xff] %v8285_v15  ;;  %v12591_v14 = vld [vmem:[#allocation34_spill] sm:$0xff] }
 0x26f   : > { %v1459_v47 = vadd.f32 %v1396_v49, %v1288_v11  ;;  %v12590_v49 = vld [vmem:[#allocation9_spill] sm:$0xff] }
 0x270   : > { %v8258_v22 = vmul.f32 %v7982_v10, %v1633_v30  ;;  %v1291_v30 = vadd.f32 %v8065_v33, %v8037_v17  ;;  %v1482_v18 = vrot.slane %v699_v32, 6  ;;  %v8290_v17 = vld [vmem:[%s7334_s28] ss:$0 sm:$0xff]  ;;  %v12589_v33 = vld [vmem:[#allocation93_spill] sm:$0xff]  ;;  %v1106_v38 = vadd.f32 %v12590_v49, %v972_v35 }
 0x271   : > { %v1560_v39 = vrot.slane %v1459_v47, 2  ;;  %1443 = vmatmul.f32.gmra.mxu0 %v12512_v43  ;;  %v12592_v47 = vld [vmem:[#allocation35_spill] sm:$0xff]  ;;  %v12593_v32 = vld [vmem:[#allocation38_spill] sm:$0xff] }
 0x272   : > { %1964 = vmatmul.f32.gmra.mxu1 %v8258_v22  ;;  %v1808_v11 = vrot.slane %v8258_v22, 7  ;;  %v1858_v40 = vrot.slane %v8258_v22, 1 }
 0x273   : > { %v1598_v51 = vsel %vm1579_vm3, %v1559_v54, %v1560_v39  ;;  %v839_v54 = vadd.f32 %v8290_v17, %v12589_v33 }
 0x274   : > { %v1609_v43 = vadd.f32 %v1598_v51, %v1533_v50  ;;  %v8279_v62 = vsel %vm292_vm0, %v1807_v61, %v1808_v11  ;;  %v8283_v63 = vsel %vm343_vm1, %v1857_v45, %v1858_v40  ;;  %v527_v45 = vadd.f32 %v12592_v47, %v12591_v14  ;;  %v8308_v49 = vpop.f32.mrf.mxu3 }
 0x275   : > { %12587 = vst [vmem:[#allocation94_spill] sm:$0xff] %v8279_v62  ;;  %2056 = vmatmul.f32.gmra.mxu2 %v8279_v62  ;;  %2162 = vmatmul.f32.gmra.mxu3 %v8283_v63  ;;  %v1524_v51 = vsel %vm1503_vm2, %v1481_v56, %v1482_v18  ;;  %v973_v35 = vadd.f32 %v7729_v19, %v839_v54  ;;  %v8322_v54 = vpop.f32.mrf.mxu2 }
 0x276   : > { %v1634_v61 = vmax.f32 %v1609_v43, 0.0  ;;  %v1399_v2 = vpop.f32.mrf.mxu0  ;;  %v700_v50 = vadd.f32 %v12593_v32, %v527_v45  ;;  %v1534_v33 = vadd.f32 %v1524_v51, %v1106_v38  ;;  %v8331_v51 = vpop.permute.xlu2 %1682 }
 0x277   : > { %v1460_v26 = vadd.f32 %v1399_v2, %v1291_v30  ;;  %12599 = vst [vmem:[#allocation96_spill] sm:$0xff] %v8331_v51 }
 0x278   : > { %v8298_v55 = vmul.f32 %v8285_v15, %v1634_v61  ;;  %v1294_v61 = vadd.f32 %v8087_v5, %v8063_v4  ;;  %v1483_v38 = vrot.slane %v700_v50, 6  ;;  %v12595_v4 = vld [vmem:[#allocation6_spill] sm:$0xff]  ;;  %v6316_v50 = vld [vmem:[%s6771_s20 + $0x6d0] sm:$0xff] }
 0x279   : > { %v1561_v10 = vrot.slane %v1460_v26, 2  ;;  %1446 = vmatmul.f32.gmra.mxu0 %v7375_v12  ;;  %v840_v5 = vadd.f32 %v8290_v17, %v12595_v4  ;;  %v12598_v26 = vld [vmem:[#allocation40_spill] sm:$0xff]  ;;  %2418 = vmatpush.msrb.mxu1 %v6316_v50 }
 0x27a   : > { %1967 = vmatmul.f32.gmra.mxu1 %v8298_v55  ;;  %v1809_v43 = vrot.slane %v8298_v55, 7  ;;  %v1859_v30 = vrot.slane %v8298_v55, 1  ;;  %v1523_v48 = vsel %vm1503_vm2, %v1482_v18, %v1483_v38 }
 0x27b   : > { %v1597_v56 = vsel %vm1579_vm3, %v1560_v39, %v1561_v10  ;;  %v12596_v39 = vld [vmem:[#allocation17_spill] sm:$0xff] }
 0x27c   : > { %v1610_v2 = vadd.f32 %v1597_v56, %v1534_v33  ;;  %v8316_v12 = vsel %vm292_vm0, %v1808_v11, %v1809_v43  ;;  %v8320_v19 = vsel %vm343_vm1, %v1858_v40, %v1859_v30  ;;  %v1107_v14 = vadd.f32 %v12596_v39, %v973_v35  ;;  %v12597_v11 = vld [vmem:[#allocation39_spill] sm:$0xff]  ;;  %v12600_v56 = vld [vmem:[#allocation42_spill] sm:$0xff] }
 0x27d   : > { %12594 = vst [vmem:[#allocation95_spill] sm:$0xff] %v8316_v12  ;;  %2059 = vmatmul.f32.gmra.mxu2 %v8316_v12  ;;  %2165 = vmatmul.f32.gmra.mxu3 %v8320_v19  ;;  %v530_v32 = vadd.f32 %v12598_v26, %v12597_v11  ;;  %v12603_v26 = vld [vmem:[#allocation43_spill] sm:$0xff] }
 0x27e   : > { %v1635_v47 = vmax.f32 %v1610_v2, 0.0  ;;  %v1402_v45 = vpop.f32.mrf.mxu0  ;;  %v1535_v35 = vadd.f32 %v1523_v48, %v1107_v14  ;;  %v974_v2 = vadd.f32 %v7747_v24, %v840_v5  ;;  %v8357_v48 = vpop.f32.mrf.mxu3 }
 0x27f   : > { %v1461_v40 = vadd.f32 %v1402_v45, %v1294_v61  ;;  %v701_v15 = vadd.f32 %v12600_v56, %v530_v32  ;;  %v12604_v32 = vld [vmem:[#allocation44_spill] sm:$0xff]  ;;  %v6315_v56 = vld [vmem:[%s6771_s20 + $0x6c8] sm:$0xff] }
 0x280   : > { %v8334_v33 = vmul.f32 %v8331_v51, %v1635_v47  ;;  %v1297_v47 = vadd.f32 %v8107_v3, %v8085_v29  ;;  %v12602_v29 = vld [vmem:[#allocation7_spill] sm:$0xff]  ;;  %v1108_v3 = vadd.f32 %v7753_v7, %v974_v2  ;;  %2419 = vmatpush.msrb.mxu1 %v6315_v56 }
 0x281   : > { %v1562_v4 = vrot.slane %v1461_v40, 2  ;;  %1449 = vmatmul.f32.gmra.mxu0 %v7400_v28  ;;  %v1484_v5 = vrot.slane %v701_v15, 6  ;;  %v8368_v40 = vpop.permute.xlu0 %1687 }
 0x282   : > { %1970 = vmatmul.f32.gmra.mxu1 %v8334_v33  ;;  %v1810_v61 = vrot.slane %v8334_v33, 7  ;;  %v1860_v39 = vrot.slane %v8334_v33, 1  ;;  %12605 = vst [vmem:[#allocation20_spill] sm:$0xff] %v8368_v40 }
 0x283   : > { %v1596_v45 = vsel %vm1579_vm3, %v1561_v10, %v1562_v4  ;;  %v841_v10 = vadd.f32 %v8290_v17, %v12602_v29  ;;  %v1522_v29 = vsel %vm1503_vm2, %v1483_v38, %v1484_v5 }
 0x284   : > { %v1611_v18 = vadd.f32 %v1596_v45, %v1535_v35  ;;  %v8351_v28 = vsel %vm292_vm0, %v1809_v43, %v1810_v61  ;;  %v8355_v24 = vsel %vm343_vm1, %v1859_v30, %v1860_v39  ;;  %v8364_v43 = vpop.f32.mrf.mxu2  ;;  %v533_v30 = vadd.f32 %v12604_v32, %v12603_v26  ;;  %v12607_v35 = vld [vmem:[#allocation46_spill] sm:$0xff] }
 0x285   : > { %12601 = vst [vmem:[#allocation87_spill] sm:$0xff] %v8351_v28  ;;  %2062 = vmatmul.f32.gmra.mxu2 %v8351_v28  ;;  %2168 = vmatmul.f32.gmra.mxu3 %v8355_v24  ;;  %v1536_v2 = vadd.f32 %v1522_v29, %v1108_v3  ;;  %v12613_v29 = vld [vmem:[#allocation48_spill] sm:$0xff] }
 0x286   : > { %v1636_v14 = vmax.f32 %v1611_v18, 0.0  ;;  %v1405_v11 = vpop.f32.mrf.mxu0  ;;  %v702_v45 = vadd.f32 %v12607_v35, %v533_v30  ;;  %v12608_v18 = vld [vmem:[#allocation22_spill] sm:$0xff]  ;;  %v8399_v35 = vpop.f32.mrf.mxu3 }
 0x287   : > { %v1462_v50 = vadd.f32 %v1405_v11, %v1297_v47  ;;  %v975_v51 = vadd.f32 %v12608_v18, %v841_v10  ;;  %v1300_v11 = vadd.f32 %v8128_v31, %v8105_v1  ;;  %v12610_v30 = vld [vmem:[#allocation10_spill] sm:$0xff]  ;;  %v12611_v31 = vld [vmem:[#allocation4_spill] sm:$0xff] }
 0x288   : > { %v8371_v15 = vmul.f32 %v8368_v40, %v1636_v14  ;;  %v1485_v3 = vrot.slane %v702_v45, 6  ;;  %v842_v1 = vadd.f32 %v8290_v17, %v12610_v30 }
 0x289   : > { %v1563_v7 = vrot.slane %v1462_v50, 2  ;;  %2295 = vmatmul.f32.vlgmr.msrb.gmra.mxu0 %v8165_v13  ;;  %v1109_v50 = vadd.f32 %v12611_v31, %v975_v51 }
 0x28a   : > { %12606 = vst [vmem:[#allocation21_spill] sm:$0xff] %v8371_v15  ;;  %1973 = vmatmul.f32.gmra.mxu1 %v8371_v15  ;;  %v1811_v47 = vrot.slane %v8371_v15, 7  ;;  %v1861_v14 = vrot.slane %v8371_v15, 1  ;;  %v1521_v30 = vsel %vm1503_vm2, %v1484_v5, %v1485_v3 }
 0x28b   : > { %v1595_v26 = vsel %vm1579_vm3, %v1562_v4, %v1563_v7  ;;  %v1537_v51 = vadd.f32 %v1521_v30, %v1109_v50  ;;  %v12616_v50 = vld [vmem:[#allocation11_spill] sm:$0xff] }
 0x28c   : > { %v1612_v38 = vadd.f32 %v1595_v26, %v1536_v2  ;;  %v8388_v32 = vsel %vm292_vm0, %v1810_v61, %v1811_v47  ;;  %v8392_v10 = vsel %vm343_vm1, %v1860_v39, %v1861_v14  ;;  %v12612_v61 = vld [vmem:[#allocation47_spill] sm:$0xff]  ;;  %v8406_v45 = vpop.f32.mrf.mxu2  ;;  %v12614_v26 = vld [vmem:[#allocation50_spill] sm:$0xff] }
 0x28d   : > { %12609 = vst [vmem:[#allocation24_spill] sm:$0xff] %v8388_v32  ;;  %2065 = vmatmul.f32.gmra.mxu2 %v8388_v32  ;;  %2171 = vmatmul.f32.gmra.mxu3 %v8392_v10  ;;  %v536_v2 = vadd.f32 %v12613_v29, %v12612_v61 }
 0x28e   : > { %v1637_v4 = vmax.f32 %v1612_v38, 0.0  ;;  %v1408_v56 = vpop.f32.mrf.mxu0  ;;  %v976_v38 = vadd.f32 %v7790_v44, %v842_v1 }
 0x28f   : > { %v1463_v18 = vadd.f32 %v1408_v56, %v1300_v11  ;;  %v703_v40 = vadd.f32 %v12614_v26, %v536_v2  ;;  %v12617_v2 = vld [vmem:[#allocation51_spill] sm:$0xff]  ;;  %v8435_v26 = vpop.permute.xlu2 %1697 }
 0x290   : > { %v8404_v39 = vmul.f32 %v8019_v34, %v1637_v4  ;;  %v1303_v4 = vadd.f32 %v8167_v52, %v8137_v57  ;;  %v843_v57 = vadd.f32 %v8290_v17, %v12616_v50  ;;  %v1110_v52 = vadd.f32 %v7796_v41, %v976_v38  ;;  %12619 = vst [vmem:[#allocation25_spill] sm:$0xff] %v8435_v26 }
 0x291   : > { %v1564_v15 = vrot.slane %v1463_v18, 2  ;;  %2298 = vmatmul.f32.gmra.mxu0 %v8201_v27  ;;  %v1486_v1 = vrot.slane %v703_v40, 6  ;;  %v12618_v18 = vld [vmem:[#allocation52_spill] sm:$0xff]  ;;  %v8440_v40 = vpop.f32.mrf.mxu3 }
 0x292   : > { %1976 = vmatmul.f32.gmra.mxu1 %v8404_v39  ;;  %v1812_v11 = vrot.slane %v8404_v39, 7  ;;  %v1862_v31 = vrot.slane %v8404_v39, 1 }
 0x293   : > { %v1594_v56 = vsel %vm1579_vm3, %v1563_v7, %v1564_v15  ;;  %v1520_v50 = vsel %vm1503_vm2, %v1485_v3, %v1486_v1 }
 0x294   : > { %v1613_v5 = vadd.f32 %v1594_v56, %v1537_v51  ;;  %v8422_v61 = vsel %vm292_vm0, %v1811_v47, %v1812_v11  ;;  %v8426_v44 = vsel %vm343_vm1, %v1861_v14, %v1862_v31  ;;  %v539_v47 = vadd.f32 %v12618_v18, %v12617_v2  ;;  %v6314_v51 = vld [vmem:[%s6771_s20 + $0x6c0] sm:$0xff]  ;;  %v12621_v56 = vld [vmem:[#allocation53_spill] sm:$0xff] }
 0x295   : > { %12615 = vst [vmem:[#allocation89_spill] sm:$0xff] %v8422_v61  ;;  %2068 = vmatmul.f32.gmra.mxu2 %v8422_v61  ;;  %2174 = vmatmul.f32.gmra.mxu3 %v8426_v44  ;;  %v1538_v38 = vadd.f32 %v1520_v50, %v1110_v52  ;;  %v1306_v2 = vadd.f32 %v8216_v37, %v8173_v60  ;;  %v8472_v50 = vpop.permute.xlu0 %1702 }
 0x296   : > { %v1638_v7 = vmax.f32 %v1613_v5, 0.0  ;;  %v1411_v29 = vpop.f32.mrf.mxu0  ;;  %v704_v34 = vadd.f32 %v12621_v56, %v539_v47  ;;  %2420 = vmatpush.msrb.mxu1 %v6314_v51  ;;  %v977_v5 = vadd.f32 %v7807_v59, %v843_v57  ;;  %v12623_v47 = vld [vmem:[#allocation14_spill] sm:$0xff]  ;;  %v12625_v56 = vld [vmem:[#allocation55_spill] sm:$0xff]  ;;  %12626 = vst [vmem:[#allocation2_spill] sm:$0xff] %v8472_v50 }
 0x297   : > { %v1464_v30 = vadd.f32 %v1411_v29, %v1303_v4  ;;  %v8451_v29 = vpop.f32.mrf.mxu2  ;;  %v844_v60 = vadd.f32 %v8290_v17, %v12623_v47  ;;  %v12624_v51 = vld [vmem:[#allocation54_spill] sm:$0xff] }
 0x298   : > { %v8438_v14 = vmul.f32 %v8435_v26, %v1638_v7  ;;  %v1487_v57 = vrot.slane %v704_v34, 6  ;;  %v1111_v37 = vadd.f32 %v7813_v58, %v977_v5  ;;  %v12628_v34 = vld [vmem:[#allocation56_spill] sm:$0xff]  ;;  %v12629_v5 = vld [vmem:[#allocation23_spill] sm:$0xff] }
 0x299   : > { %v1565_v41 = vrot.slane %v1464_v30, 2  ;;  %2301 = vmatmul.f32.gmra.mxu0 %v8244_v9 }
 0x29a   : > { %12620 = vst [vmem:[#allocation26_spill] sm:$0xff] %v8438_v14  ;;  %1979 = vmatmul.f32.gmra.mxu1 %v8438_v14  ;;  %v1813_v4 = vrot.slane %v8438_v14, 7  ;;  %v1863_v7 = vrot.slane %v8438_v14, 1  ;;  %v1519_v26 = vsel %vm1503_vm2, %v1486_v1, %v1487_v57 }
 0x29b   : > { %v1593_v3 = vsel %vm1579_vm3, %v1564_v15, %v1565_v41  ;;  %v1539_v58 = vadd.f32 %v1519_v26, %v1111_v37 }
 0x29c   : > { %v1614_v18 = vadd.f32 %v1593_v3, %v1538_v38  ;;  %v8459_v52 = vsel %vm292_vm0, %v1812_v11, %v1813_v4  ;;  %v8463_v59 = vsel %vm343_vm1, %v1862_v31, %v1863_v7  ;;  %v542_v11 = vadd.f32 %v12625_v56, %v12624_v51 }
 0x29d   : > { %12622 = vst [vmem:[#allocation29_spill] sm:$0xff] %v8459_v52  ;;  %2071 = vmatmul.f32.gmra.mxu2 %v8459_v52  ;;  %2177 = vmatmul.f32.gmra.mxu3 %v8463_v59 }
 0x29e   : > { %v1639_v15 = vmax.f32 %v1614_v18, 0.0  ;;  %v1414_v30 = vpop.f32.mrf.mxu0  ;;  %v705_v3 = vadd.f32 %v12628_v34, %v542_v11  ;;  %v978_v18 = vadd.f32 %v12629_v5, %v844_v60 }
 0x29f   : > { %v1465_v38 = vadd.f32 %v1414_v30, %v1306_v2  ;;  %v8485_v30 = vpop.f32.mrf.mxu3  ;;  %v8499_v37 = vpop.f32.mrf.mxu2 }
 0x2a0   : > { %v8475_v31 = vmul.f32 %v8472_v50, %v1639_v15  ;;  %v1309_v15 = vadd.f32 %v8260_v53, %v8224_v8  ;;  %v1488_v56 = vrot.slane %v705_v3, 6  ;;  %v12632_v8 = vld [vmem:[#allocation16_spill] sm:$0xff]  ;;  %v12638_v3 = vld [vmem:[#allocation59_spill] sm:$0xff] }
 0x2a1   : > { %v1566_v14 = vrot.slane %v1465_v38, 2  ;;  %2304 = vmatmul.f32.gmra.mxu0 %v8279_v62  ;;  %v845_v53 = vadd.f32 %v8290_v17, %v12632_v8 }
 0x2a2   : > { %12627 = vst [vmem:[#allocation90_spill] sm:$0xff] %v8475_v31  ;;  %1982 = vmatmul.f32.gmra.mxu1 %v8475_v31  ;;  %v1814_v47 = vrot.slane %v8475_v31, 7  ;;  %v1864_v2 = vrot.slane %v8475_v31, 1  ;;  %v6313_v31 = vld [vmem:[%s6771_s20 + $0x6b8] sm:$0xff] }
 0x2a3   : > { %v1592_v1 = vsel %vm1579_vm3, %v1565_v41, %v1566_v14  ;;  %v12633_v41 = vld [vmem:[#allocation32_spill] sm:$0xff]  ;;  %2421 = vmatpush.msrb.mxu1 %v6313_v31 }
 0x2a4   : > { %v1615_v51 = vadd.f32 %v1592_v1, %v1539_v58  ;;  %v8493_v26 = vsel %vm292_vm0, %v1813_v4, %v1814_v47  ;;  %v8497_v60 = vsel %vm343_vm1, %v1863_v7, %v1864_v2  ;;  %v1112_v11 = vadd.f32 %v12633_v41, %v978_v18  ;;  %v12634_v4 = vld [vmem:[#allocation57_spill] sm:$0xff]  ;;  %v12635_v58 = vld [vmem:[#allocation58_spill] sm:$0xff]  ;;  %v12636_v7 = vld [vmem:[#allocation124_spill] sm:$0xff] }
 0x2a5   : > { %12630 = vst [vmem:[#allocation15_spill] sm:$0xff] %v8493_v26  ;;  %2074 = vmatmul.f32.gmra.mxu2 %v8493_v26  ;;  %2180 = vmatmul.f32.gmra.mxu3 %v8497_v60  ;;  %v545_v5 = vadd.f32 %v12635_v58, %v12634_v4 }
 0x2a6   : > { %12631 = vst [vmem:[#allocation30_spill] sm:$0xff] %v8497_v60  ;;  %v1640_v38 = vmax.f32 %v1615_v51, 0.0  ;;  %v1417_v34 = vpop.f32.mrf.mxu0  ;;  %v1518_v60 = vsel %vm1503_vm2, %v1487_v57, %v1488_v56  ;;  %v12639_v51 = vld [vmem:[#allocation36_spill] sm:$0xff] }
 0x2a7   : > { %v1466_v1 = vadd.f32 %v1417_v34, %v1309_v15  ;;  %v706_v62 = vadd.f32 %v12638_v3, %v545_v5  ;;  %v1540_v18 = vadd.f32 %v1518_v60, %v1112_v11  ;;  %v979_v8 = vadd.f32 %v12639_v51, %v845_v53  ;;  %v8532_v53 = vpop.f32.mrf.mxu3  ;;  %v12644_v3 = vld [vmem:[#allocation61_spill] sm:$0xff] }
 0x2a8   : > { %v8509_v50 = vmul.f32 %v12636_v7, %v1640_v38  ;;  %v1312_v38 = vadd.f32 %v8308_v49, %v8271_v21  ;;  %v12641_v21 = vld [vmem:[#allocation19_spill] sm:$0xff]  ;;  %v12647_v7 = vld [vmem:[#allocation62_spill] sm:$0xff] }
 0x2a9   : > { %v1567_v9 = vrot.slane %v1466_v1, 2  ;;  %2307 = vmatmul.f32.gmra.mxu0 %v8316_v12  ;;  %v1489_v11 = vrot.slane %v706_v62, 6  ;;  %v846_v49 = vadd.f32 %v8290_v17, %v12641_v21  ;;  %v12643_v1 = vld [vmem:[#allocation60_spill] sm:$0xff] }
 0x2aa   : > { %12637 = vst [vmem:[#allocation31_spill] sm:$0xff] %v8509_v50  ;;  %1985 = vmatmul.f32.gmra.mxu1 %v8509_v50  ;;  %v1815_v15 = vrot.slane %v8509_v50, 7  ;;  %v1865_v41 = vrot.slane %v8509_v50, 1 }
 0x2ab   : > { %v1591_v34 = vsel %vm1579_vm3, %v1566_v14, %v1567_v9  ;;  %v12642_v14 = vld [vmem:[#allocation41_spill] sm:$0xff]  ;;  %v1517_v21 = vsel %vm1503_vm2, %v1488_v56, %v1489_v11 }
 0x2ac   : > { %v1616_v57 = vadd.f32 %v1591_v34, %v1540_v18  ;;  %v8526_v31 = vsel %vm292_vm0, %v1814_v47, %v1815_v15  ;;  %v8530_v60 = vsel %vm343_vm1, %v1864_v2, %v1865_v41  ;;  %v1113_v4 = vadd.f32 %v12642_v14, %v979_v8  ;;  %v8539_v47 = vpop.f32.mrf.mxu2  ;;  %v8543_v18 = vpop.permute.xlu2 %1712  ;;  %v6312_v34 = vld [vmem:[%s6771_s20 + $0x6b0] sm:$0xff]  ;;  %v12648_v14 = vld [vmem:[#allocation97_spill] sm:$0xff] }
 0x2ad   : > { %12640 = vst [vmem:[#allocation33_spill] sm:$0xff] %v8526_v31  ;;  %2077 = vmatmul.f32.gmra.mxu2 %v8526_v31  ;;  %2183 = vmatmul.f32.gmra.mxu3 %v8530_v60  ;;  %v548_v2 = vadd.f32 %v12644_v3, %v12643_v1  ;;  %v980_v12 = vadd.f32 %v12648_v14, %v846_v49  ;;  %v12650_v3 = vld [vmem:[#allocation3_spill] sm:$0xff]  ;;  %v8578_v14 = vpop.permute.xlu0 %1717 }
 0x2ae   : > { %v1641_v58 = vmax.f32 %v1616_v57, 0.0  ;;  %v1420_v5 = vpop.f32.mrf.mxu0  ;;  %12645 = vst [vmem:[#allocation93_spill] sm:$0xff] %v8543_v18  ;;  %2422 = vmatpush.msrb.mxu1 %v6312_v34  ;;  %v1541_v57 = vadd.f32 %v1517_v21, %v1113_v4  ;;  %v12653_v21 = vld [vmem:[#allocation64_spill] sm:$0xff] }
 0x2af   : > { %v1467_v51 = vadd.f32 %v1420_v5, %v1312_v38  ;;  %v707_v50 = vadd.f32 %v12647_v7, %v548_v2  ;;  %v1315_v5 = vadd.f32 %v8357_v48, %v8322_v54  ;;  %v847_v54 = vadd.f32 %v8290_v17, %v12650_v3  ;;  %v12651_v48 = vld [vmem:[#allocation98_spill] sm:$0xff]  ;;  %v8574_v34 = vpop.f32.mrf.mxu3  ;;  %12654 = vst [vmem:[#allocation35_spill] sm:$0xff] %v8578_v14 }
 0x2b0   : > { %v8546_v62 = vmul.f32 %v8543_v18, %v1641_v58  ;;  %v1114_v2 = vadd.f32 %v12651_v48, %v980_v12  ;;  %v12656_v18 = vld [vmem:[#allocation65_spill] sm:$0xff]  ;;  %v12657_v48 = vld [vmem:[#allocation100_spill] sm:$0xff] }
 0x2b1   : > { %v1568_v8 = vrot.slane %v1467_v51, 2  ;;  %2310 = vmatmul.f32.gmra.mxu0 %v8351_v28  ;;  %v1490_v4 = vrot.slane %v707_v50, 6  ;;  %v981_v28 = vadd.f32 %v12657_v48, %v847_v54 }
 0x2b2   : > { %12646 = vst [vmem:[#allocation9_spill] sm:$0xff] %v8546_v62  ;;  %1988 = vmatmul.f32.gmra.mxu1 %v8546_v62  ;;  %v1816_v38 = vrot.slane %v8546_v62, 7  ;;  %v1866_v58 = vrot.slane %v8546_v62, 1 }
 0x2b3   : > { %v1590_v7 = vsel %vm1579_vm3, %v1567_v9, %v1568_v8  ;;  %v1516_v12 = vsel %vm1503_vm2, %v1489_v11, %v1490_v4 }
 0x2b4   : > { %v1617_v56 = vadd.f32 %v1590_v7, %v1541_v57  ;;  %v8563_v1 = vsel %vm292_vm0, %v1815_v15, %v1816_v38  ;;  %v8567_v49 = vsel %vm343_vm1, %v1865_v41, %v1866_v58  ;;  %v12652_v15 = vld [vmem:[#allocation63_spill] sm:$0xff]  ;;  %v8583_v7 = vpop.f32.mrf.mxu2  ;;  %v1542_v3 = vadd.f32 %v1516_v12, %v1114_v2  ;;  %v12662_v12 = vld [vmem:[#allocation66_spill] sm:$0xff] }
 0x2b5   : > { %12649 = vst [vmem:[#allocation34_spill] sm:$0xff] %v8563_v1  ;;  %2080 = vmatmul.f32.gmra.mxu2 %v8563_v1  ;;  %2186 = vmatmul.f32.gmra.mxu3 %v8567_v49  ;;  %v551_v57 = vadd.f32 %v12653_v21, %v12652_v15  ;;  %v12660_v21 = vld [vmem:[#allocation13_spill] sm:$0xff] }
 0x2b6   : > { %v1642_v9 = vmax.f32 %v1617_v56, 0.0  ;;  %v1423_v51 = vpop.f32.mrf.mxu0 }
 0x2b7   : > { %v1468_v41 = vadd.f32 %v1423_v51, %v1315_v5  ;;  %v708_v62 = vadd.f32 %v12656_v18, %v551_v57  ;;  %v1318_v51 = vadd.f32 %v8399_v35, %v8364_v43  ;;  %v848_v43 = vadd.f32 %v8290_v17, %v12660_v21  ;;  %v12661_v35 = vld [vmem:[#allocation101_spill] sm:$0xff] }
 0x2b8   : > { %v8581_v50 = vmul.f32 %v8578_v14, %v1642_v9  ;;  %v1115_v57 = vadd.f32 %v12661_v35, %v981_v28 }
 0x2b9   : > { %v1569_v56 = vrot.slane %v1468_v41, 2  ;;  %2313 = vmatmul.f32.gmra.mxu0 %v8388_v32  ;;  %v1491_v2 = vrot.slane %v708_v62, 6  ;;  %v6311_v62 = vld [vmem:[%s6771_s20 + $0x6a8] sm:$0xff] }
 0x2ba   : > { %12655 = vst [vmem:[#allocation38_spill] sm:$0xff] %v8581_v50  ;;  %1991 = vmatmul.f32.gmra.mxu1 %v8581_v50  ;;  %v1817_v5 = vrot.slane %v8581_v50, 7  ;;  %v1867_v9 = vrot.slane %v8581_v50, 1  ;;  %v12666_v50 = vld [vmem:[#allocation68_spill] sm:$0xff] }
 0x2bb   : > { %v1589_v18 = vsel %vm1579_vm3, %v1568_v8, %v1569_v56  ;;  %2423 = vmatpush.msrb.mxu1 %v6311_v62  ;;  %v12670_v62 = vld [vmem:[#allocation69_spill] sm:$0xff] }
 0x2bc   : > { %v1618_v11 = vadd.f32 %v1589_v18, %v1542_v3  ;;  %v8599_v15 = vsel %vm292_vm0, %v1816_v38, %v1817_v5  ;;  %v8603_v54 = vsel %vm343_vm1, %v1866_v58, %v1867_v9  ;;  %v12663_v3 = vld [vmem:[#allocation67_spill] sm:$0xff]  ;;  %v12664_v18 = vld [vmem:[#allocation45_spill] sm:$0xff]  ;;  %v8615_v58 = vpop.f32.mrf.mxu3 }
 0x2bd   : > { %12658 = vst [vmem:[#allocation6_spill] sm:$0xff] %v8599_v15  ;;  %2083 = vmatmul.f32.gmra.mxu2 %v8599_v15  ;;  %2189 = vmatmul.f32.gmra.mxu3 %v8603_v54  ;;  %v554_v38 = vadd.f32 %v12663_v3, %v12662_v12  ;;  %v12668_v3 = vld [vmem:[#allocation18_spill] sm:$0xff] }
 0x2be   : > { %12659 = vst [vmem:[#allocation17_spill] sm:$0xff] %v8603_v54  ;;  %v1643_v8 = vmax.f32 %v1618_v11, 0.0  ;;  %v1426_v41 = vpop.f32.mrf.mxu0  ;;  %v1515_v54 = vsel %vm1503_vm2, %v1490_v4, %v1491_v2  ;;  %v12667_v11 = vld [vmem:[#allocation103_spill] sm:$0xff] }
 0x2bf   : > { %v1469_v48 = vadd.f32 %v1426_v41, %v1318_v51  ;;  %v709_v32 = vadd.f32 %v12666_v50, %v554_v38  ;;  %v1543_v28 = vadd.f32 %v1515_v54, %v1115_v57  ;;  %v982_v35 = vadd.f32 %v12667_v11, %v848_v43  ;;  %v8626_v41 = vpop.f32.mrf.mxu2  ;;  %v8647_v11 = vpop.permute.xlu2 %1727 }
 0x2c0   : > { %v8613_v14 = vmul.f32 %v12664_v18, %v1643_v8  ;;  %v1321_v50 = vadd.f32 %v8440_v40, %v8406_v45  ;;  %v849_v45 = vadd.f32 %v8290_v17, %v12668_v3  ;;  %v12669_v40 = vld [vmem:[#allocation104_spill] sm:$0xff]  ;;  %12672 = vst [vmem:[#allocation40_spill] sm:$0xff] %v8647_v11  ;;  %v12674_v18 = vld [vmem:[#allocation71_spill] sm:$0xff] }
 0x2c1   : > { %v1570_v21 = vrot.slane %v1469_v48, 2  ;;  %2316 = vmatmul.f32.gmra.mxu0 %v8422_v61  ;;  %v1492_v57 = vrot.slane %v709_v32, 6  ;;  %v1116_v38 = vadd.f32 %v12669_v40, %v982_v35  ;;  %v6310_v32 = vld [vmem:[%s6771_s20 + $0x6a0] sm:$0xff] }
 0x2c2   : > { %12665 = vst [vmem:[#allocation39_spill] sm:$0xff] %v8613_v14  ;;  %1994 = vmatmul.f32.gmra.mxu1 %v8613_v14  ;;  %v1818_v51 = vrot.slane %v8613_v14, 7  ;;  %v1868_v8 = vrot.slane %v8613_v14, 1 }
 0x2c3   : > { %v1588_v4 = vsel %vm1579_vm3, %v1569_v56, %v1570_v21  ;;  %v1514_v61 = vsel %vm1503_vm2, %v1491_v2, %v1492_v57  ;;  %2424 = vmatpush.msrb.mxu1 %v6310_v32 }
 0x2c4   : > { %v1619_v12 = vadd.f32 %v1588_v4, %v1543_v28  ;;  %v8634_v54 = vsel %vm292_vm0, %v1817_v5, %v1818_v51  ;;  %v8638_v43 = vsel %vm343_vm1, %v1867_v9, %v1868_v8  ;;  %v12671_v28 = vld [vmem:[#allocation70_spill] sm:$0xff]  ;;  %v1544_v35 = vadd.f32 %v1514_v61, %v1116_v38 }
 0x2c5   : > { %2086 = vmatmul.f32.gmra.mxu2 %v8634_v54  ;;  %2192 = vmatmul.f32.gmra.mxu3 %v8638_v43  ;;  %v557_v5 = vadd.f32 %v12671_v28, %v12670_v62 }
 0x2c6   : > { %v1644_v56 = vmax.f32 %v1619_v12, 0.0  ;;  %v1429_v48 = vpop.f32.mrf.mxu0  ;;  %v12675_v12 = vld [vmem:[#allocation105_spill] sm:$0xff] }
 0x2c7   : > { %v1470_v4 = vadd.f32 %v1429_v48, %v1321_v50  ;;  %v710_v14 = vadd.f32 %v12674_v18, %v557_v5  ;;  %v983_v40 = vadd.f32 %v12675_v12, %v849_v45  ;;  %v8661_v48 = vpop.f32.mrf.mxu3  ;;  %v1324_v18 = vadd.f32 %v8485_v30, %v8451_v29  ;;  %v8675_v38 = vpop.f32.mrf.mxu2  ;;  %v12677_v29 = vld [vmem:[#allocation27_spill] sm:$0xff] }
 0x2c8   : > { %v8650_v9 = vmul.f32 %v8647_v11, %v1644_v56  ;;  %v850_v30 = vadd.f32 %v8290_v17, %v12677_v29 }
 0x2c9   : > { %v1571_v3 = vrot.slane %v1470_v4, 2  ;;  %2319 = vmatmul.f32.gmra.mxu0 %v8459_v52  ;;  %v1493_v28 = vrot.slane %v710_v14, 6  ;;  %v12683_v14 = vld [vmem:[#allocation74_spill] sm:$0xff] }
 0x2ca   : > { %12673 = vst [vmem:[#allocation42_spill] sm:$0xff] %v8650_v9  ;;  %1997 = vmatmul.f32.gmra.mxu1 %v8650_v9  ;;  %v1819_v50 = vrot.slane %v8650_v9, 7  ;;  %v1869_v56 = vrot.slane %v8650_v9, 1 }
 0x2cb   : > { %v1587_v2 = vsel %vm1579_vm3, %v1570_v21, %v1571_v3  ;;  %v12678_v21 = vld [vmem:[#allocation106_spill] sm:$0xff]  ;;  %v1513_v52 = vsel %vm1503_vm2, %v1492_v57, %v1493_v28 }
 0x2cc   : > { %v1620_v62 = vadd.f32 %v1587_v2, %v1544_v35  ;;  %v8669_v61 = vsel %vm292_vm0, %v1818_v51, %v1819_v50  ;;  %v8673_v45 = vsel %vm343_vm1, %v1868_v8, %v1869_v56  ;;  %v1117_v5 = vadd.f32 %v12678_v21, %v983_v40  ;;  %v12679_v51 = vld [vmem:[#allocation72_spill] sm:$0xff]  ;;  %v12680_v35 = vld [vmem:[#allocation73_spill] sm:$0xff]  ;;  %v8684_v2 = vpop.permute.xlu0 %1732 }
 0x2cd   : > { %12676 = vst [vmem:[#allocation7_spill] sm:$0xff] %v8673_v45  ;;  %2089 = vmatmul.f32.gmra.mxu2 %v8669_v61  ;;  %2195 = vmatmul.f32.gmra.mxu3 %v8673_v45  ;;  %v560_v12 = vadd.f32 %v12680_v35, %v12679_v51 }
 0x2ce   : > { %v1645_v4 = vmax.f32 %v1620_v62, 0.0  ;;  %v1432_v32 = vpop.f32.mrf.mxu0  ;;  %12681 = vst [vmem:[#allocation43_spill] sm:$0xff] %v8684_v2  ;;  %v1545_v40 = vadd.f32 %v1513_v52, %v1117_v5  ;;  %v12684_v62 = vld [vmem:[#allocation107_spill] sm:$0xff] }
 0x2cf   : > { %v1471_v8 = vadd.f32 %v1432_v32, %v1324_v18  ;;  %v8690_v9 = vadd.f32 %v12683_v14, %v560_v12  ;;  %v984_v21 = vadd.f32 %v12684_v62, %v850_v30  ;;  %v8711_v30 = vpop.f32.mrf.mxu3  ;;  %v8719_v14 = vpop.f32.mrf.mxu2 }
 0x2d0   : > { %v8687_v11 = vmul.f32 %v8684_v2, %v1645_v4  ;;  %v1327_v4 = vadd.f32 %v8532_v53, %v8499_v37  ;;  %v12686_v37 = vld [vmem:[#allocation5_spill] sm:$0xff] }
 0x2d1   : > { %v1572_v29 = vrot.slane %v1471_v8, 2  ;;  %2322 = vmatmul.f32.gmra.mxu0 %v8493_v26  ;;  %v1494_v5 = vrot.slane %v8690_v9, 6  ;;  %v851_v53 = vadd.f32 %v8290_v17, %v12686_v37  ;;  %v6337_v26 = vld [vmem:[%s6771_s20 + $0x778] sm:$0xff] }
 0x2d2   : > { %12682 = vst [vmem:[#allocation44_spill] sm:$0xff] %v8687_v11  ;;  %2000 = vmatmul.f32.gmra.mxu1 %v8687_v11  ;;  %v1820_v51 = vrot.slane %v8687_v11, 7  ;;  %v1870_v18 = vrot.slane %v8687_v11, 1  ;;  %v6309_v11 = vld [vmem:[%s6771_s20 + $0x698] sm:$0xff]  ;;  %2547 = vmatpush.msrb.mxu2 %v6337_v26  ;;  %v12693_v26 = vld [vmem:[#allocation28_spill] sm:$0xff] }
 0x2d3   : > { %v1586_v32 = vsel %vm1579_vm3, %v1571_v3, %v1572_v29  ;;  %v12687_v3 = vld [vmem:[#allocation108_spill] sm:$0xff]  ;;  %2425 = vmatpush.msrb.mxu1 %v6309_v11 }
 0x2d4   : > { %v1621_v35 = vadd.f32 %v1586_v32, %v1545_v40  ;;  %v8705_v57 = vsel %vm292_vm0, %v1819_v50, %v1820_v51  ;;  %v8709_v52 = vsel %vm343_vm1, %v1869_v56, %v1870_v18  ;;  %v1118_v12 = vadd.f32 %v12687_v3, %v984_v21  ;;  %v12688_v40 = vld [vmem:[#allocation75_spill] sm:$0xff]  ;;  %v12689_v56 = vld [vmem:[#allocation76_spill] sm:$0xff]  ;;  %v12692_v3 = vld [vmem:[#allocation109_spill] sm:$0xff] }
 0x2d5   : > { %12685 = vst [vmem:[#allocation46_spill] sm:$0xff] %v8709_v52  ;;  %2092 = vmatmul.f32.gmra.mxu2 %v8705_v57  ;;  %2198 = vmatmul.f32.gmra.mxu3 %v8709_v52  ;;  %v563_v62 = vadd.f32 %v12689_v56, %v12688_v40  ;;  %v12691_v52 = vld [vmem:[#allocation78_spill] sm:$0xff]  ;;  %v1512_v21 = vsel %vm1503_vm2, %v1493_v28, %v1494_v5 }
 0x2d6   : > { %v1646_v50 = vmax.f32 %v1621_v35, 0.0  ;;  %v1435_v8 = vpop.f32.mrf.mxu0  ;;  %v1546_v37 = vadd.f32 %v1512_v21, %v1118_v12  ;;  %v985_v40 = vadd.f32 %v12692_v3, %v851_v53  ;;  %v12696_v21 = vld [vmem:[#allocation80_spill] sm:$0xff] }
 0x2d7   : > { %v1472_v32 = vadd.f32 %v1435_v8, %v1327_v4  ;;  %v1956_v2 = vpop.f32.mrf.mxu1  ;;  %v8729_v45 = vadd.f32 %v12691_v52, %v563_v62  ;;  %v1330_v52 = vadd.f32 %v8574_v34, %v8539_v47  ;;  %v852_v47 = vadd.f32 %v8290_v17, %v12693_v26  ;;  %v12694_v34 = vld [vmem:[#allocation110_spill] sm:$0xff] }
 0x2d8   : > { %v8724_v9 = vmul.f32 %v8101_v46, %v1646_v50 }
 0x2d9   : > { %v1573_v35 = vrot.slane %v1472_v32, 2  ;;  %2325 = vmatmul.f32.gmra.mxu0 %v8526_v31  ;;  %v1495_v12 = vrot.slane %v8729_v45, 6  ;;  %v12695_v32 = vld [vmem:[#allocation79_spill] sm:$0xff]  ;;  %v12699_v31 = vld [vmem:[#allocation81_spill] sm:$0xff] }
 0x2da   : > { %12690 = vst [vmem:[#allocation22_spill] sm:$0xff] %v8724_v9  ;;  %2003 = vmatmul.f32.gmra.mxu1 %v8724_v9  ;;  %v1821_v4 = vrot.slane %v8724_v9, 7  ;;  %v1871_v50 = vrot.slane %v8724_v9, 1  ;;  %v6308_v9 = vld [vmem:[%s6771_s20 + $0x690] sm:$0xff] }
 0x2db   : > { %v1585_v28 = vsel %vm1579_vm3, %v1572_v29, %v1573_v35  ;;  %v1119_v29 = vadd.f32 %v12694_v34, %v985_v40  ;;  %v1511_v40 = vsel %vm1503_vm2, %v1494_v5, %v1495_v12  ;;  %2426 = vmatpush.msrb.mxu1 %v6308_v9 }
 0x2dc   : > { %v1622_v8 = vadd.f32 %v1585_v28, %v1546_v37  ;;  %v8744_v11 = vsel %vm292_vm0, %v1820_v51, %v1821_v4  ;;  %v8748_v53 = vsel %vm343_vm1, %v1870_v18, %v1871_v50  ;;  %v8756_v51 = vpop.f32.mrf.mxu3  ;;  %v566_v37 = vadd.f32 %v12696_v21, %v12695_v32  ;;  %v8760_v18 = vpop.permute.xlu2 %1742  ;;  %v12700_v21 = vld [vmem:[#allocation111_spill] sm:$0xff] }
 0x2dd   : > { %2095 = vmatmul.f32.gmra.mxu2 %v8744_v11  ;;  %2201 = vmatmul.f32.gmra.mxu3 %v8748_v53  ;;  %12697 = vst [vmem:[#allocation10_spill] sm:$0xff] %v8760_v18  ;;  %v1547_v32 = vadd.f32 %v1511_v40, %v1119_v29 }
 0x2de   : > { %v1647_v56 = vmax.f32 %v1622_v8, 0.0  ;;  %v1438_v62 = vpop.f32.mrf.mxu0  ;;  %v8767_v26 = vadd.f32 %v12699_v31, %v566_v37  ;;  %v1333_v31 = vadd.f32 %v8615_v58, %v8583_v7  ;;  %v12701_v7 = vld [vmem:[#allocation82_spill] sm:$0xff]  ;;  %v12702_v58 = vld [vmem:[#allocation83_spill] sm:$0xff] }
 0x2df   : > { %v1473_v3 = vadd.f32 %v1438_v62, %v1330_v52  ;;  %v1959_v45 = vpop.f32.mrf.mxu1  ;;  %v986_v52 = vadd.f32 %v12700_v21, %v852_v47  ;;  %v569_v47 = vadd.f32 %v12702_v58, %v12701_v7  ;;  %v8796_v21 = vpop.permute.xlu0 %1747 }
 0x2e0   : > { %v8763_v28 = vmul.f32 %v8760_v18, %v1647_v56  ;;  %v2048_v46 = vpop.f32.mrf.mxu2  ;;  %v1496_v9 = vrot.slane %v8767_v26, 6  ;;  %12705 = vst [vmem:[#allocation47_spill] sm:$0xff] %v8796_v21  ;;  %v12706_v26 = vld [vmem:[#allocation84_spill] sm:$0xff] }
 0x2e1   : > { %v1574_v8 = vrot.slane %v1473_v3, 2  ;;  %v2049_v34 = vadd.f32 %v2048_v46, %v1956_v2  ;;  %2328 = vmatmul.f32.gmra.mxu0 %v8563_v1  ;;  %v12704_v3 = vld [vmem:[#allocation112_spill] sm:$0xff]  ;;  %v8801_v18 = vadd.f32 %v12706_v26, %v569_v47  ;;  %v6335_v1 = vld [vmem:[%s6771_s20 + $0x768] sm:$0xff] }
 0x2e2   : > { %12698 = vst [vmem:[#allocation4_spill] sm:$0xff] %v8763_v28  ;;  %2006 = vmatmul.f32.gmra.mxu1 %v8763_v28  ;;  %v1822_v56 = vrot.slane %v8763_v28, 7  ;;  %v1872_v62 = vrot.slane %v8763_v28, 1 }
 0x2e3   : > { %v1584_v5 = vsel %vm1579_vm3, %v1573_v35, %v1574_v8  ;;  %v12703_v35 = vld [vmem:[#allocation37_spill] sm:$0xff] }
 0x2e4   : > { %v1623_v37 = vadd.f32 %v1584_v5, %v1547_v32  ;;  %v8782_v46 = vsel %vm292_vm0, %v1821_v4, %v1822_v56  ;;  %v8786_v2 = vsel %vm343_vm1, %v1871_v50, %v1872_v62  ;;  %v853_v29 = vadd.f32 %v8290_v17, %v12703_v35  ;;  %v6336_v35 = vld [vmem:[%s6771_s20 + $0x770] sm:$0xff] }
 0x2e5   : > { %2098 = vmatmul.f32.gmra.mxu2 %v8782_v46  ;;  %2204 = vmatmul.f32.gmra.mxu3 %v8786_v2  ;;  %v1120_v4 = vadd.f32 %v12704_v3, %v986_v52  ;;  %v1510_v52 = vsel %vm1503_vm2, %v1495_v12, %v1496_v9  ;;  %v1336_v12 = vadd.f32 %v8661_v48, %v8626_v41  ;;  %v12710_v41 = vld [vmem:[#allocation99_spill] sm:$0xff]  ;;  %v12711_v48 = vld [vmem:[#allocation114_spill] sm:$0xff] }
 0x2e6   : > { %v1648_v40 = vmax.f32 %v1623_v37, 0.0  ;;  %v1441_v32 = vpop.f32.mrf.mxu0  ;;  %2548 = vmatpush.msrb.mxu2 %v6336_v35 }
 0x2e7   : > { %v8798_v50 = vadd.f32 %v1441_v32, %v1333_v31  ;;  %v1962_v5 = vpop.f32.mrf.mxu1  ;;  %v1548_v47 = vadd.f32 %v1510_v52, %v1120_v4  ;;  %v12708_v32 = vld [vmem:[#allocation113_spill] sm:$0xff]  ;;  %v6334_v4 = vld [vmem:[%s6771_s20 + $0x760] sm:$0xff] }
 0x2e8   : > { %v8804_v28 = vmul.f32 %v8796_v21, %v1648_v40  ;;  %v2051_v7 = vpop.f32.mrf.mxu2  ;;  %v2157_v58 = vpop.f32.mrf.mxu3  ;;  %v987_v40 = vadd.f32 %v12708_v32, %v853_v29  ;;  %2549 = vmatpush.msrb.mxu2 %v6335_v1  ;;  %v854_v1 = vadd.f32 %v8290_v17, %v12710_v41  ;;  %v12712_v32 = vld [vmem:[#allocation85_spill] sm:$0xff]  ;;  %v12715_v41 = vrot.slane %v8801_v18, 6 }
 0x2e9   : > { %v1575_v37 = vrot.slane %v8798_v50, 2  ;;  %v2052_v31 = vadd.f32 %v2051_v7, %v1959_v45  ;;  %v8810_v3 = vadd.f32 %v2157_v58, %v2049_v34  ;;  %2331 = vmatmul.f32.gmra.mxu0 %v8599_v15  ;;  %v6307_v34 = vld [vmem:[%s6771_s20 + $0x688] sm:$0xff]  ;;  %v12716_v15 = vld [vmem:[#allocation88_spill] sm:$0xff] }
 0x2ea   : > { %12707 = vst [vmem:[#allocation48_spill] sm:$0xff] %v8804_v28  ;;  %2009 = vmatmul.f32.gmra.mxu1 %v8804_v28  ;;  %v1823_v26 = vrot.slane %v8804_v28, 7  ;;  %v1873_v21 = vrot.slane %v8804_v28, 1  ;;  %2550 = vmatpush.msrb.mxu2 %v6334_v4 }
 0x2eb   : > { %v1583_v45 = vsel %vm1579_vm3, %v1574_v8, %v1575_v37  ;;  %2427 = vmatpush.msrb.mxu1 %v6307_v34  ;;  %v1121_v8 = vadd.f32 %v12711_v48, %v987_v40  ;;  %v8842_v34 = vpop.permute.xlu2 %1752  ;;  %v1509_v40 = vsel %vm1503_vm2, %v1496_v9, %v12715_v41 }
 0x2ec   : > { %v1624_v50 = vadd.f32 %v1583_v45, %v1548_v47  ;;  %v8827_v7 = vsel %vm292_vm0, %v1822_v56, %v1823_v26  ;;  %v8831_v58 = vsel %vm343_vm1, %v1872_v62, %v1873_v21  ;;  %v6333_v56 = vld [vmem:[%s6771_s20 + $0x758] sm:$0xff]  ;;  %v12713_v62 = vld [vmem:[#allocation86_spill] sm:$0xff]  ;;  %12714 = vst [vmem:[#allocation11_spill] sm:$0xff] %v8842_v34 }
 0x2ed   : > { %12709 = vst [vmem:[#allocation50_spill] sm:$0xff] %v8831_v58  ;;  %2101 = vmatmul.f32.gmra.mxu2 %v8827_v7  ;;  %2207 = vmatmul.f32.gmra.mxu3 %v8831_v58  ;;  %v6369_v47 = vld [vmem:[%s6771_s20 + $0x878] sm:$0xff]  ;;  %v572_v45 = vadd.f32 %v12713_v62, %v12712_v32  ;;  %v6332_v32 = vld [vmem:[%s6771_s20 + $0x750] sm:$0xff]  ;;  %v1549_v9 = vadd.f32 %v1509_v40, %v1121_v8  ;;  %v6366_v40 = vld [vmem:[%s6771_s20 + $0x860] sm:$0xff] }
 0x2ee   : > { %v1649_v35 = vmax.f32 %v1624_v50, 0.0  ;;  %v1444_v52 = vpop.f32.mrf.mxu0  ;;  %2698 = vmatpush.msrb.mxu3 %v6369_v47  ;;  %2551 = vmatpush.msrb.mxu2 %v6333_v56  ;;  %v6368_v62 = vld [vmem:[%s6771_s20 + $0x870] sm:$0xff] }
 0x2ef   : > { %v8844_v29 = vadd.f32 %v1444_v52, %v1336_v12  ;;  %v1965_v28 = vpop.f32.mrf.mxu1  ;;  %v8856_v12 = vadd.f32 %v12716_v15, %v572_v45  ;;  %v6331_v45 = vld [vmem:[%s6771_s20 + $0x748] sm:$0xff] }
 0x2f0   : > { %v8851_v50 = vmul.f32 %v8842_v34, %v1649_v35  ;;  %v2054_v4 = vpop.f32.mrf.mxu2  ;;  %v2160_v48 = vpop.f32.mrf.mxu3  ;;  %2699 = vmatpush.msrb.mxu3 %v6368_v62  ;;  %v12717_v35 = vld [vmem:[#allocation116_spill] sm:$0xff]  ;;  %2552 = vmatpush.msrb.mxu2 %v6332_v32  ;;  %v12720_v62 = vld [vmem:[#allocation117_spill] sm:$0xff] }
 0x2f1   : > { %v1576_v52 = vrot.slane %v8844_v29, 2  ;;  %v2055_v47 = vadd.f32 %v2054_v4, %v1962_v5  ;;  %v8859_v58 = vadd.f32 %v2160_v48, %v2052_v31  ;;  %2334 = vmatmul.f32.gmra.mxu0 %v8634_v54  ;;  %v988_v41 = vadd.f32 %v12717_v35, %v854_v1  ;;  %v6367_v29 = vld [vmem:[%s6771_s20 + $0x868] sm:$0xff]  ;;  %v6330_v1 = vld [vmem:[%s6771_s20 + $0x740] sm:$0xff] }
 0x2f2   : > { %2012 = vmatmul.f32.gmra.mxu1 %v8851_v50  ;;  %v1824_v56 = vrot.slane %v8851_v50, 7  ;;  %v1874_v15 = vrot.slane %v8851_v50, 1  ;;  %v1339_v5 = vadd.f32 %v8711_v30, %v8675_v38  ;;  %v12243_v31 = vrot.slane %v8810_v3, 6  ;;  %2700 = vmatpush.msrb.mxu3 %v6367_v29  ;;  %v6365_v29 = vld [vmem:[%s6771_s20 + $0x858] sm:$0xff] }
 0x2f3   : > { %v1582_v4 = vsel %vm1579_vm3, %v1575_v37, %v1576_v52  ;;  %v3017_v8 = vrot.slane %v8859_v58, 6  ;;  %2553 = vmatpush.msrb.mxu2 %v6331_v45  ;;  %v6329_v45 = vld [vmem:[%s6771_s20 + $0x738] sm:$0xff] }
 0x2f4   : > { %v1625_v48 = vadd.f32 %v1582_v4, %v1549_v9  ;;  %v8878_v32 = vsel %vm292_vm0, %v1823_v26, %v1824_v56  ;;  %v8882_v38 = vsel %vm343_vm1, %v1873_v21, %v1874_v15  ;;  %v12719_v26 = vld [vmem:[#allocation102_spill] sm:$0xff]  ;;  %v1122_v21 = vadd.f32 %v12720_v62, %v988_v41  ;;  %2701 = vmatpush.msrb.mxu3 %v6366_v40  ;;  %v8898_v4 = vpop.permute.xlu0 %1757  ;;  %v6328_v41 = vld [vmem:[%s6771_s20 + $0x730] sm:$0xff] }
 0x2f5   : > { %2104 = vmatmul.f32.gmra.mxu2 %v8878_v32  ;;  %2210 = vmatmul.f32.gmra.mxu3 %v8882_v38  ;;  %v8891_v37 = vsel %vm1503_vm2, %v12243_v31, %v3017_v8  ;;  %v855_v58 = vadd.f32 %v8290_v17, %v12719_v26  ;;  %12721 = vst [vmem:[#allocation52_spill] sm:$0xff] %v8898_v4  ;;  %v6306_v31 = vld [vmem:[%s6771_s20 + $0x680] sm:$0xff]  ;;  %v12723_v40 = vrot.slane %v8801_v18, 6 }
 0x2f6   : > { %12718 = vst [vmem:[#allocation51_spill] sm:$0xff] %v8891_v37  ;;  %v1650_v9 = vmax.f32 %v1625_v48, 0.0  ;;  %v1447_v35 = vpop.f32.mrf.mxu0  ;;  %2554 = vmatpush.msrb.mxu2 %v6330_v1  ;;  %2428 = vmatpush.msrb.mxu1 %v6306_v31  ;;  %v6364_v48 = vld [vmem:[%s6771_s20 + $0x850] sm:$0xff]  ;;  %v12722_v1 = vrot.slane %v8856_v12, 6 }
 0x2f7   : > { %v8900_v30 = vadd.f32 %v1447_v35, %v1339_v5  ;;  %v1968_v34 = vpop.f32.mrf.mxu1  ;;  %2702 = vmatpush.msrb.mxu3 %v6365_v29 }
 0x2f8   : > { %v8904_v37 = vmul.f32 %v8898_v4, %v1650_v9  ;;  %v2057_v17 = vpop.f32.mrf.mxu2  ;;  %v2163_v26 = vpop.f32.mrf.mxu3  ;;  %2555 = vmatpush.msrb.mxu2 %v6329_v45  ;;  %v1508_v5 = vsel %vm1503_vm2, %v12723_v40, %v12722_v1  ;;  %v12724_v45 = vld [vmem:[#allocation119_spill] sm:$0xff] }
 0x2f9   : > { %v1577_v62 = vrot.slane %v8900_v30, 2  ;;  %v2058_v35 = vadd.f32 %v2057_v17, %v1965_v28  ;;  %v8915_v9 = vadd.f32 %v2163_v26, %v2055_v47  ;;  %2337 = vmatmul.f32.gmra.mxu0 %v8669_v61  ;;  %v1550_v31 = vadd.f32 %v1508_v5, %v1122_v21  ;;  %v6327_v30 = vld [vmem:[%s6771_s20 + $0x728] sm:$0xff]  ;;  %2703 = vmatpush.msrb.mxu3 %v6364_v48  ;;  %v6326_v21 = vld [vmem:[%s6771_s20 + $0x720] sm:$0xff]  ;;  %v6325_v5 = vld [vmem:[%s6771_s20 + $0x718] sm:$0xff] }
 0x2fa   : > { %v989_v4 = vadd.f32 %v12724_v45, %v855_v58  ;;  %2015 = vmatmul.f32.gmra.mxu1 %v8904_v37  ;;  %v1825_v18 = vrot.slane %v8904_v37, 7  ;;  %v1875_v1 = vrot.slane %v8904_v37, 1  ;;  %2556 = vmatpush.msrb.mxu2 %v6328_v41  ;;  %v1342_v28 = vadd.f32 %v8756_v51, %v8719_v14  ;;  %v6363_v58 = vld [vmem:[%s6771_s20 + $0x848] sm:$0xff]  ;;  %v6362_v14 = vld [vmem:[%s6771_s20 + $0x840] sm:$0xff]  ;;  %v6361_v45 = vld [vmem:[%s6771_s20 + $0x838] sm:$0xff] }
 0x2fb   : > { %v1581_v47 = vsel %vm1579_vm3, %v1576_v52, %v1577_v62  ;;  %v3018_v29 = vrot.slane %v8915_v9, 6  ;;  %v12726_v52 = vld [vmem:[#allocation120_spill] sm:$0xff]  ;;  %2704 = vmatpush.msrb.mxu3 %v6363_v58  ;;  %v12730_v58 = vrot.slane %v8856_v12, 6 }
 0x2fc   : > { %v1626_v17 = vadd.f32 %v1581_v47, %v1550_v31  ;;  %v8932_v26 = vsel %vm292_vm0, %v1824_v56, %v1825_v18  ;;  %v8936_v41 = vsel %vm343_vm1, %v1874_v15, %v1875_v1  ;;  %2557 = vmatpush.msrb.mxu2 %v6327_v30  ;;  %v1123_v48 = vadd.f32 %v12726_v52, %v989_v4  ;;  %v8947_v15 = vpop.permute.xlu1 %1762  ;;  %v12728_v4 = vld [vmem:[#allocation122_spill] sm:$0xff] }
 0x2fd   : > { %2107 = vmatmul.f32.gmra.mxu2 %v8932_v26  ;;  %2213 = vmatmul.f32.gmra.mxu3 %v8936_v41  ;;  %v8943_v51 = vsel %vm1503_vm2, %v3017_v8, %v3018_v29  ;;  %12727 = vst [vmem:[#allocation14_spill] sm:$0xff] %v8947_v15 }
 0x2fe   : > { %12725 = vst [vmem:[#allocation53_spill] sm:$0xff] %v8943_v51  ;;  %v1651_v56 = vmax.f32 %v1626_v17, 0.0  ;;  %v1450_v40 = vpop.f32.mrf.mxu0  ;;  %2558 = vmatpush.msrb.mxu2 %v6326_v21  ;;  %2705 = vmatpush.msrb.mxu3 %v6362_v14  ;;  %v6324_v51 = vld [vmem:[%s6771_s20 + $0x710] sm:$0xff]  ;;  %v12729_v17 = vrot.slane %v12728_v4, 6  ;;  %v12732_v4 = vld [vmem:[#allocation123_spill] sm:$0xff] }
 0x2ff   : > { %v1477_v9 = vadd.f32 %v1450_v40, %v1342_v28  ;;  %v1971_v31 = vpop.f32.mrf.mxu1 }
 0x300   : > { %v8951_v30 = vmul.f32 %v8947_v15, %v1651_v56  ;;  %v2060_v47 = vpop.f32.mrf.mxu2  ;;  %v2166_v8 = vpop.f32.mrf.mxu3  ;;  %2559 = vmatpush.msrb.mxu2 %v6325_v5  ;;  %v1507_v21 = vsel %vm1503_vm2, %v12730_v58, %v12729_v17  ;;  %v6360_v56 = vld [vmem:[%s6771_s20 + $0x830] sm:$0xff]  ;;  %2706 = vmatpush.msrb.mxu3 %v6361_v45  ;;  %v6385_v58 = vld [vmem:[%s6771_s20 + $0x8f8] sm:$0xff] }
 0x301   : > { %v1578_v28 = vrot.slane %v1477_v9, 2  ;;  %v2061_v52 = vadd.f32 %v2060_v47, %v1968_v34  ;;  %v2235_v40 = vadd.f32 %v2166_v8, %v2058_v35  ;;  %2340 = vmatmul.f32.gmra.mxu0 %v8705_v57  ;;  %v1551_v15 = vadd.f32 %v1507_v21, %v1123_v48  ;;  %v6353_v48 = vld [vmem:[%s6771_s20 + $0x7f8] sm:$0xff]  ;;  %v6323_v47 = vld [vmem:[%s6771_s20 + $0x708] sm:$0xff]  ;;  %2899 = vmatpush.msra.mxu1 %v6385_v58 }
 0x302   : > { %2018 = vmatmul.f32.gmra.mxu1 %v8951_v30  ;;  %v1826_v14 = vrot.slane %v8951_v30, 7  ;;  %v1876_v12 = vrot.slane %v8951_v30, 1  ;;  %v12731_v34 = vrot.slane %v8094_v25, 2  ;;  %2560 = vmatpush.msrb.mxu2 %v6324_v51  ;;  %v6359_v25 = vld [vmem:[%s6771_s20 + $0x828] sm:$0xff]  ;;  %v6322_v51 = vld [vmem:[%s6771_s20 + $0x700] sm:$0xff] }
 0x303   : > { %v1580_v5 = vsel %vm1579_vm3, %v1577_v62, %v1578_v28  ;;  %v3019_v9 = vrot.slane %v2235_v40, 6  ;;  %2707 = vmatpush.msrb.mxu3 %v6360_v56  ;;  %2790 = vmatpush.msra.mxu0 %v6353_v48 }
 0x304   : > { %v1604_v35 = vsel %vm1579_vm3, %v1578_v28, %v12731_v34  ;;  %v1627_v8 = vadd.f32 %v1580_v5, %v1551_v15  ;;  %v8976_v45 = vsel %vm292_vm0, %v1825_v18, %v1826_v14  ;;  %v8980_v62 = vsel %vm343_vm1, %v1875_v1, %v1876_v12  ;;  %2561 = vmatpush.msrb.mxu2 %v6323_v47  ;;  %v6358_v18 = vld [vmem:[%s6771_s20 + $0x820] sm:$0xff]  ;;  %v8992_v28 = vpop.permute.xlu2 %1767 }
 0x305   : > { %v1628_v17 = vadd.f32 %v1604_v35, %v12732_v4  ;;  %2110 = vmatmul.f32.gmra.mxu2 %v8976_v45  ;;  %2216 = vmatmul.f32.gmra.mxu3 %v8980_v62  ;;  %v8989_v15 = vsel %vm1503_vm2, %v3018_v29, %v3019_v9  ;;  %12734 = vst [vmem:[#allocation55_spill] sm:$0xff] %v8992_v28  ;;  %v6357_v35 = vld [vmem:[%s6771_s20 + $0x818] sm:$0xff]  ;;  %v9002_v4 = vpop.permute.xlu0 %1772 }
 0x306   : > { %12733 = vst [vmem:[#allocation54_spill] sm:$0xff] %v8989_v15  ;;  %v1652_v21 = vmax.f32 %v1627_v8, 0.0  ;;  %2708 = vmatpush.msrb.mxu3 %v6359_v25  ;;  %2562 = vmatpush.msrb.mxu2 %v6322_v51  ;;  %v6356_v25 = vld [vmem:[%s6771_s20 + $0x810] sm:$0xff]  ;;  %v6355_v51 = vld [vmem:[%s6771_s20 + $0x808] sm:$0xff] }
 0x307   : > { %v1974_v1 = vpop.f32.mrf.mxu1  ;;  %v1653_v40 = vmax.f32 %v1628_v17, 0.0  ;;  %12735 = vst [vmem:[#allocation56_spill] sm:$0xff] %v9002_v4  ;;  %v6348_v15 = vld [vmem:[%s6771_s20 + $0x7d0] sm:$0xff] }
 0x308   : > { %v8995_v56 = vmul.f32 %v8992_v28, %v1652_v21  ;;  %v2063_v5 = vpop.f32.mrf.mxu2  ;;  %v2169_v34 = vpop.f32.mrf.mxu3  ;;  %2709 = vmatpush.msrb.mxu3 %v6358_v18  ;;  %v6352_v21 = vld [vmem:[%s6771_s20 + $0x7f0] sm:$0xff] }
 0x309   : > { %v2064_v29 = vadd.f32 %v2063_v5, %v1971_v31  ;;  %v2236_v8 = vadd.f32 %v2169_v34, %v2061_v52  ;;  %2343 = vmatmul.f32.gmra.mxu0 %v8744_v11  ;;  %v9006_v31 = vmul.f32 %v9002_v4, %v1653_v40  ;;  %v6354_v5 = vld [vmem:[%s6771_s20 + $0x800] sm:$0xff] }
 0x30a   : > { %2021 = vmatmul.f32.gmra.mxu1 %v8995_v56  ;;  %v1827_v48 = vrot.slane %v8995_v56, 7  ;;  %v1877_v47 = vrot.slane %v8995_v56, 1  ;;  %2710 = vmatpush.msrb.mxu3 %v6357_v35 }
 0x30b   : > { %v3020_v17 = vrot.slane %v2236_v8, 6  ;;  %12736 = vst [vmem:[#allocation23_spill] sm:$0xff] %v9006_v31  ;;  %2791 = vmatpush.msra.mxu0 %v6352_v21  ;;  %v1878_v8 = vrot.slane %v9006_v31, 1 }
 0x30c   : > { %v9010_v52 = vsel %vm292_vm0, %v1826_v14, %v1827_v48  ;;  %v9014_v58 = vsel %vm343_vm1, %v1876_v12, %v1877_v47  ;;  %2711 = vmatpush.msrb.mxu3 %v6356_v25  ;;  %v6384_v14 = vld [vmem:[%s6771_s20 + $0x8f0] sm:$0xff]  ;;  %v1828_v12 = vrot.slane %v9006_v31, 7 }
 0x30d   : > { %2113 = vmatmul.f32.gmra.mxu2 %v9010_v52  ;;  %2219 = vmatmul.f32.gmra.mxu3 %v9014_v58  ;;  %v9022_v18 = vsel %vm1503_vm2, %v3019_v9, %v3020_v17  ;;  %v9036_v21 = vsel %vm343_vm1, %v1877_v47, %v1878_v8  ;;  %v6350_v47 = vld [vmem:[%s6771_s20 + $0x7e0] sm:$0xff] }
 0x30e   : > { %12737 = vst [vmem:[#allocation16_spill] sm:$0xff] %v9022_v18  ;;  %2712 = vmatpush.msrb.mxu3 %v6355_v51  ;;  %2900 = vmatpush.msra.mxu1 %v6384_v14  ;;  %v9032_v25 = vsel %vm292_vm0, %v1827_v48, %v1828_v12  ;;  %v6383_v18 = vld [vmem:[%s6771_s20 + $0x8e8] sm:$0xff] }
 0x30f   : > { %v1977_v40 = vpop.f32.mrf.mxu1 }
 0x310   : > { %v2066_v34 = vpop.f32.mrf.mxu2  ;;  %v2172_v35 = vpop.f32.mrf.mxu3  ;;  %2713 = vmatpush.msrb.mxu3 %v6354_v5  ;;  %2901 = vmatpush.msra.mxu1 %v6383_v18 }
 0x311   : > { %v2067_v4 = vadd.f32 %v2066_v34, %v1974_v1  ;;  %v2237_v28 = vadd.f32 %v2172_v35, %v2064_v29  ;;  %2346 = vmatmul.f32.gmra.mxu0 %v8782_v46  ;;  %v6351_v29 = vld [vmem:[%s6771_s20 + $0x7e8] sm:$0xff]  ;;  %v6349_v35 = vld [vmem:[%s6771_s20 + $0x7d8] sm:$0xff] }
 0x312   : > { %2024 = vmatmul.f32.gmra.mxu1 %v9006_v31  ;;  %2792 = vmatpush.msra.mxu0 %v6351_v29  ;;  %v12739_v29 = vrot.slane %v8143_v6, 7 }
 0x313   : > { %v3021_v9 = vrot.slane %v2237_v28, 6  ;;  %v9045_v28 = vpop.f32.mrf.mxu0 }
 0x314   : > { %2793 = vmatpush.msra.mxu0 %v6350_v47  ;;  %v9058_v31 = vsel %vm292_vm0, %v1828_v12, %v12739_v29 }
 0x315   : > { %2116 = vmatmul.f32.gmra.mxu2 %v9032_v25  ;;  %2222 = vmatmul.f32.gmra.mxu3 %v9036_v21  ;;  %v9042_v1 = vsel %vm1503_vm2, %v3020_v17, %v3021_v9  ;;  %v1879_v17 = vrot.slane %v8143_v6, 1 }
 0x316   : > { %12738 = vst [vmem:[#allocation32_spill] sm:$0xff] %v9042_v1  ;;  %2794 = vmatpush.msra.mxu0 %v6349_v35 }
 0x317   : > { %v1980_v48 = vpop.f32.mrf.mxu1 }
 0x318   : > { %v2069_v51 = vpop.f32.mrf.mxu2  ;;  %v2175_v5 = vpop.f32.mrf.mxu3  ;;  %2795 = vmatpush.msra.mxu0 %v6348_v15  ;;  %v6344_v15 = vld [vmem:[%s6771_s20 + $0x7b0] sm:$0xff] }
 0x319   : > { %v2070_v14 = vadd.f32 %v2069_v51, %v1977_v40  ;;  %v2238_v34 = vadd.f32 %v2175_v5, %v2067_v4  ;;  %2349 = vmatmul.f32.gmra.mxu0 %v8827_v7  ;;  %v9062_v4 = vsel %vm343_vm1, %v1878_v8, %v1879_v17  ;;  %v6347_v51 = vld [vmem:[%s6771_s20 + $0x7c8] sm:$0xff]  ;;  %v6346_v8 = vld [vmem:[%s6771_s20 + $0x7c0] sm:$0xff] }
 0x31a   : > { %2027 = vmatmul.f32.gmra.mxu1 %v8143_v6  ;;  %2796 = vmatpush.msra.mxu0 %v6347_v51 }
 0x31b   : > { %v3022_v1 = vrot.slane %v2238_v34, 6  ;;  %v9072_v34 = vpop.f32.mrf.mxu0 }
 0x31c   : > { %12741 = vst [vmem:[#allocation58_spill] sm:$0xff] %v9072_v34  ;;  %2797 = vmatpush.msra.mxu0 %v6346_v8  ;;  %v6340_v34 = vld [vmem:[%s6771_s20 + $0x790] sm:$0xff] }
 0x31d   : > { %2119 = vmatmul.f32.gmra.mxu2 %v9058_v31  ;;  %2225 = vmatmul.f32.gmra.mxu3 %v9062_v4  ;;  %v9068_v40 = vsel %vm1503_vm2, %v3021_v9, %v3022_v1  ;;  %v6345_v9 = vld [vmem:[%s6771_s20 + $0x7b8] sm:$0xff] }
 0x31e   : > { %12740 = vst [vmem:[#allocation57_spill] sm:$0xff] %v9068_v40  ;;  %v12742_v40 = vrot.slane %v8147_v0, 1  ;;  %2798 = vmatpush.msra.mxu0 %v6345_v9  ;;  %v6341_v9 = vld [vmem:[%s6771_s20 + $0x798] sm:$0xff] }
 0x31f   : > { %v1983_v12 = vpop.f32.mrf.mxu1 }
 0x320   : > { %v2072_v5 = vpop.f32.mrf.mxu2  ;;  %v2178_v47 = vpop.f32.mrf.mxu3  ;;  %v9082_v51 = vsel %vm343_vm1, %v1879_v17, %v12742_v40  ;;  %2799 = vmatpush.msra.mxu0 %v6344_v15  ;;  %v6342_v17 = vld [vmem:[%s6771_s20 + $0x7a0] sm:$0xff] }
 0x321   : > { %v2073_v18 = vadd.f32 %v2072_v5, %v1980_v48  ;;  %v2239_v35 = vadd.f32 %v2178_v47, %v2070_v14  ;;  %2352 = vmatmul.f32.gmra.mxu0 %v8878_v32  ;;  %v6343_v14 = vld [vmem:[%s6771_s20 + $0x7a8] sm:$0xff] }
 0x322   : > { %2429 = vmatmul.f32.vlgmr.msrb.gmra.mxu1 %v8147_v0  ;;  %2800 = vmatpush.msra.mxu0 %v6343_v14 }
 0x323   : > { %v3023_v29 = vrot.slane %v2239_v35, 6 }
 0x324   : > { %2801 = vmatpush.msra.mxu0 %v6342_v17  ;;  %v6338_v17 = vld [vmem:[%s6771_s20 + $0x780] sm:$0xff] }
 0x325   : > { %2228 = vmatmul.f32.gmra.mxu3 %v9082_v51  ;;  %2563 = vmatmul.f32.vlgmr.msrb.gmra.mxu2 %v8207_v20  ;;  %v9088_v48 = vsel %vm1503_vm2, %v3022_v1, %v3023_v29  ;;  %v9095_v1 = vpop.f32.mrf.mxu0 }
 0x326   : > { %12743 = vst [vmem:[#allocation59_spill] sm:$0xff] %v9088_v48  ;;  %v6382_v48 = vld [vmem:[%s6771_s20 + $0x8e0] sm:$0xff]  ;;  %2802 = vmatpush.msra.mxu0 %v6341_v9 }
 0x327   : > { %v1986_v5 = vpop.f32.mrf.mxu1  ;;  %12744 = vst [vmem:[#allocation36_spill] sm:$0xff] %v9095_v1  ;;  %2902 = vmatpush.msra.mxu1 %v6382_v48 }
 0x328   : > { %v2075_v47 = vpop.f32.mrf.mxu2  ;;  %v2181_v8 = vpop.f32.mrf.mxu3  ;;  %2803 = vmatpush.msra.mxu0 %v6340_v34 }
 0x329   : > { %v2076_v40 = vadd.f32 %v2075_v47, %v1983_v12  ;;  %v2240_v35 = vadd.f32 %v2181_v8, %v2073_v18  ;;  %2355 = vmatmul.f32.gmra.mxu0 %v8932_v26  ;;  %v6339_v18 = vld [vmem:[%s6771_s20 + $0x788] sm:$0xff] }
 0x32a   : > { %2432 = vmatmul.f32.gmra.mxu1 %v8181_v16  ;;  %2804 = vmatpush.msra.mxu0 %v6339_v18 }
 0x32b   : > { %v3024_v15 = vrot.slane %v2240_v35, 6 }
 0x32c   : > { %2805 = vmatpush.msra.mxu0 %v6338_v17 }
 0x32d   : > { %2566 = vmatmul.f32.gmra.mxu2 %v8248_v36  ;;  %2714 = vmatmul.f32.vlgmr.msrb.gmra.mxu3 %v8147_v0  ;;  %v9103_v12 = vsel %vm1503_vm2, %v3023_v29, %v3024_v15  ;;  %v6381_v0 = vld [vmem:[%s6771_s20 + $0x8d8] sm:$0xff]  ;;  %v9110_v9 = vpop.f32.mrf.mxu0 }
 0x32e   : > { %12745 = vst [vmem:[#allocation19_spill] sm:$0xff] %v9103_v12  ;;  %2903 = vmatpush.msra.mxu1 %v6381_v0 }
 0x32f   : > { %v1989_v14 = vpop.f32.mrf.mxu1 }
 0x330   : > { %v2078_v47 = vpop.f32.mrf.mxu2  ;;  %v2184_v8 = vpop.f32.mrf.mxu3 }
 0x331   : > { %v2079_v35 = vadd.f32 %v2078_v47, %v1986_v5  ;;  %v2241_v1 = vadd.f32 %v2184_v8, %v2076_v40  ;;  %2358 = vmatmul.f32.gmra.mxu0 %v8976_v45 }
 0x332   : > { %2435 = vmatmul.f32.gmra.mxu1 %v8222_v23 }
 0x333   : > { %v3025_v48 = vrot.slane %v2241_v1, 6 }
 0x335   : > { %2569 = vmatmul.f32.gmra.mxu2 %v8283_v63  ;;  %2717 = vmatmul.f32.gmra.mxu3 %v8181_v16  ;;  %v9116_v34 = vsel %vm1503_vm2, %v3024_v15, %v3025_v48  ;;  %v9126_v15 = vpop.f32.mrf.mxu0 }
 0x336   : > { %12746 = vst [vmem:[#allocation41_spill] sm:$0xff] %v9116_v34 }
 0x337   : > { %v1992_v29 = vpop.f32.mrf.mxu1  ;;  %12748 = vst [vmem:[#allocation61_spill] sm:$0xff] %v9126_v15 }
 0x338   : > { %v2081_v5 = vpop.f32.mrf.mxu2  ;;  %v2187_v40 = vpop.f32.mrf.mxu3 }
 0x339   : > { %v2082_v18 = vadd.f32 %v2081_v5, %v1989_v14  ;;  %v2242_v47 = vadd.f32 %v2187_v40, %v2079_v35  ;;  %2361 = vmatmul.f32.gmra.mxu0 %v9010_v52  ;;  %v6380_v40 = vld [vmem:[%s6771_s20 + $0x8d0] sm:$0xff] }
 0x33a   : > { %2438 = vmatmul.f32.gmra.mxu1 %v8258_v22 }
 0x33b   : > { %v3026_v1 = vrot.slane %v2242_v47, 6  ;;  %2904 = vmatpush.msra.mxu1 %v6380_v40 }
 0x33d   : > { %2572 = vmatmul.f32.gmra.mxu2 %v8320_v19  ;;  %2720 = vmatmul.f32.gmra.mxu3 %v8222_v23  ;;  %v9124_v16 = vsel %vm1503_vm2, %v3025_v48, %v3026_v1 }
 0x33e   : > { %12747 = vst [vmem:[#allocation60_spill] sm:$0xff] %v9124_v16 }
 0x33f   : > { %v1995_v8 = vpop.f32.mrf.mxu1 }
 0x340   : > { %v2084_v17 = vpop.f32.mrf.mxu2  ;;  %v2190_v14 = vpop.f32.mrf.mxu3 }
 0x341   : > { %v2085_v35 = vadd.f32 %v2084_v17, %v1992_v29  ;;  %v2243_v0 = vadd.f32 %v2190_v14, %v2082_v18  ;;  %2364 = vmatmul.f32.gmra.mxu0 %v9032_v25  ;;  %v9137_v18 = vpop.f32.mrf.mxu0 }
 0x342   : > { %2441 = vmatmul.f32.gmra.mxu1 %v8298_v55  ;;  %12750 = vst [vmem:[#allocation97_spill] sm:$0xff] %v9137_v18  ;;  %v6417_v18 = vld [vmem:[%s6771_s20 + $0x9f8] sm:$0xff] }
 0x343   : > { %v3027_v5 = vrot.slane %v2243_v0, 6  ;;  %3350 = vmatpush.msra.mxu2 %v6417_v18 }
 0x345   : > { %2575 = vmatmul.f32.gmra.mxu2 %v8355_v24  ;;  %2723 = vmatmul.f32.gmra.mxu3 %v8258_v22  ;;  %v9135_v23 = vsel %vm1503_vm2, %v3026_v1, %v3027_v5  ;;  %v6379_v22 = vld [vmem:[%s6771_s20 + $0x8c8] sm:$0xff] }
 0x346   : > { %12749 = vst [vmem:[#allocation62_spill] sm:$0xff] %v9135_v23  ;;  %2905 = vmatpush.msra.mxu1 %v6379_v22 }
 0x347   : > { %v1998_v48 = vpop.f32.mrf.mxu1 }
 0x348   : > { %v2087_v47 = vpop.f32.mrf.mxu2  ;;  %v2193_v29 = vpop.f32.mrf.mxu3 }
 0x349   : > { %v2088_v17 = vadd.f32 %v2087_v47, %v1995_v8  ;;  %v2244_v14 = vadd.f32 %v2193_v29, %v2085_v35  ;;  %2367 = vmatmul.f32.gmra.mxu0 %v9058_v31  ;;  %v12752_v47 = vld [vmem:[#allocation21_spill] sm:$0xff]  ;;  %v9150_v29 = vpop.f32.mrf.mxu0 }
 0x34a   : > { %2444 = vmatmul.f32.gmra.mxu1 %v8334_v33  ;;  %12753 = vst [vmem:[#allocation98_spill] sm:$0xff] %v9150_v29  ;;  %v6373_v29 = vld [vmem:[%s6771_s20 + $0x898] sm:$0xff] }
 0x34b   : > { %v3028_v0 = vrot.slane %v2244_v14, 6 }
 0x34d   : > { %2578 = vmatmul.f32.gmra.mxu2 %v8392_v10  ;;  %2726 = vmatmul.f32.gmra.mxu3 %v8298_v55  ;;  %v9146_v1 = vsel %vm1503_vm2, %v3027_v5, %v3028_v0 }
 0x34e   : > { %12751 = vst [vmem:[#allocation3_spill] sm:$0xff] %v9146_v1  ;;  %v6377_v1 = vld [vmem:[%s6771_s20 + $0x8b8] sm:$0xff] }
 0x34f   : > { %v2001_v40 = vpop.f32.mrf.mxu1 }
 0x350   : > { %v2090_v23 = vpop.f32.mrf.mxu2  ;;  %v2196_v16 = vpop.f32.mrf.mxu3 }
 0x351   : > { %v2091_v8 = vadd.f32 %v2090_v23, %v1998_v48  ;;  %v2245_v35 = vadd.f32 %v2196_v16, %v2088_v17  ;;  %2806 = vmatmul.f32.vlgmr.msra.gmra.mxu0 %v8165_v13  ;;  %v6378_v17 = vld [vmem:[%s6771_s20 + $0x8c0] sm:$0xff] }
 0x352   : > { %2447 = vmatmul.f32.gmra.mxu1 %v12752_v47 }
 0x353   : > { %v3029_v14 = vrot.slane %v2245_v35, 6  ;;  %2906 = vmatpush.msra.mxu1 %v6378_v17  ;;  %v9161_v35 = vpop.f32.mrf.mxu0 }
 0x354   : > { %12755 = vst [vmem:[#allocation64_spill] sm:$0xff] %v9161_v35  ;;  %v12785_v35 = vld [vmem:[#allocation46_spill] sm:$0xff] }
 0x355   : > { %2581 = vmatmul.f32.gmra.mxu2 %v8426_v44  ;;  %2729 = vmatmul.f32.gmra.mxu3 %v8334_v33  ;;  %v9156_v55 = vsel %vm1503_vm2, %v3028_v0, %v3029_v14 }
 0x356   : > { %12754 = vst [vmem:[#allocation63_spill] sm:$0xff] %v9156_v55  ;;  %v12759_v55 = vld [vmem:[#allocation30_spill] sm:$0xff]  ;;  %2907 = vmatpush.msra.mxu1 %v6377_v1 }
 0x357   : > { %v2004_v5 = vpop.f32.mrf.mxu1 }
 0x358   : > { %v2093_v22 = vpop.f32.mrf.mxu2  ;;  %v2199_v23 = vpop.f32.mrf.mxu3 }
 0x359   : > { %v2094_v16 = vadd.f32 %v2093_v22, %v2001_v40  ;;  %v2246_v48 = vadd.f32 %v2199_v23, %v2091_v8  ;;  %2809 = vmatmul.f32.gmra.mxu0 %v8201_v27  ;;  %v12757_v23 = vld [vmem:[#allocation12_spill] sm:$0xff] }
 0x35a   : > { %2450 = vmatmul.f32.gmra.mxu1 %v8404_v39 }
 0x35b   : > { %v3030_v13 = vrot.slane %v2246_v48, 6  ;;  %v12758_v48 = vld [vmem:[#allocation26_spill] sm:$0xff] }
 0x35d   : > { %2584 = vmatmul.f32.gmra.mxu2 %v8463_v59  ;;  %2732 = vmatmul.f32.gmra.mxu3 %v12752_v47  ;;  %v9167_v33 = vsel %vm1503_vm2, %v3029_v14, %v3030_v13  ;;  %v9177_v14 = vpop.f32.mrf.mxu0 }
 0x35e   : > { %12756 = vst [vmem:[#allocation65_spill] sm:$0xff] %v9167_v33 }
 0x35f   : > { %v2007_v0 = vpop.f32.mrf.mxu1  ;;  %12761 = vst [vmem:[#allocation13_spill] sm:$0xff] %v9177_v14 }
 0x360   : > { %v2096_v40 = vpop.f32.mrf.mxu2  ;;  %v2202_v8 = vpop.f32.mrf.mxu3 }
 0x361   : > { %v2097_v27 = vadd.f32 %v2096_v40, %v2004_v5  ;;  %v2247_v22 = vadd.f32 %v2202_v8, %v2094_v16  ;;  %2812 = vmatmul.f32.gmra.mxu0 %v12757_v23  ;;  %v12762_v8 = vld [vmem:[#allocation94_spill] sm:$0xff] }
 0x362   : > { %2453 = vmatmul.f32.gmra.mxu1 %v12758_v48 }
 0x363   : > { %v3031_v17 = vrot.slane %v2247_v22, 6  ;;  %v12763_v22 = vld [vmem:[#allocation90_spill] sm:$0xff] }
 0x365   : > { %2587 = vmatmul.f32.gmra.mxu2 %v12759_v55  ;;  %2735 = vmatmul.f32.gmra.mxu3 %v8404_v39  ;;  %v9175_v47 = vsel %vm1503_vm2, %v3030_v13, %v3031_v17  ;;  %v9188_v1 = vpop.f32.mrf.mxu0 }
 0x366   : > { %12760 = vst [vmem:[#allocation100_spill] sm:$0xff] %v9175_v47 }
 0x367   : > { %v2010_v33 = vpop.f32.mrf.mxu1  ;;  %12765 = vst [vmem:[#allocation66_spill] sm:$0xff] %v9188_v1  ;;  %v12772_v1 = vld [vmem:[#allocation17_spill] sm:$0xff] }
 0x368   : > { %v2099_v34 = vpop.f32.mrf.mxu2  ;;  %v2205_v5 = vpop.f32.mrf.mxu3 }
 0x369   : > { %v2100_v16 = vadd.f32 %v2099_v34, %v2007_v0  ;;  %v2248_v40 = vadd.f32 %v2205_v5, %v2097_v27  ;;  %2815 = vmatmul.f32.gmra.mxu0 %v12762_v8  ;;  %v12766_v27 = vld [vmem:[#allocation95_spill] sm:$0xff]  ;;  %v6376_v8 = vld [vmem:[%s6771_s20 + $0x8b0] sm:$0xff] }
 0x36a   : > { %2456 = vmatmul.f32.gmra.mxu1 %v12763_v22  ;;  %v12767_v5 = vld [vmem:[#allocation31_spill] sm:$0xff] }
 0x36b   : > { %v3032_v23 = vrot.slane %v2248_v40, 6  ;;  %2908 = vmatpush.msra.mxu1 %v6376_v8 }
 0x36d   : > { %2590 = vmatmul.f32.gmra.mxu2 %v8530_v60  ;;  %2738 = vmatmul.f32.gmra.mxu3 %v12758_v48  ;;  %v9186_v39 = vsel %vm1503_vm2, %v3031_v17, %v3032_v23 }
 0x36e   : > { %12764 = vst [vmem:[#allocation101_spill] sm:$0xff] %v9186_v39 }
 0x36f   : > { %v2013_v13 = vpop.f32.mrf.mxu1 }
 0x370   : > { %v2102_v47 = vpop.f32.mrf.mxu2  ;;  %v2208_v12 = vpop.f32.mrf.mxu3 }
 0x371   : > { %v2103_v34 = vadd.f32 %v2102_v47, %v2010_v33  ;;  %v2249_v0 = vadd.f32 %v2208_v12, %v2100_v16  ;;  %2818 = vmatmul.f32.gmra.mxu0 %v12766_v27  ;;  %v12769_v16 = vld [vmem:[#allocation87_spill] sm:$0xff]  ;;  %v12770_v27 = vld [vmem:[#allocation9_spill] sm:$0xff] }
 0x372   : > { %2459 = vmatmul.f32.gmra.mxu1 %v12767_v5 }
 0x373   : > { %v3033_v40 = vrot.slane %v2249_v0, 6  ;;  %v9201_v0 = vpop.f32.mrf.mxu0 }
 0x374   : > { %12771 = vst [vmem:[#allocation68_spill] sm:$0xff] %v9201_v0 }
 0x375   : > { %2593 = vmatmul.f32.gmra.mxu2 %v8567_v49  ;;  %2741 = vmatmul.f32.gmra.mxu3 %v12763_v22  ;;  %v9197_v48 = vsel %vm1503_vm2, %v3032_v23, %v3033_v40 }
 0x376   : > { %12768 = vst [vmem:[#allocation67_spill] sm:$0xff] %v9197_v48 }
 0x377   : > { %v2016_v17 = vpop.f32.mrf.mxu1 }
 0x378   : > { %v2105_v39 = vpop.f32.mrf.mxu2  ;;  %v2211_v33 = vpop.f32.mrf.mxu3 }
 0x379   : > { %v2106_v12 = vadd.f32 %v2105_v39, %v2013_v13  ;;  %v2250_v47 = vadd.f32 %v2211_v33, %v2103_v34  ;;  %2821 = vmatmul.f32.gmra.mxu0 %v12769_v16  ;;  %v6375_v39 = vld [vmem:[%s6771_s20 + $0x8a8] sm:$0xff]  ;;  %v12774_v33 = vld [vmem:[#allocation24_spill] sm:$0xff]  ;;  %v12775_v16 = vld [vmem:[#allocation38_spill] sm:$0xff] }
 0x37a   : > { %2462 = vmatmul.f32.gmra.mxu1 %v12770_v27 }
 0x37b   : > { %v3034_v8 = vrot.slane %v2250_v47, 6  ;;  %2909 = vmatpush.msra.mxu1 %v6375_v39  ;;  %v9212_v0 = vpop.f32.mrf.mxu0  ;;  %v12778_v39 = vld [vmem:[#allocation89_spill] sm:$0xff] }
 0x37c   : > { %12776 = vst [vmem:[#allocation18_spill] sm:$0xff] %v9212_v0 }
 0x37d   : > { %2596 = vmatmul.f32.gmra.mxu2 %v12772_v1  ;;  %2744 = vmatmul.f32.gmra.mxu3 %v12767_v5  ;;  %v9207_v22 = vsel %vm1503_vm2, %v3033_v40, %v3034_v8 }
 0x37e   : > { %12773 = vst [vmem:[#allocation103_spill] sm:$0xff] %v9207_v22  ;;  %v12780_v22 = vld [vmem:[#allocation7_spill] sm:$0xff] }
 0x37f   : > { %v2019_v23 = vpop.f32.mrf.mxu1 }
 0x380   : > { %v2108_v48 = vpop.f32.mrf.mxu2  ;;  %v2214_v14 = vpop.f32.mrf.mxu3 }
 0x381   : > { %v2109_v13 = vadd.f32 %v2108_v48, %v2016_v17  ;;  %v2251_v34 = vadd.f32 %v2214_v14, %v2106_v12  ;;  %2824 = vmatmul.f32.gmra.mxu0 %v12774_v33  ;;  %v12779_v33 = vld [vmem:[#allocation39_spill] sm:$0xff] }
 0x382   : > { %2465 = vmatmul.f32.gmra.mxu1 %v12775_v16 }
 0x383   : > { %v3035_v47 = vrot.slane %v2251_v34, 6 }
 0x385   : > { %2599 = vmatmul.f32.gmra.mxu2 %v8638_v43  ;;  %2747 = vmatmul.f32.gmra.mxu3 %v12770_v27  ;;  %v9218_v5 = vsel %vm1503_vm2, %v3034_v8, %v3035_v47  ;;  %v6374_v8 = vld [vmem:[%s6771_s20 + $0x8a0] sm:$0xff] }
 0x386   : > { %12777 = vst [vmem:[#allocation104_spill] sm:$0xff] %v9218_v5  ;;  %v9229_v5 = vpop.f32.mrf.mxu0  ;;  %2910 = vmatpush.msra.mxu1 %v6374_v8 }
 0x387   : > { %v2022_v40 = vpop.f32.mrf.mxu1  ;;  %12782 = vst [vmem:[#allocation70_spill] sm:$0xff] %v9229_v5 }
 0x388   : > { %v2111_v48 = vpop.f32.mrf.mxu2  ;;  %v2217_v14 = vpop.f32.mrf.mxu3  ;;  %2911 = vmatpush.msra.mxu1 %v6373_v29 }
 0x389   : > { %v2112_v17 = vadd.f32 %v2111_v48, %v2019_v23  ;;  %v2252_v12 = vadd.f32 %v2217_v14, %v2109_v13  ;;  %2827 = vmatmul.f32.gmra.mxu0 %v12778_v39  ;;  %v12783_v39 = vld [vmem:[#allocation29_spill] sm:$0xff] }
 0x38a   : > { %2468 = vmatmul.f32.gmra.mxu1 %v12779_v33 }
 0x38b   : > { %v3036_v34 = vrot.slane %v2252_v12, 6  ;;  %v12784_v12 = vld [vmem:[#allocation42_spill] sm:$0xff] }
 0x38d   : > { %2602 = vmatmul.f32.gmra.mxu2 %v12780_v22  ;;  %2750 = vmatmul.f32.gmra.mxu3 %v12775_v16  ;;  %v9226_v27 = vsel %vm1503_vm2, %v3035_v47, %v3036_v34 }
 0x38e   : > { %12781 = vst [vmem:[#allocation69_spill] sm:$0xff] %v9226_v27 }
 0x38f   : > { %v2025_v0 = vpop.f32.mrf.mxu1 }
 0x390   : > { %v2114_v23 = vpop.f32.mrf.mxu2  ;;  %v2220_v13 = vpop.f32.mrf.mxu3 }
 0x391   : > { %v2115_v48 = vadd.f32 %v2114_v23, %v2022_v40  ;;  %v2253_v14 = vadd.f32 %v2220_v13, %v2112_v17  ;;  %2830 = vmatmul.f32.gmra.mxu0 %v12783_v39  ;;  %v9239_v40 = vpop.f32.mrf.mxu0  ;;  %v12788_v13 = vld [vmem:[#allocation15_spill] sm:$0xff]  ;;  %v12789_v39 = vld [vmem:[#allocation44_spill] sm:$0xff] }
 0x392   : > { %2471 = vmatmul.f32.gmra.mxu1 %v12784_v12  ;;  %12787 = vst [vmem:[#allocation105_spill] sm:$0xff] %v9239_v40  ;;  %v6416_v40 = vld [vmem:[%s6771_s20 + $0x9f0] sm:$0xff] }
 0x393   : > { %v3037_v16 = vrot.slane %v2253_v14, 6  ;;  %3351 = vmatpush.msra.mxu2 %v6416_v40 }
 0x395   : > { %2605 = vmatmul.f32.gmra.mxu2 %v12785_v35  ;;  %2753 = vmatmul.f32.gmra.mxu3 %v12779_v33  ;;  %v9237_v47 = vsel %vm1503_vm2, %v3036_v34, %v3037_v16 }
 0x396   : > { %12786 = vst [vmem:[#allocation71_spill] sm:$0xff] %v9237_v47  ;;  %v9256_v47 = vld [vmem:[%s7334_s28 + $0x1] ss:$0 sm:$0xff] }
 0x397   : > { %v2028_v8 = vpop.f32.mrf.mxu1 }
 0x398   : > { %v2117_v27 = vpop.f32.mrf.mxu2  ;;  %v2223_v5 = vpop.f32.mrf.mxu3 }
 0x399   : > { %v2118_v17 = vadd.f32 %v2117_v27, %v2025_v0  ;;  %v2254_v23 = vadd.f32 %v2223_v5, %v2115_v48  ;;  %2833 = vmatmul.f32.gmra.mxu0 %v12788_v13  ;;  %v12792_v13 = vld [vmem:[#allocation22_spill] sm:$0xff]  ;;  %v9253_v29 = vpop.f32.mrf.mxu0 }
 0x39a   : > { %2474 = vmatmul.f32.gmra.mxu1 %v12789_v39  ;;  %12793 = vst [vmem:[#allocation106_spill] sm:$0xff] %v9253_v29  ;;  %v12795_v29 = vld [vmem:[#allocation4_spill] sm:$0xff] }
 0x39b   : > { %v3038_v14 = vrot.slane %v2254_v23, 6  ;;  %v12791_v23 = vld [vmem:[#allocation33_spill] sm:$0xff] }
 0x39d   : > { %2608 = vmatmul.f32.gmra.mxu2 %v8748_v53  ;;  %2756 = vmatmul.f32.gmra.mxu3 %v12784_v12  ;;  %v9249_v33 = vsel %vm1503_vm2, %v3037_v16, %v3038_v14  ;;  %v6372_v12 = vld [vmem:[%s6771_s20 + $0x890] sm:$0xff] }
 0x39e   : > { %12790 = vst [vmem:[#allocation27_spill] sm:$0xff] %v9249_v33  ;;  %2912 = vmatpush.msra.mxu1 %v6372_v12 }
 0x39f   : > { %v2430_v0 = vpop.f32.mrf.mxu1 }
 0x3a0   : > { %v2120_v5 = vpop.f32.mrf.mxu2  ;;  %v2226_v34 = vpop.f32.mrf.mxu3 }
 0x3a1   : > { %v2121_v27 = vadd.f32 %v2120_v5, %v2028_v8  ;;  %v2255_v48 = vadd.f32 %v2226_v34, %v2118_v17  ;;  %2836 = vmatmul.f32.gmra.mxu0 %v12791_v23  ;;  %v2371_v17 = vadd.f32 %v9256_v47, %v9045_v28  ;;  %v12794_v23 = vld [vmem:[#allocation34_spill] sm:$0xff]  ;;  %v9272_v12 = vpop.f32.mrf.mxu0 }
 0x3a2   : > { %2477 = vmatmul.f32.gmra.mxu1 %v12792_v13  ;;  %12796 = vst [vmem:[#allocation72_spill] sm:$0xff] %v9272_v12  ;;  %v12797_v28 = vld [vmem:[#allocation50_spill] sm:$0xff] }
 0x3a3   : > { %v3039_v18 = vrot.slane %v2255_v48, 6  ;;  %v2505_v33 = vadd.f32 %v2430_v0, %v2371_v17 }
 0x3a5   : > { %2611 = vmatmul.f32.gmra.mxu2 %v8786_v2  ;;  %2759 = vmatmul.f32.gmra.mxu3 %v12789_v39  ;;  %v9263_v16 = vsel %vm1503_vm2, %v3038_v14, %v3039_v18 }
 0x3a7   : > { %v9265_v8 = vpop.f32.mrf.mxu1 }
 0x3a8   : > { %v2229_v5 = vpop.f32.mrf.mxu3  ;;  %v2564_v34 = vpop.f32.mrf.mxu2 }
 0x3a9   : > { %v2256_v48 = vadd.f32 %v2229_v5, %v2121_v27  ;;  %2839 = vmatmul.f32.gmra.mxu0 %v12794_v23  ;;  %v2639_v14 = vadd.f32 %v2564_v34, %v2505_v33  ;;  %v12798_v27 = vrot.slane %v8810_v3, 6  ;;  %v12799_v33 = vld [vmem:[#allocation6_spill] sm:$0xff]  ;;  %v12800_v34 = vld [vmem:[#allocation48_spill] sm:$0xff]  ;;  %v9296_v3 = vpop.f32.mrf.mxu0 }
 0x3aa   : > { %2480 = vmatmul.f32.gmra.mxu1 %v12795_v29  ;;  %12801 = vst [vmem:[#allocation73_spill] sm:$0xff] %v9296_v3 }
 0x3ab   : > { %v3040_v39 = vrot.slane %v2256_v48, 6  ;;  %v6415_v48 = vld [vmem:[%s6771_s20 + $0x9e8] sm:$0xff] }
 0x3ac   : > { %3352 = vmatpush.msra.mxu2 %v6415_v48 }
 0x3ad   : > { %v3041_v15 = vsel %vm1503_vm2, %v3039_v18, %v3040_v39  ;;  %2614 = vmatmul.f32.gmra.mxu2 %v12797_v28  ;;  %2762 = vmatmul.f32.gmra.mxu3 %v12792_v13  ;;  %v9282_v0 = vsel %vm1503_vm2, %v3040_v39, %v12798_v27  ;;  %v6371_v18 = vld [vmem:[%s6771_s20 + $0x888] sm:$0xff]  ;;  %v6370_v39 = vld [vmem:[%s6771_s20 + $0x880] sm:$0xff] }
 0x3ae   : > { %v9284_v17 = vadd.f32 %v3041_v15, %v2639_v14  ;;  %2913 = vmatpush.msra.mxu1 %v6371_v18 }
 0x3af   : > { %v9286_v5 = vpop.f32.mrf.mxu1 }
 0x3b0   : > { %v9288_v40 = vpop.f32.mrf.mxu2  ;;  %2914 = vmatpush.msra.mxu1 %v6370_v39  ;;  %v12805_v39 = vld [vmem:[#allocation23_spill] sm:$0xff] }
 0x3b1   : > { %2842 = vmatmul.f32.gmra.mxu0 %v12799_v33 }
 0x3b2   : > { %2483 = vmatmul.f32.gmra.mxu1 %v12800_v34 }
 0x3b5   : > { %2617 = vmatmul.f32.gmra.mxu2 %v8882_v38  ;;  %2765 = vmatmul.f32.gmra.mxu3 %v12795_v29  ;;  %v9311_v29 = vpop.f32.mrf.mxu0 }
 0x3b6   : > { %12802 = vst [vmem:[#allocation74_spill] sm:$0xff] %v9311_v29 }
 0x3b7   : > { %v9298_v15 = vpop.f32.mrf.mxu1 }
 0x3b8   : > { %v9300_v13 = vpop.f32.mrf.mxu2 }
 0x3b9   : > { %2845 = vmatmul.f32.gmra.mxu0 %v8634_v54  ;;  %v6414_v54 = vld [vmem:[%s6771_s20 + $0x9e0] sm:$0xff] }
 0x3ba   : > { %2486 = vmatmul.f32.gmra.mxu1 %v8851_v50  ;;  %3353 = vmatpush.msra.mxu2 %v6414_v54  ;;  %v6412_v54 = vld [vmem:[%s6771_s20 + $0x9d0] sm:$0xff] }
 0x3bd   : > { %2620 = vmatmul.f32.gmra.mxu2 %v8936_v41  ;;  %2768 = vmatmul.f32.gmra.mxu3 %v12800_v34  ;;  %v9324_v34 = vpop.f32.mrf.mxu0 }
 0x3be   : > { %12803 = vst [vmem:[#allocation107_spill] sm:$0xff] %v9324_v34 }
 0x3bf   : > { %v9306_v23 = vpop.f32.mrf.mxu1 }
 0x3c0   : > { %v9309_v14 = vpop.f32.mrf.mxu2 }
 0x3c1   : > { %2848 = vmatmul.f32.gmra.mxu0 %v8669_v61  ;;  %v6413_v61 = vld [vmem:[%s6771_s20 + $0x9d8] sm:$0xff] }
 0x3c2   : > { %2489 = vmatmul.f32.gmra.mxu1 %v8904_v37  ;;  %3354 = vmatpush.msra.mxu2 %v6413_v61 }
 0x3c4   : > { %3355 = vmatpush.msra.mxu2 %v6412_v54  ;;  %v6411_v54 = vld [vmem:[%s6771_s20 + $0x9c8] sm:$0xff] }
 0x3c5   : > { %2623 = vmatmul.f32.gmra.mxu2 %v8980_v62  ;;  %2771 = vmatmul.f32.gmra.mxu3 %v8851_v50 }
 0x3c6   : > { %3356 = vmatpush.msra.mxu2 %v6411_v54 }
 0x3c7   : > { %v9318_v27 = vpop.f32.mrf.mxu1 }
 0x3c8   : > { %v9320_v33 = vpop.f32.mrf.mxu2 }
 0x3c9   : > { %2851 = vmatmul.f32.gmra.mxu0 %v8705_v57  ;;  %v9335_v57 = vpop.f32.mrf.mxu0 }
 0x3ca   : > { %2492 = vmatmul.f32.gmra.mxu1 %v8951_v30  ;;  %12804 = vst [vmem:[#allocation5_spill] sm:$0xff] %v9335_v57 }
 0x3cd   : > { %2626 = vmatmul.f32.gmra.mxu2 %v9014_v58  ;;  %2774 = vmatmul.f32.gmra.mxu3 %v8904_v37 }
 0x3cf   : > { %v9329_v18 = vpop.f32.mrf.mxu1 }
 0x3d0   : > { %v9331_v50 = vpop.f32.mrf.mxu2 }
 0x3d1   : > { %2854 = vmatmul.f32.gmra.mxu0 %v8744_v11  ;;  %v9348_v11 = vpop.f32.mrf.mxu0 }
 0x3d2   : > { %2495 = vmatmul.f32.gmra.mxu1 %v8995_v56  ;;  %12806 = vst [vmem:[#allocation108_spill] sm:$0xff] %v9348_v11 }
 0x3d5   : > { %2629 = vmatmul.f32.gmra.mxu2 %v9036_v21  ;;  %2777 = vmatmul.f32.gmra.mxu3 %v8951_v30 }
 0x3d7   : > { %v9339_v48 = vpop.f32.mrf.mxu1 }
 0x3d8   : > { %v9341_v37 = vpop.f32.mrf.mxu2 }
 0x3d9   : > { %2857 = vmatmul.f32.gmra.mxu0 %v8782_v46 }
 0x3da   : > { %2498 = vmatmul.f32.gmra.mxu1 %v12805_v39 }
 0x3dd   : > { %2632 = vmatmul.f32.gmra.mxu2 %v9062_v4  ;;  %2780 = vmatmul.f32.gmra.mxu3 %v8995_v56  ;;  %v9363_v56 = vpop.f32.mrf.mxu0 }
 0x3de   : > { %12808 = vst [vmem:[#allocation76_spill] sm:$0xff] %v9363_v56  ;;  %v6410_v56 = vld [vmem:[%s6771_s20 + $0x9c0] sm:$0xff] }
 0x3df   : > { %v9350_v61 = vpop.f32.mrf.mxu1  ;;  %3357 = vmatpush.msra.mxu2 %v6410_v56 }
 0x3e0   : > { %v9352_v30 = vpop.f32.mrf.mxu2 }
 0x3e1   : > { %2860 = vmatmul.f32.gmra.mxu0 %v8827_v7  ;;  %v9367_v7 = vpop.f32.mrf.mxu3 }
 0x3e2   : > { %2501 = vmatmul.f32.gmra.mxu1 %v8143_v6 }
 0x3e5   : > { %2635 = vmatmul.f32.gmra.mxu2 %v9082_v51  ;;  %2783 = vmatmul.f32.gmra.mxu3 %v12805_v39  ;;  %v9376_v54 = vpop.f32.mrf.mxu0 }
 0x3e6   : > { %12811 = vst [vmem:[#allocation28_spill] sm:$0xff] %v9376_v54 }
 0x3e7   : > { %v9358_v46 = vpop.f32.mrf.mxu1 }
 0x3e8   : > { %12807 = vst [vmem:[#allocation75_spill] sm:$0xff] %v9358_v46  ;;  %v9361_v57 = vpop.f32.mrf.mxu2 }
 0x3e9   : > { %2863 = vmatmul.f32.gmra.mxu0 %v8878_v32 }
 0x3ea   : > { %2915 = vmatmul.f32.vlgmr.msra.gmra.mxu1 %v8207_v20 }
 0x3ed   : > { %2786 = vmatmul.f32.gmra.mxu3 %v8143_v6  ;;  %v9385_v6 = vpop.f32.mrf.mxu0 }
 0x3ee   : > { %12814 = vst [vmem:[#allocation80_spill] sm:$0xff] %v9385_v6 }
 0x3ef   : > { %v9370_v11 = vpop.f32.mrf.mxu1 }
 0x3f0   : > { %12809 = vst [vmem:[#allocation78_spill] sm:$0xff] %v9370_v11  ;;  %v9372_v39 = vpop.f32.mrf.mxu2  ;;  %v6420_v11 = vld [vmem:[%s6771_s20 + $0xa10] sm:$0xff] }
 0x3f1   : > { %12810 = vst [vmem:[#allocation109_spill] sm:$0xff] %v9372_v39  ;;  %2866 = vmatmul.f32.gmra.mxu0 %v8932_v26 }
 0x3f2   : > { %2918 = vmatmul.f32.gmra.mxu1 %v8248_v36  ;;  %v6409_v36 = vld [vmem:[%s6771_s20 + $0x9b8] sm:$0xff] }
 0x3f3   : > { %3358 = vmatpush.msra.mxu2 %v6409_v36 }
 0x3f5   : > { %v9394_v56 = vpop.f32.mrf.mxu0 }
 0x3f7   : > { %v9379_v32 = vpop.f32.mrf.mxu1 }
 0x3f8   : > { %12812 = vst [vmem:[#allocation110_spill] sm:$0xff] %v9379_v32  ;;  %v9381_v20 = vpop.f32.mrf.mxu2  ;;  %v6424_v32 = vld [vmem:[%s6771_s20 + $0xa30] sm:$0xff] }
 0x3f9   : > { %12813 = vst [vmem:[#allocation79_spill] sm:$0xff] %v9381_v20  ;;  %2869 = vmatmul.f32.gmra.mxu0 %v8976_v45 }
 0x3fa   : > { %2921 = vmatmul.f32.gmra.mxu1 %v8283_v63  ;;  %v6408_v63 = vld [vmem:[%s6771_s20 + $0x9b0] sm:$0xff] }
 0x3fb   : > { %3359 = vmatpush.msra.mxu2 %v6408_v63 }
 0x3fd   : > { %v9407_v36 = vpop.f32.mrf.mxu0 }
 0x3ff   : > { %v9387_v34 = vpop.f32.mrf.mxu1 }
 0x400   : > { %12815 = vst [vmem:[#allocation81_spill] sm:$0xff] %v9387_v34  ;;  %v9389_v26 = vpop.f32.mrf.mxu2  ;;  %v6430_v34 = vld [vmem:[%s6771_s20 + $0xa60] sm:$0xff] }
 0x401   : > { %12816 = vst [vmem:[#allocation111_spill] sm:$0xff] %v9389_v26  ;;  %2872 = vmatmul.f32.gmra.mxu0 %v9010_v52  ;;  %v6389_v26 = vld [vmem:[%s6771_s20 + $0x918] sm:$0xff] }
 0x402   : > { %2924 = vmatmul.f32.gmra.mxu1 %v8320_v19 }
 0x405   : > { %v9419_v63 = vpop.f32.mrf.mxu0 }
 0x407   : > { %v9396_v54 = vpop.f32.mrf.mxu1 }
 0x408   : > { %12817 = vst [vmem:[#allocation82_spill] sm:$0xff] %v9396_v54  ;;  %v9398_v45 = vpop.f32.mrf.mxu2  ;;  %v6400_v54 = vld [vmem:[%s6771_s20 + $0x970] sm:$0xff] }
 0x409   : > { %12818 = vst [vmem:[#allocation83_spill] sm:$0xff] %v9398_v45  ;;  %2875 = vmatmul.f32.gmra.mxu0 %v9032_v25  ;;  %v6407_v25 = vld [vmem:[%s6771_s20 + $0x9a8] sm:$0xff] }
 0x40a   : > { %2927 = vmatmul.f32.gmra.mxu1 %v8355_v24  ;;  %v9416_v24 = vpop.f32.mrf.mxu3  ;;  %3360 = vmatpush.msra.mxu2 %v6407_v25  ;;  %v6431_v45 = vld [vmem:[%s6771_s20 + $0xa68] sm:$0xff] }
 0x40f   : > { %v9403_v6 = vpop.f32.mrf.mxu1 }
 0x410   : > { %12819 = vst [vmem:[#allocation37_spill] sm:$0xff] %v9403_v6  ;;  %v9405_v52 = vpop.f32.mrf.mxu2 }
 0x411   : > { %12820 = vst [vmem:[#allocation112_spill] sm:$0xff] %v9405_v52  ;;  %2878 = vmatmul.f32.gmra.mxu0 %v9058_v31 }
 0x412   : > { %2930 = vmatmul.f32.gmra.mxu1 %v8392_v10  ;;  %v6406_v10 = vld [vmem:[%s6771_s20 + $0x9a0] sm:$0xff]  ;;  %v9427_v31 = vpop.f32.mrf.mxu3 }
 0x413   : > { %3361 = vmatpush.msra.mxu2 %v6406_v10  ;;  %v6405_v10 = vld [vmem:[%s6771_s20 + $0x998] sm:$0xff] }
 0x415   : > { %3362 = vmatpush.msra.mxu2 %v6405_v10 }
 0x417   : > { %v9411_v19 = vpop.f32.mrf.mxu1 }
 0x418   : > { %12821 = vst [vmem:[#allocation84_spill] sm:$0xff] %v9411_v19  ;;  %v9413_v29 = vpop.f32.mrf.mxu2  ;;  %v9429_v19 = vpop.f32.mrf.mxu0 }
 0x419   : > { %12822 = vst [vmem:[#allocation113_spill] sm:$0xff] %v9413_v29 }
 0x41a   : > { %2933 = vmatmul.f32.gmra.mxu1 %v8426_v44  ;;  %v9436_v25 = vpop.f32.mrf.mxu3 }
 0x41f   : > { %v9421_v3 = vpop.f32.mrf.mxu1 }
 0x420   : > { %12823 = vst [vmem:[#allocation99_spill] sm:$0xff] %v9421_v3  ;;  %v9423_v12 = vpop.f32.mrf.mxu2 }
 0x421   : > { %12824 = vst [vmem:[#allocation114_spill] sm:$0xff] %v9423_v12 }
 0x422   : > { %2936 = vmatmul.f32.gmra.mxu1 %v8463_v59  ;;  %v9442_v59 = vpop.f32.mrf.mxu0 }
 0x427   : > { %v9431_v44 = vpop.f32.mrf.mxu1 }
 0x428   : > { %12825 = vst [vmem:[#allocation85_spill] sm:$0xff] %v9431_v44  ;;  %v9433_v29 = vpop.f32.mrf.mxu2 }
 0x429   : > { %12826 = vst [vmem:[#allocation86_spill] sm:$0xff] %v9433_v29  ;;  %v9450_v29 = vpop.f32.mrf.mxu3 }
 0x42a   : > { %2939 = vmatmul.f32.gmra.mxu1 %v12759_v55  ;;  %v9453_v55 = vpop.f32.mrf.mxu0 }
 0x42f   : > { %v9438_v3 = vpop.f32.mrf.mxu1 }
 0x430   : > { %12827 = vst [vmem:[#allocation88_spill] sm:$0xff] %v9438_v3  ;;  %v9440_v12 = vpop.f32.mrf.mxu2  ;;  %v6401_v3 = vld [vmem:[%s6771_s20 + $0x978] sm:$0xff] }
 0x431   : > { %12828 = vst [vmem:[#allocation116_spill] sm:$0xff] %v9440_v12  ;;  %3442 = vmatpush.msra.mxu3 %v6401_v3  ;;  %v6403_v3 = vld [vmem:[%s6771_s20 + $0x988] sm:$0xff] }
 0x432   : > { %2942 = vmatmul.f32.gmra.mxu1 %v8530_v60  ;;  %v6404_v60 = vld [vmem:[%s6771_s20 + $0x990] sm:$0xff] }
 0x433   : > { %3363 = vmatpush.msra.mxu2 %v6404_v60  ;;  %3443 = vmatpush.msra.mxu3 %v6400_v54  ;;  %v6399_v60 = vld [vmem:[%s6771_s20 + $0x968] sm:$0xff] }
 0x435   : > { %3364 = vmatpush.msra.mxu2 %v6403_v3  ;;  %3444 = vmatpush.msra.mxu3 %v6399_v60  ;;  %v6396_v3 = vld [vmem:[%s6771_s20 + $0x950] sm:$0xff] }
 0x436   : > { %v6432_v60 = vld [vmem:[%s6771_s20 + $0xa70] sm:$0xff] }
 0x437   : > { %v9446_v6 = vpop.f32.mrf.mxu1 }
 0x438   : > { %12829 = vst [vmem:[#allocation102_spill] sm:$0xff] %v9446_v6  ;;  %v9448_v44 = vpop.f32.mrf.mxu2  ;;  %v9462_v6 = vpop.f32.mrf.mxu3 }
 0x439   : > { %12830 = vst [vmem:[#allocation117_spill] sm:$0xff] %v9448_v44  ;;  %v9464_v44 = vpop.f32.mrf.mxu0 }
 0x43a   : > { %2945 = vmatmul.f32.gmra.mxu1 %v8567_v49 }
 0x43f   : > { %v9456_v12 = vpop.f32.mrf.mxu1 }
 0x440   : > { %12831 = vst [vmem:[#allocation119_spill] sm:$0xff] %v9456_v12  ;;  %v9459_v10 = vpop.f32.mrf.mxu2  ;;  %v6398_v12 = vld [vmem:[%s6771_s20 + $0x960] sm:$0xff] }
 0x441   : > { %12832 = vst [vmem:[#allocation120_spill] sm:$0xff] %v9459_v10  ;;  %3445 = vmatpush.msra.mxu3 %v6398_v12  ;;  %v9477_v10 = vpop.f32.mrf.mxu0  ;;  %v6395_v12 = vld [vmem:[%s6771_s20 + $0x948] sm:$0xff] }
 0x442   : > { %2948 = vmatmul.f32.gmra.mxu1 %v12772_v1  ;;  %v9475_v1 = vpop.f32.mrf.mxu3 }
 0x447   : > { %v9466_v49 = vpop.f32.mrf.mxu1 }
 0x448   : > { %12833 = vst [vmem:[#allocation122_spill] sm:$0xff] %v9466_v49  ;;  %v9468_v52 = vpop.f32.mrf.mxu2 }
 0x449   : > { %12834 = vst [vmem:[#allocation123_spill] sm:$0xff] %v9468_v52  ;;  %v6433_v52 = vld [vmem:[%s6771_s20 + $0xa78] sm:$0xff] }
 0x44a   : > { %2951 = vmatmul.f32.gmra.mxu1 %v8638_v43  ;;  %v6397_v43 = vld [vmem:[%s6771_s20 + $0x958] sm:$0xff]  ;;  %3551 = vmatpush.msrb.mxu0 %v6433_v52  ;;  %v9492_v52 = vpop.f32.mrf.mxu3 }
 0x44b   : > { %3446 = vmatpush.msra.mxu3 %v6397_v43 }
 0x44c   : > { %3552 = vmatpush.msrb.mxu0 %v6432_v60  ;;  %v9498_v60 = vpop.f32.mrf.mxu0 }
 0x44d   : > { %3447 = vmatpush.msra.mxu3 %v6396_v3  ;;  %v6429_v3 = vld [vmem:[%s6771_s20 + $0xa58] sm:$0xff] }
 0x44e   : > { %3553 = vmatpush.msrb.mxu0 %v6431_v45  ;;  %v6392_v45 = vld [vmem:[%s6771_s20 + $0x930] sm:$0xff] }
 0x44f   : > { %v9479_v49 = vpop.f32.mrf.mxu1  ;;  %3448 = vmatpush.msra.mxu3 %v6395_v12  ;;  %v6428_v12 = vld [vmem:[%s6771_s20 + $0xa50] sm:$0xff] }
 0x450   : > { %12835 = vst [vmem:[#allocation21_spill] sm:$0xff] %v9479_v49  ;;  %v9483_v54 = vpop.f32.mrf.mxu2  ;;  %v6394_v49 = vld [vmem:[%s6771_s20 + $0x940] sm:$0xff]  ;;  %3554 = vmatpush.msrb.mxu0 %v6430_v34  ;;  %v6391_v34 = vld [vmem:[%s6771_s20 + $0x928] sm:$0xff] }
 0x451   : > { %12836 = vst [vmem:[#allocation12_spill] sm:$0xff] %v9483_v54  ;;  %3449 = vmatpush.msra.mxu3 %v6394_v49  ;;  %v6427_v49 = vld [vmem:[%s6771_s20 + $0xa48] sm:$0xff] }
 0x452   : > { %2954 = vmatmul.f32.gmra.mxu1 %v12780_v22  ;;  %v6393_v22 = vld [vmem:[%s6771_s20 + $0x938] sm:$0xff]  ;;  %3555 = vmatpush.msrb.mxu0 %v6429_v3 }
 0x453   : > { %3450 = vmatpush.msra.mxu3 %v6393_v22  ;;  %v6390_v22 = vld [vmem:[%s6771_s20 + $0x920] sm:$0xff] }
 0x454   : > { %3556 = vmatpush.msrb.mxu0 %v6428_v12  ;;  %v6388_v12 = vld [vmem:[%s6771_s20 + $0x910] sm:$0xff] }
 0x455   : > { %3451 = vmatpush.msra.mxu3 %v6392_v45  ;;  %v6402_v45 = vld [vmem:[%s6771_s20 + $0x980] sm:$0xff] }
 0x456   : > { %3557 = vmatpush.msrb.mxu0 %v6427_v49  ;;  %3365 = vmatpush.msra.mxu2 %v6402_v45  ;;  %v6466_v45 = vld [vmem:[%s6771_s20 + $0xb78] sm:$0xff] }
 0x457   : > { %v9494_v43 = vpop.f32.mrf.mxu1  ;;  %3452 = vmatpush.msra.mxu3 %v6391_v34  ;;  %v9517_v34 = vpop.f32.mrf.mxu0 }
 0x458   : > { %12837 = vst [vmem:[#allocation26_spill] sm:$0xff] %v9494_v43  ;;  %v9502_v54 = vpop.f32.mrf.mxu2  ;;  %v6426_v43 = vld [vmem:[%s6771_s20 + $0xa40] sm:$0xff]  ;;  %3824 = vmatpush.msrb.mxu2 %v6466_v45 }
 0x459   : > { %12838 = vst [vmem:[#allocation30_spill] sm:$0xff] %v9502_v54  ;;  %3453 = vmatpush.msra.mxu3 %v6390_v22  ;;  %3558 = vmatpush.msrb.mxu0 %v6426_v43  ;;  %v6425_v54 = vld [vmem:[%s6771_s20 + $0xa38] sm:$0xff]  ;;  %v6387_v43 = vld [vmem:[%s6771_s20 + $0x908] sm:$0xff]  ;;  %v6422_v22 = vld [vmem:[%s6771_s20 + $0xa20] sm:$0xff] }
 0x45a   : > { %2957 = vmatmul.f32.gmra.mxu1 %v12785_v35  ;;  %v9511_v35 = vpop.f32.mrf.mxu3 }
 0x45b   : > { %3454 = vmatpush.msra.mxu3 %v6389_v26  ;;  %3559 = vmatpush.msrb.mxu0 %v6425_v54  ;;  %v6423_v26 = vld [vmem:[%s6771_s20 + $0xa28] sm:$0xff]  ;;  %v6386_v54 = vld [vmem:[%s6771_s20 + $0x900] sm:$0xff] }
 0x45d   : > { %3455 = vmatpush.msra.mxu3 %v6388_v12  ;;  %3560 = vmatpush.msrb.mxu0 %v6424_v32  ;;  %v6419_v12 = vld [vmem:[%s6771_s20 + $0xa08] sm:$0xff] }
 0x45f   : > { %v2502_v3 = vpop.f32.mrf.mxu1  ;;  %3456 = vmatpush.msra.mxu3 %v6387_v43  ;;  %3561 = vmatpush.msrb.mxu0 %v6423_v26  ;;  %v2808_v43 = vadd.f32 %v9407_v36, %v9367_v7  ;;  %v2395_v26 = vadd.f32 %v9256_v47, %v9394_v56  ;;  %v6450_v36 = vld [vmem:[%s6771_s20 + $0xaf8] sm:$0xff] }
 0x460   : > { %v9521_v49 = vpop.f32.mrf.mxu2  ;;  %3690 = vmatpush.msrb.mxu1 %v6450_v36 }
 0x461   : > { %12839 = vst [vmem:[#allocation94_spill] sm:$0xff] %v9521_v49  ;;  %3457 = vmatpush.msra.mxu3 %v6386_v54  ;;  %3562 = vmatpush.msrb.mxu0 %v6422_v22  ;;  %v9536_v54 = vpop.f32.mrf.mxu0  ;;  %v6418_v22 = vld [vmem:[%s6771_s20 + $0xa00] sm:$0xff]  ;;  %v2529_v49 = vadd.f32 %v2502_v3, %v2395_v26  ;;  %v6449_v3 = vld [vmem:[%s6771_s20 + $0xaf0] sm:$0xff] }
 0x462   : > { %2960 = vmatmul.f32.gmra.mxu1 %v8748_v53  ;;  %v6421_v53 = vld [vmem:[%s6771_s20 + $0xa18] sm:$0xff]  ;;  %v9529_v32 = vpop.f32.mrf.mxu3 }
 0x463   : > { %3563 = vmatpush.msrb.mxu0 %v6421_v53  ;;  %v2811_v53 = vadd.f32 %v9419_v63, %v9416_v24  ;;  %3691 = vmatpush.msrb.mxu1 %v6449_v3 }
 0x465   : > { %3564 = vmatpush.msrb.mxu0 %v6420_v11 }
 0x467   : > { %v2916_v20 = vpop.f32.mrf.mxu1  ;;  %3565 = vmatpush.msrb.mxu0 %v6419_v12 }
 0x468   : > { %v2636_v45 = vpop.f32.mrf.mxu2 }
 0x469   : > { %3566 = vmatpush.msrb.mxu0 %v6418_v22  ;;  %v2663_v7 = vadd.f32 %v2636_v45, %v2529_v49  ;;  %v2814_v49 = vadd.f32 %v9429_v19, %v9427_v31  ;;  %v6465_v22 = vld [vmem:[%s6771_s20 + $0xb70] sm:$0xff]  ;;  %v6446_v31 = vld [vmem:[%s6771_s20 + $0xad8] sm:$0xff] }
 0x46a   : > { %2963 = vmatmul.f32.gmra.mxu1 %v8786_v2  ;;  %v9541_v2 = vadd.f32 %v2916_v20, %v2808_v43  ;;  %v9550_v24 = vpop.f32.mrf.mxu3  ;;  %v6448_v43 = vld [vmem:[%s6771_s20 + $0xae8] sm:$0xff]  ;;  %3825 = vmatpush.msrb.mxu2 %v6465_v22 }
 0x46b   : > { %v3090_v63 = vadd.f32 %v9263_v16, %v2663_v7  ;;  %3692 = vmatpush.msrb.mxu1 %v6448_v43  ;;  %v12840_v16 = vld [vmem:[#allocation58_spill] sm:$0xff]  ;;  %v12843_v22 = vld [vmem:[#allocation91_spill] sm:$0xff] }
 0x46c   : > { %v12256_v56 = vrot.slane %v9541_v2, 2 }
 0x46f   : > { %v2919_v11 = vpop.f32.mrf.mxu1 }
 0x470   : > { %v2992_v39 = vadd.f32 %v2919_v11, %v2811_v53  ;;  %v6447_v53 = vld [vmem:[%s6771_s20 + $0xae0] sm:$0xff]  ;;  %v2372_v11 = vadd.f32 %v9256_v47, %v12840_v16  ;;  %v6464_v16 = vld [vmem:[%s6771_s20 + $0xb68] sm:$0xff] }
 0x471   : > { %3693 = vmatpush.msrb.mxu1 %v6447_v53  ;;  %3826 = vmatpush.msrb.mxu2 %v6464_v16  ;;  %v12845_v16 = vld [vmem:[#allocation92_spill] sm:$0xff] }
 0x472   : > { %v3092_v46 = vrot.slane %v2992_v39, 2  ;;  %2966 = vmatmul.f32.gmra.mxu1 %v12797_v28  ;;  %v9556_v39 = vpop.f32.mrf.mxu0  ;;  %v2506_v36 = vadd.f32 %v9265_v8, %v2372_v11 }
 0x473   : > { %3694 = vmatpush.msrb.mxu1 %v6446_v31 }
 0x474   : > { %v3139_v20 = vsel %vm1579_vm3, %v12256_v56, %v3092_v46  ;;  %v2640_v3 = vadd.f32 %v9288_v40, %v2506_v36  ;;  %v6442_v36 = vld [vmem:[%s6771_s20 + $0xab8] sm:$0xff] }
 0x475   : > { %v3165_v12 = vadd.f32 %v3139_v20, %v3090_v63  ;;  %v6445_v63 = vld [vmem:[%s6771_s20 + $0xad0] sm:$0xff] }
 0x476   : > { %3695 = vmatpush.msrb.mxu1 %v6445_v63 }
 0x477   : > { %v2922_v28 = vpop.f32.mrf.mxu1  ;;  %v3190_v19 = vmax.f32 %v3165_v12, 0.0  ;;  %v12841_v12 = vld [vmem:[#allocation49_spill] sm:$0xff] }
 0x478   : > { %v2993_v26 = vadd.f32 %v2922_v28, %v2814_v49  ;;  %v9573_v49 = vpop.f32.mrf.mxu3 }
 0x479   : > { %v9576_v28 = vmul.f32 %v3190_v19, %v12841_v12  ;;  %v3067_v19 = vadd.f32 %v9282_v0, %v2640_v3  ;;  %v2820_v3 = vadd.f32 %v9453_v55, %v9450_v29  ;;  %v2374_v29 = vadd.f32 %v9256_v47, %v9110_v9  ;;  %v6457_v12 = vld [vmem:[%s6771_s20 + $0xb30] sm:$0xff] }
 0x47a   : > { %v3093_v45 = vrot.slane %v2993_v26, 2  ;;  %2969 = vmatmul.f32.gmra.mxu1 %v8882_v38  ;;  %v2817_v38 = vadd.f32 %v9442_v59, %v9436_v25  ;;  %v6444_v26 = vld [vmem:[%s6771_s20 + $0xac8] sm:$0xff]  ;;  %v6443_v25 = vld [vmem:[%s6771_s20 + $0xac0] sm:$0xff]  ;;  %v12844_v59 = vld [vmem:[#allocation36_spill] sm:$0xff] }
 0x47b   : > { %12842 = vst [vmem:[#allocation90_spill] sm:$0xff] %v9576_v28  ;;  %3696 = vmatpush.msrb.mxu1 %v6444_v26  ;;  %v2373_v11 = vadd.f32 %v9256_v47, %v12844_v59  ;;  %v6439_v59 = vld [vmem:[%s6771_s20 + $0xaa0] sm:$0xff] }
 0x47c   : > { %v3138_v7 = vsel %vm1579_vm3, %v3092_v46, %v3093_v45 }
 0x47d   : > { %v3141_v20 = vadd.f32 %v3138_v7, %v9284_v17  ;;  %v9579_v17 = vpop.f32.mrf.mxu0  ;;  %v12255_v7 = vrot.slane %v9576_v28, 7  ;;  %3697 = vmatpush.msrb.mxu1 %v6443_v25 }
 0x47f   : > { %v3166_v43 = vmax.f32 %v3141_v20, 0.0  ;;  %v2925_v46 = vpop.f32.mrf.mxu1  ;;  %3698 = vmatpush.msrb.mxu1 %v6442_v36 }
 0x480   : > { %v2994_v8 = vadd.f32 %v2925_v46, %v2817_v38  ;;  %v6441_v38 = vld [vmem:[%s6771_s20 + $0xab0] sm:$0xff] }
 0x481   : > { %v9582_v53 = vmul.f32 %v3166_v43, %v12843_v22  ;;  %3699 = vmatpush.msrb.mxu1 %v6441_v38  ;;  %v12889_v22 = vld [vmem:[#allocation60_spill] sm:$0xff] }
 0x482   : > { %v3094_v40 = vrot.slane %v2994_v8, 2  ;;  %2972 = vmatmul.f32.gmra.mxu1 %v8936_v41  ;;  %v2507_v41 = vadd.f32 %v9286_v5, %v2373_v11  ;;  %v6440_v5 = vld [vmem:[%s6771_s20 + $0xaa8] sm:$0xff]  ;;  %v9609_v8 = vpop.f32.mrf.mxu3 }
 0x483   : > { %3366 = vmatmul.f32.vlgmr.msra.gmra.mxu2 %v9582_v53  ;;  %v3216_v31 = vrot.slane %v9582_v53, 7  ;;  %3700 = vmatpush.msrb.mxu1 %v6440_v5  ;;  %v6436_v5 = vld [vmem:[%s6771_s20 + $0xa88] sm:$0xff] }
 0x484   : > { %v3137_v20 = vsel %vm1579_vm3, %v3093_v45, %v3094_v40  ;;  %v2641_v43 = vadd.f32 %v9300_v13, %v2507_v41  ;;  %v12846_v13 = vld [vmem:[#allocation51_spill] sm:$0xff] }
 0x485   : > { %v3142_v63 = vadd.f32 %v3137_v20, %v3067_v19  ;;  %v9601_v0 = vsel %vm292_vm0, %v12255_v7, %v3216_v31  ;;  %v9619_v19 = vpop.f32.mrf.mxu0  ;;  %v12254_v20 = vrot.slane %v9582_v53, 1  ;;  %3701 = vmatpush.msrb.mxu1 %v6439_v59  ;;  %v12848_v59 = vld [vmem:[#allocation115_spill] sm:$0xff] }
 0x486   : > { %3458 = vmatmul.f32.vlgmr.msra.gmra.mxu3 %v9601_v0  ;;  %v3068_v11 = vadd.f32 %v12846_v13, %v2641_v43  ;;  %v6463_v13 = vld [vmem:[%s6771_s20 + $0xb60] sm:$0xff] }
 0x487   : > { %v3167_v45 = vmax.f32 %v3142_v63, 0.0  ;;  %v2928_v46 = vpop.f32.mrf.mxu1  ;;  %v6438_v63 = vld [vmem:[%s6771_s20 + $0xa98] sm:$0xff]  ;;  %3827 = vmatpush.msrb.mxu2 %v6463_v13 }
 0x488   : > { %v2995_v26 = vadd.f32 %v2928_v46, %v2820_v3  ;;  %3702 = vmatpush.msrb.mxu1 %v6438_v63 }
 0x489   : > { %v9612_v25 = vmul.f32 %v3167_v45, %v12845_v16  ;;  %v6437_v45 = vld [vmem:[%s6771_s20 + $0xa90] sm:$0xff] }
 0x48a   : > { %v3095_v55 = vrot.slane %v2995_v26, 2  ;;  %2975 = vmatmul.f32.gmra.mxu1 %v8980_v62  ;;  %v2508_v62 = vadd.f32 %v9298_v15, %v2374_v29 }
 0x48b   : > { %3369 = vmatmul.f32.gmra.mxu2 %v9612_v25  ;;  %v3217_v36 = vrot.slane %v9612_v25, 7  ;;  %v3267_v41 = vrot.slane %v9612_v25, 1  ;;  %3703 = vmatpush.msrb.mxu1 %v6437_v45 }
 0x48c   : > { %v3136_v9 = vsel %vm1579_vm3, %v3094_v40, %v3095_v55  ;;  %v2823_v40 = vadd.f32 %v9464_v44, %v9462_v6  ;;  %v2642_v15 = vadd.f32 %v9309_v14, %v2508_v62  ;;  %v12849_v6 = vld [vmem:[#allocation61_spill] sm:$0xff]  ;;  %v9655_v62 = vpop.f32.mrf.mxu3 }
 0x48d   : > { %v3143_v38 = vadd.f32 %v3136_v9, %v3068_v11  ;;  %v9631_v3 = vsel %vm292_vm0, %v3216_v31, %v3217_v36  ;;  %v9637_v43 = vsel %vm343_vm1, %v12254_v20, %v3267_v41  ;;  %3704 = vmatpush.msrb.mxu1 %v6436_v5  ;;  %v6435_v11 = vld [vmem:[%s6771_s20 + $0xa80] sm:$0xff]  ;;  %v2375_v44 = vadd.f32 %v9256_v47, %v12849_v6  ;;  %v12850_v9 = vld [vmem:[#allocation53_spill] sm:$0xff] }
 0x48e   : > { %12847 = vst [vmem:[#allocation95_spill] sm:$0xff] %v9637_v43  ;;  %3461 = vmatmul.f32.gmra.mxu3 %v9631_v3  ;;  %3567 = vmatmul.f32.vlgmr.msrb.gmra.mxu0 %v9637_v43  ;;  %v3069_v14 = vadd.f32 %v12850_v9, %v2642_v15  ;;  %v12851_v6 = vld [vmem:[#allocation118_spill] sm:$0xff] }
 0x48f   : > { %v3168_v31 = vmax.f32 %v3143_v38, 0.0  ;;  %v2931_v46 = vpop.f32.mrf.mxu1  ;;  %3705 = vmatpush.msrb.mxu1 %v6435_v11 }
 0x490   : > { %v2996_v26 = vadd.f32 %v2931_v46, %v2823_v40 }
 0x491   : > { %v9647_v29 = vmul.f32 %v3168_v31, %v12848_v59  ;;  %v9663_v31 = vpop.f32.mrf.mxu0 }
 0x492   : > { %v3096_v63 = vrot.slane %v2996_v26, 2  ;;  %2978 = vmatmul.f32.gmra.mxu1 %v9014_v58  ;;  %v2509_v58 = vadd.f32 %v9306_v23, %v2375_v44  ;;  %v2826_v26 = vadd.f32 %v9477_v10, %v9475_v1  ;;  %v12853_v1 = vld [vmem:[#allocation54_spill] sm:$0xff] }
 0x493   : > { %3372 = vmatmul.f32.gmra.mxu2 %v9647_v29  ;;  %v3218_v38 = vrot.slane %v9647_v29, 7  ;;  %v3268_v45 = vrot.slane %v9647_v29, 1 }
 0x494   : > { %v3135_v40 = vsel %vm1579_vm3, %v3095_v55, %v3096_v63  ;;  %v2643_v23 = vadd.f32 %v9320_v33, %v2509_v58 }
 0x495   : > { %v3144_v46 = vadd.f32 %v3135_v40, %v3069_v14  ;;  %v9667_v15 = vsel %vm292_vm0, %v3217_v36, %v3218_v38  ;;  %v9671_v5 = vsel %vm343_vm1, %v3267_v41, %v3268_v45  ;;  %v6462_v36 = vld [vmem:[%s6771_s20 + $0xb58] sm:$0xff] }
 0x496   : > { %3464 = vmatmul.f32.gmra.mxu3 %v9667_v15  ;;  %3570 = vmatmul.f32.gmra.mxu0 %v9671_v5  ;;  %v12852_v41 = vld [vmem:[#allocation97_spill] sm:$0xff]  ;;  %v3070_v14 = vadd.f32 %v12853_v1, %v2643_v23 }
 0x497   : > { %v3169_v55 = vmax.f32 %v3144_v46, 0.0  ;;  %v2934_v13 = vpop.f32.mrf.mxu1  ;;  %3828 = vmatpush.msrb.mxu2 %v6462_v36  ;;  %v2376_v10 = vadd.f32 %v9256_v47, %v12852_v41 }
 0x498   : > { %v2997_v11 = vadd.f32 %v2934_v13, %v2826_v26  ;;  %v9692_v26 = vpop.f32.mrf.mxu3  ;;  %v2829_v13 = vadd.f32 %v9498_v60, %v9492_v52  ;;  %v12856_v60 = vld [vmem:[#allocation16_spill] sm:$0xff] }
 0x499   : > { %v9679_v44 = vmul.f32 %v3169_v55, %v12851_v6  ;;  %v2510_v46 = vadd.f32 %v9318_v27, %v2376_v10 }
 0x49a   : > { %v3097_v9 = vrot.slane %v2997_v11, 2  ;;  %2981 = vmatmul.f32.gmra.mxu1 %v9036_v21 }
 0x49b   : > { %3375 = vmatmul.f32.gmra.mxu2 %v9679_v44  ;;  %v3219_v33 = vrot.slane %v9679_v44, 7  ;;  %v3269_v40 = vrot.slane %v9679_v44, 1  ;;  %v2644_v27 = vadd.f32 %v9331_v50, %v2510_v46 }
 0x49c   : > { %v3134_v58 = vsel %vm1579_vm3, %v3096_v63, %v3097_v9  ;;  %v9707_v63 = vpop.f32.mrf.mxu0 }
 0x49d   : > { %v3145_v21 = vadd.f32 %v3134_v58, %v3070_v14  ;;  %v9696_v55 = vsel %vm292_vm0, %v3218_v38, %v3219_v33  ;;  %v9700_v23 = vsel %vm343_vm1, %v3268_v45, %v3269_v40  ;;  %v12854_v38 = vld [vmem:[#allocation77_spill] sm:$0xff]  ;;  %v12855_v45 = vld [vmem:[#allocation98_spill] sm:$0xff]  ;;  %v3071_v14 = vadd.f32 %v12856_v60, %v2644_v27 }
 0x49e   : > { %3467 = vmatmul.f32.gmra.mxu3 %v9696_v55  ;;  %3573 = vmatmul.f32.gmra.mxu0 %v9700_v23  ;;  %v2377_v52 = vadd.f32 %v9256_v47, %v12855_v45 }
 0x49f   : > { %v3170_v11 = vmax.f32 %v3145_v21, 0.0  ;;  %v2937_v36 = vpop.f32.mrf.mxu1 }
 0x4a0   : > { %v2998_v41 = vadd.f32 %v2937_v36, %v2829_v13  ;;  %v2511_v21 = vadd.f32 %v9329_v18, %v2377_v52  ;;  %v9735_v36 = vpop.f32.mrf.mxu3  ;;  %v12858_v52 = vld [vmem:[#allocation96_spill] sm:$0xff] }
 0x4a1   : > { %v9710_v10 = vmul.f32 %v3170_v11, %v12854_v38  ;;  %v2832_v11 = vadd.f32 %v9517_v34, %v9511_v35  ;;  %v12859_v35 = vld [vmem:[#allocation64_spill] sm:$0xff]  ;;  %v12881_v38 = vld [vmem:[#allocation41_spill] sm:$0xff] }
 0x4a2   : > { %v3098_v1 = vrot.slane %v2998_v41, 2  ;;  %2984 = vmatmul.f32.gmra.mxu1 %v9062_v4  ;;  %v2378_v34 = vadd.f32 %v9256_v47, %v12859_v35 }
 0x4a3   : > { %3378 = vmatmul.f32.gmra.mxu2 %v9710_v10  ;;  %v3220_v50 = vrot.slane %v9710_v10, 7  ;;  %v3270_v58 = vrot.slane %v9710_v10, 1 }
 0x4a4   : > { %v3133_v46 = vsel %vm1579_vm3, %v3097_v9, %v3098_v1  ;;  %v2645_v9 = vadd.f32 %v9341_v37, %v2511_v21 }
 0x4a5   : > { %v3146_v13 = vadd.f32 %v3133_v46, %v3071_v14  ;;  %v9724_v4 = vsel %vm292_vm0, %v3219_v33, %v3220_v50  ;;  %v9728_v27 = vsel %vm343_vm1, %v3269_v40, %v3270_v58  ;;  %v9737_v33 = vpop.f32.mrf.mxu0  ;;  %v6461_v40 = vld [vmem:[%s6771_s20 + $0xb50] sm:$0xff] }
 0x4a6   : > { %12857 = vst [vmem:[#allocation31_spill] sm:$0xff] %v9724_v4  ;;  %3470 = vmatmul.f32.gmra.mxu3 %v9724_v4  ;;  %3576 = vmatmul.f32.gmra.mxu0 %v9728_v27  ;;  %v12860_v46 = vld [vmem:[#allocation32_spill] sm:$0xff] }
 0x4a7   : > { %v3171_v18 = vmax.f32 %v3146_v13, 0.0  ;;  %v2940_v41 = vpop.f32.mrf.mxu1  ;;  %3829 = vmatpush.msrb.mxu2 %v6461_v40  ;;  %v3072_v37 = vadd.f32 %v12860_v46, %v2645_v9 }
 0x4a8   : > { %v2999_v45 = vadd.f32 %v2940_v41, %v2832_v11 }
 0x4a9   : > { %v9740_v60 = vmul.f32 %v3171_v18, %v12858_v52  ;;  %v2512_v18 = vadd.f32 %v9339_v48, %v2378_v34  ;;  %v9766_v34 = vpop.f32.mrf.mxu3 }
 0x4aa   : > { %v3099_v14 = vrot.slane %v2999_v45, 2  ;;  %2987 = vmatmul.f32.gmra.mxu1 %v9082_v51  ;;  %v2835_v45 = vadd.f32 %v9536_v54, %v9529_v32  ;;  %v12863_v32 = vld [vmem:[#allocation13_spill] sm:$0xff] }
 0x4ab   : > { %3381 = vmatmul.f32.gmra.mxu2 %v9740_v60  ;;  %v3221_v21 = vrot.slane %v9740_v60, 7  ;;  %v3271_v13 = vrot.slane %v9740_v60, 1  ;;  %v2379_v54 = vadd.f32 %v9256_v47, %v12863_v32  ;;  %v12866_v32 = vld [vmem:[#allocation121_spill] sm:$0xff] }
 0x4ac   : > { %v3132_v11 = vsel %vm1579_vm3, %v3098_v1, %v3099_v14  ;;  %v2646_v1 = vadd.f32 %v9352_v30, %v2512_v18 }
 0x4ad   : > { %v3147_v41 = vadd.f32 %v3132_v11, %v3072_v37  ;;  %v9755_v51 = vsel %vm292_vm0, %v3220_v50, %v3221_v21  ;;  %v9759_v9 = vsel %vm343_vm1, %v3270_v58, %v3271_v13  ;;  %v12862_v50 = vld [vmem:[#allocation20_spill] sm:$0xff]  ;;  %v6460_v37 = vld [vmem:[%s6771_s20 + $0xb48] sm:$0xff]  ;;  %v12864_v11 = vld [vmem:[#allocation57_spill] sm:$0xff]  ;;  %v9776_v7 = vpop.f32.mrf.mxu0 }
 0x4ae   : > { %12861 = vst [vmem:[#allocation87_spill] sm:$0xff] %v9755_v51  ;;  %3473 = vmatmul.f32.gmra.mxu3 %v9755_v51  ;;  %3579 = vmatmul.f32.gmra.mxu0 %v9759_v9  ;;  %v3073_v20 = vadd.f32 %v12864_v11, %v2646_v1 }
 0x4af   : > { %v3172_v40 = vmax.f32 %v3147_v41, 0.0  ;;  %v2943_v48 = vpop.f32.mrf.mxu1  ;;  %3830 = vmatpush.msrb.mxu2 %v6460_v37 }
 0x4b0   : > { %v3000_v35 = vadd.f32 %v2943_v48, %v2835_v45  ;;  %v2513_v45 = vadd.f32 %v9350_v61, %v2379_v54 }
 0x4b1   : > { %v9769_v46 = vmul.f32 %v3172_v40, %v12862_v50 }
 0x4b2   : > { %v3100_v58 = vrot.slane %v3000_v35, 2  ;;  %3706 = vmatmul.f32.vlgmr.msrb.gmra.mxu1 %v9601_v0  ;;  %v2838_v35 = vadd.f32 %v9556_v39, %v9550_v24  ;;  %v9804_v39 = vpop.f32.mrf.mxu3 }
 0x4b3   : > { %3384 = vmatmul.f32.gmra.mxu2 %v9769_v46  ;;  %v3222_v30 = vrot.slane %v9769_v46, 7  ;;  %v3272_v18 = vrot.slane %v9769_v46, 1 }
 0x4b4   : > { %v3131_v41 = vsel %vm1579_vm3, %v3099_v14, %v3100_v58  ;;  %v2647_v14 = vadd.f32 %v9361_v57, %v2513_v45 }
 0x4b5   : > { %v3148_v40 = vadd.f32 %v3131_v41, %v3073_v20  ;;  %v9786_v48 = vsel %vm292_vm0, %v3221_v21, %v3222_v30  ;;  %v9790_v1 = vsel %vm343_vm1, %v3271_v13, %v3272_v18  ;;  %v12867_v13 = vld [vmem:[#allocation66_spill] sm:$0xff]  ;;  %v12868_v41 = vld [vmem:[#allocation59_spill] sm:$0xff] }
 0x4b6   : > { %12865 = vst [vmem:[#allocation9_spill] sm:$0xff] %v9786_v48  ;;  %3476 = vmatmul.f32.gmra.mxu3 %v9786_v48  ;;  %3582 = vmatmul.f32.gmra.mxu0 %v9790_v1  ;;  %v2380_v11 = vadd.f32 %v9256_v47, %v12867_v13  ;;  %v3074_v24 = vadd.f32 %v12868_v41, %v2647_v14 }
 0x4b7   : > { %v3173_v37 = vmax.f32 %v3148_v40, 0.0  ;;  %v2946_v61 = vpop.f32.mrf.mxu1  ;;  %v2841_v41 = vadd.f32 %v9579_v17, %v9573_v49  ;;  %v12874_v17 = vld [vmem:[#allocation19_spill] sm:$0xff] }
 0x4b8   : > { %v3001_v20 = vadd.f32 %v2946_v61, %v2838_v35  ;;  %v12869_v35 = vld [vmem:[#allocation75_spill] sm:$0xff]  ;;  %v9812_v61 = vpop.f32.mrf.mxu0 }
 0x4b9   : > { %v9798_v54 = vmul.f32 %v3173_v37, %v12866_v32  ;;  %v2514_v37 = vadd.f32 %v12869_v35, %v2380_v11 }
 0x4ba   : > { %v3101_v21 = vrot.slane %v3001_v20, 2  ;;  %3709 = vmatmul.f32.gmra.mxu1 %v9631_v3 }
 0x4bb   : > { %3387 = vmatmul.f32.gmra.mxu2 %v9798_v54  ;;  %v3223_v57 = vrot.slane %v9798_v54, 7  ;;  %v3273_v45 = vrot.slane %v9798_v54, 1 }
 0x4bc   : > { %v3130_v40 = vsel %vm1579_vm3, %v3100_v58, %v3101_v21  ;;  %v12871_v58 = vld [vmem:[#allocation109_spill] sm:$0xff] }
 0x4bd   : > { %v3149_v20 = vadd.f32 %v3130_v40, %v3074_v24  ;;  %v9816_v14 = vsel %vm292_vm0, %v3222_v30, %v3223_v57  ;;  %v9820_v13 = vsel %vm343_vm1, %v3272_v18, %v3273_v45  ;;  %v2648_v11 = vadd.f32 %v12871_v58, %v2514_v37  ;;  %v12872_v40 = vld [vmem:[#allocation25_spill] sm:$0xff]  ;;  %v6459_v30 = vld [vmem:[%s6771_s20 + $0xb40] sm:$0xff]  ;;  %v12873_v18 = vld [vmem:[#allocation68_spill] sm:$0xff] }
 0x4be   : > { %12870 = vst [vmem:[#allocation17_spill] sm:$0xff] %v9816_v14  ;;  %3479 = vmatmul.f32.gmra.mxu3 %v9816_v14  ;;  %3585 = vmatmul.f32.gmra.mxu0 %v9820_v13  ;;  %v2381_v49 = vadd.f32 %v9256_v47, %v12873_v18 }
 0x4bf   : > { %v3174_v35 = vmax.f32 %v3149_v20, 0.0  ;;  %v2949_v56 = vpop.f32.mrf.mxu1  ;;  %3831 = vmatpush.msrb.mxu2 %v6459_v30  ;;  %v3075_v52 = vadd.f32 %v12874_v17, %v2648_v11  ;;  %v2844_v30 = vadd.f32 %v9619_v19, %v9609_v8  ;;  %v12880_v8 = vld [vmem:[#allocation18_spill] sm:$0xff] }
 0x4c0   : > { %v3002_v24 = vadd.f32 %v2949_v56, %v2841_v41  ;;  %v12875_v41 = vld [vmem:[#allocation78_spill] sm:$0xff] }
 0x4c1   : > { %v9828_v32 = vmul.f32 %v3174_v35, %v12872_v40  ;;  %v2515_v58 = vadd.f32 %v12875_v41, %v2381_v49  ;;  %v9841_v35 = vpop.f32.mrf.mxu3  ;;  %v9856_v49 = vpop.f32.mrf.mxu0 }
 0x4c2   : > { %v3102_v50 = vrot.slane %v3002_v24, 2  ;;  %3712 = vmatmul.f32.gmra.mxu1 %v9667_v15 }
 0x4c3   : > { %3390 = vmatmul.f32.gmra.mxu2 %v9828_v32  ;;  %v3224_v37 = vrot.slane %v9828_v32, 7  ;;  %v3274_v20 = vrot.slane %v9828_v32, 1 }
 0x4c4   : > { %v3129_v56 = vsel %vm1579_vm3, %v3101_v21, %v3102_v50  ;;  %v12878_v21 = vld [vmem:[#allocation79_spill] sm:$0xff] }
 0x4c5   : > { %v3150_v24 = vadd.f32 %v3129_v56, %v3075_v52  ;;  %v9845_v47 = vsel %vm292_vm0, %v3223_v57, %v3224_v37  ;;  %v9849_v11 = vsel %vm343_vm1, %v3273_v45, %v3274_v20  ;;  %v2649_v18 = vadd.f32 %v12878_v21, %v2515_v58  ;;  %v12879_v57 = vld [vmem:[#allocation2_spill] sm:$0xff] }
 0x4c6   : > { %12876 = vst [vmem:[#allocation24_spill] sm:$0xff] %v9845_v47  ;;  %3482 = vmatmul.f32.gmra.mxu3 %v9845_v47  ;;  %3588 = vmatmul.f32.gmra.mxu0 %v9849_v11  ;;  %v9863_v45 = vld [vmem:[%s7334_s28 + $0x1] ss:$0 sm:$0xff] }
 0x4c7   : > { %12877 = vst [vmem:[#allocation38_spill] sm:$0xff] %v9849_v11  ;;  %v3175_v52 = vmax.f32 %v3150_v24, 0.0  ;;  %v2952_v17 = vpop.f32.mrf.mxu1  ;;  %v2382_v19 = vadd.f32 %v9863_v45, %v12880_v8  ;;  %v3076_v6 = vadd.f32 %v12881_v38, %v2649_v18  ;;  %v12882_v21 = vld [vmem:[#allocation110_spill] sm:$0xff]  ;;  %v2847_v18 = vadd.f32 %v9663_v31, %v9655_v62  ;;  %v12885_v8 = vld [vmem:[#allocation111_spill] sm:$0xff] }
 0x4c8   : > { %v3003_v56 = vadd.f32 %v2952_v17, %v2844_v30  ;;  %v12888_v62 = vld [vmem:[#allocation70_spill] sm:$0xff] }
 0x4c9   : > { %v9859_v41 = vmul.f32 %v3175_v52, %v12879_v57  ;;  %v2516_v52 = vadd.f32 %v12882_v21, %v2382_v19  ;;  %v9887_v57 = vpop.f32.mrf.mxu3  ;;  %v12886_v21 = vld [vmem:[#allocation124_spill] sm:$0xff]  ;;  %v2383_v31 = vadd.f32 %v9863_v45, %v12888_v62  ;;  %v12893_v62 = vld [vmem:[#allocation83_spill] sm:$0xff] }
 0x4ca   : > { %v3103_v40 = vrot.slane %v3003_v56, 2  ;;  %3715 = vmatmul.f32.gmra.mxu1 %v9696_v55 }
 0x4cb   : > { %3393 = vmatmul.f32.gmra.mxu2 %v9859_v41  ;;  %v3225_v58 = vrot.slane %v9859_v41, 7  ;;  %v3275_v24 = vrot.slane %v9859_v41, 1 }
 0x4cc   : > { %v3128_v30 = vsel %vm1579_vm3, %v3102_v50, %v3103_v40  ;;  %v2650_v50 = vadd.f32 %v12885_v8, %v2516_v52 }
 0x4cd   : > { %v3151_v17 = vadd.f32 %v3128_v30, %v3076_v6  ;;  %v9876_v56 = vsel %vm292_vm0, %v3224_v37, %v3225_v58  ;;  %v9880_v38 = vsel %vm343_vm1, %v3274_v20, %v3275_v24  ;;  %v9889_v37 = vpop.f32.mrf.mxu0  ;;  %v6458_v20 = vld [vmem:[%s6771_s20 + $0xb38] sm:$0xff] }
 0x4ce   : > { %12883 = vst [vmem:[#allocation89_spill] sm:$0xff] %v9876_v56  ;;  %3485 = vmatmul.f32.gmra.mxu3 %v9876_v56  ;;  %3591 = vmatmul.f32.gmra.mxu0 %v9880_v38  ;;  %v3077_v52 = vadd.f32 %v12889_v22, %v2650_v50  ;;  %v2850_v50 = vadd.f32 %v9707_v63, %v9692_v26  ;;  %v12896_v26 = vld [vmem:[#allocation105_spill] sm:$0xff] }
 0x4cf   : > { %12884 = vst [vmem:[#allocation39_spill] sm:$0xff] %v9880_v38  ;;  %v3176_v6 = vmax.f32 %v3151_v17, 0.0  ;;  %v2955_v19 = vpop.f32.mrf.mxu1  ;;  %3832 = vmatpush.msrb.mxu2 %v6458_v20  ;;  %v2384_v63 = vadd.f32 %v9863_v45, %v12896_v26 }
 0x4d0   : > { %v3004_v30 = vadd.f32 %v2955_v19, %v2847_v18 }
 0x4d1   : > { %v9892_v59 = vmul.f32 %v3176_v6, %v12886_v21  ;;  %v12890_v6 = vld [vmem:[#allocation81_spill] sm:$0xff]  ;;  %3833 = vmatpush.msrb.mxu2 %v6457_v12 }
 0x4d2   : > { %v3104_v16 = vrot.slane %v3004_v30, 2  ;;  %3718 = vmatmul.f32.gmra.mxu1 %v9724_v4  ;;  %v2517_v19 = vadd.f32 %v12890_v6, %v2383_v31 }
 0x4d3   : > { %12887 = vst [vmem:[#allocation7_spill] sm:$0xff] %v9892_v59  ;;  %3396 = vmatmul.f32.gmra.mxu2 %v9892_v59  ;;  %v3226_v17 = vrot.slane %v9892_v59, 7  ;;  %v3276_v18 = vrot.slane %v9892_v59, 1  ;;  %v12897_v59 = vld [vmem:[#allocation62_spill] sm:$0xff] }
 0x4d4   : > { %v3127_v8 = vsel %vm1579_vm3, %v3103_v40, %v3104_v16  ;;  %v2651_v40 = vadd.f32 %v12893_v62, %v2517_v19 }
 0x4d5   : > { %v3152_v30 = vadd.f32 %v3127_v8, %v3077_v52  ;;  %v9907_v20 = vsel %vm292_vm0, %v3225_v58, %v3226_v17  ;;  %v9911_v22 = vsel %vm343_vm1, %v3275_v24, %v3276_v18  ;;  %v9918_v8 = vpop.f32.mrf.mxu3  ;;  %v12894_v58 = vld [vmem:[#allocation93_spill] sm:$0xff] }
 0x4d6   : > { %12891 = vst [vmem:[#allocation29_spill] sm:$0xff] %v9907_v20  ;;  %3488 = vmatmul.f32.gmra.mxu3 %v9907_v20  ;;  %3594 = vmatmul.f32.gmra.mxu0 %v9911_v22  ;;  %v3078_v4 = vadd.f32 %v12897_v59, %v2651_v40  ;;  %v2853_v40 = vadd.f32 %v9737_v33, %v9735_v36 }
 0x4d7   : > { %12892 = vst [vmem:[#allocation42_spill] sm:$0xff] %v9911_v22  ;;  %v3177_v21 = vmax.f32 %v3152_v30, 0.0  ;;  %v2958_v31 = vpop.f32.mrf.mxu1  ;;  %v9928_v22 = vpop.f32.mrf.mxu0 }
 0x4d8   : > { %v3005_v52 = vadd.f32 %v2958_v31, %v2850_v50  ;;  %v12898_v50 = vld [vmem:[#allocation82_spill] sm:$0xff] }
 0x4d9   : > { %v9921_v6 = vmul.f32 %v3177_v21, %v12894_v58  ;;  %v2518_v62 = vadd.f32 %v12898_v50, %v2384_v63 }
 0x4da   : > { %v3105_v24 = vrot.slane %v3005_v52, 2  ;;  %3721 = vmatmul.f32.gmra.mxu1 %v9755_v51  ;;  %v12900_v52 = vld [vmem:[#allocation112_spill] sm:$0xff] }
 0x4db   : > { %12895 = vst [vmem:[#allocation46_spill] sm:$0xff] %v9921_v6  ;;  %3399 = vmatmul.f32.gmra.mxu2 %v9921_v6  ;;  %v3227_v19 = vrot.slane %v9921_v6, 7  ;;  %v3277_v30 = vrot.slane %v9921_v6, 1  ;;  %v12904_v6 = vld [vmem:[#allocation3_spill] sm:$0xff] }
 0x4dc   : > { %v3126_v21 = vsel %vm1579_vm3, %v3104_v16, %v3105_v24  ;;  %v2652_v16 = vadd.f32 %v12900_v52, %v2518_v62  ;;  %v12905_v52 = vld [vmem:[#allocation37_spill] sm:$0xff] }
 0x4dd   : > { %v3153_v31 = vadd.f32 %v3126_v21, %v3078_v4  ;;  %v9938_v12 = vsel %vm292_vm0, %v3226_v17, %v3227_v19  ;;  %v9942_v59 = vsel %vm343_vm1, %v3276_v18, %v3277_v30  ;;  %v12901_v21 = vld [vmem:[#allocation35_spill] sm:$0xff]  ;;  %v12903_v18 = vld [vmem:[#allocation106_spill] sm:$0xff]  ;;  %v9956_v33 = vpop.f32.mrf.mxu3 }
 0x4de   : > { %12899 = vst [vmem:[#allocation15_spill] sm:$0xff] %v9942_v59  ;;  %3491 = vmatmul.f32.gmra.mxu3 %v9938_v12  ;;  %3597 = vmatmul.f32.gmra.mxu0 %v9942_v59  ;;  %v2385_v58 = vadd.f32 %v9863_v45, %v12903_v18  ;;  %v3079_v36 = vadd.f32 %v12904_v6, %v2652_v16 }
 0x4df   : > { %v3178_v26 = vmax.f32 %v3153_v31, 0.0  ;;  %v2961_v63 = vpop.f32.mrf.mxu1  ;;  %v2856_v18 = vadd.f32 %v9776_v7, %v9766_v34  ;;  %v12911_v34 = vld [vmem:[#allocation63_spill] sm:$0xff] }
 0x4e0   : > { %v3006_v4 = vadd.f32 %v2961_v63, %v2853_v40  ;;  %v9964_v63 = vpop.f32.mrf.mxu0 }
 0x4e1   : > { %v9950_v50 = vmul.f32 %v3178_v26, %v12901_v21  ;;  %v2519_v26 = vadd.f32 %v12905_v52, %v2385_v58 }
 0x4e2   : > { %v3106_v17 = vrot.slane %v3006_v4, 2  ;;  %3724 = vmatmul.f32.gmra.mxu1 %v9786_v48 }
 0x4e3   : > { %12902 = vst [vmem:[#allocation44_spill] sm:$0xff] %v9950_v50  ;;  %3402 = vmatmul.f32.gmra.mxu2 %v9950_v50  ;;  %v3228_v62 = vrot.slane %v9950_v50, 7  ;;  %v3278_v31 = vrot.slane %v9950_v50, 1 }
 0x4e4   : > { %v3125_v40 = vsel %vm1579_vm3, %v3105_v24, %v3106_v17  ;;  %v12907_v24 = vld [vmem:[#allocation113_spill] sm:$0xff] }
 0x4e5   : > { %v3154_v4 = vadd.f32 %v3125_v40, %v3079_v36  ;;  %v9968_v6 = vsel %vm292_vm0, %v3227_v19, %v3228_v62  ;;  %v9972_v16 = vsel %vm343_vm1, %v3277_v30, %v3278_v31  ;;  %v2653_v58 = vadd.f32 %v12907_v24, %v2519_v26  ;;  %v12908_v40 = vld [vmem:[#allocation45_spill] sm:$0xff]  ;;  %v6456_v19 = vld [vmem:[%s6771_s20 + $0xb28] sm:$0xff]  ;;  %v12910_v30 = vld [vmem:[#allocation72_spill] sm:$0xff] }
 0x4e6   : > { %12906 = vst [vmem:[#allocation33_spill] sm:$0xff] %v9972_v16  ;;  %3494 = vmatmul.f32.gmra.mxu3 %v9968_v6  ;;  %3600 = vmatmul.f32.gmra.mxu0 %v9972_v16  ;;  %v2386_v7 = vadd.f32 %v9863_v45, %v12910_v30  ;;  %v2859_v30 = vadd.f32 %v9812_v61, %v9804_v39  ;;  %v12918_v39 = vld [vmem:[#allocation73_spill] sm:$0xff] }
 0x4e7   : > { %v3179_v52 = vmax.f32 %v3154_v4, 0.0  ;;  %v2964_v21 = vpop.f32.mrf.mxu1  ;;  %3834 = vmatpush.msrb.mxu2 %v6456_v19  ;;  %v3080_v51 = vadd.f32 %v12911_v34, %v2653_v58  ;;  %v2387_v61 = vadd.f32 %v9863_v45, %v12918_v39 }
 0x4e8   : > { %v3007_v36 = vadd.f32 %v2964_v21, %v2856_v18  ;;  %v12912_v18 = vld [vmem:[#allocation84_spill] sm:$0xff]  ;;  %v10008_v34 = vpop.f32.mrf.mxu0 }
 0x4e9   : > { %v9980_v50 = vmul.f32 %v3179_v52, %v12908_v40  ;;  %v2520_v24 = vadd.f32 %v12912_v18, %v2386_v7  ;;  %v9993_v52 = vpop.f32.mrf.mxu3 }
 0x4ea   : > { %v3107_v48 = vrot.slane %v3007_v36, 2  ;;  %3727 = vmatmul.f32.gmra.mxu1 %v9816_v14  ;;  %v12919_v14 = vld [vmem:[#allocation65_spill] sm:$0xff] }
 0x4eb   : > { %12909 = vst [vmem:[#allocation22_spill] sm:$0xff] %v9980_v50  ;;  %3405 = vmatmul.f32.gmra.mxu2 %v9980_v50  ;;  %v3229_v26 = vrot.slane %v9980_v50, 7  ;;  %v3279_v4 = vrot.slane %v9980_v50, 1  ;;  %v6455_v50 = vld [vmem:[%s6771_s20 + $0xb20] sm:$0xff] }
 0x4ec   : > { %v3124_v21 = vsel %vm1579_vm3, %v3106_v17, %v3107_v48  ;;  %v12915_v17 = vld [vmem:[#allocation114_spill] sm:$0xff]  ;;  %3835 = vmatpush.msrb.mxu2 %v6455_v50 }
 0x4ed   : > { %v3155_v36 = vadd.f32 %v3124_v21, %v3080_v51  ;;  %v9997_v19 = vsel %vm292_vm0, %v3228_v62, %v3229_v26  ;;  %v10001_v58 = vsel %vm343_vm1, %v3278_v31, %v3279_v4  ;;  %v2654_v7 = vadd.f32 %v12915_v17, %v2520_v24  ;;  %v12916_v62 = vld [vmem:[#allocation40_spill] sm:$0xff]  ;;  %v12920_v17 = vld [vmem:[#allocation99_spill] sm:$0xff] }
 0x4ee   : > { %12913 = vst [vmem:[#allocation34_spill] sm:$0xff] %v9997_v19  ;;  %3497 = vmatmul.f32.gmra.mxu3 %v9997_v19  ;;  %3603 = vmatmul.f32.gmra.mxu0 %v10001_v58 }
 0x4ef   : > { %12914 = vst [vmem:[#allocation4_spill] sm:$0xff] %v10001_v58  ;;  %v3180_v51 = vmax.f32 %v3155_v36, 0.0  ;;  %v2967_v21 = vpop.f32.mrf.mxu1  ;;  %v3081_v58 = vadd.f32 %v12919_v14, %v2654_v7  ;;  %v2862_v14 = vadd.f32 %v9856_v49, %v9841_v35  ;;  %v12923_v7 = vld [vmem:[#allocation86_spill] sm:$0xff] }
 0x4f0   : > { %v3008_v18 = vadd.f32 %v2967_v21, %v2859_v30  ;;  %v12926_v35 = vld [vmem:[#allocation74_spill] sm:$0xff] }
 0x4f1   : > { %v10011_v40 = vmul.f32 %v3180_v51, %v12916_v62  ;;  %v2521_v51 = vadd.f32 %v12920_v17, %v2387_v61  ;;  %v10037_v39 = vpop.f32.mrf.mxu3  ;;  %v12924_v17 = vld [vmem:[#allocation43_spill] sm:$0xff]  ;;  %v2388_v49 = vadd.f32 %v9863_v45, %v12926_v35  ;;  %v12930_v35 = vld [vmem:[#allocation116_spill] sm:$0xff] }
 0x4f2   : > { %v3108_v31 = vrot.slane %v3008_v18, 2  ;;  %3730 = vmatmul.f32.gmra.mxu1 %v9845_v47 }
 0x4f3   : > { %12917 = vst [vmem:[#allocation50_spill] sm:$0xff] %v10011_v40  ;;  %3408 = vmatmul.f32.gmra.mxu2 %v10011_v40  ;;  %v3230_v24 = vrot.slane %v10011_v40, 7  ;;  %v3280_v36 = vrot.slane %v10011_v40, 1  ;;  %v12927_v40 = vld [vmem:[#allocation100_spill] sm:$0xff] }
 0x4f4   : > { %v3123_v30 = vsel %vm1579_vm3, %v3107_v48, %v3108_v31  ;;  %v2655_v48 = vadd.f32 %v12923_v7, %v2521_v51  ;;  %v12928_v7 = vld [vmem:[#allocation85_spill] sm:$0xff] }
 0x4f5   : > { %v3156_v21 = vadd.f32 %v3123_v30, %v3081_v58  ;;  %v10026_v50 = vsel %vm292_vm0, %v3229_v26, %v3230_v24  ;;  %v10030_v18 = vsel %vm343_vm1, %v3279_v4, %v3280_v36  ;;  %v10039_v26 = vpop.f32.mrf.mxu0 }
 0x4f6   : > { %12921 = vst [vmem:[#allocation6_spill] sm:$0xff] %v10026_v50  ;;  %3500 = vmatmul.f32.gmra.mxu3 %v10026_v50  ;;  %3606 = vmatmul.f32.gmra.mxu0 %v10030_v18  ;;  %v3082_v47 = vadd.f32 %v12927_v40, %v2655_v48  ;;  %v2865_v48 = vadd.f32 %v9889_v37, %v9887_v57  ;;  %v12933_v57 = vld [vmem:[#allocation107_spill] sm:$0xff] }
 0x4f7   : > { %12922 = vst [vmem:[#allocation48_spill] sm:$0xff] %v10030_v18  ;;  %v3181_v58 = vmax.f32 %v3156_v21, 0.0  ;;  %v2970_v61 = vpop.f32.mrf.mxu1  ;;  %v2389_v37 = vadd.f32 %v9863_v45, %v12933_v57 }
 0x4f8   : > { %v3009_v30 = vadd.f32 %v2970_v61, %v2862_v14 }
 0x4f9   : > { %v10042_v62 = vmul.f32 %v3181_v58, %v12924_v17  ;;  %v2522_v58 = vadd.f32 %v12928_v7, %v2388_v49 }
 0x4fa   : > { %v3109_v4 = vrot.slane %v3009_v30, 2  ;;  %3733 = vmatmul.f32.gmra.mxu1 %v9876_v56  ;;  %v12934_v56 = vld [vmem:[#allocation101_spill] sm:$0xff] }
 0x4fb   : > { %12925 = vst [vmem:[#allocation23_spill] sm:$0xff] %v10042_v62  ;;  %3411 = vmatmul.f32.gmra.mxu2 %v10042_v62  ;;  %v3231_v51 = vrot.slane %v10042_v62, 7  ;;  %v3281_v21 = vrot.slane %v10042_v62, 1  ;;  %v6454_v62 = vld [vmem:[%s6771_s20 + $0xb18] sm:$0xff] }
 0x4fc   : > { %v3122_v14 = vsel %vm1579_vm3, %v3108_v31, %v3109_v4  ;;  %v2656_v31 = vadd.f32 %v12930_v35, %v2522_v58  ;;  %3836 = vmatpush.msrb.mxu2 %v6454_v62 }
 0x4fd   : > { %v3157_v61 = vadd.f32 %v3122_v14, %v3082_v47  ;;  %v10056_v30 = vsel %vm292_vm0, %v3230_v24, %v3231_v51  ;;  %v10060_v40 = vsel %vm343_vm1, %v3280_v36, %v3281_v21  ;;  %v10067_v14 = vpop.f32.mrf.mxu3  ;;  %v12931_v24 = vld [vmem:[#allocation8_spill] sm:$0xff]  ;;  %v10077_v18 = vpop.f32.mrf.mxu0 }
 0x4fe   : > { %12929 = vst [vmem:[#allocation58_spill] sm:$0xff] %v10060_v40  ;;  %3503 = vmatmul.f32.gmra.mxu3 %v10056_v30  ;;  %3609 = vmatmul.f32.gmra.mxu0 %v10060_v40  ;;  %v3083_v40 = vadd.f32 %v12934_v56, %v2656_v31  ;;  %v2868_v31 = vadd.f32 %v9928_v22, %v9918_v8  ;;  %v12940_v22 = vld [vmem:[#allocation5_spill] sm:$0xff] }
 0x4ff   : > { %v3182_v17 = vmax.f32 %v3157_v61, 0.0  ;;  %v2973_v49 = vpop.f32.mrf.mxu1  ;;  %v2390_v8 = vadd.f32 %v9863_v45, %v12940_v22 }
 0x500   : > { %v3010_v47 = vadd.f32 %v2973_v49, %v2865_v48  ;;  %v12935_v48 = vld [vmem:[#allocation88_spill] sm:$0xff] }
 0x501   : > { %v10070_v7 = vmul.f32 %v3182_v17, %v12931_v24  ;;  %v2523_v62 = vadd.f32 %v12935_v48, %v2389_v37  ;;  %v12938_v48 = vld [vmem:[#allocation10_spill] sm:$0xff] }
 0x502   : > { %v3110_v36 = vrot.slane %v3010_v47, 2  ;;  %3736 = vmatmul.f32.gmra.mxu1 %v9907_v20 }
 0x503   : > { %12932 = vst [vmem:[#allocation36_spill] sm:$0xff] %v10070_v7  ;;  %3414 = vmatmul.f32.gmra.mxu2 %v10070_v7  ;;  %v3232_v58 = vrot.slane %v10070_v7, 7  ;;  %v3282_v61 = vrot.slane %v10070_v7, 1  ;;  %v6482_v7 = vld [vmem:[%s6771_s20 + $0xbf8] sm:$0xff] }
 0x504   : > { %v3121_v17 = vsel %vm1579_vm3, %v3109_v4, %v3110_v36  ;;  %v12937_v4 = vld [vmem:[#allocation117_spill] sm:$0xff]  ;;  %3958 = vmatpush.msrb.mxu3 %v6482_v7 }
 0x505   : > { %v3158_v35 = vadd.f32 %v3121_v17, %v3083_v40  ;;  %v10087_v49 = vsel %vm292_vm0, %v3231_v51, %v3232_v58  ;;  %v10091_v56 = vsel %vm343_vm1, %v3281_v21, %v3282_v61  ;;  %v2657_v57 = vadd.f32 %v12937_v4, %v2523_v62  ;;  %v6453_v21 = vld [vmem:[%s6771_s20 + $0xb10] sm:$0xff] }
 0x506   : > { %12936 = vst [vmem:[#allocation51_spill] sm:$0xff] %v10091_v56  ;;  %v3367_v47 = vpop.f32.mrf.mxu2  ;;  %3506 = vmatmul.f32.gmra.mxu3 %v10087_v49  ;;  %3612 = vmatmul.f32.gmra.mxu0 %v10091_v56  ;;  %v12941_v56 = vld [vmem:[#allocation67_spill] sm:$0xff] }
 0x507   : > { %v3183_v37 = vmax.f32 %v3158_v35, 0.0  ;;  %v2976_v40 = vpop.f32.mrf.mxu1  ;;  %v3084_v59 = vadd.f32 %v12941_v56, %v2657_v57  ;;  %3837 = vmatpush.msrb.mxu2 %v6453_v21  ;;  %v2871_v57 = vadd.f32 %v9964_v63, %v9956_v33 }
 0x508   : > { %v3011_v17 = vadd.f32 %v2976_v40, %v2868_v31 }
 0x509   : > { %v10099_v51 = vmul.f32 %v3183_v37, %v12938_v48  ;;  %v3459_v24 = vpop.f32.mrf.mxu3  ;;  %v6452_v48 = vld [vmem:[%s6771_s20 + $0xb08] sm:$0xff] }
 0x50a   : > { %v3111_v20 = vrot.slane %v3011_v17, 2  ;;  %v3460_v16 = vadd.f32 %v3459_v24, %v3367_v47  ;;  %3739 = vmatmul.f32.gmra.mxu1 %v9938_v12  ;;  %v12942_v24 = vld [vmem:[#allocation102_spill] sm:$0xff]  ;;  %3838 = vmatpush.msrb.mxu2 %v6452_v48 }
 0x50b   : > { %12939 = vst [vmem:[#allocation61_spill] sm:$0xff] %v10099_v51  ;;  %3417 = vmatmul.f32.gmra.mxu2 %v10099_v51  ;;  %v3568_v62 = vpop.f32.mrf.mxu0  ;;  %v3233_v35 = vrot.slane %v10099_v51, 7  ;;  %v3283_v31 = vrot.slane %v10099_v51, 1  ;;  %v2524_v47 = vadd.f32 %v12942_v24, %v2390_v8  ;;  %v12945_v51 = vld [vmem:[#allocation108_spill] sm:$0xff] }
 0x50c   : > { %v3120_v4 = vsel %vm1579_vm3, %v3110_v36, %v3111_v20  ;;  %v12943_v36 = vld [vmem:[#allocation120_spill] sm:$0xff]  ;;  %v10130_v24 = vadd.f32 %v3568_v62, %v3460_v16  ;;  %v6480_v62 = vld [vmem:[%s6771_s20 + $0xbe8] sm:$0xff] }
 0x50d   : > { %v3159_v7 = vadd.f32 %v3120_v4, %v3084_v59  ;;  %v10115_v37 = vsel %vm292_vm0, %v3232_v58, %v3233_v35  ;;  %v10119_v56 = vsel %vm343_vm1, %v3282_v61, %v3283_v31  ;;  %v2658_v17 = vadd.f32 %v12943_v36, %v2524_v47  ;;  %v12944_v58 = vld [vmem:[#allocation47_spill] sm:$0xff]  ;;  %v6481_v4 = vld [vmem:[%s6771_s20 + $0xbf0] sm:$0xff] }
 0x50e   : > { %v3370_v40 = vpop.f32.mrf.mxu2  ;;  %3509 = vmatmul.f32.gmra.mxu3 %v10115_v37  ;;  %3615 = vmatmul.f32.gmra.mxu0 %v10119_v56  ;;  %v2391_v47 = vadd.f32 %v9863_v45, %v12945_v51  ;;  %v12294_v48 = vrot.slane %v10130_v24, 6 }
 0x50f   : > { %v3184_v59 = vmax.f32 %v3159_v7, 0.0  ;;  %v2979_v21 = vpop.f32.mrf.mxu1  ;;  %3959 = vmatpush.msrb.mxu3 %v6481_v4  ;;  %v12946_v7 = vld [vmem:[#allocation103_spill] sm:$0xff] }
 0x510   : > { %v3012_v22 = vadd.f32 %v2979_v21, %v2871_v57  ;;  %v3085_v57 = vadd.f32 %v12946_v7, %v2658_v17  ;;  %v6479_v7 = vld [vmem:[%s6771_s20 + $0xbe0] sm:$0xff] }
 0x511   : > { %v10127_v8 = vmul.f32 %v3184_v59, %v12944_v58  ;;  %v3462_v61 = vpop.f32.mrf.mxu3  ;;  %3960 = vmatpush.msrb.mxu3 %v6480_v62  ;;  %v6478_v62 = vld [vmem:[%s6771_s20 + $0xbd8] sm:$0xff] }
 0x512   : > { %v3112_v33 = vrot.slane %v3012_v22, 2  ;;  %v3463_v63 = vadd.f32 %v3462_v61, %v3370_v40  ;;  %3742 = vmatmul.f32.gmra.mxu1 %v9968_v6  ;;  %v12947_v22 = vld [vmem:[#allocation119_spill] sm:$0xff] }
 0x513   : > { %3420 = vmatmul.f32.gmra.mxu2 %v10127_v8  ;;  %v3571_v36 = vpop.f32.mrf.mxu0  ;;  %v3234_v59 = vrot.slane %v10127_v8, 7  ;;  %v3284_v16 = vrot.slane %v10127_v8, 1  ;;  %v2525_v51 = vadd.f32 %v12947_v22, %v2391_v47  ;;  %3961 = vmatpush.msrb.mxu3 %v6479_v7 }
 0x514   : > { %v3119_v40 = vsel %vm1579_vm3, %v3111_v20, %v3112_v33  ;;  %v10143_v21 = vadd.f32 %v3571_v36, %v3463_v63  ;;  %v2874_v20 = vadd.f32 %v10008_v34, %v9993_v52  ;;  %v12950_v34 = vld [vmem:[#allocation11_spill] sm:$0xff] }
 0x515   : > { %v3160_v17 = vadd.f32 %v3119_v40, %v3085_v57  ;;  %v10148_v61 = vsel %vm292_vm0, %v3233_v35, %v3234_v59  ;;  %v10152_v4 = vsel %vm343_vm1, %v3283_v31, %v3284_v16  ;;  %v12948_v35 = vld [vmem:[#allocation123_spill] sm:$0xff]  ;;  %v6514_v40 = vld [vmem:[%s6771_s20 + $0xcf8] sm:$0xff]  ;;  %3962 = vmatpush.msrb.mxu3 %v6478_v62 }
 0x516   : > { %v4428_v63 = vrot.slane %v10143_v21, 6  ;;  %v3373_v47 = vpop.f32.mrf.mxu2  ;;  %3512 = vmatmul.f32.gmra.mxu3 %v10148_v61  ;;  %3618 = vmatmul.f32.gmra.mxu0 %v10152_v4  ;;  %v2659_v57 = vadd.f32 %v12948_v35, %v2525_v51  ;;  %v6477_v51 = vld [vmem:[%s6771_s20 + $0xbd0] sm:$0xff] }
 0x517   : > { %v3185_v36 = vmax.f32 %v3160_v17, 0.0  ;;  %v2982_v31 = vpop.f32.mrf.mxu1  ;;  %4109 = vmatpush.msra.mxu0 %v6514_v40  ;;  %v6513_v17 = vld [vmem:[%s6771_s20 + $0xcf0] sm:$0xff]  ;;  %3963 = vmatpush.msrb.mxu3 %v6477_v51 }
 0x518   : > { %v10164_v22 = vadd.f32 %v2982_v31, %v2874_v20  ;;  %v10170_v52 = vsel %vm1503_vm2, %v12294_v48, %v4428_v63  ;;  %v12952_v35 = vld [vmem:[#allocation76_spill] sm:$0xff] }
 0x519   : > { %12949 = vst [vmem:[#allocation53_spill] sm:$0xff] %v10170_v52  ;;  %v10173_v21 = vmul.f32 %v3185_v36, %v12950_v34  ;;  %v3465_v58 = vpop.f32.mrf.mxu3  ;;  %4110 = vmatpush.msra.mxu0 %v6513_v17  ;;  %v2392_v31 = vadd.f32 %v9863_v45, %v12952_v35  ;;  %v12953_v40 = vld [vmem:[#allocation104_spill] sm:$0xff]  ;;  %v12954_v35 = vld [vmem:[#allocation122_spill] sm:$0xff] }
 0x51a   : > { %v3113_v7 = vrot.slane %v10164_v22, 2  ;;  %v3466_v20 = vadd.f32 %v3465_v58, %v3373_v47  ;;  %3745 = vmatmul.f32.gmra.mxu1 %v9997_v19  ;;  %v3086_v48 = vadd.f32 %v12953_v40, %v2659_v57  ;;  %v6476_v22 = vld [vmem:[%s6771_s20 + $0xbc8] sm:$0xff] }
 0x51b   : > { %12951 = vst [vmem:[#allocation97_spill] sm:$0xff] %v10173_v21  ;;  %3423 = vmatmul.f32.gmra.mxu2 %v10173_v21  ;;  %v3574_v36 = vpop.f32.mrf.mxu0  ;;  %v3235_v62 = vrot.slane %v10173_v21, 7  ;;  %v3285_v34 = vrot.slane %v10173_v21, 1  ;;  %v6512_v58 = vld [vmem:[%s6771_s20 + $0xce8] sm:$0xff]  ;;  %v2526_v57 = vadd.f32 %v12954_v35, %v2392_v31  ;;  %3964 = vmatpush.msrb.mxu3 %v6476_v22  ;;  %v6475_v21 = vld [vmem:[%s6771_s20 + $0xbc0] sm:$0xff]  ;;  %v6474_v22 = vld [vmem:[%s6771_s20 + $0xbb8] sm:$0xff] }
 0x51c   : > { %v3118_v47 = vsel %vm1579_vm3, %v3112_v33, %v3113_v7  ;;  %v10189_v17 = vadd.f32 %v3574_v36, %v3466_v20  ;;  %4111 = vmatpush.msra.mxu0 %v6512_v58  ;;  %v6511_v33 = vld [vmem:[%s6771_s20 + $0xce0] sm:$0xff]  ;;  %v2877_v20 = vadd.f32 %v10039_v26, %v10037_v39 }
 0x51d   : > { %v3161_v40 = vadd.f32 %v3118_v47, %v3086_v48  ;;  %v10194_v52 = vsel %vm292_vm0, %v3234_v59, %v3235_v62  ;;  %v10198_v51 = vsel %vm343_vm1, %v3284_v16, %v3285_v34  ;;  %v12956_v59 = vld [vmem:[#allocation12_spill] sm:$0xff]  ;;  %3965 = vmatpush.msrb.mxu3 %v6475_v21  ;;  %v6510_v47 = vld [vmem:[%s6771_s20 + $0xcd8] sm:$0xff]  ;;  %v6451_v39 = vld [vmem:[%s6771_s20 + $0xb00] sm:$0xff] }
 0x51e   : > { %12955 = vst [vmem:[#allocation54_spill] sm:$0xff] %v10198_v51  ;;  %v4429_v31 = vrot.slane %v10189_v17, 6  ;;  %v3376_v48 = vpop.f32.mrf.mxu2  ;;  %3515 = vmatmul.f32.gmra.mxu3 %v10194_v52  ;;  %3621 = vmatmul.f32.gmra.mxu0 %v10198_v51  ;;  %v2660_v36 = vadd.f32 %v12956_v59, %v2526_v57  ;;  %v12958_v17 = vld [vmem:[#allocation52_spill] sm:$0xff] }
 0x51f   : > { %v3186_v16 = vmax.f32 %v3161_v40, 0.0  ;;  %v2985_v58 = vpop.f32.mrf.mxu1  ;;  %4112 = vmatpush.msra.mxu0 %v6511_v33  ;;  %3839 = vmatpush.msrb.mxu2 %v6451_v39  ;;  %v6473_v57 = vld [vmem:[%s6771_s20 + $0xbb0] sm:$0xff] }
 0x520   : > { %v10210_v35 = vadd.f32 %v2985_v58, %v2877_v20  ;;  %v10215_v26 = vsel %vm1503_vm2, %v4428_v63, %v4429_v31  ;;  %3966 = vmatpush.msrb.mxu3 %v6474_v22  ;;  %v6509_v40 = vld [vmem:[%s6771_s20 + $0xcd0] sm:$0xff]  ;;  %v12962_v58 = vld [vmem:[#allocation69_spill] sm:$0xff] }
 0x521   : > { %12957 = vst [vmem:[#allocation98_spill] sm:$0xff] %v10215_v26  ;;  %v10218_v19 = vmul.f32 %v3186_v16, %v12958_v17  ;;  %v3468_v51 = vpop.f32.mrf.mxu3  ;;  %v12960_v21 = vld [vmem:[#allocation28_spill] sm:$0xff]  ;;  %4113 = vmatpush.msra.mxu0 %v6510_v47  ;;  %v3087_v17 = vadd.f32 %v12962_v58, %v2660_v36  ;;  %v12963_v26 = vld [vmem:[#allocation21_spill] sm:$0xff]  ;;  %v12964_v36 = vld [vmem:[#allocation26_spill] sm:$0xff] }
 0x522   : > { %v2393_v33 = vadd.f32 %v9863_v45, %v12960_v21  ;;  %v3114_v20 = vrot.slane %v10210_v35, 2  ;;  %v3469_v59 = vadd.f32 %v3468_v51, %v3376_v48  ;;  %3748 = vmatmul.f32.gmra.mxu1 %v10026_v50  ;;  %v12961_v63 = vld [vmem:[#allocation80_spill] sm:$0xff]  ;;  %3967 = vmatpush.msrb.mxu3 %v6473_v57  ;;  %v6472_v35 = vld [vmem:[%s6771_s20 + $0xba8] sm:$0xff] }
 0x523   : > { %12959 = vst [vmem:[#allocation16_spill] sm:$0xff] %v10218_v19  ;;  %v2394_v16 = vadd.f32 %v9863_v45, %v12961_v63  ;;  %3426 = vmatmul.f32.gmra.mxu2 %v10218_v19  ;;  %v3577_v22 = vpop.f32.mrf.mxu0  ;;  %v3236_v39 = vrot.slane %v10218_v19, 7  ;;  %v3286_v21 = vrot.slane %v10218_v19, 1  ;;  %4114 = vmatpush.msra.mxu0 %v6509_v40  ;;  %v6508_v45 = vld [vmem:[%s6771_s20 + $0xcc8] sm:$0xff] }
 0x524   : > { %v2527_v51 = vadd.f32 %v12963_v26, %v2393_v33  ;;  %v3117_v48 = vsel %vm1579_vm3, %v3113_v7, %v3114_v20  ;;  %v10236_v47 = vadd.f32 %v3577_v22, %v3469_v59  ;;  %3968 = vmatpush.msrb.mxu3 %v6472_v35  ;;  %v6471_v26 = vld [vmem:[%s6771_s20 + $0xba0] sm:$0xff]  ;;  %v2880_v7 = vadd.f32 %v10077_v18, %v10067_v14  ;;  %v6506_v14 = vld [vmem:[%s6771_s20 + $0xcb8] sm:$0xff] }
 0x525   : > { %v2528_v63 = vadd.f32 %v12964_v36, %v2394_v16  ;;  %v3162_v58 = vadd.f32 %v3117_v48, %v3087_v17  ;;  %v10242_v50 = vsel %vm292_vm0, %v3235_v62, %v3236_v39  ;;  %v10246_v57 = vsel %vm343_vm1, %v3285_v34, %v3286_v21  ;;  %v6507_v62 = vld [vmem:[%s6771_s20 + $0xcc0] sm:$0xff]  ;;  %4115 = vmatpush.msra.mxu0 %v6508_v45  ;;  %v6470_v48 = vld [vmem:[%s6771_s20 + $0xb98] sm:$0xff]  ;;  %v6505_v45 = vld [vmem:[%s6771_s20 + $0xcb0] sm:$0xff] }
 0x526   : > { %12965 = vst [vmem:[#allocation64_spill] sm:$0xff] %v10242_v50  ;;  %v4430_v40 = vrot.slane %v10236_v47, 6  ;;  %v3379_v33 = vpop.f32.mrf.mxu2  ;;  %3518 = vmatmul.f32.gmra.mxu3 %v10242_v50  ;;  %3624 = vmatmul.f32.gmra.mxu0 %v10246_v57  ;;  %v12967_v17 = vld [vmem:[#allocation30_spill] sm:$0xff] }
 0x527   : > { %12966 = vst [vmem:[#allocation32_spill] sm:$0xff] %v10246_v57  ;;  %v2661_v59 = vadd.f32 %v12967_v17, %v2527_v51  ;;  %v12968_v16 = vld [vmem:[#allocation94_spill] sm:$0xff]  ;;  %v3187_v22 = vmax.f32 %v3162_v58, 0.0  ;;  %v2988_v35 = vpop.f32.mrf.mxu1  ;;  %3969 = vmatpush.msrb.mxu3 %v6471_v26  ;;  %4116 = vmatpush.msra.mxu0 %v6507_v62  ;;  %v6469_v51 = vld [vmem:[%s6771_s20 + $0xb90] sm:$0xff]  ;;  %v12970_v26 = vld [vmem:[#allocation71_spill] sm:$0xff] }
 0x528   : > { %v2662_v34 = vadd.f32 %v12968_v16, %v2528_v63  ;;  %v3015_v18 = vadd.f32 %v2988_v35, %v2880_v7  ;;  %v10261_v47 = vsel %vm1503_vm2, %v4429_v31, %v4430_v40  ;;  %v12969_v36 = vld [vmem:[#allocation14_spill] sm:$0xff]  ;;  %v12971_v17 = vld [vmem:[#allocation27_spill] sm:$0xff] }
 0x529   : > { %v10264_v19 = vmul.f32 %v3187_v22, %v12969_v36  ;;  %v3471_v57 = vpop.f32.mrf.mxu3  ;;  %3970 = vmatpush.msrb.mxu3 %v6470_v48  ;;  %v3088_v7 = vadd.f32 %v12970_v26, %v2661_v59  ;;  %4117 = vmatpush.msra.mxu0 %v6506_v14  ;;  %v6504_v48 = vld [vmem:[%s6771_s20 + $0xca8] sm:$0xff] }
 0x52a   : > { %v3115_v63 = vrot.slane %v3015_v18, 2  ;;  %v3472_v58 = vadd.f32 %v3471_v57, %v3379_v33  ;;  %3751 = vmatmul.f32.gmra.mxu1 %v10056_v30  ;;  %v3089_v16 = vadd.f32 %v12971_v17, %v2662_v34  ;;  %v12972_v57 = vrot.slane %v9541_v2, 2  ;;  %v6468_v34 = vld [vmem:[%s6771_s20 + $0xb88] sm:$0xff] }
 0x52b   : > { %3429 = vmatmul.f32.gmra.mxu2 %v10264_v19  ;;  %v3580_v31 = vpop.f32.mrf.mxu0  ;;  %v3237_v22 = vrot.slane %v10264_v19, 7  ;;  %v3287_v62 = vrot.slane %v10264_v19, 1  ;;  %3971 = vmatpush.msrb.mxu3 %v6469_v51  ;;  %v6530_v51 = vld [vmem:[%s6771_s20 + $0xd78] sm:$0xff] }
 0x52c   : > { %v3116_v35 = vsel %vm1579_vm3, %v3114_v20, %v3115_v63  ;;  %v3140_v33 = vsel %vm1579_vm3, %v3115_v63, %v12972_v57  ;;  %v3647_v59 = vadd.f32 %v3580_v31, %v3472_v58  ;;  %4118 = vmatpush.msra.mxu0 %v6505_v45  ;;  %v6467_v63 = vld [vmem:[%s6771_s20 + $0xb80] sm:$0xff]  ;;  %4310 = vmatpush.msra.mxu2 %v6530_v51  ;;  %v6498_v57 = vld [vmem:[%s6771_s20 + $0xc78] sm:$0xff]  ;;  %v12974_v51 = vld [vmem:[#allocation56_spill] sm:$0xff] }
 0x52d   : > { %v3163_v18 = vadd.f32 %v3116_v35, %v3088_v7  ;;  %v3164_v26 = vadd.f32 %v3140_v33, %v3089_v16  ;;  %v10284_v14 = vsel %vm292_vm0, %v3236_v39, %v3237_v22  ;;  %v10288_v20 = vsel %vm343_vm1, %v3286_v21, %v3287_v62  ;;  %v6503_v58 = vld [vmem:[%s6771_s20 + $0xca0] sm:$0xff]  ;;  %3972 = vmatpush.msrb.mxu3 %v6468_v34  ;;  %v6502_v39 = vld [vmem:[%s6771_s20 + $0xc98] sm:$0xff]  ;;  %v12973_v16 = vld [vmem:[#allocation55_spill] sm:$0xff] }
 0x52e   : > { %v4431_v2 = vrot.slane %v3647_v59, 6  ;;  %v3382_v17 = vpop.f32.mrf.mxu2  ;;  %3521 = vmatmul.f32.gmra.mxu3 %v10284_v14  ;;  %3627 = vmatmul.f32.gmra.mxu0 %v10288_v20  ;;  %v6501_v59 = vld [vmem:[%s6771_s20 + $0xc90] sm:$0xff] }
 0x52f   : > { %v3188_v7 = vmax.f32 %v3163_v18, 0.0  ;;  %4119 = vmatpush.msra.mxu0 %v6504_v48  ;;  %v3189_v45 = vmax.f32 %v3164_v26, 0.0  ;;  %3973 = vmatpush.msrb.mxu3 %v6467_v63  ;;  %v6500_v26 = vld [vmem:[%s6771_s20 + $0xc88] sm:$0xff] }
 0x530   : > { %v10298_v21 = vsel %vm1503_vm2, %v4430_v40, %v4431_v2  ;;  %4201 = vmatpush.msra.mxu1 %v6498_v57 }
 0x531   : > { %v10301_v31 = vmul.f32 %v3188_v7, %v12973_v16  ;;  %v3474_v35 = vpop.f32.mrf.mxu3  ;;  %4120 = vmatpush.msra.mxu0 %v6503_v58  ;;  %v10311_v63 = vmul.f32 %v3189_v45, %v12974_v51  ;;  %v6529_v45 = vld [vmem:[%s6771_s20 + $0xd70] sm:$0xff] }
 0x532   : > { %v3475_v33 = vadd.f32 %v3474_v35, %v3382_v17  ;;  %3754 = vmatmul.f32.gmra.mxu1 %v10087_v49  ;;  %4311 = vmatpush.msra.mxu2 %v6529_v45  ;;  %v6497_v51 = vld [vmem:[%s6771_s20 + $0xc70] sm:$0xff]  ;;  %v10345_v45 = vpop.f32.mrf.mxu1 }
 0x533   : > { %3432 = vmatmul.f32.gmra.mxu2 %v10301_v31  ;;  %v3583_v34 = vpop.f32.mrf.mxu0  ;;  %v3238_v40 = vrot.slane %v10301_v31, 7  ;;  %v3288_v48 = vrot.slane %v10301_v31, 1  ;;  %4121 = vmatpush.msra.mxu0 %v6502_v39  ;;  %v6499_v39 = vld [vmem:[%s6771_s20 + $0xc80] sm:$0xff] }
 0x534   : > { %v3648_v18 = vadd.f32 %v3583_v34, %v3475_v33  ;;  %v3239_v33 = vrot.slane %v10311_v63, 7  ;;  %4202 = vmatpush.msra.mxu1 %v6497_v51  ;;  %v3290_v51 = vrot.slane %v9576_v28, 1 }
 0x535   : > { %v10315_v17 = vsel %vm292_vm0, %v3237_v22, %v3238_v40  ;;  %v10319_v58 = vsel %vm343_vm1, %v3287_v62, %v3288_v48  ;;  %4122 = vmatpush.msra.mxu0 %v6501_v59  ;;  %v3289_v62 = vrot.slane %v10311_v63, 1 }
 0x536   : > { %v4432_v7 = vrot.slane %v3648_v18, 6  ;;  %v3385_v35 = vpop.f32.mrf.mxu2  ;;  %3524 = vmatmul.f32.gmra.mxu3 %v10315_v17  ;;  %3630 = vmatmul.f32.gmra.mxu0 %v10319_v58 }
 0x537   : > { %4123 = vmatpush.msra.mxu0 %v6500_v26  ;;  %v10339_v26 = vsel %vm343_vm1, %v3288_v48, %v3289_v62  ;;  %v6495_v48 = vld [vmem:[%s6771_s20 + $0xc60] sm:$0xff] }
 0x538   : > { %v10327_v57 = vsel %vm1503_vm2, %v4431_v2, %v4432_v7  ;;  %v10335_v2 = vsel %vm292_vm0, %v3238_v40, %v3239_v33 }
 0x539   : > { %12975 = vst [vmem:[#allocation13_spill] sm:$0xff] %v10327_v57  ;;  %v3477_v22 = vpop.f32.mrf.mxu3  ;;  %4124 = vmatpush.msra.mxu0 %v6499_v39  ;;  %v12977_v57 = vrot.slane %v9576_v28, 7 }
 0x53a   : > { %v3478_v59 = vadd.f32 %v3477_v22, %v3385_v35  ;;  %3757 = vmatmul.f32.gmra.mxu1 %v10115_v37  ;;  %v6496_v35 = vld [vmem:[%s6771_s20 + $0xc68] sm:$0xff] }
 0x53b   : > { %3435 = vmatmul.f32.gmra.mxu2 %v10311_v63  ;;  %v3586_v34 = vpop.f32.mrf.mxu0  ;;  %4203 = vmatpush.msra.mxu1 %v6496_v35  ;;  %v6493_v35 = vld [vmem:[%s6771_s20 + $0xc50] sm:$0xff] }
 0x53c   : > { %v3649_v18 = vadd.f32 %v3586_v34, %v3478_v59 }
 0x53d   : > { %4204 = vmatpush.msra.mxu1 %v6495_v48  ;;  %v6528_v48 = vld [vmem:[%s6771_s20 + $0xd68] sm:$0xff] }
 0x53e   : > { %v4433_v16 = vrot.slane %v3649_v18, 6  ;;  %v3388_v39 = vpop.f32.mrf.mxu2  ;;  %3527 = vmatmul.f32.gmra.mxu3 %v10335_v2  ;;  %3633 = vmatmul.f32.gmra.mxu0 %v10339_v26  ;;  %v6494_v18 = vld [vmem:[%s6771_s20 + $0xc58] sm:$0xff] }
 0x53f   : > { %4205 = vmatpush.msra.mxu1 %v6494_v18  ;;  %4312 = vmatpush.msra.mxu2 %v6528_v48 }
 0x540   : > { %v10349_v40 = vsel %vm1503_vm2, %v4432_v7, %v4433_v16  ;;  %v10360_v7 = vsel %vm292_vm0, %v3239_v33, %v12977_v57 }
 0x541   : > { %12976 = vst [vmem:[#allocation57_spill] sm:$0xff] %v10349_v40  ;;  %v3480_v22 = vpop.f32.mrf.mxu3  ;;  %4206 = vmatpush.msra.mxu1 %v6493_v35  ;;  %v6490_v35 = vld [vmem:[%s6771_s20 + $0xc38] sm:$0xff] }
 0x542   : > { %v3481_v59 = vadd.f32 %v3480_v22, %v3388_v39  ;;  %3760 = vmatmul.f32.gmra.mxu1 %v10148_v61  ;;  %v10364_v39 = vsel %vm343_vm1, %v3289_v62, %v3290_v51  ;;  %v6491_v62 = vld [vmem:[%s6771_s20 + $0xc40] sm:$0xff] }
 0x543   : > { %3438 = vmatmul.f32.gmra.mxu2 %v9576_v28  ;;  %v3589_v34 = vpop.f32.mrf.mxu0  ;;  %v12979_v28 = vrot.slane %v9582_v53, 1 }
 0x544   : > { %v3650_v36 = vadd.f32 %v3589_v34, %v3481_v59  ;;  %v6492_v59 = vld [vmem:[%s6771_s20 + $0xc48] sm:$0xff]  ;;  %v10376_v34 = vpop.f32.mrf.mxu1 }
 0x545   : > { %4207 = vmatpush.msra.mxu1 %v6492_v59  ;;  %v6489_v59 = vld [vmem:[%s6771_s20 + $0xc30] sm:$0xff] }
 0x546   : > { %v4434_v22 = vrot.slane %v3650_v36, 6  ;;  %v3391_v40 = vpop.f32.mrf.mxu2  ;;  %3530 = vmatmul.f32.gmra.mxu3 %v10360_v7  ;;  %3636 = vmatmul.f32.gmra.mxu0 %v10364_v39 }
 0x547   : > { %4208 = vmatpush.msra.mxu1 %v6491_v62 }
 0x548   : > { %v10373_v57 = vsel %vm1503_vm2, %v4433_v16, %v4434_v22  ;;  %v10385_v16 = vsel %vm343_vm1, %v3290_v51, %v12979_v28  ;;  %v6487_v28 = vld [vmem:[%s6771_s20 + $0xc20] sm:$0xff] }
 0x549   : > { %12978 = vst [vmem:[#allocation66_spill] sm:$0xff] %v10373_v57  ;;  %v3483_v33 = vpop.f32.mrf.mxu3  ;;  %4209 = vmatpush.msra.mxu1 %v6490_v35 }
 0x54a   : > { %v3484_v36 = vadd.f32 %v3483_v33, %v3391_v40  ;;  %3763 = vmatmul.f32.gmra.mxu1 %v10194_v52  ;;  %v6488_v33 = vld [vmem:[%s6771_s20 + $0xc28] sm:$0xff] }
 0x54b   : > { %v3592_v18 = vpop.f32.mrf.mxu0  ;;  %3840 = vmatmul.f32.vlgmr.msrb.gmra.mxu2 %v9582_v53  ;;  %4210 = vmatpush.msra.mxu1 %v6489_v59 }
 0x54c   : > { %v3651_v48 = vadd.f32 %v3592_v18, %v3484_v36  ;;  %v6527_v18 = vld [vmem:[%s6771_s20 + $0xd60] sm:$0xff]  ;;  %v10400_v59 = vpop.f32.mrf.mxu1 }
 0x54d   : > { %4211 = vmatpush.msra.mxu1 %v6488_v33  ;;  %4313 = vmatpush.msra.mxu2 %v6527_v18 }
 0x54e   : > { %v4435_v57 = vrot.slane %v3651_v48, 6  ;;  %v3394_v40 = vpop.f32.mrf.mxu2  ;;  %3639 = vmatmul.f32.gmra.mxu0 %v10385_v16  ;;  %3974 = vmatmul.f32.vlgmr.msrb.gmra.mxu3 %v9637_v43  ;;  %v6486_v48 = vld [vmem:[%s6771_s20 + $0xc18] sm:$0xff] }
 0x54f   : > { %4212 = vmatpush.msra.mxu1 %v6487_v28 }
 0x550   : > { %v10393_v62 = vsel %vm1503_vm2, %v4434_v22, %v4435_v57  ;;  %v6485_v22 = vld [vmem:[%s6771_s20 + $0xc10] sm:$0xff] }
 0x551   : > { %12980 = vst [vmem:[#allocation59_spill] sm:$0xff] %v10393_v62  ;;  %v3486_v36 = vpop.f32.mrf.mxu3  ;;  %4213 = vmatpush.msra.mxu1 %v6486_v48 }
 0x552   : > { %v3487_v51 = vadd.f32 %v3486_v36, %v3394_v40  ;;  %3766 = vmatmul.f32.gmra.mxu1 %v10242_v50  ;;  %v6484_v40 = vld [vmem:[%s6771_s20 + $0xc08] sm:$0xff]  ;;  %v6483_v50 = vld [vmem:[%s6771_s20 + $0xc00] sm:$0xff] }
 0x553   : > { %v3595_v35 = vpop.f32.mrf.mxu0  ;;  %3843 = vmatmul.f32.gmra.mxu2 %v9612_v25  ;;  %4214 = vmatpush.msra.mxu1 %v6485_v22 }
 0x554   : > { %v3652_v43 = vadd.f32 %v3595_v35, %v3487_v51  ;;  %v10413_v35 = vpop.f32.mrf.mxu1 }
 0x555   : > { %4215 = vmatpush.msra.mxu1 %v6484_v40 }
 0x556   : > { %v4436_v62 = vrot.slane %v3652_v43, 6  ;;  %v3397_v33 = vpop.f32.mrf.mxu2  ;;  %3977 = vmatmul.f32.gmra.mxu3 %v9671_v5  ;;  %4125 = vmatmul.f32.vlgmr.msra.gmra.mxu0 %v9582_v53 }
 0x557   : > { %4216 = vmatpush.msra.mxu1 %v6483_v50 }
 0x558   : > { %v10408_v36 = vsel %vm1503_vm2, %v4435_v57, %v4436_v62  ;;  %v6526_v57 = vld [vmem:[%s6771_s20 + $0xd58] sm:$0xff] }
 0x559   : > { %v3489_v28 = vpop.f32.mrf.mxu3  ;;  %4314 = vmatpush.msra.mxu2 %v6526_v57  ;;  %v6525_v57 = vld [vmem:[%s6771_s20 + $0xd50] sm:$0xff] }
 0x55a   : > { %v3490_v51 = vadd.f32 %v3489_v28, %v3397_v33  ;;  %3769 = vmatmul.f32.gmra.mxu1 %v10284_v14 }
 0x55b   : > { %v3598_v18 = vpop.f32.mrf.mxu0  ;;  %3846 = vmatmul.f32.gmra.mxu2 %v9647_v29 }
 0x55c   : > { %v3653_v43 = vadd.f32 %v3598_v18, %v3490_v51  ;;  %4315 = vmatpush.msra.mxu2 %v6525_v57 }
 0x55e   : > { %v4437_v53 = vrot.slane %v3653_v43, 6  ;;  %v3400_v48 = vpop.f32.mrf.mxu2  ;;  %3980 = vmatmul.f32.gmra.mxu3 %v9700_v23  ;;  %4128 = vmatmul.f32.gmra.mxu0 %v9612_v25  ;;  %v10426_v25 = vpop.f32.mrf.mxu1 }
 0x560   : > { %v10420_v22 = vsel %vm1503_vm2, %v4436_v62, %v4437_v53 }
 0x561   : > { %v3492_v33 = vpop.f32.mrf.mxu3 }
 0x562   : > { %v3493_v40 = vadd.f32 %v3492_v33, %v3400_v48  ;;  %3772 = vmatmul.f32.gmra.mxu1 %v10315_v17 }
 0x563   : > { %v3601_v50 = vpop.f32.mrf.mxu0  ;;  %3849 = vmatmul.f32.gmra.mxu2 %v9679_v44 }
 0x564   : > { %v3654_v28 = vadd.f32 %v3601_v50, %v3493_v40 }
 0x566   : > { %v4438_v51 = vrot.slane %v3654_v28, 6  ;;  %v3403_v18 = vpop.f32.mrf.mxu2  ;;  %3983 = vmatmul.f32.gmra.mxu3 %v9728_v27  ;;  %4131 = vmatmul.f32.gmra.mxu0 %v9647_v29 }
 0x568   : > { %v10430_v62 = vsel %vm1503_vm2, %v4437_v53, %v4438_v51 }
 0x569   : > { %12981 = vst [vmem:[#allocation75_spill] sm:$0xff] %v10430_v62  ;;  %v3495_v43 = vpop.f32.mrf.mxu3 }
 0x56a   : > { %v3496_v48 = vadd.f32 %v3495_v43, %v3403_v18  ;;  %3775 = vmatmul.f32.gmra.mxu1 %v10335_v2  ;;  %v10441_v18 = vpop.f32.mrf.mxu1 }
 0x56b   : > { %v3604_v33 = vpop.f32.mrf.mxu0  ;;  %3852 = vmatmul.f32.gmra.mxu2 %v9710_v10 }
 0x56c   : > { %v3655_v40 = vadd.f32 %v3604_v33, %v3496_v48 }
 0x56e   : > { %v4439_v50 = vrot.slane %v3655_v40, 6  ;;  %v3406_v28 = vpop.f32.mrf.mxu2  ;;  %3986 = vmatmul.f32.gmra.mxu3 %v9759_v9  ;;  %4134 = vmatmul.f32.gmra.mxu0 %v9679_v44  ;;  %v6524_v44 = vld [vmem:[%s6771_s20 + $0xd48] sm:$0xff] }
 0x56f   : > { %4316 = vmatpush.msra.mxu2 %v6524_v44 }
 0x570   : > { %v10439_v29 = vsel %vm1503_vm2, %v4438_v51, %v4439_v50 }
 0x571   : > { %12982 = vst [vmem:[#allocation109_spill] sm:$0xff] %v10439_v29  ;;  %v3498_v53 = vpop.f32.mrf.mxu3 }
 0x572   : > { %v3499_v43 = vadd.f32 %v3498_v53, %v3406_v28  ;;  %3778 = vmatmul.f32.gmra.mxu1 %v10360_v7 }
 0x573   : > { %v3607_v62 = vpop.f32.mrf.mxu0  ;;  %3855 = vmatmul.f32.gmra.mxu2 %v9740_v60 }
 0x574   : > { %v3656_v48 = vadd.f32 %v3607_v62, %v3499_v43  ;;  %v10454_v62 = vpop.f32.mrf.mxu1 }
 0x576   : > { %v4440_v57 = vrot.slane %v3656_v48, 6  ;;  %v3409_v33 = vpop.f32.mrf.mxu2  ;;  %3989 = vmatmul.f32.gmra.mxu3 %v9790_v1  ;;  %4137 = vmatmul.f32.gmra.mxu0 %v9710_v10 }
 0x578   : > { %v10450_v51 = vsel %vm1503_vm2, %v4439_v50, %v4440_v57 }
 0x579   : > { %12983 = vst [vmem:[#allocation68_spill] sm:$0xff] %v10450_v51  ;;  %v3501_v40 = vpop.f32.mrf.mxu3  ;;  %v13015_v51 = vrot.slane %v10130_v24, 6 }
 0x57a   : > { %v3502_v28 = vadd.f32 %v3501_v40, %v3409_v33  ;;  %4217 = vmatmul.f32.vlgmr.msra.gmra.mxu1 %v9601_v0 }
 0x57b   : > { %v3610_v53 = vpop.f32.mrf.mxu0  ;;  %3858 = vmatmul.f32.gmra.mxu2 %v9769_v46 }
 0x57c   : > { %v3657_v43 = vadd.f32 %v3610_v53, %v3502_v28  ;;  %v10464_v40 = vpop.f32.mrf.mxu1 }
 0x57e   : > { %v4441_v48 = vrot.slane %v3657_v43, 6  ;;  %v3412_v29 = vpop.f32.mrf.mxu2  ;;  %3992 = vmatmul.f32.gmra.mxu3 %v9820_v13  ;;  %4140 = vmatmul.f32.gmra.mxu0 %v9740_v60  ;;  %v6523_v60 = vld [vmem:[%s6771_s20 + $0xd40] sm:$0xff] }
 0x57f   : > { %4317 = vmatpush.msra.mxu2 %v6523_v60 }
 0x580   : > { %v10460_v10 = vsel %vm1503_vm2, %v4440_v57, %v4441_v48 }
 0x581   : > { %12984 = vst [vmem:[#allocation19_spill] sm:$0xff] %v10460_v10  ;;  %v3504_v50 = vpop.f32.mrf.mxu3 }
 0x582   : > { %v3505_v33 = vadd.f32 %v3504_v50, %v3412_v29  ;;  %4220 = vmatmul.f32.gmra.mxu1 %v9631_v3 }
 0x583   : > { %v3613_v0 = vpop.f32.mrf.mxu0  ;;  %3861 = vmatmul.f32.gmra.mxu2 %v9798_v54 }
 0x584   : > { %v3658_v44 = vadd.f32 %v3613_v0, %v3505_v33 }
 0x586   : > { %v4442_v28 = vrot.slane %v3658_v44, 6  ;;  %v3415_v53 = vpop.f32.mrf.mxu2  ;;  %3995 = vmatmul.f32.gmra.mxu3 %v9849_v11  ;;  %4143 = vmatmul.f32.gmra.mxu0 %v9769_v46  ;;  %v10477_v46 = vpop.f32.mrf.mxu1  ;;  %v6522_v44 = vld [vmem:[%s6771_s20 + $0xd38] sm:$0xff]  ;;  %v13003_v11 = vld [vmem:[#allocation48_spill] sm:$0xff] }
 0x587   : > { %4318 = vmatpush.msra.mxu2 %v6522_v44 }
 0x588   : > { %v10471_v29 = vsel %vm1503_vm2, %v4441_v48, %v4442_v28 }
 0x589   : > { %12985 = vst [vmem:[#allocation78_spill] sm:$0xff] %v10471_v29  ;;  %v3507_v3 = vpop.f32.mrf.mxu3  ;;  %v12991_v29 = vld [vmem:[#allocation15_spill] sm:$0xff] }
 0x58a   : > { %v3508_v57 = vadd.f32 %v3507_v3, %v3415_v53  ;;  %4223 = vmatmul.f32.gmra.mxu1 %v9667_v15 }
 0x58b   : > { %v3616_v43 = vpop.f32.mrf.mxu0  ;;  %3864 = vmatmul.f32.gmra.mxu2 %v9828_v32 }
 0x58c   : > { %v3659_v50 = vadd.f32 %v3616_v43, %v3508_v57 }
 0x58e   : > { %v4443_v33 = vrot.slane %v3659_v50, 6  ;;  %v3418_v0 = vpop.f32.mrf.mxu2  ;;  %3998 = vmatmul.f32.gmra.mxu3 %v9880_v38  ;;  %4146 = vmatmul.f32.gmra.mxu0 %v9798_v54  ;;  %v12987_v54 = vld [vmem:[#allocation42_spill] sm:$0xff]  ;;  %v10492_v44 = vpop.f32.mrf.mxu1  ;;  %v12995_v38 = vld [vmem:[#allocation33_spill] sm:$0xff] }
 0x590   : > { %v10482_v48 = vsel %vm1503_vm2, %v4442_v28, %v4443_v33 }
 0x591   : > { %12986 = vst [vmem:[#allocation79_spill] sm:$0xff] %v10482_v48  ;;  %v3510_v53 = vpop.f32.mrf.mxu3  ;;  %v12990_v48 = vld [vmem:[#allocation7_spill] sm:$0xff] }
 0x592   : > { %v3511_v15 = vadd.f32 %v3510_v53, %v3418_v0  ;;  %4226 = vmatmul.f32.gmra.mxu1 %v9696_v55  ;;  %v12989_v55 = vld [vmem:[#allocation31_spill] sm:$0xff] }
 0x593   : > { %v3619_v60 = vpop.f32.mrf.mxu0  ;;  %3867 = vmatmul.f32.gmra.mxu2 %v9859_v41 }
 0x594   : > { %v3660_v3 = vadd.f32 %v3619_v60, %v3511_v15 }
 0x596   : > { %v4444_v57 = vrot.slane %v3660_v3, 6  ;;  %v3421_v43 = vpop.f32.mrf.mxu2  ;;  %4001 = vmatmul.f32.gmra.mxu3 %v12987_v54  ;;  %4149 = vmatmul.f32.gmra.mxu0 %v9828_v32  ;;  %v6521_v32 = vld [vmem:[%s6771_s20 + $0xd30] sm:$0xff]  ;;  %v12994_v54 = vld [vmem:[#allocation46_spill] sm:$0xff] }
 0x597   : > { %4319 = vmatpush.msra.mxu2 %v6521_v32 }
 0x598   : > { %v10490_v28 = vsel %vm1503_vm2, %v4443_v33, %v4444_v57 }
 0x599   : > { %12988 = vst [vmem:[#allocation18_spill] sm:$0xff] %v10490_v28  ;;  %v3513_v50 = vpop.f32.mrf.mxu3 }
 0x59a   : > { %v3514_v0 = vadd.f32 %v3513_v50, %v3421_v43  ;;  %4229 = vmatmul.f32.gmra.mxu1 %v12989_v55  ;;  %v12993_v55 = vld [vmem:[#allocation87_spill] sm:$0xff] }
 0x59b   : > { %v3622_v53 = vpop.f32.mrf.mxu0  ;;  %3870 = vmatmul.f32.gmra.mxu2 %v12990_v48 }
 0x59c   : > { %v3661_v15 = vadd.f32 %v3622_v53, %v3514_v0  ;;  %v10505_v0 = vpop.f32.mrf.mxu1 }
 0x59e   : > { %v4445_v60 = vrot.slane %v3661_v15, 6  ;;  %v3424_v3 = vpop.f32.mrf.mxu2  ;;  %4004 = vmatmul.f32.gmra.mxu3 %v12991_v29  ;;  %4152 = vmatmul.f32.gmra.mxu0 %v9859_v41  ;;  %v6520_v41 = vld [vmem:[%s6771_s20 + $0xd28] sm:$0xff] }
 0x59f   : > { %4320 = vmatpush.msra.mxu2 %v6520_v41 }
 0x5a0   : > { %v10501_v33 = vsel %vm1503_vm2, %v4444_v57, %v4445_v60 }
 0x5a1   : > { %12992 = vst [vmem:[#allocation41_spill] sm:$0xff] %v10501_v33  ;;  %v3516_v43 = vpop.f32.mrf.mxu3  ;;  %v12998_v33 = vld [vmem:[#allocation44_spill] sm:$0xff] }
 0x5a2   : > { %v3517_v50 = vadd.f32 %v3516_v43, %v3424_v3  ;;  %4232 = vmatmul.f32.gmra.mxu1 %v12993_v55  ;;  %v12997_v43 = vld [vmem:[#allocation9_spill] sm:$0xff] }
 0x5a3   : > { %v3625_v28 = vpop.f32.mrf.mxu0  ;;  %3873 = vmatmul.f32.gmra.mxu2 %v12994_v54 }
 0x5a4   : > { %v3662_v53 = vadd.f32 %v3625_v28, %v3517_v50  ;;  %v10516_v50 = vpop.f32.mrf.mxu1 }
 0x5a6   : > { %v4446_v15 = vrot.slane %v3662_v53, 6  ;;  %v3427_v29 = vpop.f32.mrf.mxu2  ;;  %4007 = vmatmul.f32.gmra.mxu3 %v12995_v38  ;;  %4155 = vmatmul.f32.gmra.mxu0 %v12990_v48  ;;  %v12999_v48 = vld [vmem:[#allocation4_spill] sm:$0xff] }
 0x5a8   : > { %v10512_v57 = vsel %vm1503_vm2, %v4445_v60, %v4446_v15 }
 0x5a9   : > { %12996 = vst [vmem:[#allocation110_spill] sm:$0xff] %v10512_v57  ;;  %v3519_v3 = vpop.f32.mrf.mxu3  ;;  %v13002_v57 = vld [vmem:[#allocation22_spill] sm:$0xff] }
 0x5aa   : > { %v3520_v32 = vadd.f32 %v3519_v3, %v3427_v29  ;;  %4235 = vmatmul.f32.gmra.mxu1 %v12997_v43  ;;  %v13001_v3 = vld [vmem:[#allocation17_spill] sm:$0xff] }
 0x5ab   : > { %v3628_v55 = vpop.f32.mrf.mxu0  ;;  %3876 = vmatmul.f32.gmra.mxu2 %v12998_v33 }
 0x5ac   : > { %v3663_v28 = vadd.f32 %v3628_v55, %v3520_v32  ;;  %v6519_v55 = vld [vmem:[%s6771_s20 + $0xd20] sm:$0xff] }
 0x5ad   : > { %4321 = vmatpush.msra.mxu2 %v6519_v55 }
 0x5ae   : > { %v4447_v53 = vrot.slane %v3663_v28, 6  ;;  %v3430_v38 = vpop.f32.mrf.mxu2  ;;  %4010 = vmatmul.f32.gmra.mxu3 %v12999_v48  ;;  %4158 = vmatmul.f32.gmra.mxu0 %v12994_v54  ;;  %v10529_v54 = vpop.f32.mrf.mxu1  ;;  %v13010_v48 = vld [vmem:[#allocation23_spill] sm:$0xff] }
 0x5b0   : > { %v10522_v60 = vsel %vm1503_vm2, %v4446_v15, %v4447_v53 }
 0x5b1   : > { %13000 = vst [vmem:[#allocation111_spill] sm:$0xff] %v10522_v60  ;;  %v3522_v29 = vpop.f32.mrf.mxu3 }
 0x5b2   : > { %v3523_v41 = vadd.f32 %v3522_v29, %v3430_v38  ;;  %4238 = vmatmul.f32.gmra.mxu1 %v13001_v3  ;;  %v13005_v3 = vld [vmem:[#allocation24_spill] sm:$0xff] }
 0x5b3   : > { %v3631_v43 = vpop.f32.mrf.mxu0  ;;  %3879 = vmatmul.f32.gmra.mxu2 %v13002_v57 }
 0x5b4   : > { %v3664_v32 = vadd.f32 %v3631_v43, %v3523_v41  ;;  %v13006_v43 = vld [vmem:[#allocation50_spill] sm:$0xff] }
 0x5b6   : > { %v4448_v28 = vrot.slane %v3664_v32, 6  ;;  %v3433_v10 = vpop.f32.mrf.mxu2  ;;  %4013 = vmatmul.f32.gmra.mxu3 %v13003_v11  ;;  %4161 = vmatmul.f32.gmra.mxu0 %v12998_v33  ;;  %v13007_v11 = vld [vmem:[#allocation58_spill] sm:$0xff] }
 0x5b8   : > { %v10533_v15 = vsel %vm1503_vm2, %v4447_v53, %v4448_v28 }
 0x5b9   : > { %13004 = vst [vmem:[#allocation70_spill] sm:$0xff] %v10533_v15  ;;  %v3525_v38 = vpop.f32.mrf.mxu3 }
 0x5ba   : > { %v3526_v29 = vadd.f32 %v3525_v38, %v3433_v10  ;;  %4241 = vmatmul.f32.gmra.mxu1 %v13005_v3  ;;  %v10543_v10 = vpop.f32.mrf.mxu1  ;;  %v13009_v3 = vld [vmem:[#allocation89_spill] sm:$0xff] }
 0x5bb   : > { %v3634_v41 = vpop.f32.mrf.mxu0  ;;  %3882 = vmatmul.f32.gmra.mxu2 %v13006_v43 }
 0x5bc   : > { %v3665_v32 = vadd.f32 %v3634_v41, %v3526_v29  ;;  %v6518_v41 = vld [vmem:[%s6771_s20 + $0xd18] sm:$0xff] }
 0x5bd   : > { %4322 = vmatpush.msra.mxu2 %v6518_v41 }
 0x5be   : > { %v4449_v55 = vrot.slane %v3665_v32, 6  ;;  %v3436_v60 = vpop.f32.mrf.mxu2  ;;  %4016 = vmatmul.f32.gmra.mxu3 %v13007_v11  ;;  %4164 = vmatmul.f32.gmra.mxu0 %v13002_v57  ;;  %v13011_v11 = vld [vmem:[#allocation51_spill] sm:$0xff] }
 0x5c0   : > { %v10541_v33 = vsel %vm1503_vm2, %v4448_v28, %v4449_v55 }
 0x5c1   : > { %13008 = vst [vmem:[#allocation60_spill] sm:$0xff] %v10541_v33  ;;  %v3528_v53 = vpop.f32.mrf.mxu3  ;;  %v13013_v33 = vld [vmem:[#allocation29_spill] sm:$0xff] }
 0x5c2   : > { %v3529_v38 = vadd.f32 %v3528_v53, %v3436_v60  ;;  %4244 = vmatmul.f32.gmra.mxu1 %v13009_v3  ;;  %v10555_v60 = vld [vmem:[%s7334_s28 + $0x2] ss:$0 sm:$0xff] }
 0x5c3   : > { %v3637_v15 = vpop.f32.mrf.mxu0  ;;  %3885 = vmatmul.f32.gmra.mxu2 %v13010_v48 }
 0x5c4   : > { %v3666_v29 = vadd.f32 %v3637_v15, %v3529_v38  ;;  %v13014_v38 = vld [vmem:[#allocation36_spill] sm:$0xff] }
 0x5c6   : > { %v4450_v32 = vrot.slane %v3666_v29, 6  ;;  %v3439_v57 = vpop.f32.mrf.mxu2  ;;  %4019 = vmatmul.f32.gmra.mxu3 %v13011_v11  ;;  %4167 = vmatmul.f32.gmra.mxu0 %v13006_v43  ;;  %v10559_v29 = vpop.f32.mrf.mxu1  ;;  %v6562_v11 = vld [vmem:[%s6771_s20 + $0xe78] sm:$0xff]  ;;  %v3782_v43 = vadd.f32 %v10555_v60, %v10345_v45 }
 0x5c7   : > { %4761 = vmatpush.msra.mxu3 %v6562_v11 }
 0x5c8   : > { %v10552_v28 = vsel %vm1503_vm2, %v4449_v55, %v4450_v32 }
 0x5c9   : > { %13012 = vst [vmem:[#allocation81_spill] sm:$0xff] %v10552_v28  ;;  %v3531_v53 = vpop.f32.mrf.mxu3 }
 0x5ca   : > { %v3532_v3 = vadd.f32 %v3531_v53, %v3439_v57  ;;  %4247 = vmatmul.f32.gmra.mxu1 %v13013_v33  ;;  %v6517_v33 = vld [vmem:[%s6771_s20 + $0xd10] sm:$0xff] }
 0x5cb   : > { %v3640_v15 = vpop.f32.mrf.mxu0  ;;  %3888 = vmatmul.f32.gmra.mxu2 %v13014_v38 }
 0x5cc   : > { %v3667_v41 = vadd.f32 %v3640_v15, %v3532_v3  ;;  %4323 = vmatpush.msra.mxu2 %v6517_v33  ;;  %v13016_v15 = vld [vmem:[#allocation61_spill] sm:$0xff] }
 0x5ce   : > { %v4451_v55 = vrot.slane %v3667_v41, 6  ;;  %v3841_v28 = vpop.f32.mrf.mxu2  ;;  %4022 = vmatmul.f32.gmra.mxu3 %v10119_v56  ;;  %4170 = vmatmul.f32.gmra.mxu0 %v13010_v48  ;;  %v10579_v41 = vpop.f32.mrf.mxu1 }
 0x5cf   : > { %v3916_v57 = vadd.f32 %v3841_v28, %v3782_v43  ;;  %v3783_v28 = vadd.f32 %v10555_v60, %v10376_v34  ;;  %v6516_v34 = vld [vmem:[%s6771_s20 + $0xd08] sm:$0xff] }
 0x5d0   : > { %v4452_v53 = vsel %vm1503_vm2, %v4450_v32, %v4451_v55  ;;  %v4476_v3 = vsel %vm1503_vm2, %v4451_v55, %v13015_v51  ;;  %v6561_v51 = vld [vmem:[%s6771_s20 + $0xe70] sm:$0xff]  ;;  %4324 = vmatpush.msra.mxu2 %v6516_v34  ;;  %v6515_v34 = vld [vmem:[%s6771_s20 + $0xd00] sm:$0xff] }
 0x5d1   : > { %v3975_v45 = vpop.f32.mrf.mxu3  ;;  %4762 = vmatpush.msra.mxu3 %v6561_v51  ;;  %v3785_v51 = vadd.f32 %v10555_v60, %v10413_v35 }
 0x5d2   : > { %v4050_v11 = vadd.f32 %v3975_v45, %v3916_v57  ;;  %4250 = vmatmul.f32.gmra.mxu1 %v9938_v12  ;;  %v3784_v57 = vadd.f32 %v10555_v60, %v10400_v59  ;;  %v6560_v59 = vld [vmem:[%s6771_s20 + $0xe68] sm:$0xff]  ;;  %4325 = vmatpush.msra.mxu2 %v6515_v34 }
 0x5d3   : > { %3891 = vmatmul.f32.gmra.mxu2 %v13016_v15  ;;  %4763 = vmatpush.msra.mxu3 %v6560_v59 }
 0x5d4   : > { %v10575_v48 = vadd.f32 %v4452_v53, %v4050_v11  ;;  %v13017_v53 = vld [vmem:[#allocation54_spill] sm:$0xff] }
 0x5d6   : > { %v3844_v32 = vpop.f32.mrf.mxu2  ;;  %4025 = vmatmul.f32.gmra.mxu3 %v10152_v4  ;;  %4173 = vmatmul.f32.gmra.mxu0 %v13014_v38  ;;  %v10593_v45 = vpop.f32.mrf.mxu1 }
 0x5d7   : > { %v3917_v24 = vadd.f32 %v3844_v32, %v3783_v28  ;;  %v13018_v28 = vld [vmem:[#allocation34_spill] sm:$0xff]  ;;  %v13020_v32 = vld [vmem:[#allocation53_spill] sm:$0xff] }
 0x5d9   : > { %v3978_v43 = vpop.f32.mrf.mxu3 }
 0x5da   : > { %v4051_v12 = vadd.f32 %v3978_v43, %v3917_v24  ;;  %4253 = vmatmul.f32.gmra.mxu1 %v9968_v6 }
 0x5db   : > { %3894 = vmatmul.f32.gmra.mxu2 %v10127_v8 }
 0x5dc   : > { %v10586_v55 = vadd.f32 %v4476_v3, %v4051_v12  ;;  %v13019_v3 = vld [vmem:[#allocation97_spill] sm:$0xff]  ;;  %v13021_v12 = vld [vmem:[#allocation32_spill] sm:$0xff] }
 0x5de   : > { %v3847_v33 = vpop.f32.mrf.mxu2  ;;  %4028 = vmatmul.f32.gmra.mxu3 %v13017_v53  ;;  %4176 = vmatmul.f32.gmra.mxu0 %v13016_v15 }
 0x5df   : > { %v3918_v38 = vadd.f32 %v3847_v33, %v3784_v57  ;;  %v10606_v33 = vpop.f32.mrf.mxu1 }
 0x5e1   : > { %v3981_v6 = vpop.f32.mrf.mxu3 }
 0x5e2   : > { %v4052_v11 = vadd.f32 %v3981_v6, %v3918_v38  ;;  %4256 = vmatmul.f32.gmra.mxu1 %v13018_v28  ;;  %v13022_v6 = vld [vmem:[#allocation6_spill] sm:$0xff] }
 0x5e3   : > { %3897 = vmatmul.f32.gmra.mxu2 %v13019_v3  ;;  %v13024_v28 = vld [vmem:[#allocation98_spill] sm:$0xff] }
 0x5e4   : > { %v10598_v24 = vadd.f32 %v13020_v32, %v4052_v11  ;;  %v13023_v11 = vld [vmem:[#allocation16_spill] sm:$0xff]  ;;  %v3786_v32 = vadd.f32 %v10555_v60, %v10426_v25  ;;  %v3787_v25 = vadd.f32 %v10555_v60, %v10441_v18 }
 0x5e6   : > { %v3850_v43 = vpop.f32.mrf.mxu2  ;;  %4031 = vmatmul.f32.gmra.mxu3 %v13021_v12  ;;  %4179 = vmatmul.f32.gmra.mxu0 %v10127_v8 }
 0x5e7   : > { %v3919_v15 = vadd.f32 %v3850_v43, %v3785_v51  ;;  %v6559_v51 = vld [vmem:[%s6771_s20 + $0xe60] sm:$0xff]  ;;  %v10620_v34 = vpop.f32.mrf.mxu1 }
 0x5e8   : > { %4764 = vmatpush.msra.mxu3 %v6559_v51 }
 0x5e9   : > { %v3984_v57 = vpop.f32.mrf.mxu3 }
 0x5ea   : > { %v4053_v38 = vadd.f32 %v3984_v57, %v3919_v15  ;;  %4259 = vmatmul.f32.gmra.mxu1 %v13022_v6 }
 0x5eb   : > { %3900 = vmatmul.f32.gmra.mxu2 %v13023_v11 }
 0x5ec   : > { %v10611_v35 = vadd.f32 %v13024_v28, %v4053_v38 }
 0x5ee   : > { %v3853_v59 = vpop.f32.mrf.mxu2  ;;  %4034 = vmatmul.f32.gmra.mxu3 %v10288_v20  ;;  %4182 = vmatmul.f32.gmra.mxu0 %v13019_v3 }
 0x5ef   : > { %v3920_v8 = vadd.f32 %v3853_v59, %v3786_v32  ;;  %v3788_v32 = vadd.f32 %v10555_v60, %v10454_v62  ;;  %v10637_v18 = vpop.f32.mrf.mxu1  ;;  %v3789_v62 = vadd.f32 %v10555_v60, %v10464_v40  ;;  %v3790_v40 = vadd.f32 %v10555_v60, %v10477_v46 }
 0x5f0   : > { %v3791_v46 = vadd.f32 %v10555_v60, %v10492_v44  ;;  %v3792_v44 = vadd.f32 %v10555_v60, %v10505_v0 }
 0x5f1   : > { %v3987_v43 = vpop.f32.mrf.mxu3 }
 0x5f2   : > { %v4054_v15 = vadd.f32 %v3987_v43, %v3920_v8  ;;  %4262 = vmatmul.f32.gmra.mxu1 %v10056_v30 }
 0x5f3   : > { %3903 = vmatmul.f32.gmra.mxu2 %v10264_v19 }
 0x5f4   : > { %v10623_v57 = vadd.f32 %v10261_v47, %v4054_v15  ;;  %v6558_v47 = vld [vmem:[%s6771_s20 + $0xe58] sm:$0xff] }
 0x5f5   : > { %4765 = vmatpush.msra.mxu3 %v6558_v47 }
 0x5f6   : > { %v3856_v38 = vpop.f32.mrf.mxu2  ;;  %4037 = vmatmul.f32.gmra.mxu3 %v10319_v58  ;;  %4185 = vmatmul.f32.gmra.mxu0 %v13023_v11 }
 0x5f7   : > { %v3921_v3 = vadd.f32 %v3856_v38, %v3787_v25  ;;  %v10650_v15 = vpop.f32.mrf.mxu1 }
 0x5f9   : > { %v3990_v6 = vpop.f32.mrf.mxu3 }
 0x5fa   : > { %v4055_v28 = vadd.f32 %v3990_v6, %v3921_v3  ;;  %4265 = vmatmul.f32.gmra.mxu1 %v10087_v49  ;;  %v13027_v3 = vld [vmem:[#allocation57_spill] sm:$0xff] }
 0x5fb   : > { %3906 = vmatmul.f32.gmra.mxu2 %v10301_v31 }
 0x5fc   : > { %v10632_v30 = vadd.f32 %v10298_v21, %v4055_v28  ;;  %v13025_v21 = vld [vmem:[#allocation13_spill] sm:$0xff]  ;;  %v6557_v28 = vld [vmem:[%s6771_s20 + $0xe50] sm:$0xff] }
 0x5fd   : > { %4766 = vmatpush.msra.mxu3 %v6557_v28 }
 0x5fe   : > { %v3859_v59 = vpop.f32.mrf.mxu2  ;;  %4040 = vmatmul.f32.gmra.mxu3 %v10339_v26  ;;  %4188 = vmatmul.f32.gmra.mxu0 %v10264_v19 }
 0x5ff   : > { %v3922_v11 = vadd.f32 %v3859_v59, %v3788_v32  ;;  %v10662_v59 = vpop.f32.mrf.mxu1 }
 0x601   : > { %v3993_v8 = vpop.f32.mrf.mxu3 }
 0x602   : > { %v4056_v49 = vadd.f32 %v3993_v8, %v3922_v11  ;;  %4268 = vmatmul.f32.gmra.mxu1 %v10115_v37  ;;  %v13026_v37 = vld [vmem:[#allocation90_spill] sm:$0xff]  ;;  %v13028_v11 = vld [vmem:[#allocation95_spill] sm:$0xff] }
 0x603   : > { %3909 = vmatmul.f32.gmra.mxu2 %v10311_v63  ;;  %v13029_v8 = vld [vmem:[#allocation66_spill] sm:$0xff] }
 0x604   : > { %v10644_v51 = vadd.f32 %v13025_v21, %v4056_v49  ;;  %v6556_v21 = vld [vmem:[%s6771_s20 + $0xe48] sm:$0xff] }
 0x605   : > { %4767 = vmatpush.msra.mxu3 %v6556_v21 }
 0x606   : > { %v3862_v43 = vpop.f32.mrf.mxu2  ;;  %4043 = vmatmul.f32.gmra.mxu3 %v10364_v39  ;;  %4191 = vmatmul.f32.gmra.mxu0 %v10301_v31 }
 0x607   : > { %v3923_v19 = vadd.f32 %v3862_v43, %v3789_v62  ;;  %v10672_v62 = vpop.f32.mrf.mxu0 }
 0x609   : > { %v3996_v25 = vpop.f32.mrf.mxu3 }
 0x60a   : > { %v4057_v38 = vadd.f32 %v3996_v25, %v3923_v19  ;;  %4271 = vmatmul.f32.gmra.mxu1 %v10148_v61 }
 0x60b   : > { %3912 = vmatmul.f32.gmra.mxu2 %v13026_v37 }
 0x60c   : > { %v10655_v6 = vadd.f32 %v13027_v3, %v4057_v38  ;;  %v10677_v38 = vpop.f32.mrf.mxu1  ;;  %v13031_v3 = vld [vmem:[#allocation59_spill] sm:$0xff] }
 0x60e   : > { %v3865_v47 = vpop.f32.mrf.mxu2  ;;  %4046 = vmatmul.f32.gmra.mxu3 %v10385_v16  ;;  %4194 = vmatmul.f32.gmra.mxu0 %v10311_v63 }
 0x60f   : > { %v3924_v31 = vadd.f32 %v3865_v47, %v3790_v40 }
 0x611   : > { %v3999_v32 = vpop.f32.mrf.mxu3 }
 0x612   : > { %v4058_v61 = vadd.f32 %v3999_v32, %v3924_v31  ;;  %4274 = vmatmul.f32.gmra.mxu1 %v10194_v52  ;;  %v13030_v52 = vld [vmem:[#allocation64_spill] sm:$0xff] }
 0x613   : > { %4326 = vmatmul.f32.vlgmr.msra.gmra.mxu2 %v13028_v11 }
 0x614   : > { %v10667_v49 = vadd.f32 %v13029_v8, %v4058_v61  ;;  %v3793_v61 = vadd.f32 %v10555_v60, %v10516_v50  ;;  %v10692_v11 = vpop.f32.mrf.mxu1  ;;  %v6554_v50 = vld [vmem:[%s6771_s20 + $0xe38] sm:$0xff] }
 0x616   : > { %v3868_v63 = vpop.f32.mrf.mxu2  ;;  %4197 = vmatmul.f32.gmra.mxu0 %v13026_v37 }
 0x617   : > { %v3925_v43 = vadd.f32 %v3868_v63, %v3791_v46 }
 0x619   : > { %v4002_v19 = vpop.f32.mrf.mxu3 }
 0x61a   : > { %v4059_v25 = vadd.f32 %v4002_v19, %v3925_v43  ;;  %4277 = vmatmul.f32.gmra.mxu1 %v13030_v52 }
 0x61b   : > { %4329 = vmatmul.f32.gmra.mxu2 %v9671_v5  ;;  %v6555_v5 = vld [vmem:[%s6771_s20 + $0xe40] sm:$0xff] }
 0x61c   : > { %v10680_v28 = vadd.f32 %v13031_v3, %v4059_v25  ;;  %4768 = vmatpush.msra.mxu3 %v6555_v5  ;;  %v10702_v43 = vpop.f32.mrf.mxu1 }
 0x61e   : > { %v3871_v40 = vpop.f32.mrf.mxu2  ;;  %4769 = vmatpush.msra.mxu3 %v6554_v50 }
 0x61f   : > { %v3926_v47 = vadd.f32 %v3871_v40, %v3792_v44 }
 0x621   : > { %v4005_v31 = vpop.f32.mrf.mxu3 }
 0x622   : > { %v4060_v37 = vadd.f32 %v4005_v31, %v3926_v47  ;;  %4280 = vmatmul.f32.gmra.mxu1 %v10284_v14  ;;  %v3794_v14 = vadd.f32 %v10555_v60, %v10529_v54  ;;  %v3796_v31 = vadd.f32 %v10555_v60, %v10559_v29 }
 0x623   : > { %4332 = vmatmul.f32.gmra.mxu2 %v9700_v23 }
 0x624   : > { %v10687_v32 = vadd.f32 %v10408_v36, %v4060_v37  ;;  %v10711_v44 = vpop.f32.mrf.mxu1 }
 0x626   : > { %v3874_v0 = vpop.f32.mrf.mxu2 }
 0x627   : > { %v3927_v8 = vadd.f32 %v3874_v0, %v3793_v61  ;;  %v10722_v0 = vpop.f32.mrf.mxu0 }
 0x629   : > { %v4008_v21 = vpop.f32.mrf.mxu3 }
 0x62a   : > { %v4061_v46 = vadd.f32 %v4008_v21, %v3927_v8  ;;  %4283 = vmatmul.f32.gmra.mxu1 %v10315_v17 }
 0x62b   : > { %4335 = vmatmul.f32.gmra.mxu2 %v9728_v27  ;;  %v13032_v27 = vld [vmem:[#allocation75_spill] sm:$0xff] }
 0x62c   : > { %v10697_v23 = vadd.f32 %v10420_v22, %v4061_v46  ;;  %v3795_v22 = vadd.f32 %v10555_v60, %v10543_v10  ;;  %v10731_v50 = vpop.f32.mrf.mxu1 }
 0x62e   : > { %v3877_v36 = vpop.f32.mrf.mxu2 }
 0x62f   : > { %v3928_v63 = vadd.f32 %v3877_v36, %v3794_v14  ;;  %v6552_v14 = vld [vmem:[%s6771_s20 + $0xe28] sm:$0xff] }
 0x631   : > { %v4011_v19 = vpop.f32.mrf.mxu3 }
 0x632   : > { %v4062_v25 = vadd.f32 %v4011_v19, %v3928_v63  ;;  %4286 = vmatmul.f32.gmra.mxu1 %v10335_v2  ;;  %v13033_v2 = vld [vmem:[#allocation109_spill] sm:$0xff]  ;;  %v13035_v63 = vld [vmem:[#allocation38_spill] sm:$0xff] }
 0x633   : > { %4338 = vmatmul.f32.gmra.mxu2 %v9759_v9  ;;  %v6553_v9 = vld [vmem:[%s6771_s20 + $0xe30] sm:$0xff] }
 0x634   : > { %v10707_v17 = vadd.f32 %v13032_v27, %v4062_v25  ;;  %4770 = vmatpush.msra.mxu3 %v6553_v9  ;;  %v3798_v25 = vadd.f32 %v10555_v60, %v10593_v45  ;;  %v10738_v27 = vpop.f32.mrf.mxu0  ;;  %v6551_v9 = vld [vmem:[%s6771_s20 + $0xe20] sm:$0xff] }
 0x636   : > { %v3880_v54 = vpop.f32.mrf.mxu2  ;;  %4771 = vmatpush.msra.mxu3 %v6552_v14  ;;  %v3800_v14 = vadd.f32 %v10555_v60, %v10620_v34 }
 0x637   : > { %v3929_v52 = vadd.f32 %v3880_v54, %v3795_v22 }
 0x638   : > { %4772 = vmatpush.msra.mxu3 %v6551_v9 }
 0x639   : > { %v4014_v3 = vpop.f32.mrf.mxu3 }
 0x63a   : > { %v4063_v40 = vadd.f32 %v4014_v3, %v3929_v52  ;;  %4289 = vmatmul.f32.gmra.mxu1 %v10360_v7  ;;  %v13034_v7 = vld [vmem:[#allocation68_spill] sm:$0xff]  ;;  %v13037_v3 = vld [vmem:[#allocation39_spill] sm:$0xff] }
 0x63b   : > { %4341 = vmatmul.f32.gmra.mxu2 %v9790_v1  ;;  %v3797_v1 = vadd.f32 %v10555_v60, %v10579_v41 }
 0x63c   : > { %v10716_v47 = vadd.f32 %v13033_v2, %v4063_v40  ;;  %v13038_v40 = vld [vmem:[#allocation78_spill] sm:$0xff] }
 0x63e   : > { %v3883_v10 = vpop.f32.mrf.mxu2 }
 0x63f   : > { %v3930_v37 = vadd.f32 %v3883_v10, %v3796_v31  ;;  %v3799_v31 = vadd.f32 %v10555_v60, %v10606_v33  ;;  %v10747_v10 = vpop.f32.mrf.mxu1 }
 0x641   : > { %v4017_v5 = vpop.f32.mrf.mxu3 }
 0x642   : > { %v4064_v61 = vadd.f32 %v4017_v5, %v3930_v37  ;;  %v10749_v5 = vpop.f32.mrf.mxu0 }
 0x643   : > { %4344 = vmatmul.f32.gmra.mxu2 %v9820_v13  ;;  %v13036_v13 = vld [vmem:[#allocation19_spill] sm:$0xff] }
 0x644   : > { %v10725_v8 = vadd.f32 %v13034_v7, %v4064_v61 }
 0x646   : > { %v3886_v21 = vpop.f32.mrf.mxu2 }
 0x647   : > { %v3931_v46 = vadd.f32 %v3886_v21, %v3797_v1  ;;  %v13039_v1 = vld [vmem:[#allocation42_spill] sm:$0xff]  ;;  %v13040_v21 = vld [vmem:[#allocation79_spill] sm:$0xff]  ;;  %v10757_v33 = vpop.f32.mrf.mxu1 }
 0x649   : > { %v4020_v29 = vpop.f32.mrf.mxu3 }
 0x64a   : > { %v4065_v36 = vadd.f32 %v4020_v29, %v3931_v46 }
 0x64b   : > { %4347 = vmatmul.f32.gmra.mxu2 %v13035_v63  ;;  %v6550_v63 = vld [vmem:[%s6771_s20 + $0xe18] sm:$0xff] }
 0x64c   : > { %v10734_v19 = vadd.f32 %v13036_v13, %v4065_v36  ;;  %4773 = vmatpush.msra.mxu3 %v6550_v63 }
 0x64e   : > { %v3889_v41 = vpop.f32.mrf.mxu2 }
 0x64f   : > { %v3932_v22 = vadd.f32 %v3889_v41, %v3798_v25  ;;  %v10760_v25 = vpop.f32.mrf.mxu0 }
 0x651   : > { %v4023_v54 = vpop.f32.mrf.mxu3 }
 0x652   : > { %v4066_v52 = vadd.f32 %v4023_v54, %v3932_v22  ;;  %v13041_v22 = vld [vmem:[#allocation15_spill] sm:$0xff]  ;;  %v13042_v54 = vld [vmem:[#allocation18_spill] sm:$0xff] }
 0x653   : > { %4350 = vmatmul.f32.gmra.mxu2 %v13037_v3  ;;  %v3801_v3 = vadd.f32 %v10555_v60, %v10637_v18 }
 0x654   : > { %v10742_v2 = vadd.f32 %v13038_v40, %v4066_v52 }
 0x656   : > { %v3892_v45 = vpop.f32.mrf.mxu2 }
 0x657   : > { %v3933_v37 = vadd.f32 %v3892_v45, %v3799_v31  ;;  %v10768_v31 = vpop.f32.mrf.mxu1 }
 0x659   : > { %v4026_v61 = vpop.f32.mrf.mxu3 }
 0x65a   : > { %v4067_v7 = vadd.f32 %v4026_v61, %v3933_v37  ;;  %v13043_v37 = vld [vmem:[#allocation33_spill] sm:$0xff]  ;;  %v10771_v61 = vpop.f32.mrf.mxu0 }
 0x65b   : > { %4353 = vmatmul.f32.gmra.mxu2 %v13039_v1 }
 0x65c   : > { %v10753_v46 = vadd.f32 %v13040_v21, %v4067_v7  ;;  %v13044_v7 = vld [vmem:[#allocation41_spill] sm:$0xff]  ;;  %v6549_v21 = vld [vmem:[%s6771_s20 + $0xe10] sm:$0xff] }
 0x65d   : > { %4774 = vmatpush.msra.mxu3 %v6549_v21  ;;  %v6544_v21 = vld [vmem:[%s6771_s20 + $0xde8] sm:$0xff] }
 0x65e   : > { %v3895_v29 = vpop.f32.mrf.mxu2 }
 0x65f   : > { %v3934_v36 = vadd.f32 %v3895_v29, %v3800_v14  ;;  %v3802_v14 = vadd.f32 %v10555_v60, %v10650_v15 }
 0x661   : > { %v4029_v13 = vpop.f32.mrf.mxu3 }
 0x662   : > { %v4068_v41 = vadd.f32 %v4029_v13, %v3934_v36  ;;  %v13045_v13 = vld [vmem:[#allocation4_spill] sm:$0xff] }
 0x663   : > { %4356 = vmatmul.f32.gmra.mxu2 %v13041_v22  ;;  %v13046_v22 = vld [vmem:[#allocation110_spill] sm:$0xff] }
 0x664   : > { %v10764_v52 = vadd.f32 %v13042_v54, %v4068_v41  ;;  %v10780_v41 = vpop.f32.mrf.mxu1 }
 0x666   : > { %v3898_v34 = vpop.f32.mrf.mxu2 }
 0x667   : > { %v3935_v40 = vadd.f32 %v3898_v34, %v3801_v3  ;;  %v3803_v3 = vadd.f32 %v10555_v60, %v10662_v59  ;;  %v10787_v34 = vpop.f32.mrf.mxu0  ;;  %v6543_v59 = vld [vmem:[%s6771_s20 + $0xde0] sm:$0xff] }
 0x669   : > { %v4032_v9 = vpop.f32.mrf.mxu3 }
 0x66a   : > { %v4069_v45 = vadd.f32 %v4032_v9, %v3935_v40  ;;  %v6546_v40 = vld [vmem:[%s6771_s20 + $0xdf8] sm:$0xff] }
 0x66b   : > { %4359 = vmatmul.f32.gmra.mxu2 %v13043_v37  ;;  %4853 = vmatpush.msrb.mxu0 %v6546_v40 }
 0x66c   : > { %v10774_v1 = vadd.f32 %v13044_v7, %v4069_v45  ;;  %v6545_v45 = vld [vmem:[%s6771_s20 + $0xdf0] sm:$0xff]  ;;  %v6548_v7 = vld [vmem:[%s6771_s20 + $0xe08] sm:$0xff] }
 0x66d   : > { %4854 = vmatpush.msrb.mxu0 %v6545_v45  ;;  %4775 = vmatpush.msra.mxu3 %v6548_v7  ;;  %v6541_v45 = vld [vmem:[%s6771_s20 + $0xdd0] sm:$0xff] }
 0x66e   : > { %v3901_v18 = vpop.f32.mrf.mxu2 }
 0x66f   : > { %v3936_v29 = vadd.f32 %v3901_v18, %v3802_v14  ;;  %v13047_v18 = vld [vmem:[#allocation48_spill] sm:$0xff]  ;;  %4855 = vmatpush.msrb.mxu0 %v6544_v21  ;;  %v6540_v21 = vld [vmem:[%s6771_s20 + $0xdc8] sm:$0xff] }
 0x671   : > { %v4035_v36 = vpop.f32.mrf.mxu3  ;;  %4856 = vmatpush.msrb.mxu0 %v6543_v59  ;;  %v13050_v59 = vld [vmem:[#allocation70_spill] sm:$0xff] }
 0x672   : > { %v4070_v63 = vadd.f32 %v4035_v36, %v3936_v29  ;;  %v13048_v29 = vld [vmem:[#allocation111_spill] sm:$0xff] }
 0x673   : > { %4362 = vmatmul.f32.gmra.mxu2 %v13045_v13  ;;  %v10800_v13 = vpop.f32.mrf.mxu1 }
 0x674   : > { %v10783_v54 = vadd.f32 %v13046_v22, %v4070_v63  ;;  %v3804_v63 = vadd.f32 %v10555_v60, %v10677_v38 }
 0x676   : > { %v3904_v15 = vpop.f32.mrf.mxu2 }
 0x677   : > { %v3937_v9 = vadd.f32 %v3904_v15, %v3803_v3  ;;  %v6542_v3 = vld [vmem:[%s6771_s20 + $0xdd8] sm:$0xff] }
 0x678   : > { %v6578_v15 = vld [vmem:[%s6771_s20 + $0xef8] sm:$0xff]  ;;  %4857 = vmatpush.msrb.mxu0 %v6542_v3  ;;  %v3805_v3 = vadd.f32 %v10555_v60, %v10692_v11 }
 0x679   : > { %v4038_v37 = vpop.f32.mrf.mxu3  ;;  %4962 = vmatpush.msrb.mxu1 %v6578_v15 }
 0x67a   : > { %v4071_v14 = vadd.f32 %v4038_v37, %v3937_v9  ;;  %v10804_v9 = vpop.f32.mrf.mxu0  ;;  %v6577_v37 = vld [vmem:[%s6771_s20 + $0xef0] sm:$0xff]  ;;  %4858 = vmatpush.msrb.mxu0 %v6541_v45  ;;  %v6574_v45 = vld [vmem:[%s6771_s20 + $0xed8] sm:$0xff] }
 0x67b   : > { %4365 = vmatmul.f32.gmra.mxu2 %v13047_v18  ;;  %4963 = vmatpush.msrb.mxu1 %v6577_v37  ;;  %v13049_v18 = vld [vmem:[#allocation58_spill] sm:$0xff] }
 0x67c   : > { %v10796_v36 = vadd.f32 %v13048_v29, %v4071_v14  ;;  %v6576_v14 = vld [vmem:[%s6771_s20 + $0xee8] sm:$0xff]  ;;  %4859 = vmatpush.msrb.mxu0 %v6540_v21  ;;  %v6573_v21 = vld [vmem:[%s6771_s20 + $0xed0] sm:$0xff] }
 0x67d   : > { %4964 = vmatpush.msrb.mxu1 %v6576_v14 }
 0x67e   : > { %v3907_v22 = vpop.f32.mrf.mxu2 }
 0x67f   : > { %v3938_v40 = vadd.f32 %v3907_v22, %v3804_v63  ;;  %v6539_v63 = vld [vmem:[%s6771_s20 + $0xdc0] sm:$0xff] }
 0x680   : > { %v6575_v22 = vld [vmem:[%s6771_s20 + $0xee0] sm:$0xff]  ;;  %4860 = vmatpush.msrb.mxu0 %v6539_v63  ;;  %v6572_v63 = vld [vmem:[%s6771_s20 + $0xec8] sm:$0xff] }
 0x681   : > { %v4041_v7 = vpop.f32.mrf.mxu3  ;;  %4965 = vmatpush.msrb.mxu1 %v6575_v22  ;;  %v13052_v22 = vld [vmem:[#allocation51_spill] sm:$0xff] }
 0x682   : > { %v4072_v38 = vadd.f32 %v4041_v7, %v3938_v40  ;;  %v6538_v40 = vld [vmem:[%s6771_s20 + $0xdb8] sm:$0xff]  ;;  %v10820_v7 = vpop.f32.mrf.mxu1  ;;  %v10824_v11 = vpop.f32.mrf.mxu0 }
 0x683   : > { %4368 = vmatmul.f32.gmra.mxu2 %v13049_v18  ;;  %4861 = vmatpush.msrb.mxu0 %v6538_v40  ;;  %v6535_v40 = vld [vmem:[%s6771_s20 + $0xda0] sm:$0xff] }
 0x684   : > { %v10812_v29 = vadd.f32 %v13050_v59, %v4072_v38  ;;  %4966 = vmatpush.msrb.mxu1 %v6574_v45  ;;  %v6537_v38 = vld [vmem:[%s6771_s20 + $0xdb0] sm:$0xff]  ;;  %v6536_v59 = vld [vmem:[%s6771_s20 + $0xda8] sm:$0xff]  ;;  %v6571_v45 = vld [vmem:[%s6771_s20 + $0xec0] sm:$0xff] }
 0x685   : > { %4862 = vmatpush.msrb.mxu0 %v6537_v38 }
 0x686   : > { %13051 = vst [vmem:[#allocation83_spill] sm:$0xff] %v10812_v29  ;;  %v3910_v15 = vpop.f32.mrf.mxu2  ;;  %4967 = vmatpush.msrb.mxu1 %v6573_v21  ;;  %v6570_v21 = vld [vmem:[%s6771_s20 + $0xeb8] sm:$0xff] }
 0x687   : > { %v3939_v37 = vadd.f32 %v3910_v15, %v3805_v3  ;;  %4863 = vmatpush.msrb.mxu0 %v6536_v59  ;;  %v13053_v3 = vld [vmem:[#allocation60_spill] sm:$0xff] }
 0x688   : > { %4968 = vmatpush.msrb.mxu1 %v6572_v63  ;;  %v6569_v59 = vld [vmem:[%s6771_s20 + $0xeb0] sm:$0xff]  ;;  %v6532_v63 = vld [vmem:[%s6771_s20 + $0xd88] sm:$0xff] }
 0x689   : > { %v4044_v14 = vpop.f32.mrf.mxu3  ;;  %4864 = vmatpush.msrb.mxu0 %v6535_v40 }
 0x68a   : > { %v4073_v18 = vadd.f32 %v4044_v14, %v3939_v37  ;;  %4969 = vmatpush.msrb.mxu1 %v6571_v45  ;;  %v6534_v37 = vld [vmem:[%s6771_s20 + $0xd98] sm:$0xff]  ;;  %v6547_v14 = vld [vmem:[%s6771_s20 + $0xe00] sm:$0xff]  ;;  %v10844_v40 = vpop.f32.mrf.mxu0 }
 0x68b   : > { %4371 = vmatmul.f32.gmra.mxu2 %v13052_v22  ;;  %4865 = vmatpush.msrb.mxu0 %v6534_v37  ;;  %v6533_v22 = vld [vmem:[%s6771_s20 + $0xd90] sm:$0xff]  ;;  %v6531_v45 = vld [vmem:[%s6771_s20 + $0xd80] sm:$0xff] }
 0x68c   : > { %v10830_v15 = vadd.f32 %v13053_v3, %v4073_v18  ;;  %4970 = vmatpush.msrb.mxu1 %v6570_v21  ;;  %4776 = vmatpush.msra.mxu3 %v6547_v14  ;;  %v10839_v18 = vpop.f32.mrf.mxu1  ;;  %v6568_v3 = vld [vmem:[%s6771_s20 + $0xea8] sm:$0xff]  ;;  %v6567_v37 = vld [vmem:[%s6771_s20 + $0xea0] sm:$0xff]  ;;  %v6566_v14 = vld [vmem:[%s6771_s20 + $0xe98] sm:$0xff] }
 0x68d   : > { %4866 = vmatpush.msrb.mxu0 %v6533_v22  ;;  %v6595_v22 = vld [vmem:[%s6771_s20 + $0xf78] sm:$0xff] }
 0x68e   : > { %13054 = vst [vmem:[#allocation105_spill] sm:$0xff] %v10830_v15  ;;  %v3913_v38 = vpop.f32.mrf.mxu2  ;;  %4971 = vmatpush.msrb.mxu1 %v6569_v59  ;;  %v6611_v15 = vld [vmem:[%s6771_s20 + $0xff8] sm:$0xff]  ;;  %v6565_v59 = vld [vmem:[%s6771_s20 + $0xe90] sm:$0xff]  ;;  %5101 = vmatpush.msrb.mxu2 %v6595_v22 }
 0x68f   : > { %4867 = vmatpush.msrb.mxu0 %v6532_v63  ;;  %5235 = vmatpush.msrb.mxu3 %v6611_v15  ;;  %v6564_v63 = vld [vmem:[%s6771_s20 + $0xe88] sm:$0xff]  ;;  %v4222_v15 = vadd.f32 %v10731_v50, %v10722_v0  ;;  %v6592_v0 = vld [vmem:[%s6771_s20 + $0xf60] sm:$0xff] }
 0x690   : > { %4972 = vmatpush.msrb.mxu1 %v6568_v3  ;;  %v4219_v3 = vadd.f32 %v10711_v44, %v10672_v62  ;;  %v6594_v62 = vld [vmem:[%s6771_s20 + $0xf70] sm:$0xff] }
 0x691   : > { %4868 = vmatpush.msrb.mxu0 %v6531_v45  ;;  %v4047_v22 = vpop.f32.mrf.mxu3  ;;  %5102 = vmatpush.msrb.mxu2 %v6594_v62 }
 0x692   : > { %4973 = vmatpush.msrb.mxu1 %v6567_v37 }
 0x693   : > { %4374 = vmatmul.f32.gmra.mxu2 %v10119_v56  ;;  %v3806_v56 = vadd.f32 %v10555_v60, %v10702_v43  ;;  %v10865_v60 = vpop.f32.mrf.mxu0 }
 0x694   : > { %4974 = vmatpush.msrb.mxu1 %v6566_v14  ;;  %v10858_v45 = vpop.f32.mrf.mxu1  ;;  %v6563_v14 = vld [vmem:[%s6771_s20 + $0xe80] sm:$0xff] }
 0x695   : > { %v3940_v37 = vadd.f32 %v3913_v38, %v3806_v56  ;;  %v6593_v38 = vld [vmem:[%s6771_s20 + $0xf68] sm:$0xff] }
 0x696   : > { %v4327_v21 = vpop.f32.mrf.mxu2  ;;  %4975 = vmatpush.msrb.mxu1 %v6565_v59  ;;  %5103 = vmatpush.msrb.mxu2 %v6593_v38  ;;  %v6610_v38 = vld [vmem:[%s6771_s20 + $0xff0] sm:$0xff] }
 0x697   : > { %v10863_v29 = vadd.f32 %v4327_v21, %v4219_v3  ;;  %v13055_v21 = vld [vmem:[#allocation81_spill] sm:$0xff]  ;;  %5236 = vmatpush.msrb.mxu3 %v6610_v38  ;;  %v13058_v38 = vld [vmem:[#allocation91_spill] sm:$0xff] }
 0x698   : > { %4976 = vmatpush.msrb.mxu1 %v6564_v63  ;;  %5104 = vmatpush.msrb.mxu2 %v6592_v0  ;;  %v6591_v3 = vld [vmem:[%s6771_s20 + $0xf58] sm:$0xff] }
 0x699   : > { %v12313_v59 = vrot.slane %v10863_v29, 2 }
 0x69a   : > { %4977 = vmatpush.msrb.mxu1 %v6563_v14  ;;  %5105 = vmatpush.msrb.mxu2 %v6591_v3  ;;  %v13056_v3 = vld [vmem:[#allocation49_spill] sm:$0xff] }
 0x69b   : > { %4377 = vmatmul.f32.gmra.mxu2 %v10152_v4  ;;  %v4074_v4 = vadd.f32 %v4047_v22, %v3940_v37  ;;  %v4225_v37 = vadd.f32 %v10747_v10, %v10738_v27  ;;  %v6588_v27 = vld [vmem:[%s6771_s20 + $0xf40] sm:$0xff] }
 0x69c   : > { %v10880_v14 = vpop.f32.mrf.mxu1 }
 0x69d   : > { %v4501_v63 = vadd.f32 %v13055_v21, %v4074_v4  ;;  %v6587_v21 = vld [vmem:[%s6771_s20 + $0xf38] sm:$0xff] }
 0x69e   : > { %v4330_v43 = vpop.f32.mrf.mxu2 }
 0x69f   : > { %v4403_v44 = vadd.f32 %v4330_v43, %v4222_v15  ;;  %v6590_v43 = vld [vmem:[%s6771_s20 + $0xf50] sm:$0xff] }
 0x6a0   : > { %5106 = vmatpush.msrb.mxu2 %v6590_v43  ;;  %v6586_v43 = vld [vmem:[%s6771_s20 + $0xf30] sm:$0xff] }
 0x6a1   : > { %v4503_v56 = vrot.slane %v4403_v44, 2  ;;  %v10883_v44 = vpop.f32.mrf.mxu0 }
 0x6a3   : > { %v4550_v50 = vsel %vm1579_vm3, %v12313_v59, %v4503_v56  ;;  %4380 = vmatmul.f32.gmra.mxu2 %v13017_v53  ;;  %v6589_v53 = vld [vmem:[%s6771_s20 + $0xf48] sm:$0xff] }
 0x6a4   : > { %v4576_v15 = vadd.f32 %v4550_v50, %v4501_v63  ;;  %5107 = vmatpush.msrb.mxu2 %v6589_v53  ;;  %v4228_v63 = vadd.f32 %v10757_v33, %v10749_v5  ;;  %v6585_v53 = vld [vmem:[%s6771_s20 + $0xf28] sm:$0xff] }
 0x6a6   : > { %v4333_v22 = vpop.f32.mrf.mxu2  ;;  %v4601_v0 = vmax.f32 %v4576_v15, 0.0  ;;  %5108 = vmatpush.msrb.mxu2 %v6588_v27 }
 0x6a7   : > { %v4404_v62 = vadd.f32 %v4333_v22, %v4225_v37 }
 0x6a8   : > { %v10896_v37 = vmul.f32 %v4601_v0, %v13056_v3  ;;  %5109 = vmatpush.msrb.mxu2 %v6587_v21  ;;  %v6583_v3 = vld [vmem:[%s6771_s20 + $0xf18] sm:$0xff] }
 0x6a9   : > { %v4504_v4 = vrot.slane %v4404_v62, 2  ;;  %v10906_v5 = vpop.f32.mrf.mxu0 }
 0x6aa   : > { %13057 = vst [vmem:[#allocation62_spill] sm:$0xff] %v10896_v37  ;;  %5110 = vmatpush.msrb.mxu2 %v6586_v43  ;;  %v12312_v0 = vrot.slane %v10896_v37, 7 }
 0x6ab   : > { %v4549_v10 = vsel %vm1579_vm3, %v4503_v56, %v4504_v4  ;;  %4383 = vmatmul.f32.gmra.mxu2 %v13021_v12  ;;  %v10899_v56 = vpop.f32.mrf.mxu1 }
 0x6ac   : > { %v4552_v50 = vadd.f32 %v4549_v10, %v10575_v48  ;;  %v6609_v48 = vld [vmem:[%s6771_s20 + $0xfe8] sm:$0xff]  ;;  %5111 = vmatpush.msrb.mxu2 %v6585_v53  ;;  %v6584_v10 = vld [vmem:[%s6771_s20 + $0xf20] sm:$0xff] }
 0x6ad   : > { %5237 = vmatpush.msrb.mxu3 %v6609_v48 }
 0x6ae   : > { %v4577_v15 = vmax.f32 %v4552_v50, 0.0  ;;  %v4336_v22 = vpop.f32.mrf.mxu2  ;;  %5112 = vmatpush.msrb.mxu2 %v6584_v10 }
 0x6af   : > { %v4405_v62 = vadd.f32 %v4336_v22, %v4228_v63 }
 0x6b0   : > { %v10902_v12 = vmul.f32 %v4577_v15, %v13058_v38  ;;  %v4231_v15 = vadd.f32 %v10768_v31, %v10760_v25  ;;  %5113 = vmatpush.msrb.mxu2 %v6583_v3  ;;  %v6581_v38 = vld [vmem:[%s6771_s20 + $0xf08] sm:$0xff] }
 0x6b1   : > { %v4505_v27 = vrot.slane %v4405_v62, 2  ;;  %v10941_v3 = vpop.f32.mrf.mxu0 }
 0x6b2   : > { %4777 = vmatmul.f32.vlgmr.msra.gmra.mxu3 %v10902_v12  ;;  %v4627_v33 = vrot.slane %v10902_v12, 7  ;;  %v12311_v31 = vrot.slane %v10902_v12, 1 }
 0x6b3   : > { %v4548_v50 = vsel %vm1579_vm3, %v4504_v4, %v4505_v27  ;;  %4386 = vmatmul.f32.gmra.mxu2 %v10288_v20  ;;  %v6582_v20 = vld [vmem:[%s6771_s20 + $0xf10] sm:$0xff]  ;;  %v10931_v53 = vpop.f32.mrf.mxu1 }
 0x6b4   : > { %v4553_v21 = vadd.f32 %v4548_v50, %v10586_v55  ;;  %v10920_v63 = vsel %vm292_vm0, %v12312_v0, %v4627_v33  ;;  %v13059_v55 = vld [vmem:[#allocation92_spill] sm:$0xff]  ;;  %5114 = vmatpush.msrb.mxu2 %v6582_v20  ;;  %v6580_v50 = vld [vmem:[%s6771_s20 + $0xf00] sm:$0xff] }
 0x6b5   : > { %4869 = vmatmul.f32.vlgmr.msrb.gmra.mxu0 %v10920_v63  ;;  %v13070_v0 = vld [vmem:[#allocation20_spill] sm:$0xff] }
 0x6b6   : > { %v4578_v22 = vmax.f32 %v4553_v21, 0.0  ;;  %v4339_v4 = vpop.f32.mrf.mxu2  ;;  %5115 = vmatpush.msrb.mxu2 %v6581_v38 }
 0x6b7   : > { %v4406_v43 = vadd.f32 %v4339_v4, %v4231_v15 }
 0x6b8   : > { %v10928_v62 = vmul.f32 %v4578_v22, %v13059_v55  ;;  %5116 = vmatpush.msrb.mxu2 %v6580_v50  ;;  %v6608_v55 = vld [vmem:[%s6771_s20 + $0xfe0] sm:$0xff] }
 0x6b9   : > { %v4506_v48 = vrot.slane %v4406_v43, 2  ;;  %v13062_v43 = vld [vmem:[#allocation115_spill] sm:$0xff]  ;;  %5238 = vmatpush.msrb.mxu3 %v6608_v55 }
 0x6ba   : > { %4780 = vmatmul.f32.gmra.mxu3 %v10928_v62  ;;  %v4628_v25 = vrot.slane %v10928_v62, 7  ;;  %v4678_v10 = vrot.slane %v10928_v62, 1 }
 0x6bb   : > { %v4547_v21 = vsel %vm1579_vm3, %v4505_v27, %v4506_v48  ;;  %4389 = vmatmul.f32.gmra.mxu2 %v10319_v58  ;;  %v4234_v27 = vadd.f32 %v10780_v41, %v10771_v61 }
 0x6bc   : > { %v4554_v15 = vadd.f32 %v4547_v21, %v10598_v24  ;;  %v10946_v22 = vsel %vm292_vm0, %v4627_v33, %v4628_v25  ;;  %v10952_v4 = vsel %vm343_vm1, %v12311_v31, %v4678_v10  ;;  %v10968_v21 = vpop.f32.mrf.mxu1 }
 0x6bd   : > { %13060 = vst [vmem:[#allocation82_spill] sm:$0xff] %v10946_v22  ;;  %4872 = vmatmul.f32.gmra.mxu0 %v10946_v22  ;;  %4978 = vmatmul.f32.vlgmr.msrb.gmra.mxu1 %v10952_v4 }
 0x6be   : > { %13061 = vst [vmem:[#allocation112_spill] sm:$0xff] %v10952_v4  ;;  %v4579_v58 = vmax.f32 %v4554_v15, 0.0  ;;  %v4342_v24 = vpop.f32.mrf.mxu2 }
 0x6bf   : > { %v4407_v20 = vadd.f32 %v4342_v24, %v4234_v27  ;;  %v4237_v24 = vadd.f32 %v10800_v13, %v10787_v34 }
 0x6c0   : > { %v10959_v33 = vmul.f32 %v4579_v58, %v13062_v43  ;;  %v13064_v43 = vld [vmem:[#allocation118_spill] sm:$0xff] }
 0x6c1   : > { %v4507_v38 = vrot.slane %v4407_v20, 2 }
 0x6c2   : > { %4783 = vmatmul.f32.gmra.mxu3 %v10959_v33  ;;  %v4629_v50 = vrot.slane %v10959_v33, 7  ;;  %v4679_v61 = vrot.slane %v10959_v33, 1 }
 0x6c3   : > { %v4546_v41 = vsel %vm1579_vm3, %v4506_v48, %v4507_v38  ;;  %4392 = vmatmul.f32.gmra.mxu2 %v10339_v26  ;;  %v10983_v26 = vpop.f32.mrf.mxu0 }
 0x6c4   : > { %v4555_v15 = vadd.f32 %v4546_v41, %v10611_v35  ;;  %v10973_v27 = vsel %vm292_vm0, %v4628_v25, %v4629_v50  ;;  %v10977_v58 = vsel %vm343_vm1, %v4678_v10, %v4679_v61  ;;  %v6607_v25 = vld [vmem:[%s6771_s20 + $0xfd8] sm:$0xff] }
 0x6c5   : > { %13063 = vst [vmem:[#allocation106_spill] sm:$0xff] %v10973_v27  ;;  %4875 = vmatmul.f32.gmra.mxu0 %v10973_v27  ;;  %4981 = vmatmul.f32.gmra.mxu1 %v10977_v58 }
 0x6c6   : > { %v4580_v48 = vmax.f32 %v4555_v15, 0.0  ;;  %v4345_v20 = vpop.f32.mrf.mxu2  ;;  %5239 = vmatpush.msrb.mxu3 %v6607_v25 }
 0x6c7   : > { %v4408_v35 = vadd.f32 %v4345_v20, %v4237_v24  ;;  %v4240_v20 = vadd.f32 %v10820_v7, %v10804_v9 }
 0x6c8   : > { %v10986_v55 = vmul.f32 %v4580_v48, %v13064_v43 }
 0x6c9   : > { %v4508_v41 = vrot.slane %v4408_v35, 2 }
 0x6ca   : > { %4786 = vmatmul.f32.gmra.mxu3 %v10986_v55  ;;  %v4630_v10 = vrot.slane %v10986_v55, 7  ;;  %v4680_v34 = vrot.slane %v10986_v55, 1 }
 0x6cb   : > { %v4545_v13 = vsel %vm1579_vm3, %v4507_v38, %v4508_v41  ;;  %4395 = vmatmul.f32.gmra.mxu2 %v10364_v39  ;;  %v11008_v38 = vpop.f32.mrf.mxu1  ;;  %v11010_v43 = vpop.f32.mrf.mxu0 }
 0x6cc   : > { %v4556_v15 = vadd.f32 %v4545_v13, %v10623_v57  ;;  %v10998_v24 = vsel %vm292_vm0, %v4629_v50, %v4630_v10  ;;  %v11002_v48 = vsel %vm343_vm1, %v4679_v61, %v4680_v34  ;;  %v13066_v50 = vld [vmem:[#allocation77_spill] sm:$0xff] }
 0x6cd   : > { %13065 = vst [vmem:[#allocation3_spill] sm:$0xff] %v10998_v24  ;;  %4878 = vmatmul.f32.gmra.mxu0 %v10998_v24  ;;  %4984 = vmatmul.f32.gmra.mxu1 %v11002_v48 }
 0x6ce   : > { %v4581_v39 = vmax.f32 %v4556_v15, 0.0  ;;  %v4348_v35 = vpop.f32.mrf.mxu2 }
 0x6cf   : > { %v4409_v57 = vadd.f32 %v4348_v35, %v4240_v20  ;;  %v4243_v35 = vadd.f32 %v10839_v18, %v10824_v11 }
 0x6d0   : > { %v11013_v25 = vmul.f32 %v4581_v39, %v13066_v50 }
 0x6d1   : > { %v4509_v13 = vrot.slane %v4409_v57, 2 }
 0x6d2   : > { %4789 = vmatmul.f32.gmra.mxu3 %v11013_v25  ;;  %v4631_v9 = vrot.slane %v11013_v25, 7  ;;  %v4681_v7 = vrot.slane %v11013_v25, 1 }
 0x6d3   : > { %v4544_v61 = vsel %vm1579_vm3, %v4508_v41, %v4509_v13  ;;  %4398 = vmatmul.f32.gmra.mxu2 %v10385_v16  ;;  %v11034_v50 = vpop.f32.mrf.mxu1 }
 0x6d4   : > { %v4557_v15 = vadd.f32 %v4544_v61, %v10632_v30  ;;  %v11024_v20 = vsel %vm292_vm0, %v4630_v10, %v4631_v9  ;;  %v11028_v39 = vsel %vm343_vm1, %v4680_v34, %v4681_v7  ;;  %v13068_v30 = vld [vmem:[#allocation96_spill] sm:$0xff]  ;;  %v11040_v34 = vpop.f32.mrf.mxu0 }
 0x6d5   : > { %13067 = vst [vmem:[#allocation37_spill] sm:$0xff] %v11024_v20  ;;  %4881 = vmatmul.f32.gmra.mxu0 %v11024_v20  ;;  %4987 = vmatmul.f32.gmra.mxu1 %v11028_v39  ;;  %v6606_v10 = vld [vmem:[%s6771_s20 + $0xfd0] sm:$0xff] }
 0x6d6   : > { %v4582_v41 = vmax.f32 %v4557_v15, 0.0  ;;  %v4351_v57 = vpop.f32.mrf.mxu2  ;;  %5240 = vmatpush.msrb.mxu3 %v6606_v10 }
 0x6d7   : > { %v4410_v16 = vadd.f32 %v4351_v57, %v4243_v35 }
 0x6d8   : > { %v11037_v61 = vmul.f32 %v4582_v41, %v13068_v30 }
 0x6d9   : > { %v4510_v31 = vrot.slane %v4410_v16, 2  ;;  %v4246_v16 = vadd.f32 %v10858_v45, %v10844_v40 }
 0x6da   : > { %4792 = vmatmul.f32.gmra.mxu3 %v11037_v61  ;;  %v4632_v11 = vrot.slane %v11037_v61, 7  ;;  %v4682_v18 = vrot.slane %v11037_v61, 1 }
 0x6db   : > { %v4543_v15 = vsel %vm1579_vm3, %v4509_v13, %v4510_v31  ;;  %5117 = vmatmul.f32.vlgmr.msrb.gmra.mxu2 %v10920_v63  ;;  %v11065_v59 = vpop.f32.mrf.mxu1 }
 0x6dc   : > { %v4558_v35 = vadd.f32 %v4543_v15, %v10644_v51  ;;  %v11051_v41 = vsel %vm292_vm0, %v4631_v9, %v4632_v11  ;;  %v11055_v57 = vsel %vm343_vm1, %v4681_v7, %v4682_v18  ;;  %v6605_v15 = vld [vmem:[%s6771_s20 + $0xfc8] sm:$0xff] }
 0x6dd   : > { %13069 = vst [vmem:[#allocation113_spill] sm:$0xff] %v11051_v41  ;;  %4884 = vmatmul.f32.gmra.mxu0 %v11051_v41  ;;  %4990 = vmatmul.f32.gmra.mxu1 %v11055_v57 }
 0x6de   : > { %v4583_v13 = vmax.f32 %v4558_v35, 0.0  ;;  %v4354_v30 = vpop.f32.mrf.mxu2  ;;  %5241 = vmatpush.msrb.mxu3 %v6605_v15  ;;  %v11073_v35 = vpop.f32.mrf.mxu0 }
 0x6df   : > { %v4411_v10 = vadd.f32 %v4354_v30, %v4246_v16  ;;  %v4249_v30 = vadd.f32 %v10880_v14, %v10865_v60 }
 0x6e0   : > { %v11062_v51 = vmul.f32 %v4583_v13, %v13070_v0 }
 0x6e1   : > { %v4511_v9 = vrot.slane %v4411_v10, 2 }
 0x6e2   : > { %4795 = vmatmul.f32.gmra.mxu3 %v11062_v51  ;;  %v4633_v7 = vrot.slane %v11062_v51, 7  ;;  %v4683_v40 = vrot.slane %v11062_v51, 1 }
 0x6e3   : > { %v4542_v45 = vsel %vm1579_vm3, %v4510_v31, %v4511_v9  ;;  %5120 = vmatmul.f32.gmra.mxu2 %v10946_v22  ;;  %v13072_v22 = vld [vmem:[#allocation121_spill] sm:$0xff]  ;;  %v11097_v14 = vpop.f32.mrf.mxu1 }
 0x6e4   : > { %v4559_v0 = vadd.f32 %v4542_v45, %v10655_v6  ;;  %v11078_v16 = vsel %vm292_vm0, %v4632_v11, %v4633_v7  ;;  %v11082_v13 = vsel %vm343_vm1, %v4682_v18, %v4683_v40 }
 0x6e5   : > { %13071 = vst [vmem:[#allocation72_spill] sm:$0xff] %v11078_v16  ;;  %4887 = vmatmul.f32.gmra.mxu0 %v11078_v16  ;;  %4993 = vmatmul.f32.gmra.mxu1 %v11082_v13 }
 0x6e6   : > { %v4584_v31 = vmax.f32 %v4559_v0, 0.0  ;;  %v4357_v10 = vpop.f32.mrf.mxu2 }
 0x6e7   : > { %v4412_v15 = vadd.f32 %v4357_v10, %v4249_v30 }
 0x6e8   : > { %v11089_v6 = vmul.f32 %v4584_v31, %v13072_v22  ;;  %v4252_v31 = vadd.f32 %v10899_v56, %v10883_v44 }
 0x6e9   : > { %v4512_v45 = vrot.slane %v4412_v15, 2 }
 0x6ea   : > { %13073 = vst [vmem:[#allocation63_spill] sm:$0xff] %v11089_v6  ;;  %4798 = vmatmul.f32.gmra.mxu3 %v11089_v6  ;;  %v4634_v11 = vrot.slane %v11089_v6, 7  ;;  %v4684_v18 = vrot.slane %v11089_v6, 1 }
 0x6eb   : > { %v4541_v60 = vsel %vm1579_vm3, %v4511_v9, %v4512_v45  ;;  %5123 = vmatmul.f32.gmra.mxu2 %v10973_v27  ;;  %v11112_v9 = vpop.f32.mrf.mxu0 }
 0x6ec   : > { %v4560_v0 = vadd.f32 %v4541_v60, %v10667_v49  ;;  %v11102_v22 = vsel %vm292_vm0, %v4633_v7, %v4634_v11  ;;  %v11106_v30 = vsel %vm343_vm1, %v4683_v40, %v4684_v18  ;;  %v13075_v60 = vld [vmem:[#allocation25_spill] sm:$0xff]  ;;  %v6604_v7 = vld [vmem:[%s6771_s20 + $0xfc0] sm:$0xff] }
 0x6ed   : > { %13074 = vst [vmem:[#allocation84_spill] sm:$0xff] %v11102_v22  ;;  %4890 = vmatmul.f32.gmra.mxu0 %v11102_v22  ;;  %4996 = vmatmul.f32.gmra.mxu1 %v11106_v30 }
 0x6ee   : > { %v4585_v10 = vmax.f32 %v4560_v0, 0.0  ;;  %v4360_v15 = vpop.f32.mrf.mxu2  ;;  %5242 = vmatpush.msrb.mxu3 %v6604_v7 }
 0x6ef   : > { %v4413_v49 = vadd.f32 %v4360_v15, %v4252_v31  ;;  %v4255_v15 = vadd.f32 %v10931_v53, %v10906_v5 }
 0x6f0   : > { %v11115_v27 = vmul.f32 %v4585_v10, %v13075_v60 }
 0x6f1   : > { %v4513_v6 = vrot.slane %v4413_v49, 2 }
 0x6f2   : > { %4801 = vmatmul.f32.gmra.mxu3 %v11115_v27  ;;  %v4635_v40 = vrot.slane %v11115_v27, 7  ;;  %v4685_v44 = vrot.slane %v11115_v27, 1 }
 0x6f3   : > { %v4540_v56 = vsel %vm1579_vm3, %v4512_v45, %v4513_v6  ;;  %5126 = vmatmul.f32.gmra.mxu2 %v10998_v24  ;;  %v11137_v45 = vpop.f32.mrf.mxu1  ;;  %v11139_v7 = vpop.f32.mrf.mxu0 }
 0x6f4   : > { %v4561_v0 = vadd.f32 %v4540_v56, %v10680_v28  ;;  %v11127_v31 = vsel %vm292_vm0, %v4634_v11, %v4635_v40  ;;  %v11131_v10 = vsel %vm343_vm1, %v4684_v18, %v4685_v44  ;;  %v13078_v11 = vld [vmem:[#allocation2_spill] sm:$0xff] }
 0x6f5   : > { %13076 = vst [vmem:[#allocation114_spill] sm:$0xff] %v11127_v31  ;;  %4893 = vmatmul.f32.gmra.mxu0 %v11127_v31  ;;  %4999 = vmatmul.f32.gmra.mxu1 %v11131_v10 }
 0x6f6   : > { %13077 = vst [vmem:[#allocation73_spill] sm:$0xff] %v11131_v10  ;;  %v4586_v49 = vmax.f32 %v4561_v0, 0.0  ;;  %v4363_v60 = vpop.f32.mrf.mxu2 }
 0x6f7   : > { %v4414_v28 = vadd.f32 %v4363_v60, %v4255_v15  ;;  %v4258_v60 = vadd.f32 %v10968_v21, %v10941_v3 }
 0x6f8   : > { %v11142_v56 = vmul.f32 %v4586_v49, %v13078_v11 }
 0x6f9   : > { %v4514_v24 = vrot.slane %v4414_v28, 2 }
 0x6fa   : > { %13079 = vst [vmem:[#allocation65_spill] sm:$0xff] %v11142_v56  ;;  %4804 = vmatmul.f32.gmra.mxu3 %v11142_v56  ;;  %v4636_v5 = vrot.slane %v11142_v56, 7  ;;  %v4686_v53 = vrot.slane %v11142_v56, 1 }
 0x6fb   : > { %v4539_v18 = vsel %vm1579_vm3, %v4513_v6, %v4514_v24  ;;  %5129 = vmatmul.f32.gmra.mxu2 %v11024_v20  ;;  %v11163_v20 = vpop.f32.mrf.mxu1 }
 0x6fc   : > { %v4562_v0 = vadd.f32 %v4539_v18, %v10687_v32  ;;  %v11153_v15 = vsel %vm292_vm0, %v4635_v40, %v4636_v5  ;;  %v11157_v49 = vsel %vm343_vm1, %v4685_v44, %v4686_v53  ;;  %v13082_v32 = vld [vmem:[#allocation124_spill] sm:$0xff]  ;;  %v6603_v40 = vld [vmem:[%s6771_s20 + $0xfb8] sm:$0xff]  ;;  %v11169_v44 = vpop.f32.mrf.mxu0 }
 0x6fd   : > { %13080 = vst [vmem:[#allocation99_spill] sm:$0xff] %v11153_v15  ;;  %4896 = vmatmul.f32.gmra.mxu0 %v11153_v15  ;;  %5002 = vmatmul.f32.gmra.mxu1 %v11157_v49 }
 0x6fe   : > { %13081 = vst [vmem:[#allocation86_spill] sm:$0xff] %v11157_v49  ;;  %v4587_v6 = vmax.f32 %v4562_v0, 0.0  ;;  %v4366_v28 = vpop.f32.mrf.mxu2  ;;  %5243 = vmatpush.msrb.mxu3 %v6603_v40 }
 0x6ff   : > { %v4415_v11 = vadd.f32 %v4366_v28, %v4258_v60 }
 0x700   : > { %v11166_v18 = vmul.f32 %v4587_v6, %v13082_v32 }
 0x701   : > { %v4515_v56 = vrot.slane %v4415_v11, 2  ;;  %v4261_v11 = vadd.f32 %v11008_v38, %v10983_v26 }
 0x702   : > { %13083 = vst [vmem:[#allocation74_spill] sm:$0xff] %v11166_v18  ;;  %4807 = vmatmul.f32.gmra.mxu3 %v11166_v18  ;;  %v4637_v3 = vrot.slane %v11166_v18, 7  ;;  %v4687_v21 = vrot.slane %v11166_v18, 1 }
 0x703   : > { %v4538_v0 = vsel %vm1579_vm3, %v4514_v24, %v4515_v56  ;;  %5132 = vmatmul.f32.gmra.mxu2 %v11051_v41  ;;  %v13086_v41 = vld [vmem:[#allocation93_spill] sm:$0xff]  ;;  %v11194_v18 = vpop.f32.mrf.mxu1 }
 0x704   : > { %v4563_v60 = vadd.f32 %v4538_v0, %v10697_v23  ;;  %v11180_v6 = vsel %vm292_vm0, %v4636_v5, %v4637_v3  ;;  %v11184_v28 = vsel %vm343_vm1, %v4686_v53, %v4687_v21  ;;  %v6602_v0 = vld [vmem:[%s6771_s20 + $0xfb0] sm:$0xff] }
 0x705   : > { %13084 = vst [vmem:[#allocation100_spill] sm:$0xff] %v11180_v6  ;;  %4899 = vmatmul.f32.gmra.mxu0 %v11180_v6  ;;  %5005 = vmatmul.f32.gmra.mxu1 %v11184_v28 }
 0x706   : > { %13085 = vst [vmem:[#allocation85_spill] sm:$0xff] %v11184_v28  ;;  %v4588_v24 = vmax.f32 %v4563_v60, 0.0  ;;  %v4369_v32 = vpop.f32.mrf.mxu2  ;;  %5244 = vmatpush.msrb.mxu3 %v6602_v0  ;;  %v11202_v60 = vpop.f32.mrf.mxu0 }
 0x707   : > { %v4416_v40 = vadd.f32 %v4369_v32, %v4261_v11  ;;  %v4264_v32 = vadd.f32 %v11034_v50, %v11010_v43 }
 0x708   : > { %v11191_v23 = vmul.f32 %v4588_v24, %v13086_v41 }
 0x709   : > { %v4516_v5 = vrot.slane %v4416_v40, 2 }
 0x70a   : > { %4810 = vmatmul.f32.gmra.mxu3 %v11191_v23  ;;  %v4638_v53 = vrot.slane %v11191_v23, 7  ;;  %v4688_v26 = vrot.slane %v11191_v23, 1 }
 0x70b   : > { %v4537_v38 = vsel %vm1579_vm3, %v4515_v56, %v4516_v5  ;;  %5135 = vmatmul.f32.gmra.mxu2 %v11078_v16  ;;  %v13089_v16 = vld [vmem:[#allocation35_spill] sm:$0xff]  ;;  %v11226_v50 = vpop.f32.mrf.mxu1 }
 0x70c   : > { %v4564_v41 = vadd.f32 %v4537_v38, %v10707_v17  ;;  %v11207_v11 = vsel %vm292_vm0, %v4637_v3, %v4638_v53  ;;  %v11211_v24 = vsel %vm343_vm1, %v4687_v21, %v4688_v26 }
 0x70d   : > { %13087 = vst [vmem:[#allocation116_spill] sm:$0xff] %v11207_v11  ;;  %4902 = vmatmul.f32.gmra.mxu0 %v11207_v11  ;;  %5008 = vmatmul.f32.gmra.mxu1 %v11211_v24 }
 0x70e   : > { %13088 = vst [vmem:[#allocation107_spill] sm:$0xff] %v11211_v24  ;;  %v4589_v56 = vmax.f32 %v4564_v41, 0.0  ;;  %v4372_v40 = vpop.f32.mrf.mxu2 }
 0x70f   : > { %v4417_v0 = vadd.f32 %v4372_v40, %v4264_v32 }
 0x710   : > { %v11218_v17 = vmul.f32 %v4589_v56, %v13089_v16  ;;  %v4267_v56 = vadd.f32 %v11065_v59, %v11040_v34 }
 0x711   : > { %v4517_v38 = vrot.slane %v4417_v0, 2 }
 0x712   : > { %13090 = vst [vmem:[#allocation101_spill] sm:$0xff] %v11218_v17  ;;  %4813 = vmatmul.f32.gmra.mxu3 %v11218_v17  ;;  %v4639_v3 = vrot.slane %v11218_v17, 7  ;;  %v4689_v21 = vrot.slane %v11218_v17, 1 }
 0x713   : > { %v4536_v43 = vsel %vm1579_vm3, %v4516_v5, %v4517_v38  ;;  %5138 = vmatmul.f32.gmra.mxu2 %v11102_v22  ;;  %v11241_v5 = vpop.f32.mrf.mxu0 }
 0x714   : > { %v4565_v41 = vadd.f32 %v4536_v43, %v10716_v47  ;;  %v11231_v16 = vsel %vm292_vm0, %v4638_v53, %v4639_v3  ;;  %v11235_v32 = vsel %vm343_vm1, %v4688_v26, %v4689_v21  ;;  %v13093_v43 = vld [vmem:[#allocation45_spill] sm:$0xff]  ;;  %v6601_v53 = vld [vmem:[%s6771_s20 + $0xfa8] sm:$0xff] }
 0x715   : > { %13091 = vst [vmem:[#allocation88_spill] sm:$0xff] %v11231_v16  ;;  %4905 = vmatmul.f32.gmra.mxu0 %v11231_v16  ;;  %5011 = vmatmul.f32.gmra.mxu1 %v11235_v32 }
 0x716   : > { %13092 = vst [vmem:[#allocation117_spill] sm:$0xff] %v11235_v32  ;;  %v4590_v40 = vmax.f32 %v4565_v41, 0.0  ;;  %v4375_v0 = vpop.f32.mrf.mxu2  ;;  %5245 = vmatpush.msrb.mxu3 %v6601_v53 }
 0x717   : > { %v4418_v47 = vadd.f32 %v4375_v0, %v4267_v56  ;;  %v4270_v0 = vadd.f32 %v11097_v14, %v11073_v35 }
 0x718   : > { %v11244_v22 = vmul.f32 %v4590_v40, %v13093_v43 }
 0x719   : > { %v4518_v17 = vrot.slane %v4418_v47, 2 }
 0x71a   : > { %13094 = vst [vmem:[#allocation5_spill] sm:$0xff] %v11244_v22  ;;  %4816 = vmatmul.f32.gmra.mxu3 %v11244_v22  ;;  %v4640_v26 = vrot.slane %v11244_v22, 7  ;;  %v4690_v59 = vrot.slane %v11244_v22, 1 }
 0x71b   : > { %v4535_v34 = vsel %vm1579_vm3, %v4517_v38, %v4518_v17  ;;  %5141 = vmatmul.f32.gmra.mxu2 %v11127_v31  ;;  %v11266_v38 = vpop.f32.mrf.mxu1  ;;  %v11268_v53 = vpop.f32.mrf.mxu0  ;;  %v6600_v31 = vld [vmem:[%s6771_s20 + $0xfa0] sm:$0xff] }
 0x71c   : > { %v4566_v41 = vadd.f32 %v4535_v34, %v10725_v8  ;;  %v11256_v56 = vsel %vm292_vm0, %v4639_v3, %v4640_v26  ;;  %v11260_v40 = vsel %vm343_vm1, %v4689_v21, %v4690_v59  ;;  %v13097_v3 = vld [vmem:[#allocation40_spill] sm:$0xff]  ;;  %5246 = vmatpush.msrb.mxu3 %v6600_v31 }
 0x71d   : > { %13095 = vst [vmem:[#allocation67_spill] sm:$0xff] %v11256_v56  ;;  %4908 = vmatmul.f32.gmra.mxu0 %v11256_v56  ;;  %5014 = vmatmul.f32.gmra.mxu1 %v11260_v40 }
 0x71e   : > { %13096 = vst [vmem:[#allocation102_spill] sm:$0xff] %v11260_v40  ;;  %v4591_v47 = vmax.f32 %v4566_v41, 0.0  ;;  %v4378_v43 = vpop.f32.mrf.mxu2 }
 0x71f   : > { %v4419_v8 = vadd.f32 %v4378_v43, %v4270_v0 }
 0x720   : > { %v11271_v34 = vmul.f32 %v4591_v47, %v13097_v3  ;;  %v4273_v47 = vadd.f32 %v11137_v45, %v11112_v9 }
 0x721   : > { %v4519_v21 = vrot.slane %v4419_v8, 2 }
 0x722   : > { %13098 = vst [vmem:[#allocation120_spill] sm:$0xff] %v11271_v34  ;;  %4819 = vmatmul.f32.gmra.mxu3 %v11271_v34  ;;  %v4641_v35 = vrot.slane %v11271_v34, 7  ;;  %v4691_v14 = vrot.slane %v11271_v34, 1 }
 0x723   : > { %v4534_v22 = vsel %vm1579_vm3, %v4518_v17, %v4519_v21  ;;  %5144 = vmatmul.f32.gmra.mxu2 %v11153_v15  ;;  %v11293_v3 = vpop.f32.mrf.mxu1  ;;  %v11298_v15 = vpop.f32.mrf.mxu0 }
 0x724   : > { %v4567_v41 = vadd.f32 %v4534_v22, %v10734_v19  ;;  %v11283_v0 = vsel %vm292_vm0, %v4640_v26, %v4641_v35  ;;  %v11287_v31 = vsel %vm343_vm1, %v4690_v59, %v4691_v14  ;;  %v13101_v19 = vld [vmem:[#allocation43_spill] sm:$0xff] }
 0x725   : > { %13099 = vst [vmem:[#allocation108_spill] sm:$0xff] %v11283_v0  ;;  %4911 = vmatmul.f32.gmra.mxu0 %v11283_v0  ;;  %5017 = vmatmul.f32.gmra.mxu1 %v11287_v31 }
 0x726   : > { %13100 = vst [vmem:[#allocation103_spill] sm:$0xff] %v11287_v31  ;;  %v4592_v17 = vmax.f32 %v4567_v41, 0.0  ;;  %v4381_v43 = vpop.f32.mrf.mxu2 }
 0x727   : > { %v4420_v8 = vadd.f32 %v4381_v43, %v4273_v47  ;;  %v4276_v43 = vadd.f32 %v11163_v20, %v11139_v7 }
 0x728   : > { %v11296_v22 = vmul.f32 %v4592_v17, %v13101_v19 }
 0x729   : > { %v4520_v26 = vrot.slane %v4420_v8, 2 }
 0x72a   : > { %13102 = vst [vmem:[#allocation119_spill] sm:$0xff] %v11296_v22  ;;  %4822 = vmatmul.f32.gmra.mxu3 %v11296_v22  ;;  %v4642_v9 = vrot.slane %v11296_v22, 7  ;;  %v4692_v45 = vrot.slane %v11296_v22, 1 }
 0x72b   : > { %v4533_v59 = vsel %vm1579_vm3, %v4519_v21, %v4520_v26  ;;  %5147 = vmatmul.f32.gmra.mxu2 %v11180_v6  ;;  %v13105_v6 = vld [vmem:[#allocation8_spill] sm:$0xff]  ;;  %v11323_v22 = vpop.f32.mrf.mxu1 }
 0x72c   : > { %v4568_v41 = vadd.f32 %v4533_v59, %v10742_v2  ;;  %v11309_v47 = vsel %vm292_vm0, %v4641_v35, %v4642_v9  ;;  %v11313_v17 = vsel %vm343_vm1, %v4691_v14, %v4692_v45  ;;  %v6599_v59 = vld [vmem:[%s6771_s20 + $0xf98] sm:$0xff] }
 0x72d   : > { %13103 = vst [vmem:[#allocation123_spill] sm:$0xff] %v11309_v47  ;;  %4914 = vmatmul.f32.gmra.mxu0 %v11309_v47  ;;  %5020 = vmatmul.f32.gmra.mxu1 %v11313_v17 }
 0x72e   : > { %13104 = vst [vmem:[#allocation76_spill] sm:$0xff] %v11313_v17  ;;  %v4593_v21 = vmax.f32 %v4568_v41, 0.0  ;;  %v4384_v8 = vpop.f32.mrf.mxu2  ;;  %5247 = vmatpush.msrb.mxu3 %v6599_v59 }
 0x72f   : > { %v4421_v19 = vadd.f32 %v4384_v8, %v4276_v43  ;;  %v4279_v8 = vadd.f32 %v11194_v18, %v11169_v44 }
 0x730   : > { %v11320_v2 = vmul.f32 %v4593_v21, %v13105_v6 }
 0x731   : > { %v4521_v35 = vrot.slane %v4421_v19, 2 }
 0x732   : > { %13106 = vst [vmem:[#allocation104_spill] sm:$0xff] %v11320_v2  ;;  %4825 = vmatmul.f32.gmra.mxu3 %v11320_v2  ;;  %v4870_v14 = vpop.f32.mrf.mxu0  ;;  %v4643_v20 = vrot.slane %v11320_v2, 7  ;;  %v4693_v7 = vrot.slane %v11320_v2, 1 }
 0x733   : > { %v4532_v41 = vsel %vm1579_vm3, %v4520_v26, %v4521_v35  ;;  %5150 = vmatmul.f32.gmra.mxu2 %v11207_v11 }
 0x734   : > { %v4569_v6 = vadd.f32 %v4532_v41, %v10753_v46  ;;  %v11334_v43 = vsel %vm292_vm0, %v4642_v9, %v4643_v20  ;;  %v11338_v21 = vsel %vm343_vm1, %v4692_v45, %v4693_v7  ;;  %v13109_v41 = vld [vmem:[#allocation10_spill] sm:$0xff]  ;;  %v6598_v9 = vld [vmem:[%s6771_s20 + $0xf90] sm:$0xff] }
 0x735   : > { %13107 = vst [vmem:[#allocation122_spill] sm:$0xff] %v11334_v43  ;;  %v4778_v19 = vpop.f32.mrf.mxu3  ;;  %4917 = vmatmul.f32.gmra.mxu0 %v11334_v43  ;;  %5023 = vmatmul.f32.gmra.mxu1 %v11338_v21 }
 0x736   : > { %13108 = vst [vmem:[#allocation12_spill] sm:$0xff] %v11338_v21  ;;  %v4594_v26 = vmax.f32 %v4569_v6, 0.0  ;;  %v4871_v59 = vadd.f32 %v4870_v14, %v4778_v19  ;;  %v4387_v11 = vpop.f32.mrf.mxu2  ;;  %5248 = vmatpush.msrb.mxu3 %v6598_v9  ;;  %v4282_v19 = vadd.f32 %v11226_v50, %v11202_v60 }
 0x737   : > { %v4422_v46 = vadd.f32 %v4387_v11, %v4279_v8 }
 0x738   : > { %v11345_v2 = vmul.f32 %v4594_v26, %v13109_v41 }
 0x739   : > { %v4522_v17 = vrot.slane %v4422_v46, 2 }
 0x73a   : > { %13110 = vst [vmem:[#allocation28_spill] sm:$0xff] %v11345_v2  ;;  %4828 = vmatmul.f32.gmra.mxu3 %v11345_v2  ;;  %v4873_v45 = vpop.f32.mrf.mxu0  ;;  %v4979_v18 = vpop.f32.mrf.mxu1  ;;  %v4644_v44 = vrot.slane %v11345_v2, 7  ;;  %v4694_v34 = vrot.slane %v11345_v2, 1 }
 0x73b   : > { %v4531_v14 = vsel %vm1579_vm3, %v4521_v35, %v4522_v17  ;;  %5153 = vmatmul.f32.gmra.mxu2 %v11231_v16  ;;  %v6597_v16 = vld [vmem:[%s6771_s20 + $0xf88] sm:$0xff]  ;;  %v11373_v2 = vadd.f32 %v4979_v18, %v4871_v59 }
 0x73c   : > { %v4570_v11 = vadd.f32 %v4531_v14, %v10764_v52  ;;  %v11357_v6 = vsel %vm292_vm0, %v4643_v20, %v4644_v44  ;;  %v11361_v8 = vsel %vm343_vm1, %v4693_v7, %v4694_v34  ;;  %v6627_v52 = vld [vmem:[%s6771_s20 + $0x1078] sm:$0xff]  ;;  %v13112_v20 = vld [vmem:[#allocation47_spill] sm:$0xff]  ;;  %v6626_v7 = vld [vmem:[%s6771_s20 + $0x1070] sm:$0xff]  ;;  %5249 = vmatpush.msrb.mxu3 %v6597_v16 }
 0x73d   : > { %13111 = vst [vmem:[#allocation80_spill] sm:$0xff] %v11361_v8  ;;  %v4781_v26 = vpop.f32.mrf.mxu3  ;;  %4920 = vmatmul.f32.gmra.mxu0 %v11357_v6  ;;  %5026 = vmatmul.f32.gmra.mxu1 %v11361_v8 }
 0x73e   : > { %v4595_v35 = vmax.f32 %v4570_v11, 0.0  ;;  %v4874_v46 = vadd.f32 %v4873_v45, %v4781_v26  ;;  %v4390_v41 = vpop.f32.mrf.mxu2  ;;  %5369 = vmatpush.msra.mxu0 %v6627_v52  ;;  %v6625_v26 = vld [vmem:[%s6771_s20 + $0x1068] sm:$0xff]  ;;  %v6624_v52 = vld [vmem:[%s6771_s20 + $0x1060] sm:$0xff] }
 0x73f   : > { %v4423_v9 = vadd.f32 %v4390_v41, %v4282_v19 }
 0x740   : > { %v11369_v14 = vmul.f32 %v4595_v35, %v13112_v20  ;;  %5370 = vmatpush.msra.mxu0 %v6626_v7 }
 0x741   : > { %v4523_v60 = vrot.slane %v4423_v9, 2 }
 0x742   : > { %4831 = vmatmul.f32.gmra.mxu3 %v11369_v14  ;;  %v4876_v50 = vpop.f32.mrf.mxu0  ;;  %v4982_v45 = vpop.f32.mrf.mxu1  ;;  %v4645_v11 = vrot.slane %v11369_v14, 7  ;;  %v4695_v19 = vrot.slane %v11369_v14, 1  ;;  %5371 = vmatpush.msra.mxu0 %v6625_v26 }
 0x743   : > { %v4530_v35 = vsel %vm1579_vm3, %v4522_v17, %v4523_v60  ;;  %v11381_v41 = vadd.f32 %v4982_v45, %v4874_v46  ;;  %5156 = vmatmul.f32.gmra.mxu2 %v11256_v56  ;;  %v4285_v17 = vadd.f32 %v11266_v38, %v11241_v5  ;;  %v12347_v46 = vrot.slane %v11373_v2, 6  ;;  %v6659_v45 = vld [vmem:[%s6771_s20 + $0x1178] sm:$0xff]  ;;  %v6622_v5 = vld [vmem:[%s6771_s20 + $0x1050] sm:$0xff] }
 0x744   : > { %v4571_v16 = vadd.f32 %v4530_v35, %v10774_v1  ;;  %v11387_v59 = vsel %vm292_vm0, %v4644_v44, %v4645_v11  ;;  %v11391_v18 = vsel %vm343_vm1, %v4694_v34, %v4695_v19  ;;  %5372 = vmatpush.msra.mxu0 %v6624_v52  ;;  %v6623_v34 = vld [vmem:[%s6771_s20 + $0x1058] sm:$0xff]  ;;  %5520 = vmatpush.msra.mxu1 %v6659_v45  ;;  %v6658_v38 = vld [vmem:[%s6771_s20 + $0x1170] sm:$0xff]  ;;  %v6657_v45 = vld [vmem:[%s6771_s20 + $0x1168] sm:$0xff] }
 0x745   : > { %13113 = vst [vmem:[#allocation69_spill] sm:$0xff] %v11387_v59  ;;  %v5839_v9 = vrot.slane %v11381_v41, 6  ;;  %v4784_v20 = vpop.f32.mrf.mxu3  ;;  %4923 = vmatmul.f32.gmra.mxu0 %v11387_v59  ;;  %5029 = vmatmul.f32.gmra.mxu1 %v11391_v18  ;;  %v13114_v41 = vld [vmem:[#allocation11_spill] sm:$0xff] }
 0x746   : > { %v4596_v1 = vmax.f32 %v4571_v16, 0.0  ;;  %v4877_v44 = vadd.f32 %v4876_v50, %v4784_v20  ;;  %v4393_v7 = vpop.f32.mrf.mxu2  ;;  %5373 = vmatpush.msra.mxu0 %v6623_v34  ;;  %5521 = vmatpush.msra.mxu1 %v6658_v38  ;;  %v4288_v38 = vadd.f32 %v11293_v3, %v11268_v53  ;;  %v13117_v3 = vld [vmem:[#allocation52_spill] sm:$0xff] }
 0x747   : > { %v4424_v26 = vadd.f32 %v4393_v7, %v4285_v17  ;;  %v11408_v35 = vsel %vm1503_vm2, %v12347_v46, %v5839_v9  ;;  %v6621_v7 = vld [vmem:[%s6771_s20 + $0x1048] sm:$0xff] }
 0x748   : > { %v11411_v56 = vmul.f32 %v4596_v1, %v13114_v41  ;;  %5374 = vmatpush.msra.mxu0 %v6622_v5  ;;  %5522 = vmatpush.msra.mxu1 %v6657_v45 }
 0x749   : > { %v4524_v50 = vrot.slane %v4424_v26, 2 }
 0x74a   : > { %13115 = vst [vmem:[#allocation21_spill] sm:$0xff] %v11411_v56  ;;  %4834 = vmatmul.f32.gmra.mxu3 %v11411_v56  ;;  %v4879_v16 = vpop.f32.mrf.mxu0  ;;  %v4985_v52 = vpop.f32.mrf.mxu1  ;;  %v4646_v17 = vrot.slane %v11411_v56, 7  ;;  %v4696_v20 = vrot.slane %v11411_v56, 1  ;;  %5375 = vmatpush.msra.mxu0 %v6621_v7  ;;  %v6619_v7 = vld [vmem:[%s6771_s20 + $0x1038] sm:$0xff]  ;;  %v6618_v56 = vld [vmem:[%s6771_s20 + $0x1030] sm:$0xff] }
 0x74b   : > { %v4529_v1 = vsel %vm1579_vm3, %v4523_v60, %v4524_v50  ;;  %v11420_v41 = vadd.f32 %v4985_v52, %v4877_v44  ;;  %5159 = vmatmul.f32.gmra.mxu2 %v11283_v0  ;;  %v6620_v60 = vld [vmem:[%s6771_s20 + $0x1040] sm:$0xff] }
 0x74c   : > { %v4572_v34 = vadd.f32 %v4529_v1, %v10783_v54  ;;  %v11426_v26 = vsel %vm292_vm0, %v4645_v11, %v4646_v17  ;;  %v11430_v5 = vsel %vm343_vm1, %v4695_v19, %v4696_v20  ;;  %v6656_v44 = vld [vmem:[%s6771_s20 + $0x1160] sm:$0xff]  ;;  %5376 = vmatpush.msra.mxu0 %v6620_v60  ;;  %v6655_v1 = vld [vmem:[%s6771_s20 + $0x1158] sm:$0xff] }
 0x74d   : > { %13116 = vst [vmem:[#allocation26_spill] sm:$0xff] %v11426_v26  ;;  %v5840_v54 = vrot.slane %v11420_v41, 6  ;;  %v4787_v52 = vpop.f32.mrf.mxu3  ;;  %4926 = vmatmul.f32.gmra.mxu0 %v11426_v26  ;;  %5032 = vmatmul.f32.gmra.mxu1 %v11430_v5  ;;  %v6596_v0 = vld [vmem:[%s6771_s20 + $0xf80] sm:$0xff] }
 0x74e   : > { %v4597_v11 = vmax.f32 %v4572_v34, 0.0  ;;  %v4880_v45 = vadd.f32 %v4879_v16, %v4787_v52  ;;  %v4396_v19 = vpop.f32.mrf.mxu2  ;;  %5523 = vmatpush.msra.mxu1 %v6656_v44  ;;  %5250 = vmatpush.msrb.mxu3 %v6596_v0  ;;  %v6654_v16 = vld [vmem:[%s6771_s20 + $0x1150] sm:$0xff] }
 0x74f   : > { %v4425_v46 = vadd.f32 %v4396_v19, %v4288_v38  ;;  %v11445_v53 = vsel %vm1503_vm2, %v5839_v9, %v5840_v54  ;;  %5377 = vmatpush.msra.mxu0 %v6619_v7  ;;  %v6617_v9 = vld [vmem:[%s6771_s20 + $0x1028] sm:$0xff] }
 0x750   : > { %v11448_v41 = vmul.f32 %v4597_v11, %v13117_v3  ;;  %5524 = vmatpush.msra.mxu1 %v6655_v1 }
 0x751   : > { %v4525_v34 = vrot.slane %v4425_v46, 2  ;;  %5378 = vmatpush.msra.mxu0 %v6618_v56  ;;  %v6653_v46 = vld [vmem:[%s6771_s20 + $0x1148] sm:$0xff] }
 0x752   : > { %13118 = vst [vmem:[#allocation30_spill] sm:$0xff] %v11448_v41  ;;  %4837 = vmatmul.f32.gmra.mxu3 %v11448_v41  ;;  %v4882_v60 = vpop.f32.mrf.mxu0  ;;  %v4988_v44 = vpop.f32.mrf.mxu1  ;;  %v4647_v38 = vrot.slane %v11448_v41, 7  ;;  %v4697_v52 = vrot.slane %v11448_v41, 1  ;;  %5525 = vmatpush.msra.mxu1 %v6654_v16  ;;  %v6614_v41 = vld [vmem:[%s6771_s20 + $0x1010] sm:$0xff] }
 0x753   : > { %v4528_v0 = vsel %vm1579_vm3, %v4524_v50, %v4525_v34  ;;  %v11457_v11 = vadd.f32 %v4988_v44, %v4880_v45  ;;  %5162 = vmatmul.f32.gmra.mxu2 %v11309_v47  ;;  %5379 = vmatpush.msra.mxu0 %v6617_v9  ;;  %v6616_v50 = vld [vmem:[%s6771_s20 + $0x1020] sm:$0xff]  ;;  %v4291_v45 = vadd.f32 %v11323_v22, %v11298_v15  ;;  %v6615_v44 = vld [vmem:[%s6771_s20 + $0x1018] sm:$0xff] }
 0x754   : > { %v4573_v19 = vadd.f32 %v4528_v0, %v10796_v36  ;;  %v11464_v7 = vsel %vm292_vm0, %v4646_v17, %v4647_v38  ;;  %v11468_v56 = vsel %vm343_vm1, %v4696_v20, %v4697_v52  ;;  %v6652_v36 = vld [vmem:[%s6771_s20 + $0x1140] sm:$0xff]  ;;  %5526 = vmatpush.msra.mxu1 %v6653_v46  ;;  %v6651_v0 = vld [vmem:[%s6771_s20 + $0x1138] sm:$0xff] }
 0x755   : > { %13119 = vst [vmem:[#allocation94_spill] sm:$0xff] %v11464_v7  ;;  %v5841_v1 = vrot.slane %v11457_v11, 6  ;;  %v4790_v3 = vpop.f32.mrf.mxu3  ;;  %4929 = vmatmul.f32.gmra.mxu0 %v11464_v7  ;;  %5035 = vmatmul.f32.gmra.mxu1 %v11468_v56  ;;  %v6643_v47 = vld [vmem:[%s6771_s20 + $0x10f8] sm:$0xff]  ;;  %v13120_v22 = vld [vmem:[#allocation14_spill] sm:$0xff] }
 0x756   : > { %v4598_v17 = vmax.f32 %v4573_v19, 0.0  ;;  %v4883_v20 = vadd.f32 %v4882_v60, %v4790_v3  ;;  %v4399_v16 = vpop.f32.mrf.mxu2  ;;  %5380 = vmatpush.msra.mxu0 %v6616_v50  ;;  %5527 = vmatpush.msra.mxu1 %v6652_v36  ;;  %v6650_v19 = vld [vmem:[%s6771_s20 + $0x1130] sm:$0xff]  ;;  %v13122_v36 = vrot.slane %v10863_v29, 2 }
 0x757   : > { %v4426_v9 = vadd.f32 %v4399_v16, %v4291_v45  ;;  %v11482_v15 = vsel %vm1503_vm2, %v5840_v54, %v5841_v1  ;;  %5612 = vmatpush.msra.mxu2 %v6643_v47  ;;  %v6613_v16 = vld [vmem:[%s6771_s20 + $0x1008] sm:$0xff] }
 0x758   : > { %v11485_v11 = vmul.f32 %v4598_v17, %v13120_v22  ;;  %5381 = vmatpush.msra.mxu0 %v6615_v44  ;;  %5528 = vmatpush.msra.mxu1 %v6651_v0  ;;  %v6649_v44 = vld [vmem:[%s6771_s20 + $0x1128] sm:$0xff]  ;;  %v13124_v0 = vld [vmem:[#allocation105_spill] sm:$0xff] }
 0x759   : > { %v4526_v60 = vrot.slane %v4426_v9, 2  ;;  %v13123_v9 = vld [vmem:[#allocation83_spill] sm:$0xff] }
 0x75a   : > { %13121 = vst [vmem:[#allocation71_spill] sm:$0xff] %v11485_v11  ;;  %4840 = vmatmul.f32.gmra.mxu3 %v11485_v11  ;;  %v4885_v46 = vpop.f32.mrf.mxu0  ;;  %v4991_v50 = vpop.f32.mrf.mxu1  ;;  %v4648_v45 = vrot.slane %v11485_v11, 7  ;;  %v4698_v54 = vrot.slane %v11485_v11, 1  ;;  %5382 = vmatpush.msra.mxu0 %v6614_v41  ;;  %v6675_v41 = vld [vmem:[%s6771_s20 + $0x11f8] sm:$0xff] }
 0x75b   : > { %v4527_v3 = vsel %vm1579_vm3, %v4525_v34, %v4526_v60  ;;  %v4551_v17 = vsel %vm1579_vm3, %v4526_v60, %v13122_v36  ;;  %v5058_v47 = vadd.f32 %v4991_v50, %v4883_v20  ;;  %5165 = vmatmul.f32.gmra.mxu2 %v11334_v43  ;;  %5529 = vmatpush.msra.mxu1 %v6650_v19  ;;  %v6612_v50 = vld [vmem:[%s6771_s20 + $0x1000] sm:$0xff]  ;;  %v6646_v43 = vld [vmem:[%s6771_s20 + $0x1110] sm:$0xff] }
 0x75c   : > { %v4574_v22 = vadd.f32 %v4527_v3, %v13123_v9  ;;  %v4575_v11 = vadd.f32 %v4551_v17, %v13124_v0  ;;  %v11505_v34 = vsel %vm292_vm0, %v4647_v38, %v4648_v45  ;;  %v11509_v29 = vsel %vm343_vm1, %v4697_v52, %v4698_v54  ;;  %v6648_v3 = vld [vmem:[%s6771_s20 + $0x1120] sm:$0xff]  ;;  %5383 = vmatpush.msra.mxu0 %v6613_v16  ;;  %v6647_v52 = vld [vmem:[%s6771_s20 + $0x1118] sm:$0xff]  ;;  %v13125_v9 = vld [vmem:[#allocation55_spill] sm:$0xff] }
 0x75d   : > { %v5842_v20 = vrot.slane %v5058_v47, 6  ;;  %v4793_v60 = vpop.f32.mrf.mxu3  ;;  %4932 = vmatmul.f32.gmra.mxu0 %v11505_v34  ;;  %5038 = vmatmul.f32.gmra.mxu1 %v11509_v29 }
 0x75e   : > { %v4599_v36 = vmax.f32 %v4574_v22, 0.0  ;;  %v4886_v17 = vadd.f32 %v4885_v46, %v4793_v60  ;;  %v11516_v38 = vpop.f32.mrf.mxu2  ;;  %5530 = vmatpush.msra.mxu1 %v6649_v44  ;;  %5721 = vmatpush.msra.mxu3 %v6675_v41  ;;  %v4600_v47 = vmax.f32 %v4575_v11, 0.0  ;;  %v6645_v11 = vld [vmem:[%s6771_s20 + $0x1108] sm:$0xff]  ;;  %v13126_v60 = vld [vmem:[#allocation56_spill] sm:$0xff] }
 0x75f   : > { %v11521_v19 = vsel %vm1503_vm2, %v5841_v1, %v5842_v20  ;;  %5384 = vmatpush.msra.mxu0 %v6612_v50 }
 0x760   : > { %v11524_v0 = vmul.f32 %v4599_v36, %v13125_v9  ;;  %5531 = vmatpush.msra.mxu1 %v6648_v3  ;;  %v11533_v41 = vmul.f32 %v4600_v47, %v13126_v60  ;;  %v6641_v60 = vld [vmem:[%s6771_s20 + $0x10e8] sm:$0xff] }
 0x762   : > { %4843 = vmatmul.f32.gmra.mxu3 %v11524_v0  ;;  %v4888_v46 = vpop.f32.mrf.mxu0  ;;  %v4994_v16 = vpop.f32.mrf.mxu1  ;;  %v4649_v44 = vrot.slane %v11524_v0, 7  ;;  %v4699_v22 = vrot.slane %v11524_v0, 1  ;;  %5532 = vmatpush.msra.mxu1 %v6647_v52  ;;  %13127 = vst [vmem:[#allocation27_spill] sm:$0xff] %v11533_v41 }
 0x763   : > { %v5059_v1 = vadd.f32 %v4994_v16, %v4886_v17  ;;  %5168 = vmatmul.f32.gmra.mxu2 %v11357_v6  ;;  %v6644_v17 = vld [vmem:[%s6771_s20 + $0x1100] sm:$0xff]  ;;  %v6642_v16 = vld [vmem:[%s6771_s20 + $0x10f0] sm:$0xff] }
 0x764   : > { %v11537_v50 = vsel %vm292_vm0, %v4648_v45, %v4649_v44  ;;  %v11541_v3 = vsel %vm343_vm1, %v4698_v54, %v4699_v22  ;;  %5533 = vmatpush.msra.mxu1 %v6646_v43  ;;  %5613 = vmatpush.msra.mxu2 %v6642_v16  ;;  %v6674_v45 = vld [vmem:[%s6771_s20 + $0x11f0] sm:$0xff]  ;;  %v4650_v54 = vrot.slane %v11533_v41, 7 }
 0x765   : > { %13128 = vst [vmem:[#allocation31_spill] sm:$0xff] %v11537_v50  ;;  %v5843_v36 = vrot.slane %v5059_v1, 6  ;;  %v4796_v52 = vpop.f32.mrf.mxu3  ;;  %4935 = vmatmul.f32.gmra.mxu0 %v11537_v50  ;;  %5041 = vmatmul.f32.gmra.mxu1 %v11541_v3  ;;  %v4700_v1 = vrot.slane %v11533_v41, 1 }
 0x766   : > { %v4889_v9 = vadd.f32 %v4888_v46, %v4796_v52  ;;  %v11546_v47 = vpop.f32.mrf.mxu2  ;;  %5534 = vmatpush.msra.mxu1 %v6645_v11  ;;  %5722 = vmatpush.msra.mxu3 %v6674_v45  ;;  %v6640_v52 = vld [vmem:[%s6771_s20 + $0x10e0] sm:$0xff] }
 0x767   : > { %v11553_v43 = vsel %vm1503_vm2, %v5842_v20, %v5843_v36  ;;  %5614 = vmatpush.msra.mxu2 %v6641_v60  ;;  %v11562_v20 = vsel %vm292_vm0, %v4649_v44, %v4650_v54  ;;  %v6638_v44 = vld [vmem:[%s6771_s20 + $0x10d0] sm:$0xff] }
 0x768   : > { %13129 = vst [vmem:[#allocation7_spill] sm:$0xff] %v11553_v43  ;;  %5535 = vmatpush.msra.mxu1 %v6644_v17  ;;  %v11566_v43 = vsel %vm343_vm1, %v4699_v22, %v4700_v1  ;;  %v6639_v17 = vld [vmem:[%s6771_s20 + $0x10d8] sm:$0xff] }
 0x769   : > { %13130 = vst [vmem:[#allocation87_spill] sm:$0xff] %v11566_v43  ;;  %5615 = vmatpush.msra.mxu2 %v6640_v52 }
 0x76a   : > { %4846 = vmatmul.f32.gmra.mxu3 %v11533_v41  ;;  %v4891_v46 = vpop.f32.mrf.mxu0  ;;  %v4997_v11 = vpop.f32.mrf.mxu1  ;;  %v4701_v41 = vrot.slane %v10896_v37, 1 }
 0x76b   : > { %v5060_v16 = vadd.f32 %v4997_v11, %v4889_v9  ;;  %5171 = vmatmul.f32.gmra.mxu2 %v11387_v59  ;;  %v6637_v59 = vld [vmem:[%s6771_s20 + $0x10c8] sm:$0xff] }
 0x76c   : > { %5616 = vmatpush.msra.mxu2 %v6639_v17  ;;  %v13132_v17 = vrot.slane %v10896_v37, 7 }
 0x76d   : > { %v5844_v45 = vrot.slane %v5060_v16, 6  ;;  %v4799_v60 = vpop.f32.mrf.mxu3  ;;  %4938 = vmatmul.f32.gmra.mxu0 %v11562_v20  ;;  %5044 = vmatmul.f32.gmra.mxu1 %v11566_v43 }
 0x76e   : > { %v4892_v9 = vadd.f32 %v4891_v46, %v4799_v60  ;;  %v11571_v11 = vpop.f32.mrf.mxu2  ;;  %5617 = vmatpush.msra.mxu2 %v6638_v44  ;;  %v6636_v46 = vld [vmem:[%s6771_s20 + $0x10c0] sm:$0xff]  ;;  %v11591_v44 = vsel %vm343_vm1, %v4700_v1, %v4701_v41 }
 0x76f   : > { %v11577_v22 = vsel %vm1503_vm2, %v5843_v36, %v5844_v45  ;;  %v11587_v36 = vsel %vm292_vm0, %v4650_v54, %v13132_v17  ;;  %v6634_v54 = vld [vmem:[%s6771_s20 + $0x10b0] sm:$0xff]  ;;  %v6633_v17 = vld [vmem:[%s6771_s20 + $0x10a8] sm:$0xff] }
 0x770   : > { %13131 = vst [vmem:[#allocation46_spill] sm:$0xff] %v11577_v22  ;;  %5618 = vmatpush.msra.mxu2 %v6637_v59  ;;  %v6635_v22 = vld [vmem:[%s6771_s20 + $0x10b8] sm:$0xff] }
 0x771   : > { %13133 = vst [vmem:[#allocation9_spill] sm:$0xff] %v11587_v36 }
 0x772   : > { %4849 = vmatmul.f32.gmra.mxu3 %v10896_v37  ;;  %v4894_v52 = vpop.f32.mrf.mxu0  ;;  %v5000_v16 = vpop.f32.mrf.mxu1  ;;  %5619 = vmatpush.msra.mxu2 %v6636_v46 }
 0x773   : > { %v5061_v60 = vadd.f32 %v5000_v16, %v4892_v9  ;;  %5174 = vmatmul.f32.gmra.mxu2 %v11426_v26  ;;  %v6673_v9 = vld [vmem:[%s6771_s20 + $0x11e8] sm:$0xff] }
 0x774   : > { %5723 = vmatpush.msra.mxu3 %v6673_v9  ;;  %5620 = vmatpush.msra.mxu2 %v6635_v22  ;;  %v13135_v22 = vrot.slane %v10902_v12, 1 }
 0x775   : > { %v5845_v43 = vrot.slane %v5061_v60, 6  ;;  %v4802_v59 = vpop.f32.mrf.mxu3  ;;  %4941 = vmatmul.f32.gmra.mxu0 %v11587_v36  ;;  %5047 = vmatmul.f32.gmra.mxu1 %v11591_v44 }
 0x776   : > { %v4895_v16 = vadd.f32 %v4894_v52, %v4802_v59  ;;  %v11597_v26 = vpop.f32.mrf.mxu2  ;;  %5621 = vmatpush.msra.mxu2 %v6634_v54  ;;  %v6632_v52 = vld [vmem:[%s6771_s20 + $0x10a0] sm:$0xff]  ;;  %v11612_v9 = vsel %vm343_vm1, %v4701_v41, %v13135_v22 }
 0x777   : > { %v11603_v1 = vsel %vm1503_vm2, %v5844_v45, %v5845_v43  ;;  %v6631_v45 = vld [vmem:[%s6771_s20 + $0x1098] sm:$0xff]  ;;  %v6628_v22 = vld [vmem:[%s6771_s20 + $0x1080] sm:$0xff] }
 0x778   : > { %13134 = vst [vmem:[#allocation44_spill] sm:$0xff] %v11603_v1  ;;  %5622 = vmatpush.msra.mxu2 %v6633_v17 }
 0x77a   : > { %v4897_v46 = vpop.f32.mrf.mxu0  ;;  %v5003_v60 = vpop.f32.mrf.mxu1  ;;  %5251 = vmatmul.f32.vlgmr.msrb.gmra.mxu3 %v10902_v12  ;;  %5623 = vmatpush.msra.mxu2 %v6632_v52 }
 0x77b   : > { %v5062_v59 = vadd.f32 %v5003_v60, %v4895_v16  ;;  %5177 = vmatmul.f32.gmra.mxu2 %v11464_v7  ;;  %v6630_v16 = vld [vmem:[%s6771_s20 + $0x1090] sm:$0xff]  ;;  %v6629_v60 = vld [vmem:[%s6771_s20 + $0x1088] sm:$0xff]  ;;  %v6672_v7 = vld [vmem:[%s6771_s20 + $0x11e0] sm:$0xff] }
 0x77c   : > { %5624 = vmatpush.msra.mxu2 %v6631_v45  ;;  %5724 = vmatpush.msra.mxu3 %v6672_v7 }
 0x77d   : > { %v5846_v54 = vrot.slane %v5062_v59, 6  ;;  %v4805_v1 = vpop.f32.mrf.mxu3  ;;  %5050 = vmatmul.f32.gmra.mxu1 %v11612_v9  ;;  %5385 = vmatmul.f32.vlgmr.msra.gmra.mxu0 %v10952_v4 }
 0x77e   : > { %v4898_v17 = vadd.f32 %v4897_v46, %v4805_v1  ;;  %v11617_v37 = vpop.f32.mrf.mxu2  ;;  %5625 = vmatpush.msra.mxu2 %v6630_v16 }
 0x77f   : > { %v11624_v41 = vsel %vm1503_vm2, %v5845_v43, %v5846_v54 }
 0x780   : > { %5626 = vmatpush.msra.mxu2 %v6629_v60 }
 0x782   : > { %v4900_v52 = vpop.f32.mrf.mxu0  ;;  %v5006_v59 = vpop.f32.mrf.mxu1  ;;  %5254 = vmatmul.f32.gmra.mxu3 %v10928_v62  ;;  %5627 = vmatpush.msra.mxu2 %v6628_v22 }
 0x783   : > { %v5063_v4 = vadd.f32 %v5006_v59, %v4898_v17  ;;  %5180 = vmatmul.f32.gmra.mxu2 %v11505_v34 }
 0x785   : > { %v5847_v1 = vrot.slane %v5063_v4, 6  ;;  %v4808_v46 = vpop.f32.mrf.mxu3  ;;  %5388 = vmatmul.f32.gmra.mxu0 %v10977_v58  ;;  %5536 = vmatmul.f32.vlgmr.msra.gmra.mxu1 %v10902_v12  ;;  %v6671_v12 = vld [vmem:[%s6771_s20 + $0x11d8] sm:$0xff] }
 0x786   : > { %v4901_v43 = vadd.f32 %v4900_v52, %v4808_v46  ;;  %v11631_v45 = vpop.f32.mrf.mxu2  ;;  %5725 = vmatpush.msra.mxu3 %v6671_v12 }
 0x787   : > { %v11635_v7 = vsel %vm1503_vm2, %v5846_v54, %v5847_v1 }
 0x78a   : > { %v4903_v16 = vpop.f32.mrf.mxu0  ;;  %v5009_v60 = vpop.f32.mrf.mxu1  ;;  %5257 = vmatmul.f32.gmra.mxu3 %v10959_v33 }
 0x78b   : > { %v5064_v17 = vadd.f32 %v5009_v60, %v4901_v43  ;;  %5183 = vmatmul.f32.gmra.mxu2 %v11537_v50 }
 0x78d   : > { %v5848_v4 = vrot.slane %v5064_v17, 6  ;;  %v4811_v59 = vpop.f32.mrf.mxu3  ;;  %5391 = vmatmul.f32.gmra.mxu0 %v11002_v48  ;;  %5539 = vmatmul.f32.gmra.mxu1 %v10928_v62 }
 0x78e   : > { %v4904_v52 = vadd.f32 %v4903_v16, %v4811_v59  ;;  %v11642_v22 = vpop.f32.mrf.mxu2  ;;  %v6670_v59 = vld [vmem:[%s6771_s20 + $0x11d0] sm:$0xff] }
 0x78f   : > { %v11646_v54 = vsel %vm1503_vm2, %v5847_v1, %v5848_v4  ;;  %5726 = vmatpush.msra.mxu3 %v6670_v59 }
 0x790   : > { %13136 = vst [vmem:[#allocation17_spill] sm:$0xff] %v11646_v54 }
 0x792   : > { %v4906_v46 = vpop.f32.mrf.mxu0  ;;  %v5012_v43 = vpop.f32.mrf.mxu1  ;;  %5260 = vmatmul.f32.gmra.mxu3 %v10986_v55 }
 0x793   : > { %v5065_v60 = vadd.f32 %v5012_v43, %v4904_v52  ;;  %5186 = vmatmul.f32.gmra.mxu2 %v11562_v20 }
 0x795   : > { %v5849_v17 = vrot.slane %v5065_v60, 6  ;;  %v4814_v50 = vpop.f32.mrf.mxu3  ;;  %5394 = vmatmul.f32.gmra.mxu0 %v11028_v39  ;;  %5542 = vmatmul.f32.gmra.mxu1 %v10959_v33 }
 0x796   : > { %v4907_v62 = vadd.f32 %v4906_v46, %v4814_v50  ;;  %v11652_v16 = vpop.f32.mrf.mxu2 }
 0x797   : > { %v11657_v1 = vsel %vm1503_vm2, %v5848_v4, %v5849_v17 }
 0x79a   : > { %v4909_v12 = vpop.f32.mrf.mxu0  ;;  %v5015_v54 = vpop.f32.mrf.mxu1  ;;  %5263 = vmatmul.f32.gmra.mxu3 %v11013_v25 }
 0x79b   : > { %v5066_v52 = vadd.f32 %v5015_v54, %v4907_v62  ;;  %5189 = vmatmul.f32.gmra.mxu2 %v11587_v36 }
 0x79d   : > { %v5850_v43 = vrot.slane %v5066_v52, 6  ;;  %v4817_v60 = vpop.f32.mrf.mxu3  ;;  %5397 = vmatmul.f32.gmra.mxu0 %v11055_v57  ;;  %5545 = vmatmul.f32.gmra.mxu1 %v10986_v55 }
 0x79e   : > { %v4910_v33 = vadd.f32 %v4909_v12, %v4817_v60  ;;  %v11663_v50 = vpop.f32.mrf.mxu2  ;;  %v6669_v60 = vld [vmem:[%s6771_s20 + $0x11c8] sm:$0xff] }
 0x79f   : > { %v11667_v4 = vsel %vm1503_vm2, %v5849_v17, %v5850_v43  ;;  %5727 = vmatpush.msra.mxu3 %v6669_v60 }
 0x7a0   : > { %13137 = vst [vmem:[#allocation22_spill] sm:$0xff] %v11667_v4 }
 0x7a2   : > { %v4912_v46 = vpop.f32.mrf.mxu0  ;;  %v5018_v59 = vpop.f32.mrf.mxu1  ;;  %5266 = vmatmul.f32.gmra.mxu3 %v11037_v61 }
 0x7a3   : > { %v5067_v54 = vadd.f32 %v5018_v59, %v4910_v33  ;;  %5628 = vmatmul.f32.vlgmr.msra.gmra.mxu2 %v10920_v63  ;;  %v13139_v33 = vld [vmem:[#allocation82_spill] sm:$0xff] }
 0x7a5   : > { %v5851_v62 = vrot.slane %v5067_v54, 6  ;;  %v4820_v52 = vpop.f32.mrf.mxu3  ;;  %5400 = vmatmul.f32.gmra.mxu0 %v11082_v13  ;;  %5548 = vmatmul.f32.gmra.mxu1 %v11013_v25 }
 0x7a6   : > { %v4913_v55 = vadd.f32 %v4912_v46, %v4820_v52  ;;  %v11673_v12 = vpop.f32.mrf.mxu2 }
 0x7a7   : > { %v11678_v17 = vsel %vm1503_vm2, %v5850_v43, %v5851_v62 }
 0x7a8   : > { %13138 = vst [vmem:[#allocation24_spill] sm:$0xff] %v11678_v17  ;;  %v13141_v17 = vld [vmem:[#allocation63_spill] sm:$0xff] }
 0x7aa   : > { %v4915_v4 = vpop.f32.mrf.mxu0  ;;  %v5021_v36 = vpop.f32.mrf.mxu1  ;;  %5269 = vmatmul.f32.gmra.mxu3 %v11062_v51 }
 0x7ab   : > { %v5068_v63 = vadd.f32 %v5021_v36, %v4913_v55  ;;  %5631 = vmatmul.f32.gmra.mxu2 %v13139_v33  ;;  %v13142_v55 = vld [vmem:[#allocation106_spill] sm:$0xff] }
 0x7ad   : > { %v5852_v59 = vrot.slane %v5068_v63, 6  ;;  %v4823_v54 = vpop.f32.mrf.mxu3  ;;  %5403 = vmatmul.f32.gmra.mxu0 %v11106_v30  ;;  %5551 = vmatmul.f32.gmra.mxu1 %v11037_v61  ;;  %v6668_v61 = vld [vmem:[%s6771_s20 + $0x11c0] sm:$0xff] }
 0x7ae   : > { %v4916_v25 = vadd.f32 %v4915_v4, %v4823_v54  ;;  %v11684_v46 = vpop.f32.mrf.mxu2  ;;  %5728 = vmatpush.msra.mxu3 %v6668_v61 }
 0x7af   : > { %v11688_v43 = vsel %vm1503_vm2, %v5851_v62, %v5852_v59 }
 0x7b0   : > { %13140 = vst [vmem:[#allocation50_spill] sm:$0xff] %v11688_v43 }
 0x7b2   : > { %v4918_v52 = vpop.f32.mrf.mxu0  ;;  %v5024_v60 = vpop.f32.mrf.mxu1  ;;  %5272 = vmatmul.f32.gmra.mxu3 %v13141_v17 }
 0x7b3   : > { %v5069_v36 = vadd.f32 %v5024_v60, %v4916_v25  ;;  %5634 = vmatmul.f32.gmra.mxu2 %v13142_v55 }
 0x7b5   : > { %v5853_v63 = vrot.slane %v5069_v36, 6  ;;  %v4826_v33 = vpop.f32.mrf.mxu3  ;;  %5406 = vmatmul.f32.gmra.mxu0 %v11131_v10  ;;  %5554 = vmatmul.f32.gmra.mxu1 %v11062_v51  ;;  %v13144_v36 = vld [vmem:[#allocation3_spill] sm:$0xff] }
 0x7b6   : > { %v4919_v4 = vadd.f32 %v4918_v52, %v4826_v33  ;;  %v11695_v54 = vpop.f32.mrf.mxu2  ;;  %v6667_v33 = vld [vmem:[%s6771_s20 + $0x11b8] sm:$0xff] }
 0x7b7   : > { %v11699_v62 = vsel %vm1503_vm2, %v5852_v59, %v5853_v63  ;;  %5729 = vmatpush.msra.mxu3 %v6667_v33 }
 0x7b8   : > { %13143 = vst [vmem:[#allocation89_spill] sm:$0xff] %v11699_v62 }
 0x7ba   : > { %v4921_v43 = vpop.f32.mrf.mxu0  ;;  %v5027_v25 = vpop.f32.mrf.mxu1  ;;  %5275 = vmatmul.f32.gmra.mxu3 %v11115_v27 }
 0x7bb   : > { %v5070_v60 = vadd.f32 %v5027_v25, %v4919_v4  ;;  %5637 = vmatmul.f32.gmra.mxu2 %v13144_v36  ;;  %v13146_v4 = vld [vmem:[#allocation65_spill] sm:$0xff] }
 0x7bd   : > { %v5854_v55 = vrot.slane %v5070_v60, 6  ;;  %v4829_v10 = vpop.f32.mrf.mxu3  ;;  %5409 = vmatmul.f32.gmra.mxu0 %v11157_v49  ;;  %5557 = vmatmul.f32.gmra.mxu1 %v13141_v17  ;;  %v13147_v60 = vld [vmem:[#allocation37_spill] sm:$0xff] }
 0x7be   : > { %v4922_v51 = vadd.f32 %v4921_v43, %v4829_v10  ;;  %v11705_v52 = vpop.f32.mrf.mxu2 }
 0x7bf   : > { %v11710_v59 = vsel %vm1503_vm2, %v5853_v63, %v5854_v55 }
 0x7c0   : > { %13145 = vst [vmem:[#allocation23_spill] sm:$0xff] %v11710_v59  ;;  %v13149_v59 = vld [vmem:[#allocation74_spill] sm:$0xff] }
 0x7c2   : > { %v4924_v61 = vpop.f32.mrf.mxu0  ;;  %v5030_v62 = vpop.f32.mrf.mxu1  ;;  %5278 = vmatmul.f32.gmra.mxu3 %v13146_v4 }
 0x7c3   : > { %v5071_v25 = vadd.f32 %v5030_v62, %v4922_v51  ;;  %5640 = vmatmul.f32.gmra.mxu2 %v13147_v60  ;;  %v13150_v51 = vld [vmem:[#allocation113_spill] sm:$0xff] }
 0x7c5   : > { %v5855_v36 = vrot.slane %v5071_v25, 6  ;;  %v4832_v49 = vpop.f32.mrf.mxu3  ;;  %5412 = vmatmul.f32.gmra.mxu0 %v11184_v28  ;;  %5560 = vmatmul.f32.gmra.mxu1 %v11115_v27  ;;  %v6666_v27 = vld [vmem:[%s6771_s20 + $0x11b0] sm:$0xff]  ;;  %v13164_v28 = vld [vmem:[#allocation119_spill] sm:$0xff] }
 0x7c6   : > { %v4925_v10 = vadd.f32 %v4924_v61, %v4832_v49  ;;  %v11716_v17 = vpop.f32.mrf.mxu2  ;;  %5730 = vmatpush.msra.mxu3 %v6666_v27 }
 0x7c7   : > { %v11720_v43 = vsel %vm1503_vm2, %v5854_v55, %v5855_v36 }
 0x7c8   : > { %13148 = vst [vmem:[#allocation29_spill] sm:$0xff] %v11720_v43 }
 0x7ca   : > { %v4927_v63 = vpop.f32.mrf.mxu0  ;;  %v5033_v33 = vpop.f32.mrf.mxu1  ;;  %5281 = vmatmul.f32.gmra.mxu3 %v13149_v59 }
 0x7cb   : > { %v5072_v62 = vadd.f32 %v5033_v33, %v4925_v10  ;;  %5643 = vmatmul.f32.gmra.mxu2 %v13150_v51 }
 0x7cd   : > { %v5856_v25 = vrot.slane %v5072_v62, 6  ;;  %v4835_v60 = vpop.f32.mrf.mxu3  ;;  %5415 = vmatmul.f32.gmra.mxu0 %v11211_v24  ;;  %5563 = vmatmul.f32.gmra.mxu1 %v13146_v4  ;;  %v13152_v62 = vld [vmem:[#allocation72_spill] sm:$0xff] }
 0x7ce   : > { %v4928_v49 = vadd.f32 %v4927_v63, %v4835_v60  ;;  %v11727_v61 = vpop.f32.mrf.mxu2  ;;  %v6665_v60 = vld [vmem:[%s6771_s20 + $0x11a8] sm:$0xff] }
 0x7cf   : > { %v11731_v55 = vsel %vm1503_vm2, %v5855_v36, %v5856_v25  ;;  %5731 = vmatpush.msra.mxu3 %v6665_v60 }
 0x7d0   : > { %13151 = vst [vmem:[#allocation36_spill] sm:$0xff] %v11731_v55 }
 0x7d2   : > { %v4930_v43 = vpop.f32.mrf.mxu0  ;;  %v5036_v10 = vpop.f32.mrf.mxu1  ;;  %5284 = vmatmul.f32.gmra.mxu3 %v11191_v23 }
 0x7d3   : > { %v5073_v33 = vadd.f32 %v5036_v10, %v4928_v49  ;;  %5646 = vmatmul.f32.gmra.mxu2 %v13152_v62  ;;  %v13154_v49 = vld [vmem:[#allocation101_spill] sm:$0xff] }
 0x7d5   : > { %v5857_v51 = vrot.slane %v5073_v33, 6  ;;  %v4838_v24 = vpop.f32.mrf.mxu3  ;;  %5418 = vmatmul.f32.gmra.mxu0 %v11235_v32  ;;  %5566 = vmatmul.f32.gmra.mxu1 %v13149_v59  ;;  %v13155_v33 = vld [vmem:[#allocation84_spill] sm:$0xff] }
 0x7d6   : > { %v4931_v4 = vadd.f32 %v4930_v43, %v4838_v24  ;;  %v11737_v63 = vpop.f32.mrf.mxu2 }
 0x7d7   : > { %v11742_v36 = vsel %vm1503_vm2, %v5856_v25, %v5857_v51 }
 0x7d8   : > { %13153 = vst [vmem:[#allocation61_spill] sm:$0xff] %v11742_v36  ;;  %v13157_v36 = vld [vmem:[#allocation5_spill] sm:$0xff] }
 0x7da   : > { %v4933_v27 = vpop.f32.mrf.mxu0  ;;  %v5039_v55 = vpop.f32.mrf.mxu1  ;;  %5287 = vmatmul.f32.gmra.mxu3 %v13154_v49 }
 0x7db   : > { %v5074_v10 = vadd.f32 %v5039_v55, %v4931_v4  ;;  %5649 = vmatmul.f32.gmra.mxu2 %v13155_v33  ;;  %v13158_v4 = vld [vmem:[#allocation114_spill] sm:$0xff] }
 0x7dd   : > { %v5858_v62 = vrot.slane %v5074_v10, 6  ;;  %v4841_v32 = vpop.f32.mrf.mxu3  ;;  %5421 = vmatmul.f32.gmra.mxu0 %v11260_v40  ;;  %5569 = vmatmul.f32.gmra.mxu1 %v11191_v23  ;;  %v6664_v10 = vld [vmem:[%s6771_s20 + $0x11a0] sm:$0xff] }
 0x7de   : > { %v4934_v24 = vadd.f32 %v4933_v27, %v4841_v32  ;;  %v11748_v59 = vpop.f32.mrf.mxu2  ;;  %5732 = vmatpush.msra.mxu3 %v6664_v10  ;;  %v13161_v10 = vld [vmem:[#allocation99_spill] sm:$0xff] }
 0x7df   : > { %v11752_v43 = vsel %vm1503_vm2, %v5857_v51, %v5858_v62 }
 0x7e0   : > { %13156 = vst [vmem:[#allocation54_spill] sm:$0xff] %v11752_v43 }
 0x7e2   : > { %v4936_v25 = vpop.f32.mrf.mxu0  ;;  %v5042_v60 = vpop.f32.mrf.mxu1  ;;  %5290 = vmatmul.f32.gmra.mxu3 %v13157_v36 }
 0x7e3   : > { %v5075_v55 = vadd.f32 %v5042_v60, %v4934_v24  ;;  %5652 = vmatmul.f32.gmra.mxu2 %v13158_v4  ;;  %v13160_v60 = vld [vmem:[#allocation120_spill] sm:$0xff] }
 0x7e5   : > { %v5859_v33 = vrot.slane %v5075_v55, 6  ;;  %v4844_v40 = vpop.f32.mrf.mxu3  ;;  %5424 = vmatmul.f32.gmra.mxu0 %v11287_v31  ;;  %5572 = vmatmul.f32.gmra.mxu1 %v13154_v49  ;;  %v13162_v31 = vld [vmem:[#allocation76_spill] sm:$0xff] }
 0x7e6   : > { %v4937_v23 = vadd.f32 %v4936_v25, %v4844_v40  ;;  %v11759_v32 = vpop.f32.mrf.mxu2 }
 0x7e7   : > { %v11763_v51 = vsel %vm1503_vm2, %v5858_v62, %v5859_v33 }
 0x7e8   : > { %13159 = vst [vmem:[#allocation34_spill] sm:$0xff] %v11763_v51 }
 0x7ea   : > { %v4939_v27 = vpop.f32.mrf.mxu0  ;;  %v5045_v24 = vpop.f32.mrf.mxu1  ;;  %5293 = vmatmul.f32.gmra.mxu3 %v13160_v60 }
 0x7eb   : > { %v5076_v4 = vadd.f32 %v5045_v24, %v4937_v23  ;;  %5655 = vmatmul.f32.gmra.mxu2 %v13161_v10  ;;  %v6663_v23 = vld [vmem:[%s6771_s20 + $0x1198] sm:$0xff] }
 0x7ec   : > { %5733 = vmatpush.msra.mxu3 %v6663_v23 }
 0x7ed   : > { %v5860_v55 = vrot.slane %v5076_v4, 6  ;;  %v4847_v43 = vpop.f32.mrf.mxu3  ;;  %5427 = vmatmul.f32.gmra.mxu0 %v13162_v31  ;;  %5575 = vmatmul.f32.gmra.mxu1 %v13157_v36  ;;  %v13165_v4 = vld [vmem:[#allocation100_spill] sm:$0xff] }
 0x7ee   : > { %v4940_v40 = vadd.f32 %v4939_v27, %v4847_v43  ;;  %v11769_v49 = vpop.f32.mrf.mxu2  ;;  %v11787_v27 = vld [vmem:[%s7334_s28 + $0x3] ss:$0 sm:$0xff] }
 0x7ef   : > { %v11773_v62 = vsel %vm1503_vm2, %v5859_v33, %v5860_v55 }
 0x7f0   : > { %13163 = vst [vmem:[#allocation97_spill] sm:$0xff] %v11773_v62 }
 0x7f2   : > { %v4942_v25 = vpop.f32.mrf.mxu0  ;;  %v5048_v51 = vpop.f32.mrf.mxu1  ;;  %5296 = vmatmul.f32.gmra.mxu3 %v13164_v28 }
 0x7f3   : > { %v5077_v24 = vadd.f32 %v5048_v51, %v4940_v40  ;;  %5658 = vmatmul.f32.gmra.mxu2 %v13165_v4  ;;  %v13167_v51 = vld [vmem:[#allocation104_spill] sm:$0xff] }
 0x7f5   : > { %v5861_v10 = vrot.slane %v5077_v24, 6  ;;  %v4850_v31 = vpop.f32.mrf.mxu3  ;;  %5430 = vmatmul.f32.gmra.mxu0 %v11338_v21  ;;  %5578 = vmatmul.f32.gmra.mxu1 %v13160_v60  ;;  %v13168_v24 = vld [vmem:[#allocation116_spill] sm:$0xff]  ;;  %v5193_v60 = vadd.f32 %v11787_v27, %v11516_v38  ;;  %v13169_v21 = vrot.slane %v11373_v2, 6 }
 0x7f6   : > { %v4943_v36 = vadd.f32 %v4942_v25, %v4850_v31  ;;  %v11780_v43 = vpop.f32.mrf.mxu2  ;;  %v13170_v38 = vld [vmem:[#allocation28_spill] sm:$0xff] }
 0x7f7   : > { %v11784_v33 = vsel %vm1503_vm2, %v5860_v55, %v5861_v10 }
 0x7f8   : > { %13166 = vst [vmem:[#allocation53_spill] sm:$0xff] %v11784_v33 }
 0x7fa   : > { %v5051_v62 = vpop.f32.mrf.mxu1  ;;  %5299 = vmatmul.f32.gmra.mxu3 %v13167_v51  ;;  %v5386_v40 = vpop.f32.mrf.mxu0 }
 0x7fb   : > { %v5078_v23 = vadd.f32 %v5051_v62, %v4943_v36  ;;  %5661 = vmatmul.f32.gmra.mxu2 %v13168_v24 }
 0x7fd   : > { %v5862_v31 = vrot.slane %v5078_v23, 6  ;;  %v5252_v25 = vpop.f32.mrf.mxu3  ;;  %5433 = vmatmul.f32.gmra.mxu0 %v11361_v8  ;;  %5581 = vmatmul.f32.gmra.mxu1 %v13164_v28  ;;  %v6662_v8 = vld [vmem:[%s6771_s20 + $0x1190] sm:$0xff] }
 0x7fe   : > { %v5327_v55 = vadd.f32 %v5252_v25, %v5193_v60  ;;  %v11795_v4 = vpop.f32.mrf.mxu2  ;;  %v13171_v28 = vld [vmem:[#allocation88_spill] sm:$0xff]  ;;  %5734 = vmatpush.msra.mxu3 %v6662_v8  ;;  %v5194_v60 = vadd.f32 %v11787_v27, %v11546_v47  ;;  %v6661_v25 = vld [vmem:[%s6771_s20 + $0x1188] sm:$0xff]  ;;  %v5195_v8 = vadd.f32 %v11787_v27, %v11571_v11  ;;  %v5196_v11 = vadd.f32 %v11787_v27, %v11597_v26 }
 0x7ff   : > { %v5863_v33 = vsel %vm1503_vm2, %v5861_v10, %v5862_v31  ;;  %v5887_v62 = vsel %vm1503_vm2, %v5862_v31, %v13169_v21  ;;  %v5197_v26 = vadd.f32 %v11787_v27, %v11617_v37  ;;  %v5198_v37 = vadd.f32 %v11787_v27, %v11631_v45 }
 0x800   : > { %v5461_v36 = vadd.f32 %v5386_v40, %v5327_v55  ;;  %v13172_v55 = vld [vmem:[#allocation67_spill] sm:$0xff]  ;;  %5735 = vmatpush.msra.mxu3 %v6661_v25  ;;  %v13175_v25 = vld [vmem:[#allocation30_spill] sm:$0xff]  ;;  %v5199_v45 = vadd.f32 %v11787_v27, %v11642_v22 }
 0x802   : > { %v11803_v24 = vadd.f32 %v5863_v33, %v5461_v36  ;;  %5302 = vmatmul.f32.gmra.mxu3 %v13170_v38  ;;  %v5389_v23 = vpop.f32.mrf.mxu0 }
 0x803   : > { %5664 = vmatmul.f32.gmra.mxu2 %v13171_v28  ;;  %v13173_v28 = vld [vmem:[#allocation21_spill] sm:$0xff] }
 0x805   : > { %v5255_v10 = vpop.f32.mrf.mxu3  ;;  %5436 = vmatmul.f32.gmra.mxu0 %v11391_v18  ;;  %5584 = vmatmul.f32.gmra.mxu1 %v13167_v51 }
 0x806   : > { %v5328_v2 = vadd.f32 %v5255_v10, %v5194_v60  ;;  %v11812_v21 = vpop.f32.mrf.mxu2  ;;  %v13174_v10 = vld [vmem:[#allocation108_spill] sm:$0xff] }
 0x808   : > { %v5462_v33 = vadd.f32 %v5389_v23, %v5328_v2 }
 0x80a   : > { %v11814_v40 = vadd.f32 %v5887_v62, %v5462_v33  ;;  %5305 = vmatmul.f32.gmra.mxu3 %v11369_v14  ;;  %v5392_v31 = vpop.f32.mrf.mxu0 }
 0x80b   : > { %5667 = vmatmul.f32.gmra.mxu2 %v13172_v55 }
 0x80d   : > { %v5258_v47 = vpop.f32.mrf.mxu3  ;;  %5439 = vmatmul.f32.gmra.mxu0 %v11430_v5  ;;  %5587 = vmatmul.f32.gmra.mxu1 %v13170_v38 }
 0x80e   : > { %v5329_v51 = vadd.f32 %v5258_v47, %v5195_v8  ;;  %v11823_v36 = vpop.f32.mrf.mxu2  ;;  %v6660_v8 = vld [vmem:[%s6771_s20 + $0x1180] sm:$0xff]  ;;  %v13176_v47 = vld [vmem:[#allocation123_spill] sm:$0xff]  ;;  %s6679_s20 = smul.u32 200, %s13215_s16 }
 0x80f   : > { %5736 = vmatpush.msra.mxu3 %v6660_v8 }
 0x810   : > { %v5463_v62 = vadd.f32 %v5392_v31, %v5329_v51  ;;  %s12004_s18 = scalar_lea.vmem %s12118_s4, %s6679_s20 }
 0x812   : > { %v11826_v23 = vadd.f32 %v11408_v35, %v5463_v62  ;;  %5308 = vmatmul.f32.gmra.mxu3 %v13173_v28  ;;  %v5395_v60 = vpop.f32.mrf.mxu0 }
 0x813   : > { %5670 = vmatmul.f32.gmra.mxu2 %v13174_v10  ;;  %v13177_v10 = vld [vmem:[#allocation71_spill] sm:$0xff] }
 0x815   : > { %v5261_v2 = vpop.f32.mrf.mxu3  ;;  %5442 = vmatmul.f32.gmra.mxu0 %v11468_v56  ;;  %5590 = vmatmul.f32.gmra.mxu1 %v11369_v14 }
 0x816   : > { %v5330_v38 = vadd.f32 %v5261_v2, %v5196_v11  ;;  %v11834_v33 = vpop.f32.mrf.mxu2  ;;  %v13178_v2 = vld [vmem:[#allocation122_spill] sm:$0xff] }
 0x818   : > { %v5464_v31 = vadd.f32 %v5395_v60, %v5330_v38 }
 0x81a   : > { %v11837_v35 = vadd.f32 %v11445_v53, %v5464_v31  ;;  %5311 = vmatmul.f32.gmra.mxu3 %v13175_v25  ;;  %v5398_v55 = vpop.f32.mrf.mxu0 }
 0x81b   : > { %5673 = vmatmul.f32.gmra.mxu2 %v13176_v47 }
 0x81d   : > { %v5264_v51 = vpop.f32.mrf.mxu3  ;;  %5445 = vmatmul.f32.gmra.mxu0 %v11509_v29  ;;  %5593 = vmatmul.f32.gmra.mxu1 %v13173_v28  ;;  %v5537_v28 = vpop.f32.mrf.mxu1 }
 0x81e   : > { %v5331_v14 = vadd.f32 %v5264_v51, %v5197_v26  ;;  %v11846_v62 = vpop.f32.mrf.mxu2 }
 0x820   : > { %v5465_v53 = vadd.f32 %v5398_v55, %v5331_v14  ;;  %v13179_v14 = vld [vmem:[#allocation87_spill] sm:$0xff] }
 0x822   : > { %v11849_v60 = vadd.f32 %v11482_v15, %v5465_v53  ;;  %5314 = vmatmul.f32.gmra.mxu3 %v13177_v10  ;;  %v5401_v11 = vpop.f32.mrf.mxu0 }
 0x823   : > { %5676 = vmatmul.f32.gmra.mxu2 %v13178_v2  ;;  %v13180_v2 = vld [vmem:[#allocation7_spill] sm:$0xff] }
 0x825   : > { %v5267_v38 = vpop.f32.mrf.mxu3  ;;  %5448 = vmatmul.f32.gmra.mxu0 %v11541_v3  ;;  %5596 = vmatmul.f32.gmra.mxu1 %v13175_v25 }
 0x826   : > { %v5332_v31 = vadd.f32 %v5267_v38, %v5198_v37  ;;  %v5629_v8 = vpop.f32.mrf.mxu2  ;;  %v13182_v38 = vld [vmem:[#allocation69_spill] sm:$0xff] }
 0x827   : > { %v11857_v55 = vadd.f32 %v5629_v8, %v5537_v28 }
 0x828   : > { %v5466_v15 = vadd.f32 %v5401_v11, %v5332_v31  ;;  %v13183_v31 = vld [vmem:[#allocation46_spill] sm:$0xff] }
 0x82a   : > { %v11860_v47 = vadd.f32 %v11521_v19, %v5466_v15  ;;  %5317 = vmatmul.f32.gmra.mxu3 %v11524_v0  ;;  %v5404_v26 = vpop.f32.mrf.mxu0  ;;  %v13181_v19 = vld [vmem:[#allocation27_spill] sm:$0xff]  ;;  %v13184_v15 = vld [vmem:[#allocation62_spill] sm:$0xff] }
 0x82b   : > { %5679 = vmatmul.f32.gmra.mxu2 %v11357_v6  ;;  %v5200_v6 = vadd.f32 %v11787_v27, %v11652_v16 }
 0x82d   : > { %v5270_v51 = vpop.f32.mrf.mxu3  ;;  %5451 = vmatmul.f32.gmra.mxu0 %v13179_v14  ;;  %5599 = vmatmul.f32.gmra.mxu1 %v13177_v10 }
 0x82e   : > { %v5333_v25 = vadd.f32 %v5270_v51, %v5199_v45  ;;  %v13185_v45 = vld [vmem:[#allocation26_spill] sm:$0xff]  ;;  %v5201_v51 = vadd.f32 %v11787_v27, %v11663_v50 }
 0x830   : > { %v5467_v53 = vadd.f32 %v5404_v26, %v5333_v25 }
 0x832   : > { %v11869_v11 = vadd.f32 %v13180_v2, %v5467_v53  ;;  %5320 = vmatmul.f32.gmra.mxu3 %v13181_v19  ;;  %v5407_v37 = vpop.f32.mrf.mxu0  ;;  %v13186_v53 = vld [vmem:[#allocation44_spill] sm:$0xff] }
 0x833   : > { %5682 = vmatmul.f32.gmra.mxu2 %v13182_v38  ;;  %v13187_v38 = vld [vmem:[#allocation112_spill] sm:$0xff] }
 0x835   : > { %v5273_v28 = vpop.f32.mrf.mxu3  ;;  %5454 = vmatmul.f32.gmra.mxu0 %v11591_v44  ;;  %5602 = vmatmul.f32.gmra.mxu1 %v11524_v0 }
 0x836   : > { %v5334_v22 = vadd.f32 %v5273_v28, %v5200_v6  ;;  %v13188_v6 = vld [vmem:[#allocation94_spill] sm:$0xff]  ;;  %v5202_v28 = vadd.f32 %v11787_v27, %v11673_v12 }
 0x838   : > { %v5468_v10 = vadd.f32 %v5407_v37, %v5334_v22 }
 0x83a   : > { %v11878_v8 = vadd.f32 %v13183_v31, %v5468_v10  ;;  %5323 = vmatmul.f32.gmra.mxu3 %v13184_v15  ;;  %v5410_v26 = vpop.f32.mrf.mxu0 }
 0x83b   : > { %5685 = vmatmul.f32.gmra.mxu2 %v13185_v45 }
 0x83d   : > { %v5276_v25 = vpop.f32.mrf.mxu3  ;;  %5457 = vmatmul.f32.gmra.mxu0 %v11612_v9  ;;  %5605 = vmatmul.f32.gmra.mxu1 %v13181_v19 }
 0x83e   : > { %v5335_v16 = vadd.f32 %v5276_v25, %v5201_v51 }
 0x840   : > { %v5469_v0 = vadd.f32 %v5410_v26, %v5335_v16  ;;  %v5203_v26 = vadd.f32 %v11787_v27, %v11684_v46  ;;  %v13189_v16 = vld [vmem:[#allocation31_spill] sm:$0xff] }
 0x842   : > { %v11887_v2 = vadd.f32 %v13186_v53, %v5469_v0  ;;  %v5413_v37 = vpop.f32.mrf.mxu0  ;;  %5737 = vmatmul.f32.vlgmr.msra.gmra.mxu3 %v13187_v38  ;;  %v13190_v53 = vld [vmem:[#allocation17_spill] sm:$0xff] }
 0x843   : > { %5688 = vmatmul.f32.gmra.mxu2 %v13188_v6 }
 0x845   : > { %v5279_v22 = vpop.f32.mrf.mxu3  ;;  %5608 = vmatmul.f32.gmra.mxu1 %v13184_v15 }
 0x846   : > { %v5336_v50 = vadd.f32 %v5279_v22, %v5202_v28  ;;  %v13191_v22 = vld [vmem:[#allocation9_spill] sm:$0xff] }
 0x848   : > { %v5470_v10 = vadd.f32 %v5413_v37, %v5336_v50  ;;  %v5206_v50 = vadd.f32 %v11787_v27, %v11716_v17  ;;  %v5208_v17 = vadd.f32 %v11787_v27, %v11737_v63  ;;  %v13197_v63 = vld [vmem:[#allocation86_spill] sm:$0xff] }
 0x84a   : > { %v11895_v19 = vadd.f32 %v11624_v41, %v5470_v10  ;;  %v5416_v31 = vpop.f32.mrf.mxu0  ;;  %5740 = vmatmul.f32.gmra.mxu3 %v10977_v58  ;;  %v5204_v41 = vadd.f32 %v11787_v27, %v11695_v54 }
 0x84b   : > { %5691 = vmatmul.f32.gmra.mxu2 %v11505_v34 }
 0x84d   : > { %v5282_v45 = vpop.f32.mrf.mxu3 }
 0x84e   : > { %v5337_v51 = vadd.f32 %v5282_v45, %v5203_v26 }
 0x850   : > { %v5471_v25 = vadd.f32 %v5416_v31, %v5337_v51  ;;  %v13192_v31 = vld [vmem:[#allocation22_spill] sm:$0xff] }
 0x852   : > { %v11902_v12 = vadd.f32 %v11635_v7, %v5471_v25  ;;  %v5419_v15 = vpop.f32.mrf.mxu0  ;;  %5743 = vmatmul.f32.gmra.mxu3 %v11002_v48  ;;  %v5205_v7 = vadd.f32 %v11787_v27, %v11705_v52  ;;  %v13193_v25 = vld [vmem:[#allocation24_spill] sm:$0xff] }
 0x853   : > { %5694 = vmatmul.f32.gmra.mxu2 %v13189_v16 }
 0x855   : > { %v5285_v58 = vpop.f32.mrf.mxu3 }
 0x856   : > { %v5338_v0 = vadd.f32 %v5285_v58, %v5204_v41 }
 0x858   : > { %v5472_v34 = vadd.f32 %v5419_v15, %v5338_v0 }
 0x85a   : > { %v11909_v37 = vadd.f32 %v13190_v53, %v5472_v34  ;;  %v5422_v46 = vpop.f32.mrf.mxu0  ;;  %5746 = vmatmul.f32.gmra.mxu3 %v11028_v39  ;;  %v13194_v34 = vld [vmem:[#allocation50_spill] sm:$0xff] }
 0x85b   : > { %5697 = vmatmul.f32.gmra.mxu2 %v11562_v20 }
 0x85d   : > { %v5288_v48 = vpop.f32.mrf.mxu3 }
 0x85e   : > { %v5339_v38 = vadd.f32 %v5288_v48, %v5205_v7 }
 0x860   : > { %v5473_v6 = vadd.f32 %v5422_v46, %v5339_v38  ;;  %v5209_v46 = vadd.f32 %v11787_v27, %v11748_v59  ;;  %v13199_v59 = vld [vmem:[#allocation85_spill] sm:$0xff] }
 0x862   : > { %v11916_v28 = vadd.f32 %v11657_v1, %v5473_v6  ;;  %v5425_v54 = vpop.f32.mrf.mxu0  ;;  %5749 = vmatmul.f32.gmra.mxu3 %v11055_v57  ;;  %v5207_v1 = vadd.f32 %v11787_v27, %v11727_v61  ;;  %v13195_v61 = vld [vmem:[#allocation73_spill] sm:$0xff] }
 0x863   : > { %5700 = vmatmul.f32.gmra.mxu2 %v13191_v22  ;;  %v13196_v6 = vld [vmem:[#allocation89_spill] sm:$0xff]  ;;  %v5210_v22 = vadd.f32 %v11787_v27, %v11759_v32  ;;  %v13201_v32 = vld [vmem:[#allocation107_spill] sm:$0xff] }
 0x865   : > { %v5291_v39 = vpop.f32.mrf.mxu3 }
 0x866   : > { %v5340_v10 = vadd.f32 %v5291_v39, %v5206_v50 }
 0x868   : > { %v5474_v20 = vadd.f32 %v5425_v54, %v5340_v10 }
 0x86a   : > { %v11923_v26 = vadd.f32 %v13192_v31, %v5474_v20  ;;  %v5428_v52 = vpop.f32.mrf.mxu0  ;;  %5752 = vmatmul.f32.gmra.mxu3 %v11082_v13  ;;  %v13198_v20 = vld [vmem:[#allocation23_spill] sm:$0xff] }
 0x86d   : > { %v5294_v45 = vpop.f32.mrf.mxu3 }
 0x86e   : > { %v5341_v51 = vadd.f32 %v5294_v45, %v5207_v1  ;;  %v5211_v1 = vadd.f32 %v11787_v27, %v11769_v49  ;;  %v13203_v49 = vld [vmem:[#allocation117_spill] sm:$0xff] }
 0x870   : > { %v5475_v57 = vadd.f32 %v5428_v52, %v5341_v51 }
 0x872   : > { %v11929_v15 = vadd.f32 %v13193_v25, %v5475_v57  ;;  %v5431_v16 = vpop.f32.mrf.mxu0  ;;  %5755 = vmatmul.f32.gmra.mxu3 %v11106_v30  ;;  %v13200_v25 = vld [vmem:[#allocation29_spill] sm:$0xff] }
 0x875   : > { %v5297_v41 = vpop.f32.mrf.mxu3 }
 0x876   : > { %v5342_v58 = vadd.f32 %v5297_v41, %v5208_v17  ;;  %v5212_v41 = vadd.f32 %v11787_v27, %v11780_v43 }
 0x878   : > { %v5476_v0 = vadd.f32 %v5431_v16, %v5342_v58 }
 0x87a   : > { %v11935_v13 = vadd.f32 %v13194_v34, %v5476_v0  ;;  %v5434_v53 = vpop.f32.mrf.mxu0  ;;  %5758 = vmatmul.f32.gmra.mxu3 %v13195_v61 }
 0x87d   : > { %v5300_v7 = vpop.f32.mrf.mxu3 }
 0x87e   : > { %v5343_v48 = vadd.f32 %v5300_v7, %v5209_v46  ;;  %v5632_v7 = vpop.f32.mrf.mxu2 }
 0x880   : > { %v5477_v38 = vadd.f32 %v5434_v53, %v5343_v48  ;;  %v13202_v53 = vld [vmem:[#allocation36_spill] sm:$0xff]  ;;  %v5213_v48 = vadd.f32 %v11787_v27, %v11795_v4 }
 0x882   : > { %v11941_v30 = vadd.f32 %v13196_v6, %v5477_v38  ;;  %v5437_v54 = vpop.f32.mrf.mxu0  ;;  %5761 = vmatmul.f32.gmra.mxu3 %v13197_v63  ;;  %v5540_v38 = vpop.f32.mrf.mxu1 }
 0x885   : > { %v5303_v50 = vpop.f32.mrf.mxu3 }
 0x886   : > { %v5344_v39 = vadd.f32 %v5303_v50, %v5210_v22  ;;  %v13204_v22 = vld [vmem:[#allocation61_spill] sm:$0xff] }
 0x888   : > { %v5478_v10 = vadd.f32 %v5437_v54, %v5344_v39  ;;  %v13205_v39 = vld [vmem:[#allocation102_spill] sm:$0xff] }
 0x88a   : > { %v11947_v31 = vadd.f32 %v13198_v20, %v5478_v10  ;;  %v5440_v52 = vpop.f32.mrf.mxu0  ;;  %5764 = vmatmul.f32.gmra.mxu3 %v13199_v59  ;;  %v5214_v10 = vadd.f32 %v11787_v27, %v11812_v21  ;;  %v5635_v20 = vpop.f32.mrf.mxu2  ;;  %v13208_v21 = vld [vmem:[#allocation34_spill] sm:$0xff] }
 0x88d   : > { %v5306_v45 = vpop.f32.mrf.mxu3 }
 0x88e   : > { %v5345_v51 = vadd.f32 %v5306_v45, %v5211_v1  ;;  %v5543_v1 = vpop.f32.mrf.mxu1 }
 0x890   : > { %v5479_v57 = vadd.f32 %v5440_v52, %v5345_v51  ;;  %v13206_v51 = vld [vmem:[#allocation54_spill] sm:$0xff] }
 0x892   : > { %v11953_v16 = vadd.f32 %v13200_v25, %v5479_v57  ;;  %v5443_v17 = vpop.f32.mrf.mxu0  ;;  %5767 = vmatmul.f32.gmra.mxu3 %v13201_v32  ;;  %v13207_v57 = vld [vmem:[#allocation103_spill] sm:$0xff] }
 0x895   : > { %v5309_v58 = vpop.f32.mrf.mxu3 }
 0x896   : > { %v5346_v0 = vadd.f32 %v5309_v58, %v5212_v41  ;;  %v5638_v58 = vpop.f32.mrf.mxu2 }
 0x898   : > { %v5480_v34 = vadd.f32 %v5443_v17, %v5346_v0  ;;  %v5215_v17 = vadd.f32 %v11787_v27, %v11823_v36 }
 0x89a   : > { %v11959_v61 = vadd.f32 %v13202_v53, %v5480_v34  ;;  %v5446_v46 = vpop.f32.mrf.mxu0  ;;  %5770 = vmatmul.f32.gmra.mxu3 %v13203_v49  ;;  %v5546_v34 = vpop.f32.mrf.mxu1  ;;  %v5216_v49 = vadd.f32 %v11787_v27, %v11834_v33  ;;  %v13212_v33 = vld [vmem:[#allocation53_spill] sm:$0xff] }
 0x89d   : > { %v5312_v6 = vpop.f32.mrf.mxu3 }
 0x89e   : > { %v5347_v54 = vadd.f32 %v5312_v6, %v5213_v48 }
 0x8a0   : > { %v5481_v63 = vadd.f32 %v5446_v46, %v5347_v54  ;;  %v13209_v46 = vld [vmem:[#allocation76_spill] sm:$0xff] }
 0x8a2   : > { %v11965_v50 = vadd.f32 %v13204_v22, %v5481_v63  ;;  %v5449_v43 = vpop.f32.mrf.mxu0  ;;  %5773 = vmatmul.f32.gmra.mxu3 %v13205_v39  ;;  %v5641_v22 = vpop.f32.mrf.mxu2  ;;  %v13211_v39 = vld [vmem:[#allocation12_spill] sm:$0xff] }
 0x8a5   : > { %v5315_v52 = vpop.f32.mrf.mxu3 }
 0x8a6   : > { %v5348_v59 = vadd.f32 %v5315_v52, %v5214_v10  ;;  %v5549_v10 = vpop.f32.mrf.mxu1  ;;  %v5217_v52 = vadd.f32 %v11787_v27, %v11846_v62 }
 0x8a8   : > { %v5482_v45 = vadd.f32 %v5449_v43, %v5348_v59  ;;  %v13210_v43 = vld [vmem:[#allocation97_spill] sm:$0xff] }
 0x8aa   : > { %v11971_v4 = vadd.f32 %v13206_v51, %v5482_v45  ;;  %5776 = vmatmul.f32.gmra.mxu3 %v13207_v57  ;;  %v5452_v25 = vpop.f32.mrf.mxu0 }
 0x8ad   : > { %v5318_v32 = vpop.f32.mrf.mxu3 }
 0x8ae   : > { %v5349_v41 = vadd.f32 %v5318_v32, %v5215_v17  ;;  %v13213_v17 = vld [vmem:[#allocation80_spill] sm:$0xff]  ;;  %v5644_v32 = vpop.f32.mrf.mxu2 }
 0x8b0   : > { %v5483_v0 = vadd.f32 %v5452_v25, %v5349_v41  ;;  %v5552_v41 = vpop.f32.mrf.mxu1 }
 0x8b2   : > { %v11977_v53 = vadd.f32 %v13208_v21, %v5483_v0  ;;  %5779 = vmatmul.f32.gmra.mxu3 %v13209_v46  ;;  %v5455_v48 = vpop.f32.mrf.mxu0  ;;  %v5633_v21 = vadd.f32 %v5632_v7, %v5540_v38  ;;  %v5636_v7 = vadd.f32 %v5635_v20, %v5543_v1  ;;  %v5639_v20 = vadd.f32 %v5638_v58, %v5546_v34 }
 0x8b5   : > { %v5321_v6 = vpop.f32.mrf.mxu3 }
 0x8b6   : > { %v5350_v54 = vadd.f32 %v5321_v6, %v5216_v49  ;;  %v5647_v49 = vpop.f32.mrf.mxu2 }
 0x8b8   : > { %v5484_v63 = vadd.f32 %v5455_v48, %v5350_v54  ;;  %v5555_v48 = vpop.f32.mrf.mxu1 }
 0x8ba   : > { %v11983_v36 = vadd.f32 %v13210_v43, %v5484_v63  ;;  %5782 = vmatmul.f32.gmra.mxu3 %v13211_v39  ;;  %v5458_v51 = vpop.f32.mrf.mxu0 }
 0x8bd   : > { %v5324_v59 = vpop.f32.mrf.mxu3 }
 0x8be   : > { %v5351_v45 = vadd.f32 %v5324_v59, %v5217_v52  ;;  %v5650_v39 = vpop.f32.mrf.mxu2 }
 0x8c0   : > { %v5485_v57 = vadd.f32 %v5458_v51, %v5351_v45  ;;  %v5558_v59 = vpop.f32.mrf.mxu1 }
 0x8c2   : > { %v5912_v25 = vadd.f32 %v13212_v33, %v5485_v57  ;;  %5785 = vmatmul.f32.gmra.mxu3 %v13213_v17 }
 0x8c5   : > { %v5738_v0 = vpop.f32.mrf.mxu3 }
 0x8c6   : > { %v11992_v46 = vadd.f32 %v5738_v0, %v11857_v55 }
 0x8c8   : > { %v5913_v6 = vrot.slane %v11992_v46, 2  ;;  %v5561_v0 = vpop.f32.mrf.mxu1 }
 0x8ca   : > { %5788 = vmatmul.f32.gmra.mxu3 %v11391_v18 }
 0x8cd   : > { %v5741_v27 = vpop.f32.mrf.mxu3 }
 0x8ce   : > { %v5814_v62 = vadd.f32 %v5741_v27, %v5633_v21 }
 0x8d0   : > { %v5914_v54 = vrot.slane %v5814_v62, 2 }
 0x8d2   : > { %v5961_v63 = vsel %vm1579_vm3, %v5913_v6, %v5914_v54  ;;  %5791 = vmatmul.f32.gmra.mxu3 %v11430_v5 }
 0x8d3   : > { %v5987_v18 = vadd.f32 %v5961_v63, %v5912_v25  ;;  %v5653_v25 = vpop.f32.mrf.mxu2 }
 0x8d5   : > { %v6012_v55 = vmax.f32 %v5987_v18, 0.0  ;;  %v5744_v38 = vpop.f32.mrf.mxu3  ;;  %v5645_v18 = vadd.f32 %v5644_v32, %v5552_v41 }
 0x8d6   : > { %v5815_v43 = vadd.f32 %v5744_v38, %v5636_v7 }
 0x8d7   : > { %6037 = vst [vmem:[%s12004_s18 + $0xc0] sm:$0xff] %v6012_v55 }
 0x8d8   : > { %v5915_v52 = vrot.slane %v5815_v43, 2  ;;  %v5648_v43 = vadd.f32 %v5647_v49, %v5555_v48 }
 0x8da   : > { %v5960_v45 = vsel %vm1579_vm3, %v5914_v54, %v5915_v52  ;;  %5794 = vmatmul.f32.gmra.mxu3 %v11468_v56  ;;  %v5642_v56 = vadd.f32 %v5641_v22, %v5549_v10 }
 0x8db   : > { %v5963_v5 = vadd.f32 %v5960_v45, %v11803_v24  ;;  %v5656_v54 = vpop.f32.mrf.mxu2 }
 0x8dd   : > { %v5988_v1 = vmax.f32 %v5963_v5, 0.0  ;;  %v5747_v51 = vpop.f32.mrf.mxu3 }
 0x8de   : > { %v5816_v57 = vadd.f32 %v5747_v51, %v5639_v20 }
 0x8df   : > { %6013 = vst [vmem:[%s12004_s18] sm:$0xff] %v5988_v1 }
 0x8e0   : > { %v5916_v33 = vrot.slane %v5816_v57, 2 }
 0x8e2   : > { %v5959_v17 = vsel %vm1579_vm3, %v5915_v52, %v5916_v33  ;;  %5797 = vmatmul.f32.gmra.mxu3 %v11509_v29  ;;  %v5564_v29 = vpop.f32.mrf.mxu1 }
 0x8e3   : > { %v5964_v21 = vadd.f32 %v5959_v17, %v11814_v40 }
 0x8e5   : > { %v5989_v27 = vmax.f32 %v5964_v21, 0.0  ;;  %v5750_v24 = vpop.f32.mrf.mxu3 }
 0x8e6   : > { %v5817_v62 = vadd.f32 %v5750_v24, %v5642_v56 }
 0x8e7   : > { %6014 = vst [vmem:[%s12004_s18 + $0x8] sm:$0xff] %v5989_v27 }
 0x8e8   : > { %v5917_v58 = vrot.slane %v5817_v62, 2 }
 0x8ea   : > { %v5958_v34 = vsel %vm1579_vm3, %v5916_v33, %v5917_v58  ;;  %5800 = vmatmul.f32.gmra.mxu3 %v11541_v3  ;;  %v5659_v3 = vpop.f32.mrf.mxu2  ;;  %v5567_v41 = vpop.f32.mrf.mxu1 }
 0x8eb   : > { %v5965_v63 = vadd.f32 %v5958_v34, %v11826_v23 }
 0x8ed   : > { %v5990_v7 = vmax.f32 %v5965_v63, 0.0  ;;  %v5753_v40 = vpop.f32.mrf.mxu3 }
 0x8ee   : > { %v5818_v55 = vadd.f32 %v5753_v40, %v5645_v18 }
 0x8ef   : > { %6015 = vst [vmem:[%s12004_s18 + $0x10] sm:$0xff] %v5990_v7  ;;  %v5660_v7 = vadd.f32 %v5659_v3, %v5567_v41 }
 0x8f0   : > { %v5918_v22 = vrot.slane %v5818_v55, 2 }
 0x8f2   : > { %v5957_v10 = vsel %vm1579_vm3, %v5917_v58, %v5918_v22  ;;  %5803 = vmatmul.f32.gmra.mxu3 %v13179_v14  ;;  %v5651_v14 = vadd.f32 %v5650_v39, %v5558_v59  ;;  %v5662_v48 = vpop.f32.mrf.mxu2  ;;  %v5570_v57 = vpop.f32.mrf.mxu1  ;;  %v5657_v58 = vadd.f32 %v5656_v54, %v5564_v29 }
 0x8f3   : > { %v5966_v38 = vadd.f32 %v5957_v10, %v11837_v35 }
 0x8f5   : > { %v5991_v52 = vmax.f32 %v5966_v38, 0.0  ;;  %v5756_v23 = vpop.f32.mrf.mxu3  ;;  %v5663_v38 = vadd.f32 %v5662_v48, %v5570_v57 }
 0x8f6   : > { %v5819_v32 = vadd.f32 %v5756_v23, %v5648_v43 }
 0x8f7   : > { %6016 = vst [vmem:[%s12004_s18 + $0x18] sm:$0xff] %v5991_v52 }
 0x8f8   : > { %v5919_v45 = vrot.slane %v5819_v32, 2 }
 0x8fa   : > { %v5956_v5 = vsel %vm1579_vm3, %v5918_v22, %v5919_v45  ;;  %5806 = vmatmul.f32.gmra.mxu3 %v11591_v44  ;;  %v5654_v44 = vadd.f32 %v5653_v25, %v5561_v0  ;;  %v5665_v59 = vpop.f32.mrf.mxu2  ;;  %v5573_v24 = vpop.f32.mrf.mxu1 }
 0x8fb   : > { %v5967_v20 = vadd.f32 %v5956_v5, %v11849_v60  ;;  %v5666_v5 = vadd.f32 %v5665_v59, %v5573_v24 }
 0x8fd   : > { %v5992_v1 = vmax.f32 %v5967_v20, 0.0  ;;  %v5759_v35 = vpop.f32.mrf.mxu3 }
 0x8fe   : > { %v5820_v49 = vadd.f32 %v5759_v35, %v5651_v14 }
 0x8ff   : > { %6017 = vst [vmem:[%s12004_s18 + $0x20] sm:$0xff] %v5992_v1 }
 0x900   : > { %v5920_v51 = vrot.slane %v5820_v49, 2 }
 0x902   : > { %v5955_v33 = vsel %vm1579_vm3, %v5919_v45, %v5920_v51  ;;  %5809 = vmatmul.f32.gmra.mxu3 %v11612_v9  ;;  %v5668_v0 = vpop.f32.mrf.mxu2  ;;  %v5576_v40 = vpop.f32.mrf.mxu1 }
 0x903   : > { %v5968_v17 = vadd.f32 %v5955_v33, %v11860_v47  ;;  %v5669_v57 = vadd.f32 %v5668_v0, %v5576_v40 }
 0x905   : > { %v5993_v21 = vmax.f32 %v5968_v17, 0.0  ;;  %v5762_v60 = vpop.f32.mrf.mxu3 }
 0x906   : > { %v5821_v56 = vadd.f32 %v5762_v60, %v5654_v44 }
 0x907   : > { %6018 = vst [vmem:[%s12004_s18 + $0x28] sm:$0xff] %v5993_v21 }
 0x908   : > { %v5921_v39 = vrot.slane %v5821_v56, 2 }
 0x90a   : > { %v5954_v27 = vsel %vm1579_vm3, %v5920_v51, %v5921_v39  ;;  %v5671_v43 = vpop.f32.mrf.mxu2 }
 0x90b   : > { %v5969_v62 = vadd.f32 %v5954_v27, %v11869_v11 }
 0x90d   : > { %v5994_v34 = vmax.f32 %v5969_v62, 0.0  ;;  %v5765_v9 = vpop.f32.mrf.mxu3 }
 0x90e   : > { %v5822_v63 = vadd.f32 %v5765_v9, %v5657_v58 }
 0x90f   : > { %6019 = vst [vmem:[%s12004_s18 + $0x30] sm:$0xff] %v5994_v34 }
 0x910   : > { %v5922_v47 = vrot.slane %v5822_v63, 2 }
 0x912   : > { %v5953_v25 = vsel %vm1579_vm3, %v5921_v39, %v5922_v47 }
 0x913   : > { %v5970_v18 = vadd.f32 %v5953_v25, %v11878_v8  ;;  %v5579_v8 = vpop.f32.mrf.mxu1 }
 0x914   : > { %v5672_v59 = vadd.f32 %v5671_v43, %v5579_v8 }
 0x915   : > { %v5995_v55 = vmax.f32 %v5970_v18, 0.0  ;;  %v5768_v22 = vpop.f32.mrf.mxu3 }
 0x916   : > { %v5823_v10 = vadd.f32 %v5768_v22, %v5660_v7 }
 0x917   : > { %6020 = vst [vmem:[%s12004_s18 + $0x38] sm:$0xff] %v5995_v55 }
 0x918   : > { %v5923_v11 = vrot.slane %v5823_v10, 2 }
 0x91a   : > { %v5952_v54 = vsel %vm1579_vm3, %v5922_v47, %v5923_v11 }
 0x91b   : > { %v5971_v29 = vadd.f32 %v5952_v54, %v11887_v2  ;;  %v5674_v2 = vpop.f32.mrf.mxu2  ;;  %v5582_v49 = vpop.f32.mrf.mxu1 }
 0x91c   : > { %v5675_v63 = vadd.f32 %v5674_v2, %v5582_v49 }
 0x91d   : > { %v5996_v52 = vmax.f32 %v5971_v29, 0.0  ;;  %v5771_v23 = vpop.f32.mrf.mxu3 }
 0x91e   : > { %v5824_v32 = vadd.f32 %v5771_v23, %v5663_v38 }
 0x91f   : > { %6021 = vst [vmem:[%s12004_s18 + $0x40] sm:$0xff] %v5996_v52 }
 0x920   : > { %v5924_v3 = vrot.slane %v5824_v32, 2 }
 0x922   : > { %v5951_v41 = vsel %vm1579_vm3, %v5923_v11, %v5924_v3 }
 0x923   : > { %v5972_v45 = vadd.f32 %v5951_v41, %v11895_v19  ;;  %v5677_v21 = vpop.f32.mrf.mxu2  ;;  %v5585_v56 = vpop.f32.mrf.mxu1 }
 0x924   : > { %v5678_v55 = vadd.f32 %v5677_v21, %v5585_v56 }
 0x925   : > { %v5997_v20 = vmax.f32 %v5972_v45, 0.0  ;;  %v5774_v14 = vpop.f32.mrf.mxu3 }
 0x926   : > { %v5825_v1 = vadd.f32 %v5774_v14, %v5666_v5 }
 0x927   : > { %6022 = vst [vmem:[%s12004_s18 + $0x48] sm:$0xff] %v5997_v20 }
 0x928   : > { %v5925_v35 = vrot.slane %v5825_v1, 2 }
 0x92a   : > { %v5950_v48 = vsel %vm1579_vm3, %v5924_v3, %v5925_v35 }
 0x92b   : > { %v5973_v51 = vadd.f32 %v5950_v48, %v11902_v12  ;;  %v5680_v34 = vpop.f32.mrf.mxu2  ;;  %v5588_v47 = vpop.f32.mrf.mxu1 }
 0x92c   : > { %v5681_v52 = vadd.f32 %v5680_v34, %v5588_v47 }
 0x92d   : > { %v5998_v33 = vmax.f32 %v5973_v51, 0.0  ;;  %v5777_v17 = vpop.f32.mrf.mxu3 }
 0x92e   : > { %v5826_v44 = vadd.f32 %v5777_v17, %v5669_v57 }
 0x92f   : > { %6023 = vst [vmem:[%s12004_s18 + $0x50] sm:$0xff] %v5998_v33 }
 0x930   : > { %v5926_v19 = vrot.slane %v5826_v44, 2 }
 0x932   : > { %v5949_v60 = vsel %vm1579_vm3, %v5925_v35, %v5926_v19 }
 0x933   : > { %v5974_v39 = vadd.f32 %v5949_v60, %v11909_v37  ;;  %v5683_v22 = vpop.f32.mrf.mxu2 }
 0x935   : > { %v5999_v27 = vmax.f32 %v5974_v39, 0.0  ;;  %v5780_v24 = vpop.f32.mrf.mxu3 }
 0x936   : > { %v5827_v62 = vadd.f32 %v5780_v24, %v5672_v59 }
 0x937   : > { %6024 = vst [vmem:[%s12004_s18 + $0x58] sm:$0xff] %v5999_v27 }
 0x938   : > { %v5927_v12 = vrot.slane %v5827_v62, 2 }
 0x93a   : > { %v5948_v58 = vsel %vm1579_vm3, %v5926_v19, %v5927_v12 }
 0x93b   : > { %v5975_v9 = vadd.f32 %v5948_v58, %v11916_v28  ;;  %v5591_v28 = vpop.f32.mrf.mxu1 }
 0x93c   : > { %v5684_v20 = vadd.f32 %v5683_v22, %v5591_v28 }
 0x93d   : > { %v6000_v25 = vmax.f32 %v5975_v9, 0.0  ;;  %v5783_v0 = vpop.f32.mrf.mxu3 }
 0x93e   : > { %v5828_v18 = vadd.f32 %v5783_v0, %v5675_v63 }
 0x93f   : > { %6025 = vst [vmem:[%s12004_s18 + $0x60] sm:$0xff] %v6000_v25 }
 0x940   : > { %v5928_v37 = vrot.slane %v5828_v18, 2 }
 0x942   : > { %v5947_v7 = vsel %vm1579_vm3, %v5927_v12, %v5928_v37 }
 0x943   : > { %v5976_v40 = vadd.f32 %v5947_v7, %v11923_v26  ;;  %v5686_v26 = vpop.f32.mrf.mxu2  ;;  %v5594_v41 = vpop.f32.mrf.mxu1 }
 0x944   : > { %v5687_v57 = vadd.f32 %v5686_v26, %v5594_v41 }
 0x945   : > { %v6001_v10 = vmax.f32 %v5976_v40, 0.0  ;;  %v5786_v11 = vpop.f32.mrf.mxu3 }
 0x946   : > { %v5829_v54 = vadd.f32 %v5786_v11, %v5678_v55 }
 0x947   : > { %6026 = vst [vmem:[%s12004_s18 + $0x68] sm:$0xff] %v6001_v10 }
 0x948   : > { %v5929_v29 = vrot.slane %v5829_v54, 2 }
 0x94a   : > { %v5946_v38 = vsel %vm1579_vm3, %v5928_v37, %v5929_v29 }
 0x94b   : > { %v5977_v43 = vadd.f32 %v5946_v38, %v11929_v15  ;;  %v5689_v35 = vpop.f32.mrf.mxu2  ;;  %v5597_v48 = vpop.f32.mrf.mxu1 }
 0x94c   : > { %v5690_v56 = vadd.f32 %v5689_v35, %v5597_v48 }
 0x94d   : > { %v6002_v23 = vmax.f32 %v5977_v43, 0.0  ;;  %v5789_v32 = vpop.f32.mrf.mxu3 }
 0x94e   : > { %v5830_v8 = vadd.f32 %v5789_v32, %v5681_v52 }
 0x94f   : > { %6027 = vst [vmem:[%s12004_s18 + $0x70] sm:$0xff] %v6002_v23 }
 0x950   : > { %v5930_v3 = vrot.slane %v5830_v8, 2 }
 0x952   : > { %v5945_v45 = vsel %vm1579_vm3, %v5929_v29, %v5930_v3 }
 0x953   : > { %v5978_v5 = vadd.f32 %v5945_v45, %v11935_v13  ;;  %v5692_v21 = vpop.f32.mrf.mxu2  ;;  %v5600_v39 = vpop.f32.mrf.mxu1 }
 0x954   : > { %v5693_v58 = vadd.f32 %v5692_v21, %v5600_v39 }
 0x955   : > { %v6003_v14 = vmax.f32 %v5978_v5, 0.0  ;;  %v5792_v1 = vpop.f32.mrf.mxu3 }
 0x956   : > { %v5831_v2 = vadd.f32 %v5792_v1, %v5684_v20 }
 0x957   : > { %6028 = vst [vmem:[%s12004_s18 + $0x78] sm:$0xff] %v6003_v14 }
 0x958   : > { %v5931_v15 = vrot.slane %v5831_v2, 2 }
 0x95a   : > { %v5944_v49 = vsel %vm1579_vm3, %v5930_v3, %v5931_v15 }
 0x95b   : > { %v5979_v51 = vadd.f32 %v5944_v49, %v11941_v30  ;;  %v5695_v34 = vpop.f32.mrf.mxu2 }
 0x95d   : > { %v6004_v33 = vmax.f32 %v5979_v51, 0.0  ;;  %v5795_v17 = vpop.f32.mrf.mxu3 }
 0x95e   : > { %v5832_v44 = vadd.f32 %v5795_v17, %v5687_v57 }
 0x95f   : > { %6029 = vst [vmem:[%s12004_s18 + $0x80] sm:$0xff] %v6004_v33 }
 0x960   : > { %v5932_v13 = vrot.slane %v5832_v44, 2 }
 0x962   : > { %v5943_v19 = vsel %vm1579_vm3, %v5931_v15, %v5932_v13 }
 0x963   : > { %v5980_v60 = vadd.f32 %v5943_v19, %v11947_v31  ;;  %v5603_v31 = vpop.f32.mrf.mxu1 }
 0x964   : > { %v5696_v37 = vadd.f32 %v5695_v34, %v5603_v31 }
 0x965   : > { %v6005_v59 = vmax.f32 %v5980_v60, 0.0  ;;  %v5798_v27 = vpop.f32.mrf.mxu3 }
 0x966   : > { %v5833_v24 = vadd.f32 %v5798_v27, %v5690_v56 }
 0x967   : > { %6030 = vst [vmem:[%s12004_s18 + $0x88] sm:$0xff] %v6005_v59 }
 0x968   : > { %v5933_v30 = vrot.slane %v5833_v24, 2 }
 0x96a   : > { %v5942_v62 = vsel %vm1579_vm3, %v5932_v13, %v5933_v30 }
 0x96b   : > { %v5981_v12 = vadd.f32 %v5942_v62, %v11953_v16  ;;  %v5698_v16 = vpop.f32.mrf.mxu2  ;;  %v5606_v10 = vpop.f32.mrf.mxu1 }
 0x96c   : > { %v5699_v28 = vadd.f32 %v5698_v16, %v5606_v10 }
 0x96d   : > { %v6006_v9 = vmax.f32 %v5981_v12, 0.0  ;;  %v5801_v63 = vpop.f32.mrf.mxu3 }
 0x96e   : > { %v5834_v47 = vadd.f32 %v5801_v63, %v5693_v58 }
 0x96f   : > { %6031 = vst [vmem:[%s12004_s18 + $0x90] sm:$0xff] %v6006_v9 }
 0x970   : > { %v5934_v25 = vrot.slane %v5834_v47, 2 }
 0x972   : > { %v5941_v0 = vsel %vm1579_vm3, %v5933_v30, %v5934_v25 }
 0x973   : > { %v5982_v18 = vadd.f32 %v5941_v0, %v11959_v61  ;;  %v5701_v52 = vpop.f32.mrf.mxu2  ;;  %v5609_v32 = vpop.f32.mrf.mxu1 }
 0x974   : > { %v5702_v26 = vadd.f32 %v5701_v52, %v5609_v32 }
 0x975   : > { %v6007_v7 = vmax.f32 %v5982_v18, 0.0  ;;  %v5804_v40 = vpop.f32.mrf.mxu3 }
 0x976   : > { %v5835_v55 = vadd.f32 %v5804_v40, %v5696_v37 }
 0x977   : > { %6032 = vst [vmem:[%s12004_s18 + $0x98] sm:$0xff] %v6007_v7 }
 0x978   : > { %v5935_v22 = vrot.slane %v5835_v55, 2 }
 0x97a   : > { %v5940_v11 = vsel %vm1579_vm3, %v5934_v25, %v5935_v22 }
 0x97b   : > { %v5983_v54 = vadd.f32 %v5940_v11, %v11965_v50 }
 0x97d   : > { %v6008_v29 = vmax.f32 %v5983_v54, 0.0  ;;  %v5807_v38 = vpop.f32.mrf.mxu3 }
 0x97e   : > { %v5836_v43 = vadd.f32 %v5807_v38, %v5699_v28 }
 0x97f   : > { %6033 = vst [vmem:[%s12004_s18 + $0xa0] sm:$0xff] %v6008_v29 }
 0x980   : > { %v5936_v61 = vrot.slane %v5836_v43, 2 }
 0x982   : > { %v5939_v23 = vsel %vm1579_vm3, %v5935_v22, %v5936_v61 }
 0x983   : > { %v5984_v8 = vadd.f32 %v5939_v23, %v11971_v4 }
 0x985   : > { %v6009_v3 = vmax.f32 %v5984_v8, 0.0  ;;  %v5810_v41 = vpop.f32.mrf.mxu3 }
 0x986   : > { %v5837_v45 = vadd.f32 %v5810_v41, %v5702_v26 }
 0x987   : > { %6034 = vst [vmem:[%s12004_s18 + $0xa8] sm:$0xff] %v6009_v3 }
 0x988   : > { %v5937_v50 = vrot.slane %v5837_v45, 2 }
 0x98a   : > { %v5938_v5 = vsel %vm1579_vm3, %v5936_v61, %v5937_v50  ;;  %v5962_v20 = vsel %vm1579_vm3, %v5937_v50, %v5913_v6 }
 0x98b   : > { %v5985_v14 = vadd.f32 %v5938_v5, %v11977_v53  ;;  %v5986_v1 = vadd.f32 %v5962_v20, %v11983_v36 }
 0x98d   : > { %v6010_v2 = vmax.f32 %v5985_v14, 0.0  ;;  %v6011_v4 = vmax.f32 %v5986_v1, 0.0 }
 0x98f   : > { %6035 = vst [vmem:[%s12004_s18 + $0xb0] sm:$0xff] %v6010_v2 }
 0x990   : > { %6036 = vst [vmem:[%s12004_s18 + $0xb8] sm:$0xff] %v6011_v4 }
 0x991 PF: > { %s14_s15 = sadd.s32 1, %s6729_s15  }
 0x992   : > { %p11_p4 = scmp.ge.s32.totalorder %s14_s15, 4  }
 0x994   :  { %13 = sbr.rel (!%p11_p4) target bundleno = 1 (0x1), region = 107 }

</bundles_post_ra>
